<compile_context>
chip_gen: v7x
topology: tpu7x:2x2x1
jax: 0.10.0
libtpu: 0.0.40
codegen_flags: <defaults>
</compile_context>

<pallas_src>
import math

import jax
import jax.numpy as jnp
from jax import lax
from jax.experimental import pallas as pl
from jax.experimental.pallas import tpu as pltpu

HIDDEN = 50              # LSTM hidden size per direction
H_PAD = 128              # lane-aligned padded hidden size
GATES = 4 * H_PAD        # 512 = one direction's padded gate width
GLOVE = 100              # glove embedding dim
IN_DIM = GLOVE + 2       # 102 = glove + verb tag + entity tag
IN_PAD = 128             # lane-aligned padded input dim
LSTM_OUT = 2 * HIDDEN    # 100 (bidirectional concat)
N_STATE = 4              # state-change classes
N_SEQ = 5                # sequence-tag classes


# --------------------------------------------------------------------------
# In-kernel helpers
# --------------------------------------------------------------------------
def _lstm_cell(gates, h, c):
    """Padded LSTM cell. Gate order i, f, g, o in 128-lane blocks.

    Padded lanes carry gate pre-activation 0 -> i=f=o=0.5, g=0, so padded
    lanes of h and c stay exactly zero through the recurrence.
    """
    i_g = jax.nn.sigmoid(gates[:, 0 * H_PAD:1 * H_PAD])
    f_g = jax.nn.sigmoid(gates[:, 1 * H_PAD:2 * H_PAD])
    g_g = jnp.tanh(gates[:, 2 * H_PAD:3 * H_PAD])
    o_g = jax.nn.sigmoid(gates[:, 3 * H_PAD:4 * H_PAD])
    c_new = f_g * c + i_g * g_g
    h_new = o_g * jnp.tanh(c_new)
    return h_new, c_new


def _fused_bilstm(gates_ref, whh_f, whh_b, out_f_ref, out_b_ref, seq_len):
    """Forward + backward recurrences of one bi-LSTM layer in a single loop.

    Input projections are already in gates_ref (T, 2*GATES): columns
    [0:512] hold the forward gates, [512:1024] the backward gates.  Only the
    two (1,128)@(128,512) recurrent matmuls remain on the serial chain and
    the fwd / bwd chains interleave inside the unrolled loop.
    """

    def body(i, carry):
        hf, cf, hb, cb = carry
        tb = seq_len - 1 - i
        gf = (gates_ref[pl.ds(i, 1), pl.ds(0, GATES)]
              + jnp.dot(hf, whh_f, preferred_element_type=jnp.float32))
        gb = (gates_ref[pl.ds(tb, 1), pl.ds(GATES, GATES)]
              + jnp.dot(hb, whh_b, preferred_element_type=jnp.float32))
        hf, cf = _lstm_cell(gf, hf, cf)
        hb, cb = _lstm_cell(gb, hb, cb)
        out_f_ref[pl.ds(i, 1), :] = hf
        out_b_ref[pl.ds(tb, 1), :] = hb
        return (hf, cf, hb, cb)

    z = jnp.zeros((1, H_PAD), jnp.float32)
    lax.fori_loop(0, seq_len, body, (z, z, z, z), unroll=True)


# --------------------------------------------------------------------------
# Kernel
# --------------------------------------------------------------------------
def prolocal_kernel(
    x_ref, verb_ref, ent_ref,
    w0_ih, w0hh_f, w0hh_b, b0,
    w1_ihf, w1_ihb, w1hh_f, w1hh_b, b1,
    a_agg_ref, bb_agg_ref,
    w_ff_agg_ref, b_ff_agg_ref,
    w_seq_h_ref, w_seq_e_ref, w_seq_v_ref, b_ff_seq_ref,
    state_prob_ref, seq_prob_ref,
    gates, h1f, h1b, h2f, h2b,
):
    T = x_ref.shape[0]
    x = x_ref[...]                                                 # (T, 128)

    # ---- Layer 0: one fused batched input projection (fwd|bwd gates) ------
    # TODO(synk): nn.LSTM inter-layer dropout=0.3 is a training-only RNG op; omitted.
    gates[...] = jnp.dot(x, w0_ih[...],
                         preferred_element_type=jnp.float32) + b0[...]
    _fused_bilstm(gates, w0hh_f[...], w0hh_b[...], h1f, h1b, T)

    # ---- Layer 1: fused input projection from padded per-dir buffers ------
    h1f_v = h1f[...]                                               # (T, 128)
    h1b_v = h1b[...]                                               # (T, 128)
    gates[...] = (jnp.dot(h1f_v, w1_ihf[...], preferred_element_type=jnp.float32)
                  + jnp.dot(h1b_v, w1_ihb[...], preferred_element_type=jnp.float32)
                  + b1[...])
    _fused_bilstm(gates, w1hh_f[...], w1hh_b[...], h2f, h2b, T)

    # Single one-time lane concat (off the serial path).
    hidden = jnp.concatenate([h2f[...][:, :HIDDEN], h2b[...][:, :HIDDEN]],
                             axis=1)                               # (T, 100)

    verb = verb_ref[...]                                           # (T, 1)
    ent = ent_ref[...]                                             # (T, 1)

    # Reference divides elementwise by the size-1 summed axis: v / (v + 1e-13).
    verb_w = verb / (verb + 1e-13)
    ent_w = ent / (ent + 1e-13)
    verb_hidden = jnp.sum(hidden * verb_w, axis=0, keepdims=True)  # (1, 100)
    ent_hidden = jnp.sum(hidden * ent_w, axis=0, keepdims=True)    # (1, 100)
    ev = jnp.concatenate([ent_hidden, verb_hidden], axis=1)        # (1, 200)

    # ---- Bilinear aggregate attention: score_t = h_t A ev^T + b ------------
    ha = jnp.dot(hidden, a_agg_ref[...],
                 preferred_element_type=jnp.float32)               # (T, 200)
    scores = jnp.sum(ha * ev, axis=1, keepdims=True) + bb_agg_ref[...]  # (T, 1)
    m = jnp.max(scores, axis=0, keepdims=True)                     # softmax over T
    e = jnp.exp(scores - m)
    attn = e / jnp.sum(e, axis=0, keepdims=True)                   # (T, 1)
    hidden_agg = jnp.sum(hidden * attn, axis=0, keepdims=True)     # (1, 100)
    # NOTE: bilinear_seq attention / hidden_seq in the reference are dead code
    # (never consumed by the returned outputs), so they are not materialized.

    # ---- State-change head: Linear(100 -> 4) + softmax over classes --------
    sc_logits = (jnp.dot(hidden_agg, w_ff_agg_ref[...],
                         preferred_element_type=jnp.float32)
                 + b_ff_agg_ref[...])                              # (1, 4)
    sc_m = jnp.max(sc_logits, axis=1, keepdims=True)
    sc_e = jnp.exp(sc_logits - sc_m)
    state_prob_ref[...] = sc_e / jnp.sum(sc_e, axis=1, keepdims=True)

    # ---- Sequence-tag head: Linear(102 -> 5) on [hidden|entity|verb] -------
    # Concat-free: hidden part via matmul, entity/verb rows via broadcasts.
    seq_logits = (jnp.dot(hidden, w_seq_h_ref[...],
                          preferred_element_type=jnp.float32)
                  + ent * w_seq_e_ref[...]
                  + verb * w_seq_v_ref[...]
                  + b_ff_seq_ref[...])                             # (T, 5)
    sq_m = jnp.max(seq_logits, axis=1, keepdims=True)
    sq_e = jnp.exp(seq_logits - sq_m)
    seq_prob_ref[...] = sq_e / jnp.sum(sq_e, axis=1, keepdims=True)


# --------------------------------------------------------------------------
# Wrapper
# --------------------------------------------------------------------------
def _prolocal_forward_impl(text_gloves, verb_tags, entity_tags, kp):
    T = text_gloves.shape[0]
    verb = verb_tags.reshape(T, 1).astype(jnp.float32)
    ent = entity_tags.reshape(T, 1).astype(jnp.float32)
    x = jnp.concatenate(
        [text_gloves.astype(jnp.float32), verb, ent,
         jnp.zeros((T, IN_PAD - IN_DIM), jnp.float32)], axis=1)    # (T, 128)

    args = (x, verb, ent,
            kp['w0_ih'], kp['w0_hh_f'], kp['w0_hh_b'], kp['b0'],
            kp['w1_ihf'], kp['w1_ihb'], kp['w1_hh_f'], kp['w1_hh_b'], kp['b1'],
            kp['a_agg'], kp['b_agg'],
            kp['w_ff_agg'], kp['b_ff_agg'],
            kp['w_seq_h'], kp['w_seq_e'], kp['w_seq_v'], kp['b_ff_seq'])

    vmem = pl.BlockSpec(memory_space=pltpu.MemorySpace.VMEM)
    out_shape = (jax.ShapeDtypeStruct((1, N_STATE), jnp.float32),
                 jax.ShapeDtypeStruct((T, N_SEQ), jnp.float32))

    return pl.pallas_call(
        prolocal_kernel,
        out_shape=out_shape,
        in_specs=[vmem] * len(args),
        out_specs=(vmem, vmem),
        scratch_shapes=[
            pltpu.VMEM((T, 2 * GATES), jnp.float32),   # fused gates (reused per layer)
            pltpu.VMEM((T, H_PAD), jnp.float32),       # h1f
            pltpu.VMEM((T, H_PAD), jnp.float32),       # h1b
            pltpu.VMEM((T, H_PAD), jnp.float32),       # h2f
            pltpu.VMEM((T, H_PAD), jnp.float32),       # h2b
        ],
    )(*args)


prolocal_forward = jax.jit(_prolocal_forward_impl)


# --------------------------------------------------------------------------
# Parameter construction (torch-style init) + packing to kernel layout
# --------------------------------------------------------------------------
def _pad_gate_cols(w_t):
    """(in, 4*HIDDEN) -> (in, 4*H_PAD): each gate's 50 cols padded to 128."""
    blocks = [jnp.pad(w_t[:, g * HIDDEN:(g + 1) * HIDDEN],
                      ((0, 0), (0, H_PAD - HIDDEN))) for g in range(4)]
    return jnp.concatenate(blocks, axis=1)


def _pad_rows(w, rows):
    return jnp.pad(w, ((0, rows - w.shape[0]), (0, 0)))


def _pack_bias(b):
    """(4*HIDDEN,) -> (1, 4*H_PAD) with each gate's bias at its 128-lane block."""
    blocks = [jnp.pad(b[g * HIDDEN:(g + 1) * HIDDEN], (0, H_PAD - HIDDEN))
              for g in range(4)]
    return jnp.concatenate(blocks).reshape(1, 4 * H_PAD)


def init_params(key):
    """Deterministic PyTorch-style uniform init, kept in torch layouts."""
    keys = iter(jax.random.split(key, 64))

    def u(shape, bound):
        return jax.random.uniform(next(keys), shape, jnp.float32, -bound, bound)

    p = {}
    lstm_b = 1.0 / math.sqrt(HIDDEN)
    # (layer, direction) -> input dim: layer0 sees 102, layer1 sees 2*50=100.
    for name, in_dim in (('w0f', IN_DIM), ('w0b', IN_DIM),
                         ('w1f', LSTM_OUT), ('w1b', LSTM_OUT)):
        p[name + '_ih'] = u((4 * HIDDEN, in_dim), lstm_b)   # torch weight_ih
        p[name + '_hh'] = u((4 * HIDDEN, HIDDEN), lstm_b)   # torch weight_hh
        p[name + '_bih'] = u((4 * HIDDEN,), lstm_b)
        p[name + '_bhh'] = u((4 * HIDDEN,), lstm_b)

    bil_b = 1.0 / math.sqrt(GLOVE)                # nn.Bilinear(100, 200, 1)
    p['a_agg'] = u((GLOVE, 2 * LSTM_OUT), bil_b)  # weight[0]: (100, 200)
    p['b_agg'] = u((1, 1), bil_b)

    agg_b = 1.0 / math.sqrt(GLOVE)                # nn.Linear(100, 4)
    p['w_ff_agg'] = u((N_STATE, GLOVE), agg_b)
    p['b_ff_agg'] = u((N_STATE,), agg_b)

    seq_b = 1.0 / math.sqrt(IN_DIM)               # nn.Linear(102, 5)
    p['w_ff_seq'] = u((N_SEQ, IN_DIM), seq_b)
    p['b_ff_seq'] = u((N_SEQ,), seq_b)
    return p


def pack_params(p):
    """Convert torch-layout params to the fused, lane-aligned kernel layout."""
    kp = {}

    # Layer 0: fused W_ih (128, 1024) = [fwd gates | bwd gates], per-dir W_hh.
    w0f_ih = _pad_rows(_pad_gate_cols(p['w0f_ih'].T), IN_PAD)      # (128, 512)
    w0b_ih = _pad_rows(_pad_gate_cols(p['w0b_ih'].T), IN_PAD)      # (128, 512)
    kp['w0_ih'] = jnp.concatenate([w0f_ih, w0b_ih], axis=1)        # (128, 1024)
    kp['w0_hh_f'] = _pad_rows(_pad_gate_cols(p['w0f_hh'].T), H_PAD)
    kp['w0_hh_b'] = _pad_rows(_pad_gate_cols(p['w0b_hh'].T), H_PAD)
    kp['b0'] = jnp.concatenate(
        [_pack_bias(p['w0f_bih'] + p['w0f_bhh']),
         _pack_bias(p['w0b_bih'] + p['w0b_bhh'])], axis=1)         # (1, 1024)

    # Layer 1: W_ih (4H, 100) split rows into fwd/bwd halves of h1, fused over
    # directions along the gate (column) axis.
    w1f_t = p['w1f_ih'].T                                          # (100, 200)
    w1b_t = p['w1b_ih'].T                                          # (100, 200)
    kp['w1_ihf'] = jnp.concatenate(
        [_pad_rows(_pad_gate_cols(w1f_t[:HIDDEN, :]), H_PAD),
         _pad_rows(_pad_gate_cols(w1b_t[:HIDDEN, :]), H_PAD)], axis=1)  # (128, 1024)
    kp['w1_ihb'] = jnp.concatenate(
        [_pad_rows(_pad_gate_cols(w1f_t[HIDDEN:, :]), H_PAD),
         _pad_rows(_pad_gate_cols(w1b_t[HIDDEN:, :]), H_PAD)], axis=1)  # (128, 1024)
    kp['w1_hh_f'] = _pad_rows(_pad_gate_cols(p['w1f_hh'].T), H_PAD)
    kp['w1_hh_b'] = _pad_rows(_pad_gate_cols(p['w1b_hh'].T), H_PAD)
    kp['b1'] = jnp.concatenate(
        [_pack_bias(p['w1f_bih'] + p['w1f_bhh']),
         _pack_bias(p['w1b_bih'] + p['w1b_bhh'])], axis=1)         # (1, 1024)

    kp['a_agg'] = p['a_agg']                                       # (100, 200)
    kp['b_agg'] = p['b_agg']                                       # (1, 1)
    kp['w_ff_agg'] = p['w_ff_agg'].T                               # (100, 4)
    kp['b_ff_agg'] = p['b_ff_agg'].reshape(1, N_STATE)

    w_seq_t = p['w_ff_seq'].T                                      # (102, 5)
    kp['w_seq_h'] = w_seq_t[:GLOVE, :]                             # (100, 5)
    kp['w_seq_e'] = w_seq_t[GLOVE:GLOVE + 1, :]                    # (1, 5)  entity row
    kp['w_seq_v'] = w_seq_t[GLOVE + 1:GLOVE + 2, :]                # (1, 5)  verb row
    kp['b_ff_seq'] = p['b_ff_seq'].reshape(1, N_SEQ)
    return kp


if __name__ == "__main__":
    T = 8
    key = jax.random.PRNGKey(0)
    k_glove, k_params = jax.random.split(key, 2)

    text_gloves = jax.random.normal(k_glove, (T, GLOVE), jnp.float32)
    verb_tags = jnp.zeros((T,), jnp.float32).at[3].set(1.0)
    entity_tags = jnp.zeros((T,), jnp.float32).at[1].set(1.0).at[5].set(1.0)

    params = pack_params(init_params(k_params))

    state_prob, seq_prob = prolocal_forward(text_gloves, verb_tags, entity_tags, params)
    jax.block_until_ready((state_prob, seq_prob))

    assert state_prob.shape == (1, N_STATE)
    assert seq_prob.shape == (T, N_SEQ)
    assert bool(jnp.all(jnp.isfinite(state_prob)))
    assert bool(jnp.all(jnp.isfinite(seq_prob)))
    # softmax rows sum to 1
    assert bool(jnp.allclose(jnp.sum(state_prob, axis=1), 1.0, atol=1e-5))
    assert bool(jnp.allclose(jnp.sum(seq_prob, axis=1), 1.0, atol=1e-5))

    print("KERNEL_OK")
</pallas_src>

<mosaic_0001>
module attributes {stable_mosaic.version = 11 : i64} {
  func.func @prolocal_kernel(%arg0: memref<8x128xf32, #tpu.memory_space<vmem>>, %arg1: memref<8x1xf32, #tpu.memory_space<vmem>>, %arg2: memref<8x1xf32, #tpu.memory_space<vmem>>, %arg3: memref<128x1024xf32, #tpu.memory_space<vmem>>, %arg4: memref<128x512xf32, #tpu.memory_space<vmem>>, %arg5: memref<128x512xf32, #tpu.memory_space<vmem>>, %arg6: memref<1x1024xf32, #tpu.memory_space<vmem>>, %arg7: memref<128x1024xf32, #tpu.memory_space<vmem>>, %arg8: memref<128x1024xf32, #tpu.memory_space<vmem>>, %arg9: memref<128x512xf32, #tpu.memory_space<vmem>>, %arg10: memref<128x512xf32, #tpu.memory_space<vmem>>, %arg11: memref<1x1024xf32, #tpu.memory_space<vmem>>, %arg12: memref<100x200xf32, #tpu.memory_space<vmem>>, %arg13: memref<1x1xf32, #tpu.memory_space<vmem>>, %arg14: memref<100x4xf32, #tpu.memory_space<vmem>>, %arg15: memref<1x4xf32, #tpu.memory_space<vmem>>, %arg16: memref<100x5xf32, #tpu.memory_space<vmem>>, %arg17: memref<1x5xf32, #tpu.memory_space<vmem>>, %arg18: memref<1x5xf32, #tpu.memory_space<vmem>>, %arg19: memref<1x5xf32, #tpu.memory_space<vmem>>, %arg20: memref<1x4xf32, #tpu.memory_space<vmem>>, %arg21: memref<8x5xf32, #tpu.memory_space<vmem>>, %arg22: memref<8x1024xf32, #tpu.memory_space<vmem>>, %arg23: memref<8x128xf32, #tpu.memory_space<vmem>>, %arg24: memref<8x128xf32, #tpu.memory_space<vmem>>, %arg25: memref<8x128xf32, #tpu.memory_space<vmem>>, %arg26: memref<8x128xf32, #tpu.memory_space<vmem>>) attributes {dimension_semantics = [], scalar_prefetch = 0 : i64, scratch_operands = 5 : i64, tpu.core_type = #tpu.core_type<tc>} {
    %c0 = arith.constant 0 : index
    %c0_0 = arith.constant 0 : index
    %0 = vector.load %arg0[%c0, %c0_0] : memref<8x128xf32, #tpu.memory_space<vmem>>, vector<8x128xf32>
    %c0_1 = arith.constant 0 : index
    %c0_2 = arith.constant 0 : index
    %1 = vector.load %arg3[%c0_1, %c0_2] : memref<128x1024xf32, #tpu.memory_space<vmem>>, vector<128x1024xf32>
    %cst = arith.constant dense<0.000000e+00> : vector<8x1024xf32>
    %2 = tpu.matmul %0, %1, %cst {dimension_numbers = #tpu.dot_dimension_numbers<[1], [0], [0], [1], [0, 0, 1, 1], [], []>} : vector<8x128xf32>, vector<128x1024xf32>, vector<8x1024xf32> -> vector<8x1024xf32>
    %c0_3 = arith.constant 0 : index
    %c0_4 = arith.constant 0 : index
    %3 = vector.load %arg6[%c0_3, %c0_4] : memref<1x1024xf32, #tpu.memory_space<vmem>>, vector<1x1024xf32>
    %4 = vector.broadcast %3 : vector<1x1024xf32> to vector<8x1024xf32>
    %5 = arith.addf %2, %4 : vector<8x1024xf32>
    %c0_5 = arith.constant 0 : index
    %c0_6 = arith.constant 0 : index
    %6 = vector.load %arg22[%c0_5, %c0_6] : memref<8x1024xf32, #tpu.memory_space<vmem>>, vector<8x1024xf32>
    tpu.vector_store %arg22[%c0_5, %c0_6], %5 {strides = array<i32>} : memref<8x1024xf32, #tpu.memory_space<vmem>>, vector<8x1024xf32>,
    %c0_7 = arith.constant 0 : index
    %c0_8 = arith.constant 0 : index
    %7 = vector.load %arg4[%c0_7, %c0_8] : memref<128x512xf32, #tpu.memory_space<vmem>>, vector<128x512xf32>
    %c0_9 = arith.constant 0 : index
    %c0_10 = arith.constant 0 : index
    %8 = vector.load %arg5[%c0_9, %c0_10] : memref<128x512xf32, #tpu.memory_space<vmem>>, vector<128x512xf32>
    %cst_11 = arith.constant 0.000000e+00 : f32
    %9 = vector.broadcast %cst_11 : f32 to vector<1x128xf32>
    %c0_i32 = arith.constant 0 : i32
    %c7_i32 = arith.constant 7 : i32
    %10 = arith.subi %c7_i32, %c0_i32 : i32
    %11 = arith.index_cast %c0_i32 : i32 to index
    %c0_12 = arith.constant 0 : index
    %12 = vector.load %arg22[%11, %c0_12] : memref<8x1024xf32, #tpu.memory_space<vmem>>, vector<1x512xf32>
    %cst_13 = arith.constant dense<0.000000e+00> : vector<1x512xf32>
    %13 = tpu.matmul %9, %7, %cst_13 {dimension_numbers = #tpu.dot_dimension_numbers<[1], [0], [0], [1], [0, 0, 1, 1], [], []>} : vector<1x128xf32>, vector<128x512xf32>, vector<1x512xf32> -> vector<1x512xf32>
    %14 = arith.addf %12, %13 : vector<1x512xf32>
    %15 = arith.index_cast %10 : i32 to index
    %c512 = arith.constant 512 : index
    %16 = vector.load %arg22[%15, %c512] : memref<8x1024xf32, #tpu.memory_space<vmem>>, vector<1x512xf32>
    %cst_14 = arith.constant dense<0.000000e+00> : vector<1x512xf32>
    %17 = tpu.matmul %9, %8, %cst_14 {dimension_numbers = #tpu.dot_dimension_numbers<[1], [0], [0], [1], [0, 0, 1, 1], [], []>} : vector<1x128xf32>, vector<128x512xf32>, vector<1x512xf32> -> vector<1x512xf32>
    %18 = arith.addf %16, %17 : vector<1x512xf32>
    %19 = vector.extract_strided_slice %14 {offsets = [0, 0], sizes = [1, 128], strides = [1, 1]} : vector<1x512xf32> to vector<1x128xf32>
    %20 = arith.negf %19 : vector<1x128xf32>
    %21 = math.exp %20 : vector<1x128xf32>
    %cst_15 = arith.constant 1.000000e+00 : f32
    %22 = vector.broadcast %cst_15 : f32 to vector<1x128xf32>
    %23 = arith.addf %22, %21 : vector<1x128xf32>
    %24 = arith.divf %22, %23 : vector<1x128xf32>
    %25 = vector.extract_strided_slice %14 {offsets = [0, 128], sizes = [1, 128], strides = [1, 1]} : vector<1x512xf32> to vector<1x128xf32>
    %26 = arith.negf %25 : vector<1x128xf32>
    %27 = math.exp %26 : vector<1x128xf32>
    %cst_16 = arith.constant 1.000000e+00 : f32
    %28 = vector.broadcast %cst_16 : f32 to vector<1x128xf32>
    %29 = arith.addf %28, %27 : vector<1x128xf32>
    %30 = arith.divf %28, %29 : vector<1x128xf32>
    %31 = vector.extract_strided_slice %14 {offsets = [0, 256], sizes = [1, 128], strides = [1, 1]} : vector<1x512xf32> to vector<1x128xf32>
    %32 = math.tanh %31 : vector<1x128xf32>
    %33 = vector.extract_strided_slice %14 {offsets = [0, 384], sizes = [1, 128], strides = [1, 1]} : vector<1x512xf32> to vector<1x128xf32>
    %34 = arith.negf %33 : vector<1x128xf32>
    %35 = math.exp %34 : vector<1x128xf32>
    %cst_17 = arith.constant 1.000000e+00 : f32
    %36 = vector.broadcast %cst_17 : f32 to vector<1x128xf32>
    %37 = arith.addf %36, %35 : vector<1x128xf32>
    %38 = arith.divf %36, %37 : vector<1x128xf32>
    %39 = arith.mulf %30, %9 : vector<1x128xf32>
    %40 = arith.mulf %24, %32 : vector<1x128xf32>
    %41 = arith.addf %39, %40 : vector<1x128xf32>
    %42 = math.tanh %41 : vector<1x128xf32>
    %43 = arith.mulf %38, %42 : vector<1x128xf32>
    %44 = vector.extract_strided_slice %18 {offsets = [0, 0], sizes = [1, 128], strides = [1, 1]} : vector<1x512xf32> to vector<1x128xf32>
    %45 = arith.negf %44 : vector<1x128xf32>
    %46 = math.exp %45 : vector<1x128xf32>
    %cst_18 = arith.constant 1.000000e+00 : f32
    %47 = vector.broadcast %cst_18 : f32 to vector<1x128xf32>
    %48 = arith.addf %47, %46 : vector<1x128xf32>
    %49 = arith.divf %47, %48 : vector<1x128xf32>
    %50 = vector.extract_strided_slice %18 {offsets = [0, 128], sizes = [1, 128], strides = [1, 1]} : vector<1x512xf32> to vector<1x128xf32>
    %51 = arith.negf %50 : vector<1x128xf32>
    %52 = math.exp %51 : vector<1x128xf32>
    %cst_19 = arith.constant 1.000000e+00 : f32
    %53 = vector.broadcast %cst_19 : f32 to vector<1x128xf32>
    %54 = arith.addf %53, %52 : vector<1x128xf32>
    %55 = arith.divf %53, %54 : vector<1x128xf32>
    %56 = vector.extract_strided_slice %18 {offsets = [0, 256], sizes = [1, 128], strides = [1, 1]} : vector<1x512xf32> to vector<1x128xf32>
    %57 = math.tanh %56 : vector<1x128xf32>
    %58 = vector.extract_strided_slice %18 {offsets = [0, 384], sizes = [1, 128], strides = [1, 1]} : vector<1x512xf32> to vector<1x128xf32>
    %59 = arith.negf %58 : vector<1x128xf32>
    %60 = math.exp %59 : vector<1x128xf32>
    %cst_20 = arith.constant 1.000000e+00 : f32
    %61 = vector.broadcast %cst_20 : f32 to vector<1x128xf32>
    %62 = arith.addf %61, %60 : vector<1x128xf32>
    %63 = arith.divf %61, %62 : vector<1x128xf32>
    %64 = arith.mulf %55, %9 : vector<1x128xf32>
    %65 = arith.mulf %49, %57 : vector<1x128xf32>
    %66 = arith.addf %64, %65 : vector<1x128xf32>
    %67 = math.tanh %66 : vector<1x128xf32>
    %68 = arith.mulf %63, %67 : vector<1x128xf32>
    %69 = arith.index_cast %c0_i32 : i32 to index
    %c0_21 = arith.constant 0 : index
    %70 = vector.load %arg23[%69, %c0_21] : memref<8x128xf32, #tpu.memory_space<vmem>>, vector<1x128xf32>
    tpu.vector_store %arg23[%69, %c0_21], %43 {strides = array<i32>} : memref<8x128xf32, #tpu.memory_space<vmem>>, vector<1x128xf32>,
    %71 = arith.index_cast %10 : i32 to index
    %c0_22 = arith.constant 0 : index
    %72 = vector.load %arg24[%71, %c0_22] : memref<8x128xf32, #tpu.memory_space<vmem>>, vector<1x128xf32>
    tpu.vector_store %arg24[%71, %c0_22], %68 {strides = array<i32>} : memref<8x128xf32, #tpu.memory_space<vmem>>, vector<1x128xf32>,
    %c1_i32 = arith.constant 1 : i32
    %c7_i32_23 = arith.constant 7 : i32
    %73 = arith.subi %c7_i32_23, %c1_i32 : i32
    %74 = arith.index_cast %c1_i32 : i32 to index
    %c0_24 = arith.constant 0 : index
    %75 = vector.load %arg22[%74, %c0_24] : memref<8x1024xf32, #tpu.memory_space<vmem>>, vector<1x512xf32>
    %cst_25 = arith.constant dense<0.000000e+00> : vector<1x512xf32>
    %76 = tpu.matmul %43, %7, %cst_25 {dimension_numbers = #tpu.dot_dimension_numbers<[1], [0], [0], [1], [0, 0, 1, 1], [], []>} : vector<1x128xf32>, vector<128x512xf32>, vector<1x512xf32> -> vector<1x512xf32>
    %77 = arith.addf %75, %76 : vector<1x512xf32>
    %78 = arith.index_cast %73 : i32 to index
    %c512_26 = arith.constant 512 : index
    %79 = vector.load %arg22[%78, %c512_26] : memref<8x1024xf32, #tpu.memory_space<vmem>>, vector<1x512xf32>
    %cst_27 = arith.constant dense<0.000000e+00> : vector<1x512xf32>
    %80 = tpu.matmul %68, %8, %cst_27 {dimension_numbers = #tpu.dot_dimension_numbers<[1], [0], [0], [1], [0, 0, 1, 1], [], []>} : vector<1x128xf32>, vector<128x512xf32>, vector<1x512xf32> -> vector<1x512xf32>
    %81 = arith.addf %79, %80 : vector<1x512xf32>
    %82 = vector.extract_strided_slice %77 {offsets = [0, 0], sizes = [1, 128], strides = [1, 1]} : vector<1x512xf32> to vector<1x128xf32>
    %83 = arith.negf %82 : vector<1x128xf32>
    %84 = math.exp %83 : vector<1x128xf32>
    %cst_28 = arith.constant 1.000000e+00 : f32
    %85 = vector.broadcast %cst_28 : f32 to vector<1x128xf32>
    %86 = arith.addf %85, %84 : vector<1x128xf32>
    %87 = arith.divf %85, %86 : vector<1x128xf32>
    %88 = vector.extract_strided_slice %77 {offsets = [0, 128], sizes = [1, 128], strides = [1, 1]} : vector<1x512xf32> to vector<1x128xf32>
    %89 = arith.negf %88 : vector<1x128xf32>
    %90 = math.exp %89 : vector<1x128xf32>
    %cst_29 = arith.constant 1.000000e+00 : f32
    %91 = vector.broadcast %cst_29 : f32 to vector<1x128xf32>
    %92 = arith.addf %91, %90 : vector<1x128xf32>
    %93 = arith.divf %91, %92 : vector<1x128xf32>
    %94 = vector.extract_strided_slice %77 {offsets = [0, 256], sizes = [1, 128], strides = [1, 1]} : vector<1x512xf32> to vector<1x128xf32>
    %95 = math.tanh %94 : vector<1x128xf32>
    %96 = vector.extract_strided_slice %77 {offsets = [0, 384], sizes = [1, 128], strides = [1, 1]} : vector<1x512xf32> to vector<1x128xf32>
    %97 = arith.negf %96 : vector<1x128xf32>
    %98 = math.exp %97 : vector<1x128xf32>
    %cst_30 = arith.constant 1.000000e+00 : f32
    %99 = vector.broadcast %cst_30 : f32 to vector<1x128xf32>
    %100 = arith.addf %99, %98 : vector<1x128xf32>
    %101 = arith.divf %99, %100 : vector<1x128xf32>
    %102 = arith.mulf %93, %41 : vector<1x128xf32>
    %103 = arith.mulf %87, %95 : vector<1x128xf32>
    %104 = arith.addf %102, %103 : vector<1x128xf32>
    %105 = math.tanh %104 : vector<1x128xf32>
    %106 = arith.mulf %101, %105 : vector<1x128xf32>
    %107 = vector.extract_strided_slice %81 {offsets = [0, 0], sizes = [1, 128], strides = [1, 1]} : vector<1x512xf32> to vector<1x128xf32>
    %108 = arith.negf %107 : vector<1x128xf32>
    %109 = math.exp %108 : vector<1x128xf32>
    %cst_31 = arith.constant 1.000000e+00 : f32
    %110 = vector.broadcast %cst_31 : f32 to vector<1x128xf32>
    %111 = arith.addf %110, %109 : vector<1x128xf32>
    %112 = arith.divf %110, %111 : vector<1x128xf32>
    %113 = vector.extract_strided_slice %81 {offsets = [0, 128], sizes = [1, 128], strides = [1, 1]} : vector<1x512xf32> to vector<1x128xf32>
    %114 = arith.negf %113 : vector<1x128xf32>
    %115 = math.exp %114 : vector<1x128xf32>
    %cst_32 = arith.constant 1.000000e+00 : f32
    %116 = vector.broadcast %cst_32 : f32 to vector<1x128xf32>
    %117 = arith.addf %116, %115 : vector<1x128xf32>
    %118 = arith.divf %116, %117 : vector<1x128xf32>
    %119 = vector.extract_strided_slice %81 {offsets = [0, 256], sizes = [1, 128], strides = [1, 1]} : vector<1x512xf32> to vector<1x128xf32>
    %120 = math.tanh %119 : vector<1x128xf32>
    %121 = vector.extract_strided_slice %81 {offsets = [0, 384], sizes = [1, 128], strides = [1, 1]} : vector<1x512xf32> to vector<1x128xf32>
    %122 = arith.negf %121 : vector<1x128xf32>
    %123 = math.exp %122 : vector<1x128xf32>
    %cst_33 = arith.constant 1.000000e+00 : f32
    %124 = vector.broadcast %cst_33 : f32 to vector<1x128xf32>
    %125 = arith.addf %124, %123 : vector<1x128xf32>
    %126 = arith.divf %124, %125 : vector<1x128xf32>
    %127 = arith.mulf %118, %66 : vector<1x128xf32>
    %128 = arith.mulf %112, %120 : vector<1x128xf32>
    %129 = arith.addf %127, %128 : vector<1x128xf32>
    %130 = math.tanh %129 : vector<1x128xf32>
    %131 = arith.mulf %126, %130 : vector<1x128xf32>
    %132 = arith.index_cast %c1_i32 : i32 to index
    %c0_34 = arith.constant 0 : index
    %133 = vector.load %arg23[%132, %c0_34] : memref<8x128xf32, #tpu.memory_space<vmem>>, vector<1x128xf32>
    tpu.vector_store %arg23[%132, %c0_34], %106 {strides = array<i32>} : memref<8x128xf32, #tpu.memory_space<vmem>>, vector<1x128xf32>,
    %134 = arith.index_cast %73 : i32 to index
    %c0_35 = arith.constant 0 : index
    %135 = vector.load %arg24[%134, %c0_35] : memref<8x128xf32, #tpu.memory_space<vmem>>, vector<1x128xf32>
    tpu.vector_store %arg24[%134, %c0_35], %131 {strides = array<i32>} : memref<8x128xf32, #tpu.memory_space<vmem>>, vector<1x128xf32>,
    %c2_i32 = arith.constant 2 : i32
    %c7_i32_36 = arith.constant 7 : i32
    %136 = arith.subi %c7_i32_36, %c2_i32 : i32
    %137 = arith.index_cast %c2_i32 : i32 to index
    %c0_37 = arith.constant 0 : index
    %138 = vector.load %arg22[%137, %c0_37] : memref<8x1024xf32, #tpu.memory_space<vmem>>, vector<1x512xf32>
    %cst_38 = arith.constant dense<0.000000e+00> : vector<1x512xf32>
    %139 = tpu.matmul %106, %7, %cst_38 {dimension_numbers = #tpu.dot_dimension_numbers<[1], [0], [0], [1], [0, 0, 1, 1], [], []>} : vector<1x128xf32>, vector<128x512xf32>, vector<1x512xf32> -> vector<1x512xf32>
    %140 = arith.addf %138, %139 : vector<1x512xf32>
    %141 = arith.index_cast %136 : i32 to index
    %c512_39 = arith.constant 512 : index
    %142 = vector.load %arg22[%141, %c512_39] : memref<8x1024xf32, #tpu.memory_space<vmem>>, vector<1x512xf32>
    %cst_40 = arith.constant dense<0.000000e+00> : vector<1x512xf32>
    %143 = tpu.matmul %131, %8, %cst_40 {dimension_numbers = #tpu.dot_dimension_numbers<[1], [0], [0], [1], [0, 0, 1, 1], [], []>} : vector<1x128xf32>, vector<128x512xf32>, vector<1x512xf32> -> vector<1x512xf32>
    %144 = arith.addf %142, %143 : vector<1x512xf32>
    %145 = vector.extract_strided_slice %140 {offsets = [0, 0], sizes = [1, 128], strides = [1, 1]} : vector<1x512xf32> to vector<1x128xf32>
    %146 = arith.negf %145 : vector<1x128xf32>
    %147 = math.exp %146 : vector<1x128xf32>
    %cst_41 = arith.constant 1.000000e+00 : f32
    %148 = vector.broadcast %cst_41 : f32 to vector<1x128xf32>
    %149 = arith.addf %148, %147 : vector<1x128xf32>
    %150 = arith.divf %148, %149 : vector<1x128xf32>
    %151 = vector.extract_strided_slice %140 {offsets = [0, 128], sizes = [1, 128], strides = [1, 1]} : vector<1x512xf32> to vector<1x128xf32>
    %152 = arith.negf %151 : vector<1x128xf32>
    %153 = math.exp %152 : vector<1x128xf32>
    %cst_42 = arith.constant 1.000000e+00 : f32
    %154 = vector.broadcast %cst_42 : f32 to vector<1x128xf32>
    %155 = arith.addf %154, %153 : vector<1x128xf32>
    %156 = arith.divf %154, %155 : vector<1x128xf32>
    %157 = vector.extract_strided_slice %140 {offsets = [0, 256], sizes = [1, 128], strides = [1, 1]} : vector<1x512xf32> to vector<1x128xf32>
    %158 = math.tanh %157 : vector<1x128xf32>
    %159 = vector.extract_strided_slice %140 {offsets = [0, 384], sizes = [1, 128], strides = [1, 1]} : vector<1x512xf32> to vector<1x128xf32>
    %160 = arith.negf %159 : vector<1x128xf32>
    %161 = math.exp %160 : vector<1x128xf32>
    %cst_43 = arith.constant 1.000000e+00 : f32
    %162 = vector.broadcast %cst_43 : f32 to vector<1x128xf32>
    %163 = arith.addf %162, %161 : vector<1x128xf32>
    %164 = arith.divf %162, %163 : vector<1x128xf32>
    %165 = arith.mulf %156, %104 : vector<1x128xf32>
    %166 = arith.mulf %150, %158 : vector<1x128xf32>
    %167 = arith.addf %165, %166 : vector<1x128xf32>
    %168 = math.tanh %167 : vector<1x128xf32>
    %169 = arith.mulf %164, %168 : vector<1x128xf32>
    %170 = vector.extract_strided_slice %144 {offsets = [0, 0], sizes = [1, 128], strides = [1, 1]} : vector<1x512xf32> to vector<1x128xf32>
    %171 = arith.negf %170 : vector<1x128xf32>
    %172 = math.exp %171 : vector<1x128xf32>
    %cst_44 = arith.constant 1.000000e+00 : f32
    %173 = vector.broadcast %cst_44 : f32 to vector<1x128xf32>
    %174 = arith.addf %173, %172 : vector<1x128xf32>
    %175 = arith.divf %173, %174 : vector<1x128xf32>
    %176 = vector.extract_strided_slice %144 {offsets = [0, 128], sizes = [1, 128], strides = [1, 1]} : vector<1x512xf32> to vector<1x128xf32>
    %177 = arith.negf %176 : vector<1x128xf32>
    %178 = math.exp %177 : vector<1x128xf32>
    %cst_45 = arith.constant 1.000000e+00 : f32
    %179 = vector.broadcast %cst_45 : f32 to vector<1x128xf32>
    %180 = arith.addf %179, %178 : vector<1x128xf32>
    %181 = arith.divf %179, %180 : vector<1x128xf32>
    %182 = vector.extract_strided_slice %144 {offsets = [0, 256], sizes = [1, 128], strides = [1, 1]} : vector<1x512xf32> to vector<1x128xf32>
    %183 = math.tanh %182 : vector<1x128xf32>
    %184 = vector.extract_strided_slice %144 {offsets = [0, 384], sizes = [1, 128], strides = [1, 1]} : vector<1x512xf32> to vector<1x128xf32>
    %185 = arith.negf %184 : vector<1x128xf32>
    %186 = math.exp %185 : vector<1x128xf32>
    %cst_46 = arith.constant 1.000000e+00 : f32
    %187 = vector.broadcast %cst_46 : f32 to vector<1x128xf32>
    %188 = arith.addf %187, %186 : vector<1x128xf32>
    %189 = arith.divf %187, %188 : vector<1x128xf32>
    %190 = arith.mulf %181, %129 : vector<1x128xf32>
    %191 = arith.mulf %175, %183 : vector<1x128xf32>
    %192 = arith.addf %190, %191 : vector<1x128xf32>
    %193 = math.tanh %192 : vector<1x128xf32>
    %194 = arith.mulf %189, %193 : vector<1x128xf32>
    %195 = arith.index_cast %c2_i32 : i32 to index
    %c0_47 = arith.constant 0 : index
    %196 = vector.load %arg23[%195, %c0_47] : memref<8x128xf32, #tpu.memory_space<vmem>>, vector<1x128xf32>
    tpu.vector_store %arg23[%195, %c0_47], %169 {strides = array<i32>} : memref<8x128xf32, #tpu.memory_space<vmem>>, vector<1x128xf32>,
    %197 = arith.index_cast %136 : i32 to index
    %c0_48 = arith.constant 0 : index
    %198 = vector.load %arg24[%197, %c0_48] : memref<8x128xf32, #tpu.memory_space<vmem>>, vector<1x128xf32>
    tpu.vector_store %arg24[%197, %c0_48], %194 {strides = array<i32>} : memref<8x128xf32, #tpu.memory_space<vmem>>, vector<1x128xf32>,
    %c3_i32 = arith.constant 3 : i32
    %c7_i32_49 = arith.constant 7 : i32
    %199 = arith.subi %c7_i32_49, %c3_i32 : i32
    %200 = arith.index_cast %c3_i32 : i32 to index
    %c0_50 = arith.constant 0 : index
    %201 = vector.load %arg22[%200, %c0_50] : memref<8x1024xf32, #tpu.memory_space<vmem>>, vector<1x512xf32>
    %cst_51 = arith.constant dense<0.000000e+00> : vector<1x512xf32>
    %202 = tpu.matmul %169, %7, %cst_51 {dimension_numbers = #tpu.dot_dimension_numbers<[1], [0], [0], [1], [0, 0, 1, 1], [], []>} : vector<1x128xf32>, vector<128x512xf32>, vector<1x512xf32> -> vector<1x512xf32>
    %203 = arith.addf %201, %202 : vector<1x512xf32>
    %204 = arith.index_cast %199 : i32 to index
    %c512_52 = arith.constant 512 : index
    %205 = vector.load %arg22[%204, %c512_52] : memref<8x1024xf32, #tpu.memory_space<vmem>>, vector<1x512xf32>
    %cst_53 = arith.constant dense<0.000000e+00> : vector<1x512xf32>
    %206 = tpu.matmul %194, %8, %cst_53 {dimension_numbers = #tpu.dot_dimension_numbers<[1], [0], [0], [1], [0, 0, 1, 1], [], []>} : vector<1x128xf32>, vector<128x512xf32>, vector<1x512xf32> -> vector<1x512xf32>
    %207 = arith.addf %205, %206 : vector<1x512xf32>
    %208 = vector.extract_strided_slice %203 {offsets = [0, 0], sizes = [1, 128], strides = [1, 1]} : vector<1x512xf32> to vector<1x128xf32>
    %209 = arith.negf %208 : vector<1x128xf32>
    %210 = math.exp %209 : vector<1x128xf32>
    %cst_54 = arith.constant 1.000000e+00 : f32
    %211 = vector.broadcast %cst_54 : f32 to vector<1x128xf32>
    %212 = arith.addf %211, %210 : vector<1x128xf32>
    %213 = arith.divf %211, %212 : vector<1x128xf32>
    %214 = vector.extract_strided_slice %203 {offsets = [0, 128], sizes = [1, 128], strides = [1, 1]} : vector<1x512xf32> to vector<1x128xf32>
    %215 = arith.negf %214 : vector<1x128xf32>
    %216 = math.exp %215 : vector<1x128xf32>
    %cst_55 = arith.constant 1.000000e+00 : f32
    %217 = vector.broadcast %cst_55 : f32 to vector<1x128xf32>
    %218 = arith.addf %217, %216 : vector<1x128xf32>
    %219 = arith.divf %217, %218 : vector<1x128xf32>
    %220 = vector.extract_strided_slice %203 {offsets = [0, 256], sizes = [1, 128], strides = [1, 1]} : vector<1x512xf32> to vector<1x128xf32>
    %221 = math.tanh %220 : vector<1x128xf32>
    %222 = vector.extract_strided_slice %203 {offsets = [0, 384], sizes = [1, 128], strides = [1, 1]} : vector<1x512xf32> to vector<1x128xf32>
    %223 = arith.negf %222 : vector<1x128xf32>
    %224 = math.exp %223 : vector<1x128xf32>
    %cst_56 = arith.constant 1.000000e+00 : f32
    %225 = vector.broadcast %cst_56 : f32 to vector<1x128xf32>
    %226 = arith.addf %225, %224 : vector<1x128xf32>
    %227 = arith.divf %225, %226 : vector<1x128xf32>
    %228 = arith.mulf %219, %167 : vector<1x128xf32>
    %229 = arith.mulf %213, %221 : vector<1x128xf32>
    %230 = arith.addf %228, %229 : vector<1x128xf32>
    %231 = math.tanh %230 : vector<1x128xf32>
    %232 = arith.mulf %227, %231 : vector<1x128xf32>
    %233 = vector.extract_strided_slice %207 {offsets = [0, 0], sizes = [1, 128], strides = [1, 1]} : vector<1x512xf32> to vector<1x128xf32>
    %234 = arith.negf %233 : vector<1x128xf32>
    %235 = math.exp %234 : vector<1x128xf32>
    %cst_57 = arith.constant 1.000000e+00 : f32
    %236 = vector.broadcast %cst_57 : f32 to vector<1x128xf32>
    %237 = arith.addf %236, %235 : vector<1x128xf32>
    %238 = arith.divf %236, %237 : vector<1x128xf32>
    %239 = vector.extract_strided_slice %207 {offsets = [0, 128], sizes = [1, 128], strides = [1, 1]} : vector<1x512xf32> to vector<1x128xf32>
    %240 = arith.negf %239 : vector<1x128xf32>
    %241 = math.exp %240 : vector<1x128xf32>
    %cst_58 = arith.constant 1.000000e+00 : f32
    %242 = vector.broadcast %cst_58 : f32 to vector<1x128xf32>
    %243 = arith.addf %242, %241 : vector<1x128xf32>
    %244 = arith.divf %242, %243 : vector<1x128xf32>
    %245 = vector.extract_strided_slice %207 {offsets = [0, 256], sizes = [1, 128], strides = [1, 1]} : vector<1x512xf32> to vector<1x128xf32>
    %246 = math.tanh %245 : vector<1x128xf32>
    %247 = vector.extract_strided_slice %207 {offsets = [0, 384], sizes = [1, 128], strides = [1, 1]} : vector<1x512xf32> to vector<1x128xf32>
    %248 = arith.negf %247 : vector<1x128xf32>
    %249 = math.exp %248 : vector<1x128xf32>
    %cst_59 = arith.constant 1.000000e+00 : f32
    %250 = vector.broadcast %cst_59 : f32 to vector<1x128xf32>
    %251 = arith.addf %250, %249 : vector<1x128xf32>
    %252 = arith.divf %250, %251 : vector<1x128xf32>
    %253 = arith.mulf %244, %192 : vector<1x128xf32>
    %254 = arith.mulf %238, %246 : vector<1x128xf32>
    %255 = arith.addf %253, %254 : vector<1x128xf32>
    %256 = math.tanh %255 : vector<1x128xf32>
    %257 = arith.mulf %252, %256 : vector<1x128xf32>
    %258 = arith.index_cast %c3_i32 : i32 to index
    %c0_60 = arith.constant 0 : index
    %259 = vector.load %arg23[%258, %c0_60] : memref<8x128xf32, #tpu.memory_space<vmem>>, vector<1x128xf32>
    tpu.vector_store %arg23[%258, %c0_60], %232 {strides = array<i32>} : memref<8x128xf32, #tpu.memory_space<vmem>>, vector<1x128xf32>,
    %260 = arith.index_cast %199 : i32 to index
    %c0_61 = arith.constant 0 : index
    %261 = vector.load %arg24[%260, %c0_61] : memref<8x128xf32, #tpu.memory_space<vmem>>, vector<1x128xf32>
    tpu.vector_store %arg24[%260, %c0_61], %257 {strides = array<i32>} : memref<8x128xf32, #tpu.memory_space<vmem>>, vector<1x128xf32>,
    %c4_i32 = arith.constant 4 : i32
    %c7_i32_62 = arith.constant 7 : i32
    %262 = arith.subi %c7_i32_62, %c4_i32 : i32
    %263 = arith.index_cast %c4_i32 : i32 to index
    %c0_63 = arith.constant 0 : index
    %264 = vector.load %arg22[%263, %c0_63] : memref<8x1024xf32, #tpu.memory_space<vmem>>, vector<1x512xf32>
    %cst_64 = arith.constant dense<0.000000e+00> : vector<1x512xf32>
    %265 = tpu.matmul %232, %7, %cst_64 {dimension_numbers = #tpu.dot_dimension_numbers<[1], [0], [0], [1], [0, 0, 1, 1], [], []>} : vector<1x128xf32>, vector<128x512xf32>, vector<1x512xf32> -> vector<1x512xf32>
    %266 = arith.addf %264, %265 : vector<1x512xf32>
    %267 = arith.index_cast %262 : i32 to index
    %c512_65 = arith.constant 512 : index
    %268 = vector.load %arg22[%267, %c512_65] : memref<8x1024xf32, #tpu.memory_space<vmem>>, vector<1x512xf32>
    %cst_66 = arith.constant dense<0.000000e+00> : vector<1x512xf32>
    %269 = tpu.matmul %257, %8, %cst_66 {dimension_numbers = #tpu.dot_dimension_numbers<[1], [0], [0], [1], [0, 0, 1, 1], [], []>} : vector<1x128xf32>, vector<128x512xf32>, vector<1x512xf32> -> vector<1x512xf32>
    %270 = arith.addf %268, %269 : vector<1x512xf32>
    %271 = vector.extract_strided_slice %266 {offsets = [0, 0], sizes = [1, 128], strides = [1, 1]} : vector<1x512xf32> to vector<1x128xf32>
    %272 = arith.negf %271 : vector<1x128xf32>
    %273 = math.exp %272 : vector<1x128xf32>
    %cst_67 = arith.constant 1.000000e+00 : f32
    %274 = vector.broadcast %cst_67 : f32 to vector<1x128xf32>
    %275 = arith.addf %274, %273 : vector<1x128xf32>
    %276 = arith.divf %274, %275 : vector<1x128xf32>
    %277 = vector.extract_strided_slice %266 {offsets = [0, 128], sizes = [1, 128], strides = [1, 1]} : vector<1x512xf32> to vector<1x128xf32>
    %278 = arith.negf %277 : vector<1x128xf32>
    %279 = math.exp %278 : vector<1x128xf32>
    %cst_68 = arith.constant 1.000000e+00 : f32
    %280 = vector.broadcast %cst_68 : f32 to vector<1x128xf32>
    %281 = arith.addf %280, %279 : vector<1x128xf32>
    %282 = arith.divf %280, %281 : vector<1x128xf32>
    %283 = vector.extract_strided_slice %266 {offsets = [0, 256], sizes = [1, 128], strides = [1, 1]} : vector<1x512xf32> to vector<1x128xf32>
    %284 = math.tanh %283 : vector<1x128xf32>
    %285 = vector.extract_strided_slice %266 {offsets = [0, 384], sizes = [1, 128], strides = [1, 1]} : vector<1x512xf32> to vector<1x128xf32>
    %286 = arith.negf %285 : vector<1x128xf32>
    %287 = math.exp %286 : vector<1x128xf32>
    %cst_69 = arith.constant 1.000000e+00 : f32
    %288 = vector.broadcast %cst_69 : f32 to vector<1x128xf32>
    %289 = arith.addf %288, %287 : vector<1x128xf32>
    %290 = arith.divf %288, %289 : vector<1x128xf32>
    %291 = arith.mulf %282, %230 : vector<1x128xf32>
    %292 = arith.mulf %276, %284 : vector<1x128xf32>
    %293 = arith.addf %291, %292 : vector<1x128xf32>
    %294 = math.tanh %293 : vector<1x128xf32>
    %295 = arith.mulf %290, %294 : vector<1x128xf32>
    %296 = vector.extract_strided_slice %270 {offsets = [0, 0], sizes = [1, 128], strides = [1, 1]} : vector<1x512xf32> to vector<1x128xf32>
    %297 = arith.negf %296 : vector<1x128xf32>
    %298 = math.exp %297 : vector<1x128xf32>
    %cst_70 = arith.constant 1.000000e+00 : f32
    %299 = vector.broadcast %cst_70 : f32 to vector<1x128xf32>
    %300 = arith.addf %299, %298 : vector<1x128xf32>
    %301 = arith.divf %299, %300 : vector<1x128xf32>
    %302 = vector.extract_strided_slice %270 {offsets = [0, 128], sizes = [1, 128], strides = [1, 1]} : vector<1x512xf32> to vector<1x128xf32>
    %303 = arith.negf %302 : vector<1x128xf32>
    %304 = math.exp %303 : vector<1x128xf32>
    %cst_71 = arith.constant 1.000000e+00 : f32
    %305 = vector.broadcast %cst_71 : f32 to vector<1x128xf32>
    %306 = arith.addf %305, %304 : vector<1x128xf32>
    %307 = arith.divf %305, %306 : vector<1x128xf32>
    %308 = vector.extract_strided_slice %270 {offsets = [0, 256], sizes = [1, 128], strides = [1, 1]} : vector<1x512xf32> to vector<1x128xf32>
    %309 = math.tanh %308 : vector<1x128xf32>
    %310 = vector.extract_strided_slice %270 {offsets = [0, 384], sizes = [1, 128], strides = [1, 1]} : vector<1x512xf32> to vector<1x128xf32>
    %311 = arith.negf %310 : vector<1x128xf32>
    %312 = math.exp %311 : vector<1x128xf32>
    %cst_72 = arith.constant 1.000000e+00 : f32
    %313 = vector.broadcast %cst_72 : f32 to vector<1x128xf32>
    %314 = arith.addf %313, %312 : vector<1x128xf32>
    %315 = arith.divf %313, %314 : vector<1x128xf32>
    %316 = arith.mulf %307, %255 : vector<1x128xf32>
    %317 = arith.mulf %301, %309 : vector<1x128xf32>
    %318 = arith.addf %316, %317 : vector<1x128xf32>
    %319 = math.tanh %318 : vector<1x128xf32>
    %320 = arith.mulf %315, %319 : vector<1x128xf32>
    %321 = arith.index_cast %c4_i32 : i32 to index
    %c0_73 = arith.constant 0 : index
    %322 = vector.load %arg23[%321, %c0_73] : memref<8x128xf32, #tpu.memory_space<vmem>>, vector<1x128xf32>
    tpu.vector_store %arg23[%321, %c0_73], %295 {strides = array<i32>} : memref<8x128xf32, #tpu.memory_space<vmem>>, vector<1x128xf32>,
    %323 = arith.index_cast %262 : i32 to index
    %c0_74 = arith.constant 0 : index
    %324 = vector.load %arg24[%323, %c0_74] : memref<8x128xf32, #tpu.memory_space<vmem>>, vector<1x128xf32>
    tpu.vector_store %arg24[%323, %c0_74], %320 {strides = array<i32>} : memref<8x128xf32, #tpu.memory_space<vmem>>, vector<1x128xf32>,
    %c5_i32 = arith.constant 5 : i32
    %c7_i32_75 = arith.constant 7 : i32
    %325 = arith.subi %c7_i32_75, %c5_i32 : i32
    %326 = arith.index_cast %c5_i32 : i32 to index
    %c0_76 = arith.constant 0 : index
    %327 = vector.load %arg22[%326, %c0_76] : memref<8x1024xf32, #tpu.memory_space<vmem>>, vector<1x512xf32>
    %cst_77 = arith.constant dense<0.000000e+00> : vector<1x512xf32>
    %328 = tpu.matmul %295, %7, %cst_77 {dimension_numbers = #tpu.dot_dimension_numbers<[1], [0], [0], [1], [0, 0, 1, 1], [], []>} : vector<1x128xf32>, vector<128x512xf32>, vector<1x512xf32> -> vector<1x512xf32>
    %329 = arith.addf %327, %328 : vector<1x512xf32>
    %330 = arith.index_cast %325 : i32 to index
    %c512_78 = arith.constant 512 : index
    %331 = vector.load %arg22[%330, %c512_78] : memref<8x1024xf32, #tpu.memory_space<vmem>>, vector<1x512xf32>
    %cst_79 = arith.constant dense<0.000000e+00> : vector<1x512xf32>
    %332 = tpu.matmul %320, %8, %cst_79 {dimension_numbers = #tpu.dot_dimension_numbers<[1], [0], [0], [1], [0, 0, 1, 1], [], []>} : vector<1x128xf32>, vector<128x512xf32>, vector<1x512xf32> -> vector<1x512xf32>
    %333 = arith.addf %331, %332 : vector<1x512xf32>
    %334 = vector.extract_strided_slice %329 {offsets = [0, 0], sizes = [1, 128], strides = [1, 1]} : vector<1x512xf32> to vector<1x128xf32>
    %335 = arith.negf %334 : vector<1x128xf32>
    %336 = math.exp %335 : vector<1x128xf32>
    %cst_80 = arith.constant 1.000000e+00 : f32
    %337 = vector.broadcast %cst_80 : f32 to vector<1x128xf32>
    %338 = arith.addf %337, %336 : vector<1x128xf32>
    %339 = arith.divf %337, %338 : vector<1x128xf32>
    %340 = vector.extract_strided_slice %329 {offsets = [0, 128], sizes = [1, 128], strides = [1, 1]} : vector<1x512xf32> to vector<1x128xf32>
    %341 = arith.negf %340 : vector<1x128xf32>
    %342 = math.exp %341 : vector<1x128xf32>
    %cst_81 = arith.constant 1.000000e+00 : f32
    %343 = vector.broadcast %cst_81 : f32 to vector<1x128xf32>
    %344 = arith.addf %343, %342 : vector<1x128xf32>
    %345 = arith.divf %343, %344 : vector<1x128xf32>
    %346 = vector.extract_strided_slice %329 {offsets = [0, 256], sizes = [1, 128], strides = [1, 1]} : vector<1x512xf32> to vector<1x128xf32>
    %347 = math.tanh %346 : vector<1x128xf32>
    %348 = vector.extract_strided_slice %329 {offsets = [0, 384], sizes = [1, 128], strides = [1, 1]} : vector<1x512xf32> to vector<1x128xf32>
    %349 = arith.negf %348 : vector<1x128xf32>
    %350 = math.exp %349 : vector<1x128xf32>
    %cst_82 = arith.constant 1.000000e+00 : f32
    %351 = vector.broadcast %cst_82 : f32 to vector<1x128xf32>
    %352 = arith.addf %351, %350 : vector<1x128xf32>
    %353 = arith.divf %351, %352 : vector<1x128xf32>
    %354 = arith.mulf %345, %293 : vector<1x128xf32>
    %355 = arith.mulf %339, %347 : vector<1x128xf32>
    %356 = arith.addf %354, %355 : vector<1x128xf32>
    %357 = math.tanh %356 : vector<1x128xf32>
    %358 = arith.mulf %353, %357 : vector<1x128xf32>
    %359 = vector.extract_strided_slice %333 {offsets = [0, 0], sizes = [1, 128], strides = [1, 1]} : vector<1x512xf32> to vector<1x128xf32>
    %360 = arith.negf %359 : vector<1x128xf32>
    %361 = math.exp %360 : vector<1x128xf32>
    %cst_83 = arith.constant 1.000000e+00 : f32
    %362 = vector.broadcast %cst_83 : f32 to vector<1x128xf32>
    %363 = arith.addf %362, %361 : vector<1x128xf32>
    %364 = arith.divf %362, %363 : vector<1x128xf32>
    %365 = vector.extract_strided_slice %333 {offsets = [0, 128], sizes = [1, 128], strides = [1, 1]} : vector<1x512xf32> to vector<1x128xf32>
    %366 = arith.negf %365 : vector<1x128xf32>
    %367 = math.exp %366 : vector<1x128xf32>
    %cst_84 = arith.constant 1.000000e+00 : f32
    %368 = vector.broadcast %cst_84 : f32 to vector<1x128xf32>
    %369 = arith.addf %368, %367 : vector<1x128xf32>
    %370 = arith.divf %368, %369 : vector<1x128xf32>
    %371 = vector.extract_strided_slice %333 {offsets = [0, 256], sizes = [1, 128], strides = [1, 1]} : vector<1x512xf32> to vector<1x128xf32>
    %372 = math.tanh %371 : vector<1x128xf32>
    %373 = vector.extract_strided_slice %333 {offsets = [0, 384], sizes = [1, 128], strides = [1, 1]} : vector<1x512xf32> to vector<1x128xf32>
    %374 = arith.negf %373 : vector<1x128xf32>
    %375 = math.exp %374 : vector<1x128xf32>
    %cst_85 = arith.constant 1.000000e+00 : f32
    %376 = vector.broadcast %cst_85 : f32 to vector<1x128xf32>
    %377 = arith.addf %376, %375 : vector<1x128xf32>
    %378 = arith.divf %376, %377 : vector<1x128xf32>
    %379 = arith.mulf %370, %318 : vector<1x128xf32>
    %380 = arith.mulf %364, %372 : vector<1x128xf32>
    %381 = arith.addf %379, %380 : vector<1x128xf32>
    %382 = math.tanh %381 : vector<1x128xf32>
    %383 = arith.mulf %378, %382 : vector<1x128xf32>
    %384 = arith.index_cast %c5_i32 : i32 to index
    %c0_86 = arith.constant 0 : index
    %385 = vector.load %arg23[%384, %c0_86] : memref<8x128xf32, #tpu.memory_space<vmem>>, vector<1x128xf32>
    tpu.vector_store %arg23[%384, %c0_86], %358 {strides = array<i32>} : memref<8x128xf32, #tpu.memory_space<vmem>>, vector<1x128xf32>,
    %386 = arith.index_cast %325 : i32 to index
    %c0_87 = arith.constant 0 : index
    %387 = vector.load %arg24[%386, %c0_87] : memref<8x128xf32, #tpu.memory_space<vmem>>, vector<1x128xf32>
    tpu.vector_store %arg24[%386, %c0_87], %383 {strides = array<i32>} : memref<8x128xf32, #tpu.memory_space<vmem>>, vector<1x128xf32>,
    %c6_i32 = arith.constant 6 : i32
    %c7_i32_88 = arith.constant 7 : i32
    %388 = arith.subi %c7_i32_88, %c6_i32 : i32
    %389 = arith.index_cast %c6_i32 : i32 to index
    %c0_89 = arith.constant 0 : index
    %390 = vector.load %arg22[%389, %c0_89] : memref<8x1024xf32, #tpu.memory_space<vmem>>, vector<1x512xf32>
    %cst_90 = arith.constant dense<0.000000e+00> : vector<1x512xf32>
    %391 = tpu.matmul %358, %7, %cst_90 {dimension_numbers = #tpu.dot_dimension_numbers<[1], [0], [0], [1], [0, 0, 1, 1], [], []>} : vector<1x128xf32>, vector<128x512xf32>, vector<1x512xf32> -> vector<1x512xf32>
    %392 = arith.addf %390, %391 : vector<1x512xf32>
    %393 = arith.index_cast %388 : i32 to index
    %c512_91 = arith.constant 512 : index
    %394 = vector.load %arg22[%393, %c512_91] : memref<8x1024xf32, #tpu.memory_space<vmem>>, vector<1x512xf32>
    %cst_92 = arith.constant dense<0.000000e+00> : vector<1x512xf32>
    %395 = tpu.matmul %383, %8, %cst_92 {dimension_numbers = #tpu.dot_dimension_numbers<[1], [0], [0], [1], [0, 0, 1, 1], [], []>} : vector<1x128xf32>, vector<128x512xf32>, vector<1x512xf32> -> vector<1x512xf32>
    %396 = arith.addf %394, %395 : vector<1x512xf32>
    %397 = vector.extract_strided_slice %392 {offsets = [0, 0], sizes = [1, 128], strides = [1, 1]} : vector<1x512xf32> to vector<1x128xf32>
    %398 = arith.negf %397 : vector<1x128xf32>
    %399 = math.exp %398 : vector<1x128xf32>
    %cst_93 = arith.constant 1.000000e+00 : f32
    %400 = vector.broadcast %cst_93 : f32 to vector<1x128xf32>
    %401 = arith.addf %400, %399 : vector<1x128xf32>
    %402 = arith.divf %400, %401 : vector<1x128xf32>
    %403 = vector.extract_strided_slice %392 {offsets = [0, 128], sizes = [1, 128], strides = [1, 1]} : vector<1x512xf32> to vector<1x128xf32>
    %404 = arith.negf %403 : vector<1x128xf32>
    %405 = math.exp %404 : vector<1x128xf32>
    %cst_94 = arith.constant 1.000000e+00 : f32
    %406 = vector.broadcast %cst_94 : f32 to vector<1x128xf32>
    %407 = arith.addf %406, %405 : vector<1x128xf32>
    %408 = arith.divf %406, %407 : vector<1x128xf32>
    %409 = vector.extract_strided_slice %392 {offsets = [0, 256], sizes = [1, 128], strides = [1, 1]} : vector<1x512xf32> to vector<1x128xf32>
    %410 = math.tanh %409 : vector<1x128xf32>
    %411 = vector.extract_strided_slice %392 {offsets = [0, 384], sizes = [1, 128], strides = [1, 1]} : vector<1x512xf32> to vector<1x128xf32>
    %412 = arith.negf %411 : vector<1x128xf32>
    %413 = math.exp %412 : vector<1x128xf32>
    %cst_95 = arith.constant 1.000000e+00 : f32
    %414 = vector.broadcast %cst_95 : f32 to vector<1x128xf32>
    %415 = arith.addf %414, %413 : vector<1x128xf32>
    %416 = arith.divf %414, %415 : vector<1x128xf32>
    %417 = arith.mulf %408, %356 : vector<1x128xf32>
    %418 = arith.mulf %402, %410 : vector<1x128xf32>
    %419 = arith.addf %417, %418 : vector<1x128xf32>
    %420 = math.tanh %419 : vector<1x128xf32>
    %421 = arith.mulf %416, %420 : vector<1x128xf32>
    %422 = vector.extract_strided_slice %396 {offsets = [0, 0], sizes = [1, 128], strides = [1, 1]} : vector<1x512xf32> to vector<1x128xf32>
    %423 = arith.negf %422 : vector<1x128xf32>
    %424 = math.exp %423 : vector<1x128xf32>
    %cst_96 = arith.constant 1.000000e+00 : f32
    %425 = vector.broadcast %cst_96 : f32 to vector<1x128xf32>
    %426 = arith.addf %425, %424 : vector<1x128xf32>
    %427 = arith.divf %425, %426 : vector<1x128xf32>
    %428 = vector.extract_strided_slice %396 {offsets = [0, 128], sizes = [1, 128], strides = [1, 1]} : vector<1x512xf32> to vector<1x128xf32>
    %429 = arith.negf %428 : vector<1x128xf32>
    %430 = math.exp %429 : vector<1x128xf32>
    %cst_97 = arith.constant 1.000000e+00 : f32
    %431 = vector.broadcast %cst_97 : f32 to vector<1x128xf32>
    %432 = arith.addf %431, %430 : vector<1x128xf32>
    %433 = arith.divf %431, %432 : vector<1x128xf32>
    %434 = vector.extract_strided_slice %396 {offsets = [0, 256], sizes = [1, 128], strides = [1, 1]} : vector<1x512xf32> to vector<1x128xf32>
    %435 = math.tanh %434 : vector<1x128xf32>
    %436 = vector.extract_strided_slice %396 {offsets = [0, 384], sizes = [1, 128], strides = [1, 1]} : vector<1x512xf32> to vector<1x128xf32>
    %437 = arith.negf %436 : vector<1x128xf32>
    %438 = math.exp %437 : vector<1x128xf32>
    %cst_98 = arith.constant 1.000000e+00 : f32
    %439 = vector.broadcast %cst_98 : f32 to vector<1x128xf32>
    %440 = arith.addf %439, %438 : vector<1x128xf32>
    %441 = arith.divf %439, %440 : vector<1x128xf32>
    %442 = arith.mulf %433, %381 : vector<1x128xf32>
    %443 = arith.mulf %427, %435 : vector<1x128xf32>
    %444 = arith.addf %442, %443 : vector<1x128xf32>
    %445 = math.tanh %444 : vector<1x128xf32>
    %446 = arith.mulf %441, %445 : vector<1x128xf32>
    %447 = arith.index_cast %c6_i32 : i32 to index
    %c0_99 = arith.constant 0 : index
    %448 = vector.load %arg23[%447, %c0_99] : memref<8x128xf32, #tpu.memory_space<vmem>>, vector<1x128xf32>
    tpu.vector_store %arg23[%447, %c0_99], %421 {strides = array<i32>} : memref<8x128xf32, #tpu.memory_space<vmem>>, vector<1x128xf32>,
    %449 = arith.index_cast %388 : i32 to index
    %c0_100 = arith.constant 0 : index
    %450 = vector.load %arg24[%449, %c0_100] : memref<8x128xf32, #tpu.memory_space<vmem>>, vector<1x128xf32>
    tpu.vector_store %arg24[%449, %c0_100], %446 {strides = array<i32>} : memref<8x128xf32, #tpu.memory_space<vmem>>, vector<1x128xf32>,
    %c7_i32_101 = arith.constant 7 : i32
    %c7_i32_102 = arith.constant 7 : i32
    %451 = arith.subi %c7_i32_102, %c7_i32_101 : i32
    %452 = arith.index_cast %c7_i32_101 : i32 to index
    %c0_103 = arith.constant 0 : index
    %453 = vector.load %arg22[%452, %c0_103] : memref<8x1024xf32, #tpu.memory_space<vmem>>, vector<1x512xf32>
    %cst_104 = arith.constant dense<0.000000e+00> : vector<1x512xf32>
    %454 = tpu.matmul %421, %7, %cst_104 {dimension_numbers = #tpu.dot_dimension_numbers<[1], [0], [0], [1], [0, 0, 1, 1], [], []>} : vector<1x128xf32>, vector<128x512xf32>, vector<1x512xf32> -> vector<1x512xf32>
    %455 = arith.addf %453, %454 : vector<1x512xf32>
    %456 = arith.index_cast %451 : i32 to index
    %c512_105 = arith.constant 512 : index
    %457 = vector.load %arg22[%456, %c512_105] : memref<8x1024xf32, #tpu.memory_space<vmem>>, vector<1x512xf32>
    %cst_106 = arith.constant dense<0.000000e+00> : vector<1x512xf32>
    %458 = tpu.matmul %446, %8, %cst_106 {dimension_numbers = #tpu.dot_dimension_numbers<[1], [0], [0], [1], [0, 0, 1, 1], [], []>} : vector<1x128xf32>, vector<128x512xf32>, vector<1x512xf32> -> vector<1x512xf32>
    %459 = arith.addf %457, %458 : vector<1x512xf32>
    %460 = vector.extract_strided_slice %455 {offsets = [0, 0], sizes = [1, 128], strides = [1, 1]} : vector<1x512xf32> to vector<1x128xf32>
    %461 = arith.negf %460 : vector<1x128xf32>
    %462 = math.exp %461 : vector<1x128xf32>
    %cst_107 = arith.constant 1.000000e+00 : f32
    %463 = vector.broadcast %cst_107 : f32 to vector<1x128xf32>
    %464 = arith.addf %463, %462 : vector<1x128xf32>
    %465 = arith.divf %463, %464 : vector<1x128xf32>
    %466 = vector.extract_strided_slice %455 {offsets = [0, 128], sizes = [1, 128], strides = [1, 1]} : vector<1x512xf32> to vector<1x128xf32>
    %467 = arith.negf %466 : vector<1x128xf32>
    %468 = math.exp %467 : vector<1x128xf32>
    %cst_108 = arith.constant 1.000000e+00 : f32
    %469 = vector.broadcast %cst_108 : f32 to vector<1x128xf32>
    %470 = arith.addf %469, %468 : vector<1x128xf32>
    %471 = arith.divf %469, %470 : vector<1x128xf32>
    %472 = vector.extract_strided_slice %455 {offsets = [0, 256], sizes = [1, 128], strides = [1, 1]} : vector<1x512xf32> to vector<1x128xf32>
    %473 = math.tanh %472 : vector<1x128xf32>
    %474 = vector.extract_strided_slice %455 {offsets = [0, 384], sizes = [1, 128], strides = [1, 1]} : vector<1x512xf32> to vector<1x128xf32>
    %475 = arith.negf %474 : vector<1x128xf32>
    %476 = math.exp %475 : vector<1x128xf32>
    %cst_109 = arith.constant 1.000000e+00 : f32
    %477 = vector.broadcast %cst_109 : f32 to vector<1x128xf32>
    %478 = arith.addf %477, %476 : vector<1x128xf32>
    %479 = arith.divf %477, %478 : vector<1x128xf32>
    %480 = arith.mulf %471, %419 : vector<1x128xf32>
    %481 = arith.mulf %465, %473 : vector<1x128xf32>
    %482 = arith.addf %480, %481 : vector<1x128xf32>
    %483 = math.tanh %482 : vector<1x128xf32>
    %484 = arith.mulf %479, %483 : vector<1x128xf32>
    %485 = vector.extract_strided_slice %459 {offsets = [0, 0], sizes = [1, 128], strides = [1, 1]} : vector<1x512xf32> to vector<1x128xf32>
    %486 = arith.negf %485 : vector<1x128xf32>
    %487 = math.exp %486 : vector<1x128xf32>
    %cst_110 = arith.constant 1.000000e+00 : f32
    %488 = vector.broadcast %cst_110 : f32 to vector<1x128xf32>
    %489 = arith.addf %488, %487 : vector<1x128xf32>
    %490 = arith.divf %488, %489 : vector<1x128xf32>
    %491 = vector.extract_strided_slice %459 {offsets = [0, 128], sizes = [1, 128], strides = [1, 1]} : vector<1x512xf32> to vector<1x128xf32>
    %492 = arith.negf %491 : vector<1x128xf32>
    %493 = math.exp %492 : vector<1x128xf32>
    %cst_111 = arith.constant 1.000000e+00 : f32
    %494 = vector.broadcast %cst_111 : f32 to vector<1x128xf32>
    %495 = arith.addf %494, %493 : vector<1x128xf32>
    %496 = arith.divf %494, %495 : vector<1x128xf32>
    %497 = vector.extract_strided_slice %459 {offsets = [0, 256], sizes = [1, 128], strides = [1, 1]} : vector<1x512xf32> to vector<1x128xf32>
    %498 = math.tanh %497 : vector<1x128xf32>
    %499 = vector.extract_strided_slice %459 {offsets = [0, 384], sizes = [1, 128], strides = [1, 1]} : vector<1x512xf32> to vector<1x128xf32>
    %500 = arith.negf %499 : vector<1x128xf32>
    %501 = math.exp %500 : vector<1x128xf32>
    %cst_112 = arith.constant 1.000000e+00 : f32
    %502 = vector.broadcast %cst_112 : f32 to vector<1x128xf32>
    %503 = arith.addf %502, %501 : vector<1x128xf32>
    %504 = arith.divf %502, %503 : vector<1x128xf32>
    %505 = arith.mulf %496, %444 : vector<1x128xf32>
    %506 = arith.mulf %490, %498 : vector<1x128xf32>
    %507 = arith.addf %505, %506 : vector<1x128xf32>
    %508 = math.tanh %507 : vector<1x128xf32>
    %509 = arith.mulf %504, %508 : vector<1x128xf32>
    %510 = arith.index_cast %c7_i32_101 : i32 to index
    %c0_113 = arith.constant 0 : index
    %511 = vector.load %arg23[%510, %c0_113] : memref<8x128xf32, #tpu.memory_space<vmem>>, vector<1x128xf32>
    tpu.vector_store %arg23[%510, %c0_113], %484 {strides = array<i32>} : memref<8x128xf32, #tpu.memory_space<vmem>>, vector<1x128xf32>,
    %512 = arith.index_cast %451 : i32 to index
    %c0_114 = arith.constant 0 : index
    %513 = vector.load %arg24[%512, %c0_114] : memref<8x128xf32, #tpu.memory_space<vmem>>, vector<1x128xf32>
    tpu.vector_store %arg24[%512, %c0_114], %509 {strides = array<i32>} : memref<8x128xf32, #tpu.memory_space<vmem>>, vector<1x128xf32>,
    %c8_i32 = arith.constant 8 : i32
    %c0_115 = arith.constant 0 : index
    %c0_116 = arith.constant 0 : index
    %514 = vector.load %arg23[%c0_115, %c0_116] : memref<8x128xf32, #tpu.memory_space<vmem>>, vector<8x128xf32>
    %c0_117 = arith.constant 0 : index
    %c0_118 = arith.constant 0 : index
    %515 = vector.load %arg24[%c0_117, %c0_118] : memref<8x128xf32, #tpu.memory_space<vmem>>, vector<8x128xf32>
    %c0_119 = arith.constant 0 : index
    %c0_120 = arith.constant 0 : index
    %516 = vector.load %arg7[%c0_119, %c0_120] : memref<128x1024xf32, #tpu.memory_space<vmem>>, vector<128x1024xf32>
    %cst_121 = arith.constant dense<0.000000e+00> : vector<8x1024xf32>
    %517 = tpu.matmul %514, %516, %cst_121 {dimension_numbers = #tpu.dot_dimension_numbers<[1], [0], [0], [1], [0, 0, 1, 1], [], []>} : vector<8x128xf32>, vector<128x1024xf32>, vector<8x1024xf32> -> vector<8x1024xf32>
    %c0_122 = arith.constant 0 : index
    %c0_123 = arith.constant 0 : index
    %518 = vector.load %arg8[%c0_122, %c0_123] : memref<128x1024xf32, #tpu.memory_space<vmem>>, vector<128x1024xf32>
    %cst_124 = arith.constant dense<0.000000e+00> : vector<8x1024xf32>
    %519 = tpu.matmul %515, %518, %cst_124 {dimension_numbers = #tpu.dot_dimension_numbers<[1], [0], [0], [1], [0, 0, 1, 1], [], []>} : vector<8x128xf32>, vector<128x1024xf32>, vector<8x1024xf32> -> vector<8x1024xf32>
    %520 = arith.addf %517, %519 : vector<8x1024xf32>
    %c0_125 = arith.constant 0 : index
    %c0_126 = arith.constant 0 : index
    %521 = vector.load %arg11[%c0_125, %c0_126] : memref<1x1024xf32, #tpu.memory_space<vmem>>, vector<1x1024xf32>
    %522 = vector.broadcast %521 : vector<1x1024xf32> to vector<8x1024xf32>
    %523 = arith.addf %520, %522 : vector<8x1024xf32>
    %c0_127 = arith.constant 0 : index
    %c0_128 = arith.constant 0 : index
    %524 = vector.load %arg22[%c0_127, %c0_128] : memref<8x1024xf32, #tpu.memory_space<vmem>>, vector<8x1024xf32>
    tpu.vector_store %arg22[%c0_127, %c0_128], %523 {strides = array<i32>} : memref<8x1024xf32, #tpu.memory_space<vmem>>, vector<8x1024xf32>,
    %c0_129 = arith.constant 0 : index
    %c0_130 = arith.constant 0 : index
    %525 = vector.load %arg9[%c0_129, %c0_130] : memref<128x512xf32, #tpu.memory_space<vmem>>, vector<128x512xf32>
    %c0_131 = arith.constant 0 : index
    %c0_132 = arith.constant 0 : index
    %526 = vector.load %arg10[%c0_131, %c0_132] : memref<128x512xf32, #tpu.memory_space<vmem>>, vector<128x512xf32>
    %cst_133 = arith.constant 0.000000e+00 : f32
    %527 = vector.broadcast %cst_133 : f32 to vector<1x128xf32>
    %c0_i32_134 = arith.constant 0 : i32
    %c7_i32_135 = arith.constant 7 : i32
    %528 = arith.subi %c7_i32_135, %c0_i32_134 : i32
    %529 = arith.index_cast %c0_i32_134 : i32 to index
    %c0_136 = arith.constant 0 : index
    %530 = vector.load %arg22[%529, %c0_136] : memref<8x1024xf32, #tpu.memory_space<vmem>>, vector<1x512xf32>
    %cst_137 = arith.constant dense<0.000000e+00> : vector<1x512xf32>
    %531 = tpu.matmul %527, %525, %cst_137 {dimension_numbers = #tpu.dot_dimension_numbers<[1], [0], [0], [1], [0, 0, 1, 1], [], []>} : vector<1x128xf32>, vector<128x512xf32>, vector<1x512xf32> -> vector<1x512xf32>
    %532 = arith.addf %530, %531 : vector<1x512xf32>
    %533 = arith.index_cast %528 : i32 to index
    %c512_138 = arith.constant 512 : index
    %534 = vector.load %arg22[%533, %c512_138] : memref<8x1024xf32, #tpu.memory_space<vmem>>, vector<1x512xf32>
    %cst_139 = arith.constant dense<0.000000e+00> : vector<1x512xf32>
    %535 = tpu.matmul %527, %526, %cst_139 {dimension_numbers = #tpu.dot_dimension_numbers<[1], [0], [0], [1], [0, 0, 1, 1], [], []>} : vector<1x128xf32>, vector<128x512xf32>, vector<1x512xf32> -> vector<1x512xf32>
    %536 = arith.addf %534, %535 : vector<1x512xf32>
    %537 = vector.extract_strided_slice %532 {offsets = [0, 0], sizes = [1, 128], strides = [1, 1]} : vector<1x512xf32> to vector<1x128xf32>
    %538 = arith.negf %537 : vector<1x128xf32>
    %539 = math.exp %538 : vector<1x128xf32>
    %cst_140 = arith.constant 1.000000e+00 : f32
    %540 = vector.broadcast %cst_140 : f32 to vector<1x128xf32>
    %541 = arith.addf %540, %539 : vector<1x128xf32>
    %542 = arith.divf %540, %541 : vector<1x128xf32>
    %543 = vector.extract_strided_slice %532 {offsets = [0, 128], sizes = [1, 128], strides = [1, 1]} : vector<1x512xf32> to vector<1x128xf32>
    %544 = arith.negf %543 : vector<1x128xf32>
    %545 = math.exp %544 : vector<1x128xf32>
    %cst_141 = arith.constant 1.000000e+00 : f32
    %546 = vector.broadcast %cst_141 : f32 to vector<1x128xf32>
    %547 = arith.addf %546, %545 : vector<1x128xf32>
    %548 = arith.divf %546, %547 : vector<1x128xf32>
    %549 = vector.extract_strided_slice %532 {offsets = [0, 256], sizes = [1, 128], strides = [1, 1]} : vector<1x512xf32> to vector<1x128xf32>
    %550 = math.tanh %549 : vector<1x128xf32>
    %551 = vector.extract_strided_slice %532 {offsets = [0, 384], sizes = [1, 128], strides = [1, 1]} : vector<1x512xf32> to vector<1x128xf32>
    %552 = arith.negf %551 : vector<1x128xf32>
    %553 = math.exp %552 : vector<1x128xf32>
    %cst_142 = arith.constant 1.000000e+00 : f32
    %554 = vector.broadcast %cst_142 : f32 to vector<1x128xf32>
    %555 = arith.addf %554, %553 : vector<1x128xf32>
    %556 = arith.divf %554, %555 : vector<1x128xf32>
    %557 = arith.mulf %548, %527 : vector<1x128xf32>
    %558 = arith.mulf %542, %550 : vector<1x128xf32>
    %559 = arith.addf %557, %558 : vector<1x128xf32>
    %560 = math.tanh %559 : vector<1x128xf32>
    %561 = arith.mulf %556, %560 : vector<1x128xf32>
    %562 = vector.extract_strided_slice %536 {offsets = [0, 0], sizes = [1, 128], strides = [1, 1]} : vector<1x512xf32> to vector<1x128xf32>
    %563 = arith.negf %562 : vector<1x128xf32>
    %564 = math.exp %563 : vector<1x128xf32>
    %cst_143 = arith.constant 1.000000e+00 : f32
    %565 = vector.broadcast %cst_143 : f32 to vector<1x128xf32>
    %566 = arith.addf %565, %564 : vector<1x128xf32>
    %567 = arith.divf %565, %566 : vector<1x128xf32>
    %568 = vector.extract_strided_slice %536 {offsets = [0, 128], sizes = [1, 128], strides = [1, 1]} : vector<1x512xf32> to vector<1x128xf32>
    %569 = arith.negf %568 : vector<1x128xf32>
    %570 = math.exp %569 : vector<1x128xf32>
    %cst_144 = arith.constant 1.000000e+00 : f32
    %571 = vector.broadcast %cst_144 : f32 to vector<1x128xf32>
    %572 = arith.addf %571, %570 : vector<1x128xf32>
    %573 = arith.divf %571, %572 : vector<1x128xf32>
    %574 = vector.extract_strided_slice %536 {offsets = [0, 256], sizes = [1, 128], strides = [1, 1]} : vector<1x512xf32> to vector<1x128xf32>
    %575 = math.tanh %574 : vector<1x128xf32>
    %576 = vector.extract_strided_slice %536 {offsets = [0, 384], sizes = [1, 128], strides = [1, 1]} : vector<1x512xf32> to vector<1x128xf32>
    %577 = arith.negf %576 : vector<1x128xf32>
    %578 = math.exp %577 : vector<1x128xf32>
    %cst_145 = arith.constant 1.000000e+00 : f32
    %579 = vector.broadcast %cst_145 : f32 to vector<1x128xf32>
    %580 = arith.addf %579, %578 : vector<1x128xf32>
    %581 = arith.divf %579, %580 : vector<1x128xf32>
    %582 = arith.mulf %573, %527 : vector<1x128xf32>
    %583 = arith.mulf %567, %575 : vector<1x128xf32>
    %584 = arith.addf %582, %583 : vector<1x128xf32>
    %585 = math.tanh %584 : vector<1x128xf32>
    %586 = arith.mulf %581, %585 : vector<1x128xf32>
    %587 = arith.index_cast %c0_i32_134 : i32 to index
    %c0_146 = arith.constant 0 : index
    %588 = vector.load %arg25[%587, %c0_146] : memref<8x128xf32, #tpu.memory_space<vmem>>, vector<1x128xf32>
    tpu.vector_store %arg25[%587, %c0_146], %561 {strides = array<i32>} : memref<8x128xf32, #tpu.memory_space<vmem>>, vector<1x128xf32>,
    %589 = arith.index_cast %528 : i32 to index
    %c0_147 = arith.constant 0 : index
    %590 = vector.load %arg26[%589, %c0_147] : memref<8x128xf32, #tpu.memory_space<vmem>>, vector<1x128xf32>
    tpu.vector_store %arg26[%589, %c0_147], %586 {strides = array<i32>} : memref<8x128xf32, #tpu.memory_space<vmem>>, vector<1x128xf32>,
    %c1_i32_148 = arith.constant 1 : i32
    %c7_i32_149 = arith.constant 7 : i32
    %591 = arith.subi %c7_i32_149, %c1_i32_148 : i32
    %592 = arith.index_cast %c1_i32_148 : i32 to index
    %c0_150 = arith.constant 0 : index
    %593 = vector.load %arg22[%592, %c0_150] : memref<8x1024xf32, #tpu.memory_space<vmem>>, vector<1x512xf32>
    %cst_151 = arith.constant dense<0.000000e+00> : vector<1x512xf32>
    %594 = tpu.matmul %561, %525, %cst_151 {dimension_numbers = #tpu.dot_dimension_numbers<[1], [0], [0], [1], [0, 0, 1, 1], [], []>} : vector<1x128xf32>, vector<128x512xf32>, vector<1x512xf32> -> vector<1x512xf32>
    %595 = arith.addf %593, %594 : vector<1x512xf32>
    %596 = arith.index_cast %591 : i32 to index
    %c512_152 = arith.constant 512 : index
    %597 = vector.load %arg22[%596, %c512_152] : memref<8x1024xf32, #tpu.memory_space<vmem>>, vector<1x512xf32>
    %cst_153 = arith.constant dense<0.000000e+00> : vector<1x512xf32>
    %598 = tpu.matmul %586, %526, %cst_153 {dimension_numbers = #tpu.dot_dimension_numbers<[1], [0], [0], [1], [0, 0, 1, 1], [], []>} : vector<1x128xf32>, vector<128x512xf32>, vector<1x512xf32> -> vector<1x512xf32>
    %599 = arith.addf %597, %598 : vector<1x512xf32>
    %600 = vector.extract_strided_slice %595 {offsets = [0, 0], sizes = [1, 128], strides = [1, 1]} : vector<1x512xf32> to vector<1x128xf32>
    %601 = arith.negf %600 : vector<1x128xf32>
    %602 = math.exp %601 : vector<1x128xf32>
    %cst_154 = arith.constant 1.000000e+00 : f32
    %603 = vector.broadcast %cst_154 : f32 to vector<1x128xf32>
    %604 = arith.addf %603, %602 : vector<1x128xf32>
    %605 = arith.divf %603, %604 : vector<1x128xf32>
    %606 = vector.extract_strided_slice %595 {offsets = [0, 128], sizes = [1, 128], strides = [1, 1]} : vector<1x512xf32> to vector<1x128xf32>
    %607 = arith.negf %606 : vector<1x128xf32>
    %608 = math.exp %607 : vector<1x128xf32>
    %cst_155 = arith.constant 1.000000e+00 : f32
    %609 = vector.broadcast %cst_155 : f32 to vector<1x128xf32>
    %610 = arith.addf %609, %608 : vector<1x128xf32>
    %611 = arith.divf %609, %610 : vector<1x128xf32>
    %612 = vector.extract_strided_slice %595 {offsets = [0, 256], sizes = [1, 128], strides = [1, 1]} : vector<1x512xf32> to vector<1x128xf32>
    %613 = math.tanh %612 : vector<1x128xf32>
    %614 = vector.extract_strided_slice %595 {offsets = [0, 384], sizes = [1, 128], strides = [1, 1]} : vector<1x512xf32> to vector<1x128xf32>
    %615 = arith.negf %614 : vector<1x128xf32>
    %616 = math.exp %615 : vector<1x128xf32>
    %cst_156 = arith.constant 1.000000e+00 : f32
    %617 = vector.broadcast %cst_156 : f32 to vector<1x128xf32>
    %618 = arith.addf %617, %616 : vector<1x128xf32>
    %619 = arith.divf %617, %618 : vector<1x128xf32>
    %620 = arith.mulf %611, %559 : vector<1x128xf32>
    %621 = arith.mulf %605, %613 : vector<1x128xf32>
    %622 = arith.addf %620, %621 : vector<1x128xf32>
    %623 = math.tanh %622 : vector<1x128xf32>
    %624 = arith.mulf %619, %623 : vector<1x128xf32>
    %625 = vector.extract_strided_slice %599 {offsets = [0, 0], sizes = [1, 128], strides = [1, 1]} : vector<1x512xf32> to vector<1x128xf32>
    %626 = arith.negf %625 : vector<1x128xf32>
    %627 = math.exp %626 : vector<1x128xf32>
    %cst_157 = arith.constant 1.000000e+00 : f32
    %628 = vector.broadcast %cst_157 : f32 to vector<1x128xf32>
    %629 = arith.addf %628, %627 : vector<1x128xf32>
    %630 = arith.divf %628, %629 : vector<1x128xf32>
    %631 = vector.extract_strided_slice %599 {offsets = [0, 128], sizes = [1, 128], strides = [1, 1]} : vector<1x512xf32> to vector<1x128xf32>
    %632 = arith.negf %631 : vector<1x128xf32>
    %633 = math.exp %632 : vector<1x128xf32>
    %cst_158 = arith.constant 1.000000e+00 : f32
    %634 = vector.broadcast %cst_158 : f32 to vector<1x128xf32>
    %635 = arith.addf %634, %633 : vector<1x128xf32>
    %636 = arith.divf %634, %635 : vector<1x128xf32>
    %637 = vector.extract_strided_slice %599 {offsets = [0, 256], sizes = [1, 128], strides = [1, 1]} : vector<1x512xf32> to vector<1x128xf32>
    %638 = math.tanh %637 : vector<1x128xf32>
    %639 = vector.extract_strided_slice %599 {offsets = [0, 384], sizes = [1, 128], strides = [1, 1]} : vector<1x512xf32> to vector<1x128xf32>
    %640 = arith.negf %639 : vector<1x128xf32>
    %641 = math.exp %640 : vector<1x128xf32>
    %cst_159 = arith.constant 1.000000e+00 : f32
    %642 = vector.broadcast %cst_159 : f32 to vector<1x128xf32>
    %643 = arith.addf %642, %641 : vector<1x128xf32>
    %644 = arith.divf %642, %643 : vector<1x128xf32>
    %645 = arith.mulf %636, %584 : vector<1x128xf32>
    %646 = arith.mulf %630, %638 : vector<1x128xf32>
    %647 = arith.addf %645, %646 : vector<1x128xf32>
    %648 = math.tanh %647 : vector<1x128xf32>
    %649 = arith.mulf %644, %648 : vector<1x128xf32>
    %650 = arith.index_cast %c1_i32_148 : i32 to index
    %c0_160 = arith.constant 0 : index
    %651 = vector.load %arg25[%650, %c0_160] : memref<8x128xf32, #tpu.memory_space<vmem>>, vector<1x128xf32>
    tpu.vector_store %arg25[%650, %c0_160], %624 {strides = array<i32>} : memref<8x128xf32, #tpu.memory_space<vmem>>, vector<1x128xf32>,
    %652 = arith.index_cast %591 : i32 to index
    %c0_161 = arith.constant 0 : index
    %653 = vector.load %arg26[%652, %c0_161] : memref<8x128xf32, #tpu.memory_space<vmem>>, vector<1x128xf32>
    tpu.vector_store %arg26[%652, %c0_161], %649 {strides = array<i32>} : memref<8x128xf32, #tpu.memory_space<vmem>>, vector<1x128xf32>,
    %c2_i32_162 = arith.constant 2 : i32
    %c7_i32_163 = arith.constant 7 : i32
    %654 = arith.subi %c7_i32_163, %c2_i32_162 : i32
    %655 = arith.index_cast %c2_i32_162 : i32 to index
    %c0_164 = arith.constant 0 : index
    %656 = vector.load %arg22[%655, %c0_164] : memref<8x1024xf32, #tpu.memory_space<vmem>>, vector<1x512xf32>
    %cst_165 = arith.constant dense<0.000000e+00> : vector<1x512xf32>
    %657 = tpu.matmul %624, %525, %cst_165 {dimension_numbers = #tpu.dot_dimension_numbers<[1], [0], [0], [1], [0, 0, 1, 1], [], []>} : vector<1x128xf32>, vector<128x512xf32>, vector<1x512xf32> -> vector<1x512xf32>
    %658 = arith.addf %656, %657 : vector<1x512xf32>
    %659 = arith.index_cast %654 : i32 to index
    %c512_166 = arith.constant 512 : index
    %660 = vector.load %arg22[%659, %c512_166] : memref<8x1024xf32, #tpu.memory_space<vmem>>, vector<1x512xf32>
    %cst_167 = arith.constant dense<0.000000e+00> : vector<1x512xf32>
    %661 = tpu.matmul %649, %526, %cst_167 {dimension_numbers = #tpu.dot_dimension_numbers<[1], [0], [0], [1], [0, 0, 1, 1], [], []>} : vector<1x128xf32>, vector<128x512xf32>, vector<1x512xf32> -> vector<1x512xf32>
    %662 = arith.addf %660, %661 : vector<1x512xf32>
    %663 = vector.extract_strided_slice %658 {offsets = [0, 0], sizes = [1, 128], strides = [1, 1]} : vector<1x512xf32> to vector<1x128xf32>
    %664 = arith.negf %663 : vector<1x128xf32>
    %665 = math.exp %664 : vector<1x128xf32>
    %cst_168 = arith.constant 1.000000e+00 : f32
    %666 = vector.broadcast %cst_168 : f32 to vector<1x128xf32>
    %667 = arith.addf %666, %665 : vector<1x128xf32>
    %668 = arith.divf %666, %667 : vector<1x128xf32>
    %669 = vector.extract_strided_slice %658 {offsets = [0, 128], sizes = [1, 128], strides = [1, 1]} : vector<1x512xf32> to vector<1x128xf32>
    %670 = arith.negf %669 : vector<1x128xf32>
    %671 = math.exp %670 : vector<1x128xf32>
    %cst_169 = arith.constant 1.000000e+00 : f32
    %672 = vector.broadcast %cst_169 : f32 to vector<1x128xf32>
    %673 = arith.addf %672, %671 : vector<1x128xf32>
    %674 = arith.divf %672, %673 : vector<1x128xf32>
    %675 = vector.extract_strided_slice %658 {offsets = [0, 256], sizes = [1, 128], strides = [1, 1]} : vector<1x512xf32> to vector<1x128xf32>
    %676 = math.tanh %675 : vector<1x128xf32>
    %677 = vector.extract_strided_slice %658 {offsets = [0, 384], sizes = [1, 128], strides = [1, 1]} : vector<1x512xf32> to vector<1x128xf32>
    %678 = arith.negf %677 : vector<1x128xf32>
    %679 = math.exp %678 : vector<1x128xf32>
    %cst_170 = arith.constant 1.000000e+00 : f32
    %680 = vector.broadcast %cst_170 : f32 to vector<1x128xf32>
    %681 = arith.addf %680, %679 : vector<1x128xf32>
    %682 = arith.divf %680, %681 : vector<1x128xf32>
    %683 = arith.mulf %674, %622 : vector<1x128xf32>
    %684 = arith.mulf %668, %676 : vector<1x128xf32>
    %685 = arith.addf %683, %684 : vector<1x128xf32>
    %686 = math.tanh %685 : vector<1x128xf32>
    %687 = arith.mulf %682, %686 : vector<1x128xf32>
    %688 = vector.extract_strided_slice %662 {offsets = [0, 0], sizes = [1, 128], strides = [1, 1]} : vector<1x512xf32> to vector<1x128xf32>
    %689 = arith.negf %688 : vector<1x128xf32>
    %690 = math.exp %689 : vector<1x128xf32>
    %cst_171 = arith.constant 1.000000e+00 : f32
    %691 = vector.broadcast %cst_171 : f32 to vector<1x128xf32>
    %692 = arith.addf %691, %690 : vector<1x128xf32>
    %693 = arith.divf %691, %692 : vector<1x128xf32>
    %694 = vector.extract_strided_slice %662 {offsets = [0, 128], sizes = [1, 128], strides = [1, 1]} : vector<1x512xf32> to vector<1x128xf32>
    %695 = arith.negf %694 : vector<1x128xf32>
    %696 = math.exp %695 : vector<1x128xf32>
    %cst_172 = arith.constant 1.000000e+00 : f32
    %697 = vector.broadcast %cst_172 : f32 to vector<1x128xf32>
    %698 = arith.addf %697, %696 : vector<1x128xf32>
    %699 = arith.divf %697, %698 : vector<1x128xf32>
    %700 = vector.extract_strided_slice %662 {offsets = [0, 256], sizes = [1, 128], strides = [1, 1]} : vector<1x512xf32> to vector<1x128xf32>
    %701 = math.tanh %700 : vector<1x128xf32>
    %702 = vector.extract_strided_slice %662 {offsets = [0, 384], sizes = [1, 128], strides = [1, 1]} : vector<1x512xf32> to vector<1x128xf32>
    %703 = arith.negf %702 : vector<1x128xf32>
    %704 = math.exp %703 : vector<1x128xf32>
    %cst_173 = arith.constant 1.000000e+00 : f32
    %705 = vector.broadcast %cst_173 : f32 to vector<1x128xf32>
    %706 = arith.addf %705, %704 : vector<1x128xf32>
    %707 = arith.divf %705, %706 : vector<1x128xf32>
    %708 = arith.mulf %699, %647 : vector<1x128xf32>
    %709 = arith.mulf %693, %701 : vector<1x128xf32>
    %710 = arith.addf %708, %709 : vector<1x128xf32>
    %711 = math.tanh %710 : vector<1x128xf32>
    %712 = arith.mulf %707, %711 : vector<1x128xf32>
    %713 = arith.index_cast %c2_i32_162 : i32 to index
    %c0_174 = arith.constant 0 : index
    %714 = vector.load %arg25[%713, %c0_174] : memref<8x128xf32, #tpu.memory_space<vmem>>, vector<1x128xf32>
    tpu.vector_store %arg25[%713, %c0_174], %687 {strides = array<i32>} : memref<8x128xf32, #tpu.memory_space<vmem>>, vector<1x128xf32>,
    %715 = arith.index_cast %654 : i32 to index
    %c0_175 = arith.constant 0 : index
    %716 = vector.load %arg26[%715, %c0_175] : memref<8x128xf32, #tpu.memory_space<vmem>>, vector<1x128xf32>
    tpu.vector_store %arg26[%715, %c0_175], %712 {strides = array<i32>} : memref<8x128xf32, #tpu.memory_space<vmem>>, vector<1x128xf32>,
    %c3_i32_176 = arith.constant 3 : i32
    %c7_i32_177 = arith.constant 7 : i32
    %717 = arith.subi %c7_i32_177, %c3_i32_176 : i32
    %718 = arith.index_cast %c3_i32_176 : i32 to index
    %c0_178 = arith.constant 0 : index
    %719 = vector.load %arg22[%718, %c0_178] : memref<8x1024xf32, #tpu.memory_space<vmem>>, vector<1x512xf32>
    %cst_179 = arith.constant dense<0.000000e+00> : vector<1x512xf32>
    %720 = tpu.matmul %687, %525, %cst_179 {dimension_numbers = #tpu.dot_dimension_numbers<[1], [0], [0], [1], [0, 0, 1, 1], [], []>} : vector<1x128xf32>, vector<128x512xf32>, vector<1x512xf32> -> vector<1x512xf32>
    %721 = arith.addf %719, %720 : vector<1x512xf32>
    %722 = arith.index_cast %717 : i32 to index
    %c512_180 = arith.constant 512 : index
    %723 = vector.load %arg22[%722, %c512_180] : memref<8x1024xf32, #tpu.memory_space<vmem>>, vector<1x512xf32>
    %cst_181 = arith.constant dense<0.000000e+00> : vector<1x512xf32>
    %724 = tpu.matmul %712, %526, %cst_181 {dimension_numbers = #tpu.dot_dimension_numbers<[1], [0], [0], [1], [0, 0, 1, 1], [], []>} : vector<1x128xf32>, vector<128x512xf32>, vector<1x512xf32> -> vector<1x512xf32>
    %725 = arith.addf %723, %724 : vector<1x512xf32>
    %726 = vector.extract_strided_slice %721 {offsets = [0, 0], sizes = [1, 128], strides = [1, 1]} : vector<1x512xf32> to vector<1x128xf32>
    %727 = arith.negf %726 : vector<1x128xf32>
    %728 = math.exp %727 : vector<1x128xf32>
    %cst_182 = arith.constant 1.000000e+00 : f32
    %729 = vector.broadcast %cst_182 : f32 to vector<1x128xf32>
    %730 = arith.addf %729, %728 : vector<1x128xf32>
    %731 = arith.divf %729, %730 : vector<1x128xf32>
    %732 = vector.extract_strided_slice %721 {offsets = [0, 128], sizes = [1, 128], strides = [1, 1]} : vector<1x512xf32> to vector<1x128xf32>
    %733 = arith.negf %732 : vector<1x128xf32>
    %734 = math.exp %733 : vector<1x128xf32>
    %cst_183 = arith.constant 1.000000e+00 : f32
    %735 = vector.broadcast %cst_183 : f32 to vector<1x128xf32>
    %736 = arith.addf %735, %734 : vector<1x128xf32>
    %737 = arith.divf %735, %736 : vector<1x128xf32>
    %738 = vector.extract_strided_slice %721 {offsets = [0, 256], sizes = [1, 128], strides = [1, 1]} : vector<1x512xf32> to vector<1x128xf32>
    %739 = math.tanh %738 : vector<1x128xf32>
    %740 = vector.extract_strided_slice %721 {offsets = [0, 384], sizes = [1, 128], strides = [1, 1]} : vector<1x512xf32> to vector<1x128xf32>
    %741 = arith.negf %740 : vector<1x128xf32>
    %742 = math.exp %741 : vector<1x128xf32>
    %cst_184 = arith.constant 1.000000e+00 : f32
    %743 = vector.broadcast %cst_184 : f32 to vector<1x128xf32>
    %744 = arith.addf %743, %742 : vector<1x128xf32>
    %745 = arith.divf %743, %744 : vector<1x128xf32>
    %746 = arith.mulf %737, %685 : vector<1x128xf32>
    %747 = arith.mulf %731, %739 : vector<1x128xf32>
    %748 = arith.addf %746, %747 : vector<1x128xf32>
    %749 = math.tanh %748 : vector<1x128xf32>
    %750 = arith.mulf %745, %749 : vector<1x128xf32>
    %751 = vector.extract_strided_slice %725 {offsets = [0, 0], sizes = [1, 128], strides = [1, 1]} : vector<1x512xf32> to vector<1x128xf32>
    %752 = arith.negf %751 : vector<1x128xf32>
    %753 = math.exp %752 : vector<1x128xf32>
    %cst_185 = arith.constant 1.000000e+00 : f32
    %754 = vector.broadcast %cst_185 : f32 to vector<1x128xf32>
    %755 = arith.addf %754, %753 : vector<1x128xf32>
    %756 = arith.divf %754, %755 : vector<1x128xf32>
    %757 = vector.extract_strided_slice %725 {offsets = [0, 128], sizes = [1, 128], strides = [1, 1]} : vector<1x512xf32> to vector<1x128xf32>
    %758 = arith.negf %757 : vector<1x128xf32>
    %759 = math.exp %758 : vector<1x128xf32>
    %cst_186 = arith.constant 1.000000e+00 : f32
    %760 = vector.broadcast %cst_186 : f32 to vector<1x128xf32>
    %761 = arith.addf %760, %759 : vector<1x128xf32>
    %762 = arith.divf %760, %761 : vector<1x128xf32>
    %763 = vector.extract_strided_slice %725 {offsets = [0, 256], sizes = [1, 128], strides = [1, 1]} : vector<1x512xf32> to vector<1x128xf32>
    %764 = math.tanh %763 : vector<1x128xf32>
    %765 = vector.extract_strided_slice %725 {offsets = [0, 384], sizes = [1, 128], strides = [1, 1]} : vector<1x512xf32> to vector<1x128xf32>
    %766 = arith.negf %765 : vector<1x128xf32>
    %767 = math.exp %766 : vector<1x128xf32>
    %cst_187 = arith.constant 1.000000e+00 : f32
    %768 = vector.broadcast %cst_187 : f32 to vector<1x128xf32>
    %769 = arith.addf %768, %767 : vector<1x128xf32>
    %770 = arith.divf %768, %769 : vector<1x128xf32>
    %771 = arith.mulf %762, %710 : vector<1x128xf32>
    %772 = arith.mulf %756, %764 : vector<1x128xf32>
    %773 = arith.addf %771, %772 : vector<1x128xf32>
    %774 = math.tanh %773 : vector<1x128xf32>
    %775 = arith.mulf %770, %774 : vector<1x128xf32>
    %776 = arith.index_cast %c3_i32_176 : i32 to index
    %c0_188 = arith.constant 0 : index
    %777 = vector.load %arg25[%776, %c0_188] : memref<8x128xf32, #tpu.memory_space<vmem>>, vector<1x128xf32>
    tpu.vector_store %arg25[%776, %c0_188], %750 {strides = array<i32>} : memref<8x128xf32, #tpu.memory_space<vmem>>, vector<1x128xf32>,
    %778 = arith.index_cast %717 : i32 to index
    %c0_189 = arith.constant 0 : index
    %779 = vector.load %arg26[%778, %c0_189] : memref<8x128xf32, #tpu.memory_space<vmem>>, vector<1x128xf32>
    tpu.vector_store %arg26[%778, %c0_189], %775 {strides = array<i32>} : memref<8x128xf32, #tpu.memory_space<vmem>>, vector<1x128xf32>,
    %c4_i32_190 = arith.constant 4 : i32
    %c7_i32_191 = arith.constant 7 : i32
    %780 = arith.subi %c7_i32_191, %c4_i32_190 : i32
    %781 = arith.index_cast %c4_i32_190 : i32 to index
    %c0_192 = arith.constant 0 : index
    %782 = vector.load %arg22[%781, %c0_192] : memref<8x1024xf32, #tpu.memory_space<vmem>>, vector<1x512xf32>
    %cst_193 = arith.constant dense<0.000000e+00> : vector<1x512xf32>
    %783 = tpu.matmul %750, %525, %cst_193 {dimension_numbers = #tpu.dot_dimension_numbers<[1], [0], [0], [1], [0, 0, 1, 1], [], []>} : vector<1x128xf32>, vector<128x512xf32>, vector<1x512xf32> -> vector<1x512xf32>
    %784 = arith.addf %782, %783 : vector<1x512xf32>
    %785 = arith.index_cast %780 : i32 to index
    %c512_194 = arith.constant 512 : index
    %786 = vector.load %arg22[%785, %c512_194] : memref<8x1024xf32, #tpu.memory_space<vmem>>, vector<1x512xf32>
    %cst_195 = arith.constant dense<0.000000e+00> : vector<1x512xf32>
    %787 = tpu.matmul %775, %526, %cst_195 {dimension_numbers = #tpu.dot_dimension_numbers<[1], [0], [0], [1], [0, 0, 1, 1], [], []>} : vector<1x128xf32>, vector<128x512xf32>, vector<1x512xf32> -> vector<1x512xf32>
    %788 = arith.addf %786, %787 : vector<1x512xf32>
    %789 = vector.extract_strided_slice %784 {offsets = [0, 0], sizes = [1, 128], strides = [1, 1]} : vector<1x512xf32> to vector<1x128xf32>
    %790 = arith.negf %789 : vector<1x128xf32>
    %791 = math.exp %790 : vector<1x128xf32>
    %cst_196 = arith.constant 1.000000e+00 : f32
    %792 = vector.broadcast %cst_196 : f32 to vector<1x128xf32>
    %793 = arith.addf %792, %791 : vector<1x128xf32>
    %794 = arith.divf %792, %793 : vector<1x128xf32>
    %795 = vector.extract_strided_slice %784 {offsets = [0, 128], sizes = [1, 128], strides = [1, 1]} : vector<1x512xf32> to vector<1x128xf32>
    %796 = arith.negf %795 : vector<1x128xf32>
    %797 = math.exp %796 : vector<1x128xf32>
    %cst_197 = arith.constant 1.000000e+00 : f32
    %798 = vector.broadcast %cst_197 : f32 to vector<1x128xf32>
    %799 = arith.addf %798, %797 : vector<1x128xf32>
    %800 = arith.divf %798, %799 : vector<1x128xf32>
    %801 = vector.extract_strided_slice %784 {offsets = [0, 256], sizes = [1, 128], strides = [1, 1]} : vector<1x512xf32> to vector<1x128xf32>
    %802 = math.tanh %801 : vector<1x128xf32>
    %803 = vector.extract_strided_slice %784 {offsets = [0, 384], sizes = [1, 128], strides = [1, 1]} : vector<1x512xf32> to vector<1x128xf32>
    %804 = arith.negf %803 : vector<1x128xf32>
    %805 = math.exp %804 : vector<1x128xf32>
    %cst_198 = arith.constant 1.000000e+00 : f32
    %806 = vector.broadcast %cst_198 : f32 to vector<1x128xf32>
    %807 = arith.addf %806, %805 : vector<1x128xf32>
    %808 = arith.divf %806, %807 : vector<1x128xf32>
    %809 = arith.mulf %800, %748 : vector<1x128xf32>
    %810 = arith.mulf %794, %802 : vector<1x128xf32>
    %811 = arith.addf %809, %810 : vector<1x128xf32>
    %812 = math.tanh %811 : vector<1x128xf32>
    %813 = arith.mulf %808, %812 : vector<1x128xf32>
    %814 = vector.extract_strided_slice %788 {offsets = [0, 0], sizes = [1, 128], strides = [1, 1]} : vector<1x512xf32> to vector<1x128xf32>
    %815 = arith.negf %814 : vector<1x128xf32>
    %816 = math.exp %815 : vector<1x128xf32>
    %cst_199 = arith.constant 1.000000e+00 : f32
    %817 = vector.broadcast %cst_199 : f32 to vector<1x128xf32>
    %818 = arith.addf %817, %816 : vector<1x128xf32>
    %819 = arith.divf %817, %818 : vector<1x128xf32>
    %820 = vector.extract_strided_slice %788 {offsets = [0, 128], sizes = [1, 128], strides = [1, 1]} : vector<1x512xf32> to vector<1x128xf32>
    %821 = arith.negf %820 : vector<1x128xf32>
    %822 = math.exp %821 : vector<1x128xf32>
    %cst_200 = arith.constant 1.000000e+00 : f32
    %823 = vector.broadcast %cst_200 : f32 to vector<1x128xf32>
    %824 = arith.addf %823, %822 : vector<1x128xf32>
    %825 = arith.divf %823, %824 : vector<1x128xf32>
    %826 = vector.extract_strided_slice %788 {offsets = [0, 256], sizes = [1, 128], strides = [1, 1]} : vector<1x512xf32> to vector<1x128xf32>
    %827 = math.tanh %826 : vector<1x128xf32>
    %828 = vector.extract_strided_slice %788 {offsets = [0, 384], sizes = [1, 128], strides = [1, 1]} : vector<1x512xf32> to vector<1x128xf32>
    %829 = arith.negf %828 : vector<1x128xf32>
    %830 = math.exp %829 : vector<1x128xf32>
    %cst_201 = arith.constant 1.000000e+00 : f32
    %831 = vector.broadcast %cst_201 : f32 to vector<1x128xf32>
    %832 = arith.addf %831, %830 : vector<1x128xf32>
    %833 = arith.divf %831, %832 : vector<1x128xf32>
    %834 = arith.mulf %825, %773 : vector<1x128xf32>
    %835 = arith.mulf %819, %827 : vector<1x128xf32>
    %836 = arith.addf %834, %835 : vector<1x128xf32>
    %837 = math.tanh %836 : vector<1x128xf32>
    %838 = arith.mulf %833, %837 : vector<1x128xf32>
    %839 = arith.index_cast %c4_i32_190 : i32 to index
    %c0_202 = arith.constant 0 : index
    %840 = vector.load %arg25[%839, %c0_202] : memref<8x128xf32, #tpu.memory_space<vmem>>, vector<1x128xf32>
    tpu.vector_store %arg25[%839, %c0_202], %813 {strides = array<i32>} : memref<8x128xf32, #tpu.memory_space<vmem>>, vector<1x128xf32>,
    %841 = arith.index_cast %780 : i32 to index
    %c0_203 = arith.constant 0 : index
    %842 = vector.load %arg26[%841, %c0_203] : memref<8x128xf32, #tpu.memory_space<vmem>>, vector<1x128xf32>
    tpu.vector_store %arg26[%841, %c0_203], %838 {strides = array<i32>} : memref<8x128xf32, #tpu.memory_space<vmem>>, vector<1x128xf32>,
    %c5_i32_204 = arith.constant 5 : i32
    %c7_i32_205 = arith.constant 7 : i32
    %843 = arith.subi %c7_i32_205, %c5_i32_204 : i32
    %844 = arith.index_cast %c5_i32_204 : i32 to index
    %c0_206 = arith.constant 0 : index
    %845 = vector.load %arg22[%844, %c0_206] : memref<8x1024xf32, #tpu.memory_space<vmem>>, vector<1x512xf32>
    %cst_207 = arith.constant dense<0.000000e+00> : vector<1x512xf32>
    %846 = tpu.matmul %813, %525, %cst_207 {dimension_numbers = #tpu.dot_dimension_numbers<[1], [0], [0], [1], [0, 0, 1, 1], [], []>} : vector<1x128xf32>, vector<128x512xf32>, vector<1x512xf32> -> vector<1x512xf32>
    %847 = arith.addf %845, %846 : vector<1x512xf32>
    %848 = arith.index_cast %843 : i32 to index
    %c512_208 = arith.constant 512 : index
    %849 = vector.load %arg22[%848, %c512_208] : memref<8x1024xf32, #tpu.memory_space<vmem>>, vector<1x512xf32>
    %cst_209 = arith.constant dense<0.000000e+00> : vector<1x512xf32>
    %850 = tpu.matmul %838, %526, %cst_209 {dimension_numbers = #tpu.dot_dimension_numbers<[1], [0], [0], [1], [0, 0, 1, 1], [], []>} : vector<1x128xf32>, vector<128x512xf32>, vector<1x512xf32> -> vector<1x512xf32>
    %851 = arith.addf %849, %850 : vector<1x512xf32>
    %852 = vector.extract_strided_slice %847 {offsets = [0, 0], sizes = [1, 128], strides = [1, 1]} : vector<1x512xf32> to vector<1x128xf32>
    %853 = arith.negf %852 : vector<1x128xf32>
    %854 = math.exp %853 : vector<1x128xf32>
    %cst_210 = arith.constant 1.000000e+00 : f32
    %855 = vector.broadcast %cst_210 : f32 to vector<1x128xf32>
    %856 = arith.addf %855, %854 : vector<1x128xf32>
    %857 = arith.divf %855, %856 : vector<1x128xf32>
    %858 = vector.extract_strided_slice %847 {offsets = [0, 128], sizes = [1, 128], strides = [1, 1]} : vector<1x512xf32> to vector<1x128xf32>
    %859 = arith.negf %858 : vector<1x128xf32>
    %860 = math.exp %859 : vector<1x128xf32>
    %cst_211 = arith.constant 1.000000e+00 : f32
    %861 = vector.broadcast %cst_211 : f32 to vector<1x128xf32>
    %862 = arith.addf %861, %860 : vector<1x128xf32>
    %863 = arith.divf %861, %862 : vector<1x128xf32>
    %864 = vector.extract_strided_slice %847 {offsets = [0, 256], sizes = [1, 128], strides = [1, 1]} : vector<1x512xf32> to vector<1x128xf32>
    %865 = math.tanh %864 : vector<1x128xf32>
    %866 = vector.extract_strided_slice %847 {offsets = [0, 384], sizes = [1, 128], strides = [1, 1]} : vector<1x512xf32> to vector<1x128xf32>
    %867 = arith.negf %866 : vector<1x128xf32>
    %868 = math.exp %867 : vector<1x128xf32>
    %cst_212 = arith.constant 1.000000e+00 : f32
    %869 = vector.broadcast %cst_212 : f32 to vector<1x128xf32>
    %870 = arith.addf %869, %868 : vector<1x128xf32>
    %871 = arith.divf %869, %870 : vector<1x128xf32>
    %872 = arith.mulf %863, %811 : vector<1x128xf32>
    %873 = arith.mulf %857, %865 : vector<1x128xf32>
    %874 = arith.addf %872, %873 : vector<1x128xf32>
    %875 = math.tanh %874 : vector<1x128xf32>
    %876 = arith.mulf %871, %875 : vector<1x128xf32>
    %877 = vector.extract_strided_slice %851 {offsets = [0, 0], sizes = [1, 128], strides = [1, 1]} : vector<1x512xf32> to vector<1x128xf32>
    %878 = arith.negf %877 : vector<1x128xf32>
    %879 = math.exp %878 : vector<1x128xf32>
    %cst_213 = arith.constant 1.000000e+00 : f32
    %880 = vector.broadcast %cst_213 : f32 to vector<1x128xf32>
    %881 = arith.addf %880, %879 : vector<1x128xf32>
    %882 = arith.divf %880, %881 : vector<1x128xf32>
    %883 = vector.extract_strided_slice %851 {offsets = [0, 128], sizes = [1, 128], strides = [1, 1]} : vector<1x512xf32> to vector<1x128xf32>
    %884 = arith.negf %883 : vector<1x128xf32>
    %885 = math.exp %884 : vector<1x128xf32>
    %cst_214 = arith.constant 1.000000e+00 : f32
    %886 = vector.broadcast %cst_214 : f32 to vector<1x128xf32>
    %887 = arith.addf %886, %885 : vector<1x128xf32>
    %888 = arith.divf %886, %887 : vector<1x128xf32>
    %889 = vector.extract_strided_slice %851 {offsets = [0, 256], sizes = [1, 128], strides = [1, 1]} : vector<1x512xf32> to vector<1x128xf32>
    %890 = math.tanh %889 : vector<1x128xf32>
    %891 = vector.extract_strided_slice %851 {offsets = [0, 384], sizes = [1, 128], strides = [1, 1]} : vector<1x512xf32> to vector<1x128xf32>
    %892 = arith.negf %891 : vector<1x128xf32>
    %893 = math.exp %892 : vector<1x128xf32>
    %cst_215 = arith.constant 1.000000e+00 : f32
    %894 = vector.broadcast %cst_215 : f32 to vector<1x128xf32>
    %895 = arith.addf %894, %893 : vector<1x128xf32>
    %896 = arith.divf %894, %895 : vector<1x128xf32>
    %897 = arith.mulf %888, %836 : vector<1x128xf32>
    %898 = arith.mulf %882, %890 : vector<1x128xf32>
    %899 = arith.addf %897, %898 : vector<1x128xf32>
    %900 = math.tanh %899 : vector<1x128xf32>
    %901 = arith.mulf %896, %900 : vector<1x128xf32>
    %902 = arith.index_cast %c5_i32_204 : i32 to index
    %c0_216 = arith.constant 0 : index
    %903 = vector.load %arg25[%902, %c0_216] : memref<8x128xf32, #tpu.memory_space<vmem>>, vector<1x128xf32>
    tpu.vector_store %arg25[%902, %c0_216], %876 {strides = array<i32>} : memref<8x128xf32, #tpu.memory_space<vmem>>, vector<1x128xf32>,
    %904 = arith.index_cast %843 : i32 to index
    %c0_217 = arith.constant 0 : index
    %905 = vector.load %arg26[%904, %c0_217] : memref<8x128xf32, #tpu.memory_space<vmem>>, vector<1x128xf32>
    tpu.vector_store %arg26[%904, %c0_217], %901 {strides = array<i32>} : memref<8x128xf32, #tpu.memory_space<vmem>>, vector<1x128xf32>,
    %c6_i32_218 = arith.constant 6 : i32
    %c7_i32_219 = arith.constant 7 : i32
    %906 = arith.subi %c7_i32_219, %c6_i32_218 : i32
    %907 = arith.index_cast %c6_i32_218 : i32 to index
    %c0_220 = arith.constant 0 : index
    %908 = vector.load %arg22[%907, %c0_220] : memref<8x1024xf32, #tpu.memory_space<vmem>>, vector<1x512xf32>
    %cst_221 = arith.constant dense<0.000000e+00> : vector<1x512xf32>
    %909 = tpu.matmul %876, %525, %cst_221 {dimension_numbers = #tpu.dot_dimension_numbers<[1], [0], [0], [1], [0, 0, 1, 1], [], []>} : vector<1x128xf32>, vector<128x512xf32>, vector<1x512xf32> -> vector<1x512xf32>
    %910 = arith.addf %908, %909 : vector<1x512xf32>
    %911 = arith.index_cast %906 : i32 to index
    %c512_222 = arith.constant 512 : index
    %912 = vector.load %arg22[%911, %c512_222] : memref<8x1024xf32, #tpu.memory_space<vmem>>, vector<1x512xf32>
    %cst_223 = arith.constant dense<0.000000e+00> : vector<1x512xf32>
    %913 = tpu.matmul %901, %526, %cst_223 {dimension_numbers = #tpu.dot_dimension_numbers<[1], [0], [0], [1], [0, 0, 1, 1], [], []>} : vector<1x128xf32>, vector<128x512xf32>, vector<1x512xf32> -> vector<1x512xf32>
    %914 = arith.addf %912, %913 : vector<1x512xf32>
    %915 = vector.extract_strided_slice %910 {offsets = [0, 0], sizes = [1, 128], strides = [1, 1]} : vector<1x512xf32> to vector<1x128xf32>
    %916 = arith.negf %915 : vector<1x128xf32>
    %917 = math.exp %916 : vector<1x128xf32>
    %cst_224 = arith.constant 1.000000e+00 : f32
    %918 = vector.broadcast %cst_224 : f32 to vector<1x128xf32>
    %919 = arith.addf %918, %917 : vector<1x128xf32>
    %920 = arith.divf %918, %919 : vector<1x128xf32>
    %921 = vector.extract_strided_slice %910 {offsets = [0, 128], sizes = [1, 128], strides = [1, 1]} : vector<1x512xf32> to vector<1x128xf32>
    %922 = arith.negf %921 : vector<1x128xf32>
    %923 = math.exp %922 : vector<1x128xf32>
    %cst_225 = arith.constant 1.000000e+00 : f32
    %924 = vector.broadcast %cst_225 : f32 to vector<1x128xf32>
    %925 = arith.addf %924, %923 : vector<1x128xf32>
    %926 = arith.divf %924, %925 : vector<1x128xf32>
    %927 = vector.extract_strided_slice %910 {offsets = [0, 256], sizes = [1, 128], strides = [1, 1]} : vector<1x512xf32> to vector<1x128xf32>
    %928 = math.tanh %927 : vector<1x128xf32>
    %929 = vector.extract_strided_slice %910 {offsets = [0, 384], sizes = [1, 128], strides = [1, 1]} : vector<1x512xf32> to vector<1x128xf32>
    %930 = arith.negf %929 : vector<1x128xf32>
    %931 = math.exp %930 : vector<1x128xf32>
    %cst_226 = arith.constant 1.000000e+00 : f32
    %932 = vector.broadcast %cst_226 : f32 to vector<1x128xf32>
    %933 = arith.addf %932, %931 : vector<1x128xf32>
    %934 = arith.divf %932, %933 : vector<1x128xf32>
    %935 = arith.mulf %926, %874 : vector<1x128xf32>
    %936 = arith.mulf %920, %928 : vector<1x128xf32>
    %937 = arith.addf %935, %936 : vector<1x128xf32>
    %938 = math.tanh %937 : vector<1x128xf32>
    %939 = arith.mulf %934, %938 : vector<1x128xf32>
    %940 = vector.extract_strided_slice %914 {offsets = [0, 0], sizes = [1, 128], strides = [1, 1]} : vector<1x512xf32> to vector<1x128xf32>
    %941 = arith.negf %940 : vector<1x128xf32>
    %942 = math.exp %941 : vector<1x128xf32>
    %cst_227 = arith.constant 1.000000e+00 : f32
    %943 = vector.broadcast %cst_227 : f32 to vector<1x128xf32>
    %944 = arith.addf %943, %942 : vector<1x128xf32>
    %945 = arith.divf %943, %944 : vector<1x128xf32>
    %946 = vector.extract_strided_slice %914 {offsets = [0, 128], sizes = [1, 128], strides = [1, 1]} : vector<1x512xf32> to vector<1x128xf32>
    %947 = arith.negf %946 : vector<1x128xf32>
    %948 = math.exp %947 : vector<1x128xf32>
    %cst_228 = arith.constant 1.000000e+00 : f32
    %949 = vector.broadcast %cst_228 : f32 to vector<1x128xf32>
    %950 = arith.addf %949, %948 : vector<1x128xf32>
    %951 = arith.divf %949, %950 : vector<1x128xf32>
    %952 = vector.extract_strided_slice %914 {offsets = [0, 256], sizes = [1, 128], strides = [1, 1]} : vector<1x512xf32> to vector<1x128xf32>
    %953 = math.tanh %952 : vector<1x128xf32>
    %954 = vector.extract_strided_slice %914 {offsets = [0, 384], sizes = [1, 128], strides = [1, 1]} : vector<1x512xf32> to vector<1x128xf32>
    %955 = arith.negf %954 : vector<1x128xf32>
    %956 = math.exp %955 : vector<1x128xf32>
    %cst_229 = arith.constant 1.000000e+00 : f32
    %957 = vector.broadcast %cst_229 : f32 to vector<1x128xf32>
    %958 = arith.addf %957, %956 : vector<1x128xf32>
    %959 = arith.divf %957, %958 : vector<1x128xf32>
    %960 = arith.mulf %951, %899 : vector<1x128xf32>
    %961 = arith.mulf %945, %953 : vector<1x128xf32>
    %962 = arith.addf %960, %961 : vector<1x128xf32>
    %963 = math.tanh %962 : vector<1x128xf32>
    %964 = arith.mulf %959, %963 : vector<1x128xf32>
    %965 = arith.index_cast %c6_i32_218 : i32 to index
    %c0_230 = arith.constant 0 : index
    %966 = vector.load %arg25[%965, %c0_230] : memref<8x128xf32, #tpu.memory_space<vmem>>, vector<1x128xf32>
    tpu.vector_store %arg25[%965, %c0_230], %939 {strides = array<i32>} : memref<8x128xf32, #tpu.memory_space<vmem>>, vector<1x128xf32>,
    %967 = arith.index_cast %906 : i32 to index
    %c0_231 = arith.constant 0 : index
    %968 = vector.load %arg26[%967, %c0_231] : memref<8x128xf32, #tpu.memory_space<vmem>>, vector<1x128xf32>
    tpu.vector_store %arg26[%967, %c0_231], %964 {strides = array<i32>} : memref<8x128xf32, #tpu.memory_space<vmem>>, vector<1x128xf32>,
    %c7_i32_232 = arith.constant 7 : i32
    %c7_i32_233 = arith.constant 7 : i32
    %969 = arith.subi %c7_i32_233, %c7_i32_232 : i32
    %970 = arith.index_cast %c7_i32_232 : i32 to index
    %c0_234 = arith.constant 0 : index
    %971 = vector.load %arg22[%970, %c0_234] : memref<8x1024xf32, #tpu.memory_space<vmem>>, vector<1x512xf32>
    %cst_235 = arith.constant dense<0.000000e+00> : vector<1x512xf32>
    %972 = tpu.matmul %939, %525, %cst_235 {dimension_numbers = #tpu.dot_dimension_numbers<[1], [0], [0], [1], [0, 0, 1, 1], [], []>} : vector<1x128xf32>, vector<128x512xf32>, vector<1x512xf32> -> vector<1x512xf32>
    %973 = arith.addf %971, %972 : vector<1x512xf32>
    %974 = arith.index_cast %969 : i32 to index
    %c512_236 = arith.constant 512 : index
    %975 = vector.load %arg22[%974, %c512_236] : memref<8x1024xf32, #tpu.memory_space<vmem>>, vector<1x512xf32>
    %cst_237 = arith.constant dense<0.000000e+00> : vector<1x512xf32>
    %976 = tpu.matmul %964, %526, %cst_237 {dimension_numbers = #tpu.dot_dimension_numbers<[1], [0], [0], [1], [0, 0, 1, 1], [], []>} : vector<1x128xf32>, vector<128x512xf32>, vector<1x512xf32> -> vector<1x512xf32>
    %977 = arith.addf %975, %976 : vector<1x512xf32>
    %978 = vector.extract_strided_slice %973 {offsets = [0, 0], sizes = [1, 128], strides = [1, 1]} : vector<1x512xf32> to vector<1x128xf32>
    %979 = arith.negf %978 : vector<1x128xf32>
    %980 = math.exp %979 : vector<1x128xf32>
    %cst_238 = arith.constant 1.000000e+00 : f32
    %981 = vector.broadcast %cst_238 : f32 to vector<1x128xf32>
    %982 = arith.addf %981, %980 : vector<1x128xf32>
    %983 = arith.divf %981, %982 : vector<1x128xf32>
    %984 = vector.extract_strided_slice %973 {offsets = [0, 128], sizes = [1, 128], strides = [1, 1]} : vector<1x512xf32> to vector<1x128xf32>
    %985 = arith.negf %984 : vector<1x128xf32>
    %986 = math.exp %985 : vector<1x128xf32>
    %cst_239 = arith.constant 1.000000e+00 : f32
    %987 = vector.broadcast %cst_239 : f32 to vector<1x128xf32>
    %988 = arith.addf %987, %986 : vector<1x128xf32>
    %989 = arith.divf %987, %988 : vector<1x128xf32>
    %990 = vector.extract_strided_slice %973 {offsets = [0, 256], sizes = [1, 128], strides = [1, 1]} : vector<1x512xf32> to vector<1x128xf32>
    %991 = math.tanh %990 : vector<1x128xf32>
    %992 = vector.extract_strided_slice %973 {offsets = [0, 384], sizes = [1, 128], strides = [1, 1]} : vector<1x512xf32> to vector<1x128xf32>
    %993 = arith.negf %992 : vector<1x128xf32>
    %994 = math.exp %993 : vector<1x128xf32>
    %cst_240 = arith.constant 1.000000e+00 : f32
    %995 = vector.broadcast %cst_240 : f32 to vector<1x128xf32>
    %996 = arith.addf %995, %994 : vector<1x128xf32>
    %997 = arith.divf %995, %996 : vector<1x128xf32>
    %998 = arith.mulf %989, %937 : vector<1x128xf32>
    %999 = arith.mulf %983, %991 : vector<1x128xf32>
    %1000 = arith.addf %998, %999 : vector<1x128xf32>
    %1001 = math.tanh %1000 : vector<1x128xf32>
    %1002 = arith.mulf %997, %1001 : vector<1x128xf32>
    %1003 = vector.extract_strided_slice %977 {offsets = [0, 0], sizes = [1, 128], strides = [1, 1]} : vector<1x512xf32> to vector<1x128xf32>
    %1004 = arith.negf %1003 : vector<1x128xf32>
    %1005 = math.exp %1004 : vector<1x128xf32>
    %cst_241 = arith.constant 1.000000e+00 : f32
    %1006 = vector.broadcast %cst_241 : f32 to vector<1x128xf32>
    %1007 = arith.addf %1006, %1005 : vector<1x128xf32>
    %1008 = arith.divf %1006, %1007 : vector<1x128xf32>
    %1009 = vector.extract_strided_slice %977 {offsets = [0, 128], sizes = [1, 128], strides = [1, 1]} : vector<1x512xf32> to vector<1x128xf32>
    %1010 = arith.negf %1009 : vector<1x128xf32>
    %1011 = math.exp %1010 : vector<1x128xf32>
    %cst_242 = arith.constant 1.000000e+00 : f32
    %1012 = vector.broadcast %cst_242 : f32 to vector<1x128xf32>
    %1013 = arith.addf %1012, %1011 : vector<1x128xf32>
    %1014 = arith.divf %1012, %1013 : vector<1x128xf32>
    %1015 = vector.extract_strided_slice %977 {offsets = [0, 256], sizes = [1, 128], strides = [1, 1]} : vector<1x512xf32> to vector<1x128xf32>
    %1016 = math.tanh %1015 : vector<1x128xf32>
    %1017 = vector.extract_strided_slice %977 {offsets = [0, 384], sizes = [1, 128], strides = [1, 1]} : vector<1x512xf32> to vector<1x128xf32>
    %1018 = arith.negf %1017 : vector<1x128xf32>
    %1019 = math.exp %1018 : vector<1x128xf32>
    %cst_243 = arith.constant 1.000000e+00 : f32
    %1020 = vector.broadcast %cst_243 : f32 to vector<1x128xf32>
    %1021 = arith.addf %1020, %1019 : vector<1x128xf32>
    %1022 = arith.divf %1020, %1021 : vector<1x128xf32>
    %1023 = arith.mulf %1014, %962 : vector<1x128xf32>
    %1024 = arith.mulf %1008, %1016 : vector<1x128xf32>
    %1025 = arith.addf %1023, %1024 : vector<1x128xf32>
    %1026 = math.tanh %1025 : vector<1x128xf32>
    %1027 = arith.mulf %1022, %1026 : vector<1x128xf32>
    %1028 = arith.index_cast %c7_i32_232 : i32 to index
    %c0_244 = arith.constant 0 : index
    %1029 = vector.load %arg25[%1028, %c0_244] : memref<8x128xf32, #tpu.memory_space<vmem>>, vector<1x128xf32>
    tpu.vector_store %arg25[%1028, %c0_244], %1002 {strides = array<i32>} : memref<8x128xf32, #tpu.memory_space<vmem>>, vector<1x128xf32>,
    %1030 = arith.index_cast %969 : i32 to index
    %c0_245 = arith.constant 0 : index
    %1031 = vector.load %arg26[%1030, %c0_245] : memref<8x128xf32, #tpu.memory_space<vmem>>, vector<1x128xf32>
    tpu.vector_store %arg26[%1030, %c0_245], %1027 {strides = array<i32>} : memref<8x128xf32, #tpu.memory_space<vmem>>, vector<1x128xf32>,
    %c8_i32_246 = arith.constant 8 : i32
    %c0_247 = arith.constant 0 : index
    %c0_248 = arith.constant 0 : index
    %1032 = vector.load %arg25[%c0_247, %c0_248] : memref<8x128xf32, #tpu.memory_space<vmem>>, vector<8x128xf32>
    %1033 = vector.extract_strided_slice %1032 {offsets = [0, 0], sizes = [8, 50], strides = [1, 1]} : vector<8x128xf32> to vector<8x50xf32>
    %c0_249 = arith.constant 0 : index
    %c0_250 = arith.constant 0 : index
    %1034 = vector.load %arg26[%c0_249, %c0_250] : memref<8x128xf32, #tpu.memory_space<vmem>>, vector<8x128xf32>
    %1035 = vector.extract_strided_slice %1034 {offsets = [0, 0], sizes = [8, 50], strides = [1, 1]} : vector<8x128xf32> to vector<8x50xf32>
    %1036 = tpu.concatenate %1033, %1035 in 1 : vector<8x50xf32>, vector<8x50xf32> -> vector<8x100xf32>
    %c0_251 = arith.constant 0 : index
    %c0_252 = arith.constant 0 : index
    %1037 = vector.load %arg1[%c0_251, %c0_252] : memref<8x1xf32, #tpu.memory_space<vmem>>, vector<8x1xf32>
    %c0_253 = arith.constant 0 : index
    %c0_254 = arith.constant 0 : index
    %1038 = vector.load %arg2[%c0_253, %c0_254] : memref<8x1xf32, #tpu.memory_space<vmem>>, vector<8x1xf32>
    %cst_255 = arith.constant 9.99999982E-14 : f32
    %1039 = vector.broadcast %cst_255 : f32 to vector<8x1xf32>
    %1040 = arith.addf %1037, %1039 : vector<8x1xf32>
    %1041 = arith.divf %1037, %1040 : vector<8x1xf32>
    %cst_256 = arith.constant 9.99999982E-14 : f32
    %1042 = vector.broadcast %cst_256 : f32 to vector<8x1xf32>
    %1043 = arith.addf %1038, %1042 : vector<8x1xf32>
    %1044 = arith.divf %1038, %1043 : vector<8x1xf32>
    %1045 = vector.broadcast %1041 : vector<8x1xf32> to vector<8x100xf32>
    %1046 = arith.mulf %1036, %1045 : vector<8x100xf32>
    %cst_257 = arith.constant dense<0.000000e+00> : vector<100xf32>
    %1047 = vector.multi_reduction <add>, %1046, %cst_257 [0] : vector<8x100xf32> to vector<100xf32>
    %1048 = vector.shape_cast %1047 : vector<100xf32> to vector<1x100xf32>
    %1049 = vector.broadcast %1044 : vector<8x1xf32> to vector<8x100xf32>
    %1050 = arith.mulf %1036, %1049 : vector<8x100xf32>
    %cst_258 = arith.constant dense<0.000000e+00> : vector<100xf32>
    %1051 = vector.multi_reduction <add>, %1050, %cst_258 [0] : vector<8x100xf32> to vector<100xf32>
    %1052 = vector.shape_cast %1051 : vector<100xf32> to vector<1x100xf32>
    %1053 = tpu.concatenate %1052, %1048 in 1 : vector<1x100xf32>, vector<1x100xf32> -> vector<1x200xf32>
    %c0_259 = arith.constant 0 : index
    %c0_260 = arith.constant 0 : index
    %1054 = vector.load %arg12[%c0_259, %c0_260] : memref<100x200xf32, #tpu.memory_space<vmem>>, vector<100x200xf32>
    %cst_261 = arith.constant dense<0.000000e+00> : vector<8x200xf32>
    %1055 = tpu.matmul %1036, %1054, %cst_261 {dimension_numbers = #tpu.dot_dimension_numbers<[1], [0], [0], [1], [0, 0, 1, 1], [], []>} : vector<8x100xf32>, vector<100x200xf32>, vector<8x200xf32> -> vector<8x200xf32>
    %1056 = vector.broadcast %1053 : vector<1x200xf32> to vector<8x200xf32>
    %1057 = arith.mulf %1055, %1056 : vector<8x200xf32>
    %cst_262 = arith.constant dense<0.000000e+00> : vector<8xf32>
    %1058 = vector.multi_reduction <add>, %1057, %cst_262 [1] : vector<8x200xf32> to vector<8xf32>
    %1059 = vector.shape_cast %1058 : vector<8xf32> to vector<8x1xf32>
    %c0_263 = arith.constant 0 : index
    %c0_264 = arith.constant 0 : index
    %1060 = vector.load %arg13[%c0_263, %c0_264] : memref<1x1xf32, #tpu.memory_space<vmem>>, vector<1x1xf32>
    %1061 = vector.broadcast %1060 : vector<1x1xf32> to vector<8x1xf32>
    %1062 = arith.addf %1059, %1061 : vector<8x1xf32>
    %cst_265 = arith.constant dense<0xFF800000> : vector<1xf32>
    %1063 = vector.multi_reduction <maximumf>, %1062, %cst_265 [0] : vector<8x1xf32> to vector<1xf32>
    %1064 = vector.shape_cast %1063 : vector<1xf32> to vector<1x1xf32>
    %1065 = vector.broadcast %1064 : vector<1x1xf32> to vector<8x1xf32>
    %1066 = arith.subf %1062, %1065 : vector<8x1xf32>
    %1067 = math.exp %1066 : vector<8x1xf32>
    %cst_266 = arith.constant dense<0.000000e+00> : vector<1xf32>
    %1068 = vector.multi_reduction <add>, %1067, %cst_266 [0] : vector<8x1xf32> to vector<1xf32>
    %1069 = vector.shape_cast %1068 : vector<1xf32> to vector<1x1xf32>
    %1070 = vector.broadcast %1069 : vector<1x1xf32> to vector<8x1xf32>
    %1071 = arith.divf %1067, %1070 : vector<8x1xf32>
    %1072 = vector.broadcast %1071 : vector<8x1xf32> to vector<8x100xf32>
    %1073 = arith.mulf %1036, %1072 : vector<8x100xf32>
    %cst_267 = arith.constant dense<0.000000e+00> : vector<100xf32>
    %1074 = vector.multi_reduction <add>, %1073, %cst_267 [0] : vector<8x100xf32> to vector<100xf32>
    %1075 = vector.shape_cast %1074 : vector<100xf32> to vector<1x100xf32>
    %c0_268 = arith.constant 0 : index
    %c0_269 = arith.constant 0 : index
    %1076 = vector.load %arg14[%c0_268, %c0_269] : memref<100x4xf32, #tpu.memory_space<vmem>>, vector<100x4xf32>
    %cst_270 = arith.constant dense<0.000000e+00> : vector<1x4xf32>
    %1077 = tpu.matmul %1075, %1076, %cst_270 {dimension_numbers = #tpu.dot_dimension_numbers<[1], [0], [0], [1], [0, 0, 1, 1], [], []>} : vector<1x100xf32>, vector<100x4xf32>, vector<1x4xf32> -> vector<1x4xf32>
    %c0_271 = arith.constant 0 : index
    %c0_272 = arith.constant 0 : index
    %1078 = vector.load %arg15[%c0_271, %c0_272] : memref<1x4xf32, #tpu.memory_space<vmem>>, vector<1x4xf32>
    %1079 = arith.addf %1077, %1078 : vector<1x4xf32>
    %cst_273 = arith.constant dense<0xFF800000> : vector<1xf32>
    %1080 = vector.multi_reduction <maximumf>, %1079, %cst_273 [1] : vector<1x4xf32> to vector<1xf32>
    %1081 = vector.shape_cast %1080 : vector<1xf32> to vector<1x1xf32>
    %1082 = vector.broadcast %1081 : vector<1x1xf32> to vector<1x4xf32>
    %1083 = arith.subf %1079, %1082 : vector<1x4xf32>
    %1084 = math.exp %1083 : vector<1x4xf32>
    %cst_274 = arith.constant dense<0.000000e+00> : vector<1xf32>
    %1085 = vector.multi_reduction <add>, %1084, %cst_274 [1] : vector<1x4xf32> to vector<1xf32>
    %1086 = vector.shape_cast %1085 : vector<1xf32> to vector<1x1xf32>
    %1087 = vector.broadcast %1086 : vector<1x1xf32> to vector<1x4xf32>
    %1088 = arith.divf %1084, %1087 : vector<1x4xf32>
    %c0_275 = arith.constant 0 : index
    %c0_276 = arith.constant 0 : index
    %1089 = vector.load %arg20[%c0_275, %c0_276] : memref<1x4xf32, #tpu.memory_space<vmem>>, vector<1x4xf32>
    tpu.vector_store %arg20[%c0_275, %c0_276], %1088 {strides = array<i32>} : memref<1x4xf32, #tpu.memory_space<vmem>>, vector<1x4xf32>,
    %c0_277 = arith.constant 0 : index
    %c0_278 = arith.constant 0 : index
    %1090 = vector.load %arg16[%c0_277, %c0_278] : memref<100x5xf32, #tpu.memory_space<vmem>>, vector<100x5xf32>
    %cst_279 = arith.constant dense<0.000000e+00> : vector<8x5xf32>
    %1091 = tpu.matmul %1036, %1090, %cst_279 {dimension_numbers = #tpu.dot_dimension_numbers<[1], [0], [0], [1], [0, 0, 1, 1], [], []>} : vector<8x100xf32>, vector<100x5xf32>, vector<8x5xf32> -> vector<8x5xf32>
    %c0_280 = arith.constant 0 : index
    %c0_281 = arith.constant 0 : index
    %1092 = vector.load %arg17[%c0_280, %c0_281] : memref<1x5xf32, #tpu.memory_space<vmem>>, vector<1x5xf32>
    %1093 = vector.broadcast %1038 : vector<8x1xf32> to vector<8x5xf32>
    %1094 = vector.broadcast %1092 : vector<1x5xf32> to vector<8x5xf32>
    %1095 = arith.mulf %1093, %1094 : vector<8x5xf32>
    %1096 = arith.addf %1091, %1095 : vector<8x5xf32>
    %c0_282 = arith.constant 0 : index
    %c0_283 = arith.constant 0 : index
    %1097 = vector.load %arg18[%c0_282, %c0_283] : memref<1x5xf32, #tpu.memory_space<vmem>>, vector<1x5xf32>
    %1098 = vector.broadcast %1037 : vector<8x1xf32> to vector<8x5xf32>
    %1099 = vector.broadcast %1097 : vector<1x5xf32> to vector<8x5xf32>
    %1100 = arith.mulf %1098, %1099 : vector<8x5xf32>
    %1101 = arith.addf %1096, %1100 : vector<8x5xf32>
    %c0_284 = arith.constant 0 : index
    %c0_285 = arith.constant 0 : index
    %1102 = vector.load %arg19[%c0_284, %c0_285] : memref<1x5xf32, #tpu.memory_space<vmem>>, vector<1x5xf32>
    %1103 = vector.broadcast %1102 : vector<1x5xf32> to vector<8x5xf32>
    %1104 = arith.addf %1101, %1103 : vector<8x5xf32>
    %cst_286 = arith.constant dense<0xFF800000> : vector<8xf32>
    %1105 = vector.multi_reduction <maximumf>, %1104, %cst_286 [1] : vector<8x5xf32> to vector<8xf32>
    %1106 = vector.shape_cast %1105 : vector<8xf32> to vector<8x1xf32>
    %1107 = vector.broadcast %1106 : vector<8x1xf32> to vector<8x5xf32>
    %1108 = arith.subf %1104, %1107 : vector<8x5xf32>
    %1109 = math.exp %1108 : vector<8x5xf32>
    %cst_287 = arith.constant dense<0.000000e+00> : vector<8xf32>
    %1110 = vector.multi_reduction <add>, %1109, %cst_287 [1] : vector<8x5xf32> to vector<8xf32>
    %1111 = vector.shape_cast %1110 : vector<8xf32> to vector<8x1xf32>
    %1112 = vector.broadcast %1111 : vector<8x1xf32> to vector<8x5xf32>
    %1113 = arith.divf %1109, %1112 : vector<8x5xf32>
    %c0_288 = arith.constant 0 : index
    %c0_289 = arith.constant 0 : index
    %1114 = vector.load %arg21[%c0_288, %c0_289] : memref<8x5xf32, #tpu.memory_space<vmem>>, vector<8x5xf32>
    tpu.vector_store %arg21[%c0_288, %c0_289], %1113 {strides = array<i32>} : memref<8x5xf32, #tpu.memory_space<vmem>>, vector<8x5xf32>,
    return
  }
}

</mosaic_0001>

<bundles_post_ra>
// kernel: _prolocal_forward_impl.1
= control target key start
LH: loop header
LB: loop body
LE: loop exit
PB: predicated region body
PF: predicated region fallthrough
CT: control target
= control target key end

     0   :  { %s14553_s0 = inlined_call_operand.vmem [shape: f32[8,128], index: 0, kind: input, shape index: {}]   ;;  %s14554_s1 = inlined_call_operand.vmem [shape: f32[8,1], index: 1, kind: input, shape index: {}]   ;;  %s14555_s2 = inlined_call_operand.vmem [shape: f32[8,1], index: 2, kind: input, shape index: {}]   ;;  %s14556_s3 = inlined_call_operand.hbm [shape: f32[128,1024], index: 3, kind: input, shape index: {}]   ;;  %s14557_s4 = inlined_call_operand.vmem [shape: f32[128,512], index: 4, kind: input, shape index: {}]   ;;  %s14558_s5 = inlined_call_operand.hbm [shape: f32[128,512], index: 5, kind: input, shape index: {}]   ;;  %s14559_s6 = inlined_call_operand.vmem [shape: f32[1,1024], index: 6, kind: input, shape index: {}]   ;;  %s14560_s7 = inlined_call_operand.hbm [shape: f32[128,1024], index: 7, kind: input, shape index: {}]   ;;  %s14561_s8 = inlined_call_operand.hbm [shape: f32[128,1024], index: 8, kind: input, shape index: {}]   ;;  %s14562_s9 = inlined_call_operand.hbm [shape: f32[128,512], index: 9, kind: input, shape index: {}]   ;;  %s14563_s10 = inlined_call_operand.hbm [shape: f32[128,512], index: 10, kind: input, shape index: {}]   ;;  %s14564_s11 = inlined_call_operand.vmem [shape: f32[1,1024], index: 11, kind: input, shape index: {}]   ;;  %s14565_s12 = inlined_call_operand.vmem [shape: f32[100,200], index: 12, kind: input, shape index: {}]   ;;  %s14566_s13 = inlined_call_operand.<no memory space> [shape: f32[1,1], index: 13, kind: input, shape index: {}]   ;;  %s14567_s14 = inlined_call_operand.vmem [shape: f32[100,4], index: 14, kind: input, shape index: {}]   ;;  %s14568_s15 = inlined_call_operand.vmem [shape: f32[1,4], index: 15, kind: input, shape index: {}]   ;;  %s14569_s16 = inlined_call_operand.vmem [shape: f32[100,5], index: 16, kind: input, shape index: {}]   ;;  %s14570_s17 = inlined_call_operand.vmem [shape: f32[1,5], index: 17, kind: input, shape index: {}]   ;;  %s14571_s18 = inlined_call_operand.vmem [shape: f32[1,5], index: 18, kind: input, shape index: {}]   ;;  %s14572_s19 = inlined_call_operand.vmem [shape: f32[1,5], index: 19, kind: input, shape index: {}]   ;;  %s14573_s20 = inlined_call_operand.hbm [shape: f32[1,4], index: 20, kind: output, shape index: {0}]   ;;  %s14574_s21 = inlined_call_operand.hbm [shape: f32[8,5], index: 21, kind: output, shape index: {1}]  }
   0x1   :  { %14734 = sst [smem:[#allocation66_spill]] %s14553_s0  ;;  %v27_v0 = vstv %s14566_s13 }
   0x2   :  { %14735 = sst [smem:[#allocation67_spill]] %s14554_s1  ;;  %28 = vst [vmem:[#allocation7] sm:$0x1] %v27_v0 }
   0x3   :  { %14736 = sst [smem:[#allocation68_spill]] %s14555_s2 }
   0x4   :  { %14737 = sst [smem:[#allocation69_spill]] %s14556_s3 }
   0x5   :  { %14738 = sst [smem:[#allocation70_spill]] %s14557_s4 }
   0x6   :  { %14739 = sst [smem:[#allocation71_spill]] %s14558_s5 }
   0x7   :  { %14740 = sst [smem:[#allocation72_spill]] %s14574_s21 }
   0x8   :  { %29 = vsyncpa [#allocation9], 0 }
   0x9   :  { %30 = vsyncpa [#allocation12], 0 }
   0xa   :  { %31 = vsyncpa [#allocation15], 0 }
   0xb   :  { %32 = vsyncpa [#allocation18], 0 }
   0xc   :  { %33 = vsyncpa [#allocation10], 0 }
   0xd   :  { %34 = vsyncpa [#allocation21], 0  ;;  %s12241_s26 = smov [#allocation11]   ;;  %s14741_s29 = sld [smem:[#allocation71_spill]] }
   0xe   :  { %s60_s27 = sshll.u32 %s12241_s26, 4  ;;  %s61_s27 = int_to_ptr.vmem [resolvable:$true] %s60_s27 }
  0x13   :  { %s12053_s0 = scalar_lea.hbm %s14741_s29, 8192 }
  0x14   :  { %p12054_p0 = scmp.ne.s32.totalorder %s14741_s29, %s12053_s0  ;;  %p12057_p1 = scmp.lt.u32.totalorder %s12053_s0, %s14741_s29 }
  0x16   :  { %p12059_p2 = pnand %p12057_p1, %p12054_p0 }
  0x18   :  { %12062 = shalt.err (!%p12059_p2)
}
  0x19   :  { %s12063_s22 = scalar_lea.vmem %s61_s27, 8192  ;;  %p12068_p4 = scmp.lt.s32.totalorder %s61_s27, %s61_s27 }
  0x1a   :  { %p12064_p3 = scmp.ne.s32.totalorder %s61_s27, %s12063_s22  ;;  %p12069_p5 = scmp.lt.s32.totalorder %s12063_s22, %s12063_s22 }
  0x1c   :  { %p12070_p6 = por %p12069_p5, %p12068_p4 }
  0x1e   :  { %p12071_p7 = pnand %p12070_p6, %p12064_p3 }
  0x20   :  { %12074 = shalt.err (!%p12071_p7)
}
  0x21   :  { %s14579_s23 = smov 512   ;;  %s12243_s1 = smov 32  }
  0x22   :  { %66 = dma.hbm_to_vmem [thread:$0]  %s14741_s29, 8192, %s61_s27, [#allocation12], %s14579_s23, %s14579_s23, %s12243_s1  }
  0x23   :  { %s12244_s25 = smov [#allocation14]   ;;  %s12245_s3 = smov [#allocation8]  }
  0x24   :  { %s86_s26 = sshll.u32 %s12244_s25, 4  ;;  %s46_s28 = sshll.u32 %s12245_s3, 4  ;;  %s87_s26 = int_to_ptr.vmem [resolvable:$true] %s86_s26  ;;  %s47_s28 = int_to_ptr.vmem [resolvable:$true] %s46_s28 }
  0x25   :  { %s12075_s30 = scalar_lea.hbm %s14561_s8, 16384 }
  0x26   :  { %p12076_p8 = scmp.ne.s32.totalorder %s14561_s8, %s12075_s30  ;;  %p12079_p9 = scmp.lt.u32.totalorder %s12075_s30, %s14561_s8 }
  0x28   :  { %p12081_p10 = pnand %p12079_p9, %p12076_p8 }
  0x2a   :  { %12084 = shalt.err (!%p12081_p10)
}
  0x2b   :  { %s12085_s27 = scalar_lea.vmem %s87_s26, 16384  ;;  %p12090_p12 = scmp.lt.s32.totalorder %s87_s26, %s87_s26 }
  0x2c   :  { %p12086_p11 = scmp.ne.s32.totalorder %s87_s26, %s12085_s27  ;;  %p12091_p13 = scmp.lt.s32.totalorder %s12085_s27, %s12085_s27 }
  0x2e   :  { %p12092_p0 = por %p12091_p13, %p12090_p12 }
  0x30   :  { %p12093_p1 = pnand %p12092_p0, %p12086_p11 }
  0x32   :  { %12096 = shalt.err (!%p12093_p1)
}
  0x33   :  { %s12246_s29 = smov 1024   ;;  %s12247_s24 = smov 64  }
  0x34   :  { %92 = dma.hbm_to_vmem [thread:$0]  %s14561_s8, 16384, %s87_s26, [#allocation15], %s12246_s29, %s12246_s29, %s12247_s24  }
  0x35   :  { %s14742_s0 = sld [smem:[#allocation69_spill]] }
  0x3b   :  { %s12097_s4 = scalar_lea.hbm %s14742_s0, 16384 }
  0x3c   :  { %p12098_p2 = scmp.ne.s32.totalorder %s14742_s0, %s12097_s4  ;;  %p12101_p3 = scmp.lt.u32.totalorder %s12097_s4, %s14742_s0 }
  0x3e   :  { %p12103_p4 = pnand %p12101_p3, %p12098_p2 }
  0x40   :  { %12106 = shalt.err (!%p12103_p4)
}
  0x41   :  { %s12107_s27 = scalar_lea.vmem %s47_s28, 16384  ;;  %p12112_p6 = scmp.lt.s32.totalorder %s47_s28, %s47_s28 }
  0x42   :  { %p12108_p5 = scmp.ne.s32.totalorder %s47_s28, %s12107_s27  ;;  %p12113_p7 = scmp.lt.s32.totalorder %s12107_s27, %s12107_s27 }
  0x44   :  { %p12114_p8 = por %p12113_p7, %p12112_p6 }
  0x46   :  { %p12115_p9 = pnand %p12114_p8, %p12108_p5 }
  0x48   :  { %12118 = shalt.err (!%p12115_p9)
}
  0x49   :  { %52 = dma.hbm_to_vmem [thread:$0]  %s14742_s0, 16384, %s47_s28, [#allocation9], %s12246_s29, %s12246_s29, %s12247_s24  }
  0x4a   :  { %s12248_s2 = smov [#allocation13]   ;;  %s12249_s21 = smov [#allocation16]  }
  0x4b   :  { %s74_s25 = sshll.u32 %s12248_s2, 4  ;;  %s98_s3 = sshll.u32 %s12249_s21, 4  ;;  %s75_s25 = int_to_ptr.vmem [resolvable:$true] %s74_s25  ;;  %s99_s3 = int_to_ptr.vmem [resolvable:$true] %s98_s3 }
  0x4c   :  { %s12119_s5 = scalar_lea.hbm %s14560_s7, 16384 }
  0x4d   :  { %p12120_p10 = scmp.ne.s32.totalorder %s14560_s7, %s12119_s5  ;;  %p12123_p11 = scmp.lt.u32.totalorder %s12119_s5, %s14560_s7 }
  0x4f   :  { %p12125_p12 = pnand %p12123_p11, %p12120_p10 }
  0x51   :  { %12128 = shalt.err (!%p12125_p12)
}
  0x52   :  { %s12129_s28 = scalar_lea.vmem %s75_s25, 16384  ;;  %p12134_p0 = scmp.lt.s32.totalorder %s75_s25, %s75_s25 }
  0x53   :  { %p12130_p13 = scmp.ne.s32.totalorder %s75_s25, %s12129_s28  ;;  %p12135_p1 = scmp.lt.s32.totalorder %s12129_s28, %s12129_s28 }
  0x55   :  { %p12136_p2 = por %p12135_p1, %p12134_p0 }
  0x57   :  { %p12137_p3 = pnand %p12136_p2, %p12130_p13 }
  0x59   :  { %12140 = shalt.err (!%p12137_p3)
}
  0x5a   :  { %80 = dma.hbm_to_vmem [thread:$0]  %s14560_s7, 16384, %s75_s25, [#allocation12], %s12246_s29, %s12246_s29, %s12247_s24  }
  0x5b   :  { %s12141_s2 = scalar_lea.hbm %s14562_s9, 8192 }
  0x5c   :  { %p12142_p4 = scmp.ne.s32.totalorder %s14562_s9, %s12141_s2  ;;  %p12145_p5 = scmp.lt.u32.totalorder %s12141_s2, %s14562_s9 }
  0x5e   :  { %p12147_p6 = pnand %p12145_p5, %p12142_p4 }
  0x60   :  { %12150 = shalt.err (!%p12147_p6)
}
  0x61   :  { %s12151_s13 = scalar_lea.vmem %s99_s3, 8192  ;;  %p12156_p8 = scmp.lt.s32.totalorder %s99_s3, %s99_s3 }
  0x62   :  { %p12152_p7 = scmp.ne.s32.totalorder %s99_s3, %s12151_s13  ;;  %p12157_p9 = scmp.lt.s32.totalorder %s12151_s13, %s12151_s13 }
  0x64   :  { %p12158_p10 = por %p12157_p9, %p12156_p8 }
  0x66   :  { %p12159_p11 = pnand %p12158_p10, %p12152_p7 }
  0x68   :  { %12162 = shalt.err (!%p12159_p11)
}
  0x69   :  { %s14743_s7 = smov 512   ;;  %s12250_s25 = smov [#allocation17]  }
  0x6a   :  { %104 = dma.hbm_to_vmem [thread:$0]  %s14562_s9, 8192, %s99_s3, [#allocation15], %s14743_s7, %s14743_s7, %s12243_s1  }
  0x6b   :  { %s110_s22 = sshll.u32 %s12250_s25, 4  ;;  %s12163_s0 = scalar_lea.hbm %s14563_s10, 8192  ;;  %s111_s22 = int_to_ptr.vmem [resolvable:$true] %s110_s22 }
  0x6c   :  { %p12164_p12 = scmp.ne.s32.totalorder %s14563_s10, %s12163_s0  ;;  %p12167_p13 = scmp.lt.u32.totalorder %s12163_s0, %s14563_s10 }
  0x6e   :  { %p12169_p0 = pnand %p12167_p13, %p12164_p12 }
  0x70   :  { %12172 = shalt.err (!%p12169_p0)
}
  0x71   :  { %s12173_s21 = scalar_lea.vmem %s111_s22, 8192  ;;  %p12178_p2 = scmp.lt.s32.totalorder %s111_s22, %s111_s22 }
  0x72   :  { %p12174_p1 = scmp.ne.s32.totalorder %s111_s22, %s12173_s21  ;;  %p12179_p3 = scmp.lt.s32.totalorder %s12173_s21, %s12173_s21 }
  0x74   :  { %p12180_p4 = por %p12179_p3, %p12178_p2 }
  0x76   :  { %p12181_p5 = pnand %p12180_p4, %p12174_p1 }
  0x78   :  { %12184 = shalt.err (!%p12181_p5)
}
  0x79   :  { %116 = dma.hbm_to_vmem [thread:$0]  %s14563_s10, 8192, %s111_s22, [#allocation18], %s14743_s7, %s14743_s7, %s12243_s1  }
  0x7a   :  { %12229 = dma.done.wait [#allocation9], 16384  }
  0x7b   :  { %12230 = vsyncadd [#allocation9], 4294950912 }
  0x7c   :  { %12231 = dma.done.wait [#allocation12], 24576  }
  0x7d   :  { %12232 = vsyncadd [#allocation12], 4294942720 }
  0x7e   :  { %12233 = dma.done.wait [#allocation15], 24576  }
  0x7f   :  { %12234 = vsyncadd [#allocation15], 4294942720 }
  0x80   :  { %12235 = dma.done.wait [#allocation18], 8192  }
  0x81   :  { %12236 = vsyncadd [#allocation18], 4294959104  ;;  %v14581_v1 = vmov 0.0   ;;  %v155_v2 = vld [vmem:[#allocation8 + $0x8] sm:$0xff]  ;;  %v157_v4 = vld [vmem:[#allocation8 + $0x18] sm:$0xff]  ;;  %s14744_s4 = sld [smem:[#allocation66_spill]] }
  0x82   :  { %388 = vmatprep.mubr.f32.mxu0 %v14581_v1  ;;  %459 = vmatprep.mubr.f32.mxu1 %v14581_v1  ;;  %v163_v3 = vld [vmem:[#allocation8 + $0x48] sm:$0xff]  ;;  %v165_v6 = vld [vmem:[#allocation8 + $0x58] sm:$0xff]  ;;  %v154_v7 = vld [vmem:[#allocation8] sm:$0xff]  ;;  %s14745_s13 = sld [smem:[#allocation70_spill]]  ;;  %s15113_s26 = sld [smem:[#allocation68_spill]]  ;;  %vm8408_vm0 = vcmask 1043456  }
  0x83   :  { %v9004_v5 = vpack.c.bf16 %v163_v3, %v155_v2  ;;  %v162_v8 = vld [vmem:[#allocation8 + $0x40] sm:$0xff]  ;;  %v9036_v9 = vpack.c.bf16 %v165_v6, %v157_v4  ;;  %v156_v11 = vld [vmem:[#allocation8 + $0x10] sm:$0xff]  ;;  %v171_v13 = vld [vmem:[#allocation8 + $0x88] sm:$0xff]  ;;  %s12255_s30 = smov 50   ;;  %vm12256_vm1 = vmmov 0   ;;  %vm8337_vm2 = vcmask 408576  }
  0x84   :  { %v9006_v10 = vpack.c.bf16 %v162_v8, %v154_v7  ;;  %v164_v12 = vld [vmem:[#allocation8 + $0x50] sm:$0xff]  ;;  %v179_v15 = vld [vmem:[#allocation8 + $0xc8] sm:$0xff]  ;;  %v173_v16 = vld [vmem:[#allocation8 + $0x98] sm:$0xff]  ;;  %vm8353_vm3 = vcmask 818176   ;;  %s12257_s29 = smov 100   ;;  %vm8496_vm4 = vcmask 588800  }
  0x85   :  { %9005 = vmatprep.subr.bf16.mxu0 %v9004_v5  ;;  %v9038_v14 = vpack.c.bf16 %v164_v12, %v156_v11  ;;  %v181_v17 = vld [vmem:[#allocation8 + $0xd8] sm:$0xff]  ;;  %9037 = vmatprep.subr.bf16.mxu1 %v9036_v9  ;;  %v9008_v18 = vpack.c.bf16 %v179_v15, %v171_v13  ;;  %v170_v20 = vld [vmem:[#allocation8 + $0x80] sm:$0xff]  ;;  %v172_v22 = vld [vmem:[#allocation8 + $0x90] sm:$0xff]  ;;  %vm8509_vm5 = vcmask 7168   ;;  %vm8766_vm6 = vcmask 39936   ;;  %s12259_s28 = smov [#allocation20]  }
  0x86   :  { %9007 = vmatpush1.bf16.msra.mxu0 %v9006_v10  ;;  %v9040_v19 = vpack.c.bf16 %v181_v17, %v173_v16  ;;  %v178_v21 = vld [vmem:[#allocation8 + $0xc0] sm:$0xff]  ;;  %v180_v24 = vld [vmem:[#allocation8 + $0xd0] sm:$0xff]  ;;  %v187_v25 = vld [vmem:[#allocation8 + $0x108] sm:$0xff]  ;;  %vm8632_vm7 = vcmask 24576  }
  0x87   :  { %9039 = vmatpush1.bf16.msra.mxu1 %v9038_v14  ;;  %v9010_v23 = vpack.c.bf16 %v178_v21, %v170_v20  ;;  %v195_v26 = vld [vmem:[#allocation8 + $0x148] sm:$0xff]  ;;  %9009 = vmatprep.subr.bf16.mxu0 %v9008_v18  ;;  %v9042_v27 = vpack.c.bf16 %v180_v24, %v172_v22  ;;  %v189_v29 = vld [vmem:[#allocation8 + $0x118] sm:$0xff]  ;;  %v186_v31 = vld [vmem:[#allocation8 + $0x100] sm:$0xff] }
  0x88   :  { %9041 = vmatprep.subr.bf16.mxu1 %v9040_v19  ;;  %v9012_v28 = vpack.c.bf16 %v195_v26, %v187_v25  ;;  %v197_v30 = vld [vmem:[#allocation8 + $0x158] sm:$0xff]  ;;  %v194_v33 = vld [vmem:[#allocation8 + $0x140] sm:$0xff]  ;;  %v188_v34 = vld [vmem:[#allocation8 + $0x110] sm:$0xff] }
  0x89   :  { %v9044_v32 = vpack.c.bf16 %v197_v30, %v189_v29  ;;  %v196_v35 = vld [vmem:[#allocation8 + $0x150] sm:$0xff]  ;;  %v9014_v36 = vpack.c.bf16 %v194_v33, %v186_v31  ;;  %v203_v37 = vld [vmem:[#allocation8 + $0x188] sm:$0xff]  ;;  %v205_v39 = vld [vmem:[#allocation8 + $0x198] sm:$0xff] }
  0x8a   :  { %9011 = vmatpush1.bf16.msra.mxu0 %v9010_v23  ;;  %v211_v38 = vld [vmem:[#allocation8 + $0x1c8] sm:$0xff]  ;;  %v9046_v40 = vpack.c.bf16 %v196_v35, %v188_v34  ;;  %v213_v42 = vld [vmem:[#allocation8 + $0x1d8] sm:$0xff]  ;;  %v202_v43 = vld [vmem:[#allocation8 + $0x180] sm:$0xff] }
  0x8b   :  { %9043 = vmatpush1.bf16.msra.mxu1 %v9042_v27  ;;  %9013 = vmatprep.subr.bf16.mxu0 %v9012_v28  ;;  %v9016_v41 = vpack.c.bf16 %v211_v38, %v203_v37  ;;  %v210_v44 = vld [vmem:[#allocation8 + $0x1c0] sm:$0xff]  ;;  %v9048_v45 = vpack.c.bf16 %v213_v42, %v205_v39  ;;  %v204_v46 = vld [vmem:[#allocation8 + $0x190] sm:$0xff]  ;;  %v219_v48 = vld [vmem:[#allocation8 + $0x208] sm:$0xff] }
  0x8c   :  { %9045 = vmatprep.subr.bf16.mxu1 %v9044_v32  ;;  %v212_v47 = vld [vmem:[#allocation8 + $0x1d0] sm:$0xff]  ;;  %v227_v49 = vld [vmem:[#allocation8 + $0x248] sm:$0xff]  ;;  %v221_v50 = vld [vmem:[#allocation8 + $0x218] sm:$0xff]  ;;  %v9018_v52 = vpack.c.bf16 %v210_v44, %v202_v43 }
  0x8d   :  { %v229_v51 = vld [vmem:[#allocation8 + $0x258] sm:$0xff]  ;;  %v9050_v53 = vpack.c.bf16 %v212_v47, %v204_v46  ;;  %v9020_v54 = vpack.c.bf16 %v227_v49, %v219_v48  ;;  %v218_v55 = vld [vmem:[#allocation8 + $0x200] sm:$0xff]  ;;  %v220_v57 = vld [vmem:[#allocation8 + $0x210] sm:$0xff] }
  0x8e   :  { %9015 = vmatpush1.bf16.msra.mxu0 %v9014_v36  ;;  %v226_v56 = vld [vmem:[#allocation8 + $0x240] sm:$0xff]  ;;  %v9052_v58 = vpack.c.bf16 %v229_v51, %v221_v50  ;;  %v228_v59 = vld [vmem:[#allocation8 + $0x250] sm:$0xff]  ;;  %v235_v60 = vld [vmem:[#allocation8 + $0x288] sm:$0xff] }
  0x8f   :  { %9047 = vmatpush1.bf16.msra.mxu1 %v9046_v40  ;;  %9017 = vmatprep.subr.bf16.mxu0 %v9016_v41  ;;  %v243_v61 = vld [vmem:[#allocation8 + $0x2c8] sm:$0xff]  ;;  %v237_v62 = vld [vmem:[#allocation8 + $0x298] sm:$0xff]  ;;  %v9022_v0 = vpack.c.bf16 %v226_v56, %v218_v55  ;;  %v9054_v2 = vpack.c.bf16 %v228_v59, %v220_v57  ;;  %v234_v4 = vld [vmem:[#allocation8 + $0x280] sm:$0xff] }
  0x90   :  { %9049 = vmatprep.subr.bf16.mxu1 %v9048_v45  ;;  %v245_v63 = vld [vmem:[#allocation8 + $0x2d8] sm:$0xff]  ;;  %v9024_v3 = vpack.c.bf16 %v243_v61, %v235_v60  ;;  %v242_v5 = vld [vmem:[#allocation8 + $0x2c0] sm:$0xff]  ;;  %v236_v6 = vld [vmem:[#allocation8 + $0x290] sm:$0xff] }
  0x91   :  { %v9056_v7 = vpack.c.bf16 %v245_v63, %v237_v62  ;;  %v244_v8 = vld [vmem:[#allocation8 + $0x2d0] sm:$0xff]  ;;  %v251_v9 = vld [vmem:[#allocation8 + $0x308] sm:$0xff]  ;;  %v253_v11 = vld [vmem:[#allocation8 + $0x318] sm:$0xff]  ;;  %v9026_v13 = vpack.c.bf16 %v242_v5, %v234_v4 }
  0x92   :  { %9019 = vmatpush1.bf16.msra.mxu0 %v9018_v52  ;;  %v259_v10 = vld [vmem:[#allocation8 + $0x348] sm:$0xff]  ;;  %v261_v12 = vld [vmem:[#allocation8 + $0x358] sm:$0xff]  ;;  %v9058_v14 = vpack.c.bf16 %v244_v8, %v236_v6  ;;  %v250_v16 = vld [vmem:[#allocation8 + $0x300] sm:$0xff] }
  0x93   :  { %9051 = vmatpush1.bf16.msra.mxu1 %v9050_v53  ;;  %9021 = vmatprep.subr.bf16.mxu0 %v9020_v54  ;;  %v9028_v15 = vpack.c.bf16 %v259_v10, %v251_v9  ;;  %v258_v17 = vld [vmem:[#allocation8 + $0x340] sm:$0xff]  ;;  %v252_v18 = vld [vmem:[#allocation8 + $0x310] sm:$0xff]  ;;  %v9060_v19 = vpack.c.bf16 %v261_v12, %v253_v11  ;;  %v267_v21 = vld [vmem:[#allocation8 + $0x388] sm:$0xff] }
  0x94   :  { %9053 = vmatprep.subr.bf16.mxu1 %v9052_v58  ;;  %v260_v20 = vld [vmem:[#allocation8 + $0x350] sm:$0xff]  ;;  %v275_v22 = vld [vmem:[#allocation8 + $0x3c8] sm:$0xff]  ;;  %v269_v23 = vld [vmem:[#allocation8 + $0x398] sm:$0xff]  ;;  %v9030_v25 = vpack.c.bf16 %v258_v17, %v250_v16 }
  0x95   :  { %v277_v24 = vld [vmem:[#allocation8 + $0x3d8] sm:$0xff]  ;;  %v9062_v26 = vpack.c.bf16 %v260_v20, %v252_v18  ;;  %v9032_v27 = vpack.c.bf16 %v275_v22, %v267_v21  ;;  %v266_v28 = vld [vmem:[#allocation8 + $0x380] sm:$0xff]  ;;  %v268_v30 = vld [vmem:[#allocation8 + $0x390] sm:$0xff] }
  0x96   :  { %9023 = vmatpush1.bf16.msra.mxu0 %v9022_v0  ;;  %v274_v29 = vld [vmem:[#allocation8 + $0x3c0] sm:$0xff]  ;;  %v9064_v31 = vpack.c.bf16 %v277_v24, %v269_v23  ;;  %v276_v32 = vld [vmem:[#allocation8 + $0x3d0] sm:$0xff]  ;;  %v159_v33 = vld [vmem:[#allocation8 + $0x28] sm:$0xff] }
  0x97   :  { %9055 = vmatpush1.bf16.msra.mxu1 %v9054_v2  ;;  %9025 = vmatprep.subr.bf16.mxu0 %v9024_v3  ;;  %v167_v34 = vld [vmem:[#allocation8 + $0x68] sm:$0xff]  ;;  %v161_v35 = vld [vmem:[#allocation8 + $0x38] sm:$0xff]  ;;  %v9034_v37 = vpack.c.bf16 %v274_v29, %v266_v28  ;;  %v9066_v38 = vpack.c.bf16 %v276_v32, %v268_v30  ;;  %v158_v40 = vld [vmem:[#allocation8 + $0x20] sm:$0xff] }
  0x98   :  { %9057 = vmatprep.subr.bf16.mxu1 %v9056_v7  ;;  %v169_v36 = vld [vmem:[#allocation8 + $0x78] sm:$0xff]  ;;  %v9068_v39 = vpack.c.bf16 %v167_v34, %v159_v33  ;;  %v166_v41 = vld [vmem:[#allocation8 + $0x60] sm:$0xff]  ;;  %v160_v42 = vld [vmem:[#allocation8 + $0x30] sm:$0xff] }
  0x99   :  { %v9100_v43 = vpack.c.bf16 %v169_v36, %v161_v35  ;;  %v168_v44 = vld [vmem:[#allocation8 + $0x70] sm:$0xff]  ;;  %v175_v45 = vld [vmem:[#allocation8 + $0xa8] sm:$0xff]  ;;  %v177_v47 = vld [vmem:[#allocation8 + $0xb8] sm:$0xff]  ;;  %v9070_v50 = vpack.c.bf16 %v166_v41, %v158_v40 }
  0x9a   :  { %9027 = vmatpush1.bf16.msra.mxu0 %v9026_v13  ;;  %v183_v46 = vld [vmem:[#allocation8 + $0xe8] sm:$0xff]  ;;  %v185_v48 = vld [vmem:[#allocation8 + $0xf8] sm:$0xff]  ;;  %v9102_v51 = vpack.c.bf16 %v168_v44, %v160_v42  ;;  %v174_v53 = vld [vmem:[#allocation8 + $0xa0] sm:$0xff] }
  0x9b   :  { %9059 = vmatpush1.bf16.msra.mxu1 %v9058_v14  ;;  %9029 = vmatprep.subr.bf16.mxu0 %v9028_v15  ;;  %v12468_v49 = vld [vmem:[%s14744_s4] sm:$0xff]  ;;  %v9072_v52 = vpack.c.bf16 %v183_v46, %v175_v45  ;;  %v176_v55 = vld [vmem:[#allocation8 + $0xb0] sm:$0xff]  ;;  %v9104_v56 = vpack.c.bf16 %v185_v48, %v177_v47  ;;  %v191_v58 = vld [vmem:[#allocation8 + $0x128] sm:$0xff]  ;;  %s15114_s4 = sld [smem:[#allocation67_spill]] }
  0x9c   :  { %9061 = vmatprep.subr.bf16.mxu1 %v9060_v19  ;;  %v182_v54 = vld [vmem:[#allocation8 + $0xe0] sm:$0xff]  ;;  %v184_v57 = vld [vmem:[#allocation8 + $0xf0] sm:$0xff]  ;;  %v199_v59 = vld [vmem:[#allocation8 + $0x168] sm:$0xff] }
  0x9d   :  { %v193_v60 = vld [vmem:[#allocation8 + $0x138] sm:$0xff]  ;;  %v9074_v62 = vpack.c.bf16 %v182_v54, %v174_v53  ;;  %v9106_v63 = vpack.c.bf16 %v184_v57, %v176_v55  ;;  %v9076_v0 = vpack.c.bf16 %v199_v59, %v191_v58  ;;  %v190_v2 = vld [vmem:[#allocation8 + $0x120] sm:$0xff]  ;;  %v192_v4 = vld [vmem:[#allocation8 + $0x130] sm:$0xff] }
  0x9e   :  { %9031 = vmatpush1.bf16.msra.mxu0 %v9030_v25  ;;  %v201_v61 = vld [vmem:[#allocation8 + $0x178] sm:$0xff]  ;;  %v198_v3 = vld [vmem:[#allocation8 + $0x160] sm:$0xff]  ;;  %v200_v6 = vld [vmem:[#allocation8 + $0x170] sm:$0xff] }
  0x9f   :  { %9063 = vmatpush1.bf16.msra.mxu1 %v9062_v26  ;;  %9033 = vmatprep.subr.bf16.mxu0 %v9032_v27  ;;  %v9108_v5 = vpack.c.bf16 %v201_v61, %v193_v60  ;;  %v207_v7 = vld [vmem:[#allocation8 + $0x1a8] sm:$0xff]  ;;  %v209_v9 = vld [vmem:[#allocation8 + $0x1b8] sm:$0xff]  ;;  %v9078_v11 = vpack.c.bf16 %v198_v3, %v190_v2  ;;  %v9110_v12 = vpack.c.bf16 %v200_v6, %v192_v4  ;;  %v206_v14 = vld [vmem:[#allocation8 + $0x1a0] sm:$0xff] }
  0xa0   :  { %9065 = vmatprep.subr.bf16.mxu1 %v9064_v31  ;;  %v215_v8 = vld [vmem:[#allocation8 + $0x1e8] sm:$0xff]  ;;  %v217_v10 = vld [vmem:[#allocation8 + $0x1f8] sm:$0xff]  ;;  %v214_v15 = vld [vmem:[#allocation8 + $0x1e0] sm:$0xff] }
  0xa1   :  { %v9080_v13 = vpack.c.bf16 %v215_v8, %v207_v7  ;;  %v208_v16 = vld [vmem:[#allocation8 + $0x1b0] sm:$0xff]  ;;  %v9112_v17 = vpack.c.bf16 %v217_v10, %v209_v9  ;;  %v223_v19 = vld [vmem:[#allocation8 + $0x228] sm:$0xff]  ;;  %v225_v21 = vld [vmem:[#allocation8 + $0x238] sm:$0xff]  ;;  %v9082_v23 = vpack.c.bf16 %v214_v15, %v206_v14 }
  0xa2   :  { %9035 = vmatpush1.bf16.msra.mxu0 %v9034_v37  ;;  %v216_v18 = vld [vmem:[#allocation8 + $0x1f0] sm:$0xff]  ;;  %v231_v20 = vld [vmem:[#allocation8 + $0x268] sm:$0xff]  ;;  %v233_v22 = vld [vmem:[#allocation8 + $0x278] sm:$0xff] }
  0xa3   :  { %9067 = vmatpush1.bf16.msra.mxu1 %v9066_v38  ;;  %9069 = vmatprep.subr.bf16.mxu0 %v9068_v39  ;;  %v9114_v24 = vpack.c.bf16 %v216_v18, %v208_v16  ;;  %v9084_v25 = vpack.c.bf16 %v231_v20, %v223_v19  ;;  %v222_v26 = vld [vmem:[#allocation8 + $0x220] sm:$0xff]  ;;  %v224_v28 = vld [vmem:[#allocation8 + $0x230] sm:$0xff]  ;;  %v9116_v29 = vpack.c.bf16 %v233_v22, %v225_v21  ;;  %v239_v31 = vld [vmem:[#allocation8 + $0x2a8] sm:$0xff] }
  0xa4   :  { %9101 = vmatprep.subr.bf16.mxu1 %v9100_v43  ;;  %v230_v27 = vld [vmem:[#allocation8 + $0x260] sm:$0xff]  ;;  %v232_v30 = vld [vmem:[#allocation8 + $0x270] sm:$0xff]  ;;  %v247_v32 = vld [vmem:[#allocation8 + $0x2e8] sm:$0xff] }
  0xa5   :  { %389 = vmatmul.mubr.f32.vlgmr.msra.gmra.mrb[0].mxu0 %v12468_v49  ;;  %v241_v33 = vld [vmem:[#allocation8 + $0x2b8] sm:$0xff]  ;;  %v9086_v35 = vpack.c.bf16 %v230_v27, %v222_v26  ;;  %v9118_v36 = vpack.c.bf16 %v232_v30, %v224_v28  ;;  %v9088_v37 = vpack.c.bf16 %v247_v32, %v239_v31  ;;  %v238_v38 = vld [vmem:[#allocation8 + $0x2a0] sm:$0xff]  ;;  %v240_v40 = vld [vmem:[#allocation8 + $0x2b0] sm:$0xff] }
  0xa6   :  { %460 = vmatmul.mubr.f32.vlgmr.msra.gmra.mrb[0].mxu1 %v12468_v49  ;;  %9071 = vmatpush1.bf16.msra.mxu0 %v9070_v50  ;;  %v249_v34 = vld [vmem:[#allocation8 + $0x2f8] sm:$0xff]  ;;  %v246_v39 = vld [vmem:[#allocation8 + $0x2e0] sm:$0xff]  ;;  %v248_v42 = vld [vmem:[#allocation8 + $0x2f0] sm:$0xff] }
  0xa7   :  { %9103 = vmatpush1.bf16.msra.mxu1 %v9102_v51  ;;  %9073 = vmatprep.subr.bf16.mxu0 %v9072_v52  ;;  %v9120_v41 = vpack.c.bf16 %v249_v34, %v241_v33  ;;  %v255_v43 = vld [vmem:[#allocation8 + $0x328] sm:$0xff]  ;;  %v257_v45 = vld [vmem:[#allocation8 + $0x338] sm:$0xff]  ;;  %v9090_v47 = vpack.c.bf16 %v246_v39, %v238_v38  ;;  %v9122_v48 = vpack.c.bf16 %v248_v42, %v240_v40  ;;  %v254_v51 = vld [vmem:[#allocation8 + $0x320] sm:$0xff] }
  0xa8   :  { %9105 = vmatprep.subr.bf16.mxu1 %v9104_v56  ;;  %530 = vmatprep.mubr.f32.mxu0 %v14581_v1  ;;  %v263_v44 = vld [vmem:[#allocation8 + $0x368] sm:$0xff]  ;;  %v265_v46 = vld [vmem:[#allocation8 + $0x378] sm:$0xff]  ;;  %v262_v52 = vld [vmem:[#allocation8 + $0x360] sm:$0xff] }
  0xa9   :  { %601 = vmatprep.mubr.f32.mxu1 %v14581_v1  ;;  %v9092_v50 = vpack.c.bf16 %v263_v44, %v255_v43  ;;  %v256_v53 = vld [vmem:[#allocation8 + $0x330] sm:$0xff]  ;;  %v9124_v54 = vpack.c.bf16 %v265_v46, %v257_v45  ;;  %v271_v56 = vld [vmem:[#allocation8 + $0x3a8] sm:$0xff]  ;;  %v273_v58 = vld [vmem:[#allocation8 + $0x3b8] sm:$0xff]  ;;  %v9094_v60 = vpack.c.bf16 %v262_v52, %v254_v51 }
  0xaa   :  { %9075 = vmatpush1.bf16.msra.mxu0 %v9074_v62  ;;  %v264_v55 = vld [vmem:[#allocation8 + $0x370] sm:$0xff]  ;;  %v279_v57 = vld [vmem:[#allocation8 + $0x3e8] sm:$0xff]  ;;  %v281_v59 = vld [vmem:[#allocation8 + $0x3f8] sm:$0xff] }
  0xab   :  { %9107 = vmatpush1.bf16.msra.mxu1 %v9106_v63  ;;  %9077 = vmatprep.subr.bf16.mxu0 %v9076_v0  ;;  %v9126_v61 = vpack.c.bf16 %v264_v55, %v256_v53  ;;  %v9096_v62 = vpack.c.bf16 %v279_v57, %v271_v56  ;;  %v270_v63 = vld [vmem:[#allocation8 + $0x3a0] sm:$0xff]  ;;  %v272_v2 = vld [vmem:[#allocation8 + $0x3b0] sm:$0xff]  ;;  %v9128_v3 = vpack.c.bf16 %v281_v59, %v273_v58 }
  0xac   :  { %9109 = vmatprep.subr.bf16.mxu1 %v9108_v5  ;;  %v278_v0 = vld [vmem:[#allocation8 + $0x3e0] sm:$0xff]  ;;  %v280_v4 = vld [vmem:[#allocation8 + $0x3f0] sm:$0xff] }
  0xad   :  { %v617_v5 = vld [vmem:[%s14745_s13 + $0x8] sm:$0xff]  ;;  %v619_v7 = vld [vmem:[%s14745_s13 + $0x18] sm:$0xff]  ;;  %v9098_v9 = vpack.c.bf16 %v278_v0, %v270_v63  ;;  %v9130_v10 = vpack.c.bf16 %v280_v4, %v272_v2  ;;  %v618_v14 = vld [vmem:[%s14745_s13 + $0x10] sm:$0xff] }
  0xae   :  { %9079 = vmatpush1.bf16.msra.mxu0 %v9078_v11  ;;  %v621_v6 = vld [vmem:[%s14745_s13 + $0x28] sm:$0xff]  ;;  %v623_v8 = vld [vmem:[%s14745_s13 + $0x38] sm:$0xff]  ;;  %v622_v16 = vld [vmem:[%s14745_s13 + $0x30] sm:$0xff] }
  0xaf   :  { %9111 = vmatpush1.bf16.msra.mxu1 %v9110_v12  ;;  %9081 = vmatprep.subr.bf16.mxu0 %v9080_v13  ;;  %v12486_v11 = vpack.c.bf16 %v621_v6, %v617_v5  ;;  %v616_v12 = vld [vmem:[%s14745_s13] sm:$0xff]  ;;  %v12497_v15 = vpack.c.bf16 %v623_v8, %v619_v7  ;;  %v629_v18 = vld [vmem:[%s14745_s13 + $0x68] sm:$0xff]  ;;  %v627_v19 = vld [vmem:[%s14745_s13 + $0x58] sm:$0xff]  ;;  %v12517_v22 = vpack.c.bf16 %v622_v16, %v618_v14 }
  0xb0   :  { %9113 = vmatprep.subr.bf16.mxu1 %v9112_v17  ;;  %v620_v13 = vld [vmem:[%s14745_s13 + $0x20] sm:$0xff]  ;;  %v625_v17 = vld [vmem:[%s14745_s13 + $0x48] sm:$0xff]  ;;  %v631_v20 = vld [vmem:[%s14745_s13 + $0x78] sm:$0xff] }
  0xb1   :  { %v12514_v21 = vpack.c.bf16 %v620_v13, %v616_v12  ;;  %v626_v26 = vld [vmem:[%s14745_s13 + $0x50] sm:$0xff]  ;;  %v12531_v27 = vpack.c.bf16 %v631_v20, %v627_v19  ;;  %v637_v30 = vld [vmem:[%s14745_s13 + $0xa8] sm:$0xff]  ;;  %v635_v31 = vld [vmem:[%s14745_s13 + $0x98] sm:$0xff] }
  0xb2   :  { %9083 = vmatpush1.bf16.msra.mxu0 %v9082_v23  ;;  %v12519_v23 = vpack.c.bf16 %v629_v18, %v625_v17  ;;  %v630_v28 = vld [vmem:[%s14745_s13 + $0x70] sm:$0xff]  ;;  %v639_v32 = vld [vmem:[%s14745_s13 + $0xb8] sm:$0xff]  ;;  %v641_v40 = vld [vmem:[%s14745_s13 + $0xc8] sm:$0xff] }
  0xb3   :  { %9115 = vmatpush1.bf16.msra.mxu1 %v9114_v24  ;;  %9085 = vmatprep.subr.bf16.mxu0 %v9084_v25  ;;  %v624_v24 = vld [vmem:[%s14745_s13 + $0x40] sm:$0xff]  ;;  %v12555_v34 = vpack.c.bf16 %v630_v28, %v626_v26  ;;  %v12569_v38 = vpack.c.bf16 %v639_v32, %v635_v31  ;;  %v638_v39 = vld [vmem:[%s14745_s13 + $0xb0] sm:$0xff]  ;;  %v643_v42 = vld [vmem:[%s14745_s13 + $0xd8] sm:$0xff] }
  0xb4   :  { %9117 = vmatprep.subr.bf16.mxu1 %v9116_v29  ;;  %v628_v25 = vld [vmem:[%s14745_s13 + $0x60] sm:$0xff]  ;;  %v633_v29 = vld [vmem:[%s14745_s13 + $0x88] sm:$0xff]  ;;  %v647_v43 = vld [vmem:[%s14745_s13 + $0xf8] sm:$0xff] }
  0xb5   :  { %v12551_v33 = vpack.c.bf16 %v628_v25, %v624_v24  ;;  %v12607_v51 = vpack.c.bf16 %v647_v43, %v643_v42  ;;  %v646_v52 = vld [vmem:[%s14745_s13 + $0xf0] sm:$0xff]  ;;  %v649_v53 = vld [vmem:[%s14745_s13 + $0x108] sm:$0xff]  ;;  %v651_v55 = vld [vmem:[%s14745_s13 + $0x118] sm:$0xff] }
  0xb6   :  { %9087 = vmatpush1.bf16.msra.mxu0 %v9086_v35  ;;  %v12557_v35 = vpack.c.bf16 %v637_v30, %v633_v29  ;;  %v655_v56 = vld [vmem:[%s14745_s13 + $0x138] sm:$0xff]  ;;  %v654_v0 = vld [vmem:[%s14745_s13 + $0x130] sm:$0xff]  ;;  %v657_v2 = vld [vmem:[%s14745_s13 + $0x148] sm:$0xff] }
  0xb7   :  { %9119 = vmatpush1.bf16.msra.mxu1 %v9118_v36  ;;  %9089 = vmatprep.subr.bf16.mxu0 %v9088_v37  ;;  %v632_v36 = vld [vmem:[%s14745_s13 + $0x80] sm:$0xff]  ;;  %v634_v37 = vld [vmem:[%s14745_s13 + $0x90] sm:$0xff]  ;;  %14749 = vst [vmem:[#allocation31_spill] sm:$0xff] %v12607_v51  ;;  %v12643_v63 = vpack.c.bf16 %v655_v56, %v651_v55  ;;  %v659_v4 = vld [vmem:[%s14745_s13 + $0x158] sm:$0xff] }
  0xb8   :  { %9121 = vmatprep.subr.bf16.mxu1 %v9120_v41  ;;  %v645_v41 = vld [vmem:[%s14745_s13 + $0xe8] sm:$0xff]  ;;  %v12593_v45 = vpack.c.bf16 %v638_v39, %v634_v37  ;;  %v663_v5 = vld [vmem:[%s14745_s13 + $0x178] sm:$0xff]  ;;  %v658_v12 = vld [vmem:[%s14745_s13 + $0x150] sm:$0xff] }
  0xb9   :  { %v12595_v46 = vpack.c.bf16 %v645_v41, %v641_v40  ;;  %14753 = vst [vmem:[#allocation35_spill] sm:$0xff] %v12643_v63  ;;  %v12679_v13 = vpack.c.bf16 %v663_v5, %v659_v4  ;;  %v662_v14 = vld [vmem:[%s14745_s13 + $0x170] sm:$0xff]  ;;  %v665_v16 = vld [vmem:[%s14745_s13 + $0x188] sm:$0xff]  ;;  %v667_v18 = vld [vmem:[%s14745_s13 + $0x198] sm:$0xff] }
  0xba   :  { %9091 = vmatpush1.bf16.msra.mxu0 %v9090_v47  ;;  %14747 = vst [vmem:[#allocation29_spill] sm:$0xff] %v12593_v45  ;;  %v640_v47 = vld [vmem:[%s14745_s13 + $0xc0] sm:$0xff]  ;;  %v669_v17 = vld [vmem:[%s14745_s13 + $0x1a8] sm:$0xff]  ;;  %v671_v19 = vld [vmem:[%s14745_s13 + $0x1b8] sm:$0xff]  ;;  %v12701_v24 = vpack.c.bf16 %v662_v14, %v658_v12 }
  0xbb   :  { %9123 = vmatpush1.bf16.msra.mxu1 %v9122_v48  ;;  %9093 = vmatprep.subr.bf16.mxu0 %v9092_v50  ;;  %14748 = vst [vmem:[#allocation30_spill] sm:$0xff] %v12595_v46  ;;  %v644_v48 = vld [vmem:[%s14745_s13 + $0xe0] sm:$0xff]  ;;  %v642_v50 = vld [vmem:[%s14745_s13 + $0xd0] sm:$0xff]  ;;  %14757 = vst [vmem:[#allocation39_spill] sm:$0xff] %v12679_v13  ;;  %v12703_v25 = vpack.c.bf16 %v669_v17, %v665_v16  ;;  %v12715_v30 = vpack.c.bf16 %v671_v19, %v667_v18 }
  0xbc   :  { %9125 = vmatprep.subr.bf16.mxu1 %v9124_v54  ;;  %v653_v54 = vld [vmem:[%s14745_s13 + $0x128] sm:$0xff]  ;;  %v12625_v57 = vpack.c.bf16 %v644_v48, %v640_v47  ;;  %v12629_v58 = vpack.c.bf16 %v646_v52, %v642_v50  ;;  %14759 = vst [vmem:[#allocation41_spill] sm:$0xff] %v12701_v24  ;;  %v664_v26 = vld [vmem:[%s14745_s13 + $0x180] sm:$0xff]  ;;  %v666_v29 = vld [vmem:[%s14745_s13 + $0x190] sm:$0xff] }
  0xbd   :  { %v12631_v59 = vpack.c.bf16 %v653_v54, %v649_v53  ;;  %14760 = vst [vmem:[#allocation42_spill] sm:$0xff] %v12703_v25  ;;  %v668_v28 = vld [vmem:[%s14745_s13 + $0x1a0] sm:$0xff]  ;;  %14761 = vst [vmem:[#allocation43_spill] sm:$0xff] %v12715_v30  ;;  %v670_v31 = vld [vmem:[%s14745_s13 + $0x1b0] sm:$0xff] }
  0xbe   :  { %9095 = vmatpush1.bf16.msra.mxu0 %v9094_v60  ;;  %14750 = vst [vmem:[#allocation32_spill] sm:$0xff] %v12625_v57  ;;  %14751 = vst [vmem:[#allocation33_spill] sm:$0xff] %v12629_v58  ;;  %v648_v60 = vld [vmem:[%s14745_s13 + $0x100] sm:$0xff]  ;;  %v673_v32 = vld [vmem:[%s14745_s13 + $0x1c8] sm:$0xff]  ;;  %v12733_v39 = vpack.c.bf16 %v668_v28, %v664_v26  ;;  %v12737_v40 = vpack.c.bf16 %v670_v31, %v666_v29 }
  0xbf   :  { %9127 = vmatpush1.bf16.msra.mxu1 %v9126_v61  ;;  %9097 = vmatprep.subr.bf16.mxu0 %v9096_v62  ;;  %14752 = vst [vmem:[#allocation34_spill] sm:$0xff] %v12631_v59  ;;  %v652_v61 = vld [vmem:[%s14745_s13 + $0x120] sm:$0xff]  ;;  %v650_v62 = vld [vmem:[%s14745_s13 + $0x110] sm:$0xff]  ;;  %v679_v37 = vld [vmem:[%s14745_s13 + $0x1f8] sm:$0xff] }
  0xc0   :  { %9129 = vmatprep.subr.bf16.mxu1 %v9128_v3  ;;  %v661_v3 = vld [vmem:[%s14745_s13 + $0x168] sm:$0xff]  ;;  %v12661_v6 = vpack.c.bf16 %v652_v61, %v648_v60  ;;  %v12665_v7 = vpack.c.bf16 %v654_v0, %v650_v62  ;;  %14762 = vst [vmem:[#allocation44_spill] sm:$0xff] %v12733_v39  ;;  %14763 = vst [vmem:[#allocation45_spill] sm:$0xff] %v12737_v40  ;;  %v672_v42 = vld [vmem:[%s14745_s13 + $0x1c0] sm:$0xff] }
  0xc1   :  { %v12667_v8 = vpack.c.bf16 %v661_v3, %v657_v2  ;;  %v676_v43 = vld [vmem:[%s14745_s13 + $0x1e0] sm:$0xff]  ;;  %v674_v47 = vld [vmem:[%s14745_s13 + $0x1d0] sm:$0xff] }
  0xc2   :  { %9099 = vmatpush1.bf16.msra.mxu0 %v9098_v9  ;;  %14754 = vst [vmem:[#allocation36_spill] sm:$0xff] %v12661_v6  ;;  %14755 = vst [vmem:[#allocation37_spill] sm:$0xff] %v12665_v7  ;;  %v656_v9 = vld [vmem:[%s14745_s13 + $0x140] sm:$0xff]  ;;  %v678_v50 = vld [vmem:[%s14745_s13 + $0x1f0] sm:$0xff]  ;;  %v12757_v56 = vpack.c.bf16 %v676_v43, %v672_v42 }
  0xc3   :  { %9131 = vmatpush1.bf16.msra.mxu1 %v9130_v10  ;;  %9133 = vmatprep.subr.bf16.mxu0 %v12486_v11  ;;  %14756 = vst [vmem:[#allocation38_spill] sm:$0xff] %v12667_v8  ;;  %v660_v10 = vld [vmem:[%s14745_s13 + $0x160] sm:$0xff]  ;;  %v681_v52 = vld [vmem:[#allocation11 + $0x8] sm:$0xff]  ;;  %v12761_v60 = vpack.c.bf16 %v678_v50, %v674_v47  ;;  %v682_v2 = vld [vmem:[#allocation11 + $0x10] sm:$0xff] }
  0xc4   :  { %9165 = vmatprep.subr.bf16.mxu1 %v12497_v15  ;;  %v12697_v20 = vpack.c.bf16 %v660_v10, %v656_v9  ;;  %v685_v53 = vld [vmem:[#allocation11 + $0x28] sm:$0xff]  ;;  %v683_v54 = vld [vmem:[#allocation11 + $0x18] sm:$0xff]  ;;  %14766 = vst [vmem:[#allocation48_spill] sm:$0xff] %v12757_v56  ;;  %v680_v62 = vld [vmem:[#allocation11] sm:$0xff] }
  0xc5   :  { %531 = vmatmul.mubr.f32.vlgmr.msra.gmra.mrb[2].mxu0 %v12468_v49  ;;  %v687_v55 = vld [vmem:[#allocation11 + $0x38] sm:$0xff]  ;;  %14767 = vst [vmem:[#allocation49_spill] sm:$0xff] %v12761_v60  ;;  %v12763_v61 = vpack.c.bf16 %v685_v53, %v681_v52  ;;  %v684_v0 = vld [vmem:[#allocation11 + $0x20] sm:$0xff]  ;;  %v686_v4 = vld [vmem:[#allocation11 + $0x30] sm:$0xff] }
  0xc6   :  { %602 = vmatmul.mubr.f32.vlgmr.msra.gmra.mrb[2].mxu1 %v12468_v49  ;;  %9135 = vmatpush1.bf16.msra.mxu0 %v12514_v21  ;;  %v636_v49 = vld [vmem:[%s14745_s13 + $0xa0] sm:$0xff]  ;;  %14758 = vst [vmem:[#allocation40_spill] sm:$0xff] %v12697_v20  ;;  %v12766_v3 = vpack.c.bf16 %v687_v55, %v683_v54  ;;  %v689_v5 = vld [vmem:[#allocation11 + $0x48] sm:$0xff]  ;;  %v12769_v14 = vpack.c.bf16 %v684_v0, %v680_v62  ;;  %v690_v26 = vld [vmem:[#allocation11 + $0x50] sm:$0xff] }
  0xc7   :  { %9167 = vmatpush1.bf16.msra.mxu1 %v12517_v22  ;;  %9137 = vmatprep.subr.bf16.mxu0 %v12519_v23  ;;  %v12589_v44 = vpack.c.bf16 %v636_v49, %v632_v36  ;;  %v677_v36 = vld [vmem:[%s14745_s13 + $0x1e8] sm:$0xff]  ;;  %v675_v49 = vld [vmem:[%s14745_s13 + $0x1d8] sm:$0xff]  ;;  %14768 = vst [vmem:[#allocation50_spill] sm:$0xff] %v12763_v61  ;;  %v12773_v16 = vpack.c.bf16 %v686_v4, %v682_v2 }
  0xc8   :  { %9169 = vmatprep.subr.bf16.mxu1 %v12531_v27  ;;  %809 = vmatprep.mubr.f32.mxu0 %v14581_v1  ;;  %v12739_v41 = vpack.c.bf16 %v677_v36, %v673_v32  ;;  %v12751_v48 = vpack.c.bf16 %v679_v37, %v675_v49  ;;  %14769 = vst [vmem:[#allocation51_spill] sm:$0xff] %v12766_v3  ;;  %v693_v9 = vld [vmem:[#allocation11 + $0x68] sm:$0xff]  ;;  %v691_v10 = vld [vmem:[#allocation11 + $0x58] sm:$0xff]  ;;  %v688_v18 = vld [vmem:[#allocation11 + $0x40] sm:$0xff] }
  0xc9   :  { %880 = vmatprep.mubr.f32.mxu1 %v14581_v1  ;;  %14746 = vst [vmem:[#allocation28_spill] sm:$0xff] %v12589_v44  ;;  %v695_v12 = vld [vmem:[#allocation11 + $0x78] sm:$0xff]  ;;  %v12775_v17 = vpack.c.bf16 %v693_v9, %v689_v5  ;;  %v692_v19 = vld [vmem:[#allocation11 + $0x60] sm:$0xff]  ;;  %v694_v29 = vld [vmem:[#allocation11 + $0x70] sm:$0xff] }
  0xca   :  { %9139 = vmatpush1.bf16.msra.mxu0 %v12551_v33  ;;  %14764 = vst [vmem:[#allocation46_spill] sm:$0xff] %v12739_v41  ;;  %14765 = vst [vmem:[#allocation47_spill] sm:$0xff] %v12751_v48  ;;  %v12778_v28 = vpack.c.bf16 %v695_v12, %v691_v10  ;;  %v697_v31 = vld [vmem:[#allocation11 + $0x88] sm:$0xff]  ;;  %v699_v36 = vld [vmem:[#allocation11 + $0x98] sm:$0xff]  ;;  %v12783_v37 = vpack.c.bf16 %v692_v19, %v688_v18  ;;  %v12787_v42 = vpack.c.bf16 %v694_v29, %v690_v26 }
  0xcb   :  { %9171 = vmatpush1.bf16.msra.mxu1 %v12555_v34  ;;  %9141 = vmatprep.subr.bf16.mxu0 %v12557_v35  ;;  %v701_v32 = vld [vmem:[#allocation11 + $0xa8] sm:$0xff]  ;;  %v703_v49 = vld [vmem:[#allocation11 + $0xb8] sm:$0xff]  ;;  %v696_v47 = vld [vmem:[#allocation11 + $0x80] sm:$0xff] }
  0xcc   :  { %9173 = vmatprep.subr.bf16.mxu1 %v12569_v38  ;;  %v12789_v43 = vpack.c.bf16 %v701_v32, %v697_v31  ;;  %v700_v50 = vld [vmem:[#allocation11 + $0xa0] sm:$0xff]  ;;  %v698_v52 = vld [vmem:[#allocation11 + $0x90] sm:$0xff]  ;;  %v12792_v53 = vpack.c.bf16 %v703_v49, %v699_v36  ;;  %v705_v55 = vld [vmem:[#allocation11 + $0xc8] sm:$0xff] }
  0xcd   :  { %v702_v54 = vld [vmem:[#allocation11 + $0xb0] sm:$0xff]  ;;  %v709_v62 = vld [vmem:[#allocation11 + $0xe8] sm:$0xff]  ;;  %v707_v0 = vld [vmem:[#allocation11 + $0xd8] sm:$0xff]  ;;  %v12797_v4 = vpack.c.bf16 %v700_v50, %v696_v47 }
  0xce   :  { %9143 = vmatpush1.bf16.msra.mxu0 %v12589_v44  ;;  %v711_v2 = vld [vmem:[#allocation11 + $0xf8] sm:$0xff]  ;;  %v12801_v5 = vpack.c.bf16 %v702_v54, %v698_v52  ;;  %v12803_v9 = vpack.c.bf16 %v709_v62, %v705_v55  ;;  %v704_v10 = vld [vmem:[#allocation11 + $0xc0] sm:$0xff]  ;;  %v706_v18 = vld [vmem:[#allocation11 + $0xd0] sm:$0xff] }
  0xcf   :  { %9175 = vmatpush1.bf16.msra.mxu1 %v12593_v45  ;;  %9145 = vmatprep.subr.bf16.mxu0 %v12595_v46  ;;  %v708_v12 = vld [vmem:[#allocation11 + $0xe0] sm:$0xff]  ;;  %v12806_v19 = vpack.c.bf16 %v711_v2, %v707_v0  ;;  %v710_v26 = vld [vmem:[#allocation11 + $0xf0] sm:$0xff]  ;;  %v713_v29 = vld [vmem:[#allocation11 + $0x108] sm:$0xff] }
  0xd0   :  { %9177 = vmatprep.subr.bf16.mxu1 %v12607_v51  ;;  %14770 = vst [vmem:[#allocation52_spill] sm:$0xff] %v12801_v5  ;;  %14771 = vst [vmem:[#allocation53_spill] sm:$0xff] %v12803_v9  ;;  %v717_v31 = vld [vmem:[#allocation11 + $0x128] sm:$0xff]  ;;  %v715_v32 = vld [vmem:[#allocation11 + $0x118] sm:$0xff]  ;;  %v12809_v49 = vpack.c.bf16 %v708_v12, %v704_v10  ;;  %v12813_v47 = vpack.c.bf16 %v710_v26, %v706_v18 }
  0xd1   :  { %14772 = vst [vmem:[#allocation54_spill] sm:$0xff] %v12806_v19  ;;  %v719_v36 = vld [vmem:[#allocation11 + $0x138] sm:$0xff]  ;;  %v12815_v50 = vpack.c.bf16 %v717_v31, %v713_v29  ;;  %v712_v52 = vld [vmem:[#allocation11 + $0x100] sm:$0xff]  ;;  %v714_v55 = vld [vmem:[#allocation11 + $0x110] sm:$0xff] }
  0xd2   :  { %9147 = vmatpush1.bf16.msra.mxu0 %v12625_v57  ;;  %14773 = vst [vmem:[#allocation55_spill] sm:$0xff] %v12809_v49  ;;  %14774 = vst [vmem:[#allocation56_spill] sm:$0xff] %v12813_v47  ;;  %v716_v54 = vld [vmem:[#allocation11 + $0x120] sm:$0xff]  ;;  %v12818_v62 = vpack.c.bf16 %v719_v36, %v715_v32  ;;  %v718_v0 = vld [vmem:[#allocation11 + $0x130] sm:$0xff] }
  0xd3   :  { %9179 = vmatpush1.bf16.msra.mxu1 %v12629_v58  ;;  %9149 = vmatprep.subr.bf16.mxu0 %v12631_v59  ;;  %14775 = vst [vmem:[#allocation57_spill] sm:$0xff] %v12815_v50  ;;  %v721_v2 = vld [vmem:[#allocation11 + $0x148] sm:$0xff]  ;;  %v723_v10 = vld [vmem:[#allocation11 + $0x158] sm:$0xff]  ;;  %v12825_v18 = vpack.c.bf16 %v718_v0, %v714_v55  ;;  %v720_v29 = vld [vmem:[#allocation11 + $0x140] sm:$0xff] }
  0xd4   :  { %9181 = vmatprep.subr.bf16.mxu1 %v12643_v63  ;;  %14776 = vst [vmem:[#allocation58_spill] sm:$0xff] %v12818_v62  ;;  %v727_v12 = vld [vmem:[#allocation11 + $0x178] sm:$0xff]  ;;  %v724_v31 = vld [vmem:[#allocation11 + $0x160] sm:$0xff]  ;;  %v722_v32 = vld [vmem:[#allocation11 + $0x150] sm:$0xff] }
  0xd5   :  { %14778 = vst [vmem:[#allocation60_spill] sm:$0xff] %v12825_v18  ;;  %v12830_v36 = vpack.c.bf16 %v727_v12, %v723_v10  ;;  %v728_v0 = vld [vmem:[#allocation11 + $0x180] sm:$0xff]  ;;  %v730_v10 = vld [vmem:[#allocation11 + $0x190] sm:$0xff] }
  0xd6   :  { %9151 = vmatpush1.bf16.msra.mxu0 %v12661_v6 }
  0xd7   :  { %9183 = vmatpush1.bf16.msra.mxu1 %v12665_v7  ;;  %9153 = vmatprep.subr.bf16.mxu0 %v12667_v8  ;;  %14779 = vst [vmem:[#allocation61_spill] sm:$0xff] %v12830_v36 }
  0xd8   :  { %9185 = vmatprep.subr.bf16.mxu1 %v12679_v13 }
  0xda   :  { %9155 = vmatpush1.bf16.msra.mxu0 %v12697_v20 }
  0xdb   :  { %9187 = vmatpush1.bf16.msra.mxu1 %v12701_v24  ;;  %9157 = vmatprep.subr.bf16.mxu0 %v12703_v25 }
  0xdc   :  { %9189 = vmatprep.subr.bf16.mxu1 %v12715_v30 }
  0xde   :  { %9159 = vmatpush1.bf16.msra.mxu0 %v12733_v39 }
  0xdf   :  { %9191 = vmatpush1.bf16.msra.mxu1 %v12737_v40  ;;  %9161 = vmatprep.subr.bf16.mxu0 %v12739_v41 }
  0xe0   :  { %9193 = vmatprep.subr.bf16.mxu1 %v12751_v48 }
  0xe2   :  { %9163 = vmatpush1.bf16.msra.mxu0 %v12757_v56 }
  0xe3   :  { %9195 = vmatpush1.bf16.msra.mxu1 %v12761_v60  ;;  %9197 = vmatprep.subr.bf16.mxu0 %v12763_v61 }
  0xe4   :  { %9229 = vmatprep.subr.bf16.mxu1 %v12766_v3 }
  0xe5   :  { %810 = vmatmul.mubr.f32.vlgmr.msra.gmra.mrb[4].mxu0 %v14581_v1 }
  0xe6   :  { %881 = vmatmul.mubr.f32.vlgmr.msra.gmra.mrb[4].mxu1 %v14581_v1  ;;  %9199 = vmatpush1.bf16.msra.mxu0 %v12769_v14 }
  0xe7   :  { %9231 = vmatpush1.bf16.msra.mxu1 %v12773_v16  ;;  %9201 = vmatprep.subr.bf16.mxu0 %v12775_v17 }
  0xe8   :  { %9233 = vmatprep.subr.bf16.mxu1 %v12778_v28  ;;  %983 = vmatprep.mubr.f32.mxu0 %v14581_v1 }
  0xe9   :  { %1054 = vmatprep.mubr.f32.mxu1 %v14581_v1  ;;  %v725_v1 = vld [vmem:[#allocation11 + $0x168] sm:$0xff] }
  0xea   :  { %9203 = vmatpush1.bf16.msra.mxu0 %v12783_v37  ;;  %v12827_v26 = vpack.c.bf16 %v725_v1, %v721_v2  ;;  %v732_v2 = vld [vmem:[#allocation11 + $0x1a0] sm:$0xff] }
  0xeb   :  { %9235 = vmatpush1.bf16.msra.mxu1 %v12787_v42  ;;  %9205 = vmatprep.subr.bf16.mxu0 %v12789_v43 }
  0xec   :  { %9237 = vmatprep.subr.bf16.mxu1 %v12792_v53 }
  0xee   :  { %9207 = vmatpush1.bf16.msra.mxu0 %v12797_v4 }
  0xef   :  { %9239 = vmatpush1.bf16.msra.mxu1 %v12801_v5  ;;  %9209 = vmatprep.subr.bf16.mxu0 %v12803_v9  ;;  %v12821_v5 = vpack.c.bf16 %v716_v54, %v712_v52  ;;  %v729_v9 = vld [vmem:[#allocation11 + $0x188] sm:$0xff]  ;;  %v731_v52 = vld [vmem:[#allocation11 + $0x198] sm:$0xff] }
  0xf0   :  { %9241 = vmatprep.subr.bf16.mxu1 %v12806_v19  ;;  %v726_v19 = vld [vmem:[#allocation11 + $0x170] sm:$0xff]  ;;  %v735_v54 = vld [vmem:[#allocation11 + $0x1b8] sm:$0xff] }
  0xf1   :  { %14777 = vst [vmem:[#allocation59_spill] sm:$0xff] %v12821_v5  ;;  %v12837_v1 = vpack.c.bf16 %v726_v19, %v722_v32  ;;  %v12842_v12 = vpack.c.bf16 %v735_v54, %v731_v52  ;;  %v740_v32 = vld [vmem:[#allocation11 + $0x1e0] sm:$0xff]  ;;  %v738_v54 = vld [vmem:[#allocation11 + $0x1d0] sm:$0xff] }
  0xf2   :  { %9211 = vmatpush1.bf16.msra.mxu0 %v12809_v49  ;;  %v733_v49 = vld [vmem:[#allocation11 + $0x1a8] sm:$0xff] }
  0xf3   :  { %9243 = vmatpush1.bf16.msra.mxu1 %v12813_v47  ;;  %9213 = vmatprep.subr.bf16.mxu0 %v12815_v50  ;;  %v12833_v47 = vpack.c.bf16 %v724_v31, %v720_v29  ;;  %v12839_v55 = vpack.c.bf16 %v733_v49, %v729_v9  ;;  %v737_v50 = vld [vmem:[#allocation11 + $0x1c8] sm:$0xff]  ;;  %v739_v29 = vld [vmem:[#allocation11 + $0x1d8] sm:$0xff]  ;;  %v736_v49 = vld [vmem:[#allocation11 + $0x1c0] sm:$0xff] }
  0xf4   :  { %9245 = vmatprep.subr.bf16.mxu1 %v12818_v62  ;;  %v734_v62 = vld [vmem:[#allocation11 + $0x1b0] sm:$0xff]  ;;  %v743_v31 = vld [vmem:[#allocation11 + $0x1f8] sm:$0xff] }
  0xf5   :  { %v12849_v9 = vpack.c.bf16 %v734_v62, %v730_v10  ;;  %v12854_v52 = vpack.c.bf16 %v743_v31, %v739_v29  ;;  %v282_v10 = vld [vmem:[%s14559_s6] sm:$0xff]  ;;  %s8795_s6 = sshll.u32 %s12259_s28, 4  ;;  %s8796_s6 = int_to_ptr.vmem [resolvable:$true] %s8795_s6 }
  0xf6   :  { %9215 = vmatpush1.bf16.msra.mxu0 %v12821_v5  ;;  %v741_v5 = vld [vmem:[#allocation11 + $0x1e8] sm:$0xff] }
  0xf7   :  { %9247 = vmatpush1.bf16.msra.mxu1 %v12825_v18  ;;  %9217 = vmatprep.subr.bf16.mxu0 %v12827_v26  ;;  %v12845_v18 = vpack.c.bf16 %v732_v2, %v728_v0  ;;  %v12851_v19 = vpack.c.bf16 %v741_v5, %v737_v50  ;;  %v12857_v0 = vpack.c.bf16 %v740_v32, %v736_v49  ;;  %v14780_v5 = vmov 0.0  }
  0xf8   :  { %9249 = vmatprep.subr.bf16.mxu1 %v12830_v36  ;;  %v742_v36 = vld [vmem:[#allocation11 + $0x1f0] sm:$0xff]  ;;  %v284_v50 = vlaneseq }
  0xf9   :  { %v12861_v62 = vpack.c.bf16 %v742_v36, %v738_v54 }
  0xfa   :  { %9219 = vmatpush1.bf16.msra.mxu0 %v12833_v47  ;;  %v12904_v36 = vshrl.u32 %v284_v50, 7 }
  0xfb   :  { %9251 = vmatpush1.bf16.msra.mxu1 %v12837_v1  ;;  %9221 = vmatprep.subr.bf16.mxu0 %v12839_v55 }
  0xfc   :  { %9253 = vmatprep.subr.bf16.mxu1 %v12842_v12  ;;  %14781 = vst [vmem:[#allocation62_spill] sm:$0xff] %v12904_v36  ;;  %v12907_v2 = vsub.s32 0, %v12904_v36  ;;  %v14621_v29 = vsub.s32 2, %v12904_v36  ;;  %v14624_v31 = vsub.s32 1, %v12904_v36  ;;  %v14625_v49 = vsub.s32 3, %v12904_v36 }
  0xfe   :  { %9223 = vmatpush1.bf16.msra.mxu0 %v12845_v18  ;;  %14782 = vst [vmem:[#allocation63_spill] sm:$0xff] %v12907_v2  ;;  %v287_v32 = vrot.slane %v282_v10, %v12907_v2  ;;  %v295_v54 = vrot.slane %v282_v10, %v14621_v29  ;;  %v291_v50 = vrot.slane %v282_v10, %v14624_v31  ;;  %v14626_v29 = vsub.s32 4, %v12904_v36 }
  0xff   :  { %9255 = vmatpush1.bf16.msra.mxu1 %v12849_v9  ;;  %9225 = vmatprep.subr.bf16.mxu0 %v12851_v19  ;;  %v14627_v2 = vsub.s32 6, %v12904_v36  ;;  %v14630_v31 = vsub.s32 5, %v12904_v36 }
 0x100   :  { %9257 = vmatprep.subr.bf16.mxu1 %v12854_v52 }
 0x102   :  { %9227 = vmatpush1.bf16.msra.mxu0 %v12857_v0 }
 0x103   :  { %9259 = vmatpush1.bf16.msra.mxu1 %v12861_v62  ;;  %9261 = vmatprep.subr.bf16.mxu0 %v12486_v11 }
 0x104   :  { %9293 = vmatprep.subr.bf16.mxu1 %v12497_v15 }
 0x105   :  { %984 = vmatmul.mubr.f32.vlgmr.msra.gmra.mrb[6].mxu0 %v14780_v5 }
 0x106   :  { %1055 = vmatmul.mubr.f32.vlgmr.msra.gmra.mrb[6].mxu1 %v14780_v5  ;;  %9263 = vmatpush1.bf16.msra.mxu0 %v12514_v21 }
 0x107   :  { %9295 = vmatpush1.bf16.msra.mxu1 %v12517_v22  ;;  %9265 = vmatprep.subr.bf16.mxu0 %v12519_v23 }
 0x108   :  { %9297 = vmatprep.subr.bf16.mxu1 %v12531_v27  ;;  %1221 = vmatprep.mubr.f32.mxu0 %v14780_v5 }
 0x109   :  { %1292 = vmatprep.mubr.f32.mxu1 %v14780_v5 }
 0x10a   :  { %9267 = vmatpush1.bf16.msra.mxu0 %v12551_v33 }
 0x10b   :  { %9299 = vmatpush1.bf16.msra.mxu1 %v12555_v34  ;;  %9269 = vmatprep.subr.bf16.mxu0 %v12557_v35 }
 0x10c   :  { %9301 = vmatprep.subr.bf16.mxu1 %v12569_v38 }
 0x10e   :  { %9271 = vmatpush1.bf16.msra.mxu0 %v12589_v44 }
 0x10f   :  { %9303 = vmatpush1.bf16.msra.mxu1 %v12593_v45  ;;  %9273 = vmatprep.subr.bf16.mxu0 %v12595_v46 }
 0x110   :  { %9305 = vmatprep.subr.bf16.mxu1 %v12607_v51 }
 0x112   :  { %9275 = vmatpush1.bf16.msra.mxu0 %v12625_v57 }
 0x113   :  { %9307 = vmatpush1.bf16.msra.mxu1 %v12629_v58  ;;  %9277 = vmatprep.subr.bf16.mxu0 %v12631_v59 }
 0x114   :  { %9309 = vmatprep.subr.bf16.mxu1 %v12643_v63 }
 0x116   :  { %9279 = vmatpush1.bf16.msra.mxu0 %v12661_v6 }
 0x117   :  { %9311 = vmatpush1.bf16.msra.mxu1 %v12665_v7  ;;  %9281 = vmatprep.subr.bf16.mxu0 %v12667_v8 }
 0x118   :  { %9313 = vmatprep.subr.bf16.mxu1 %v12679_v13 }
 0x11a   :  { %9283 = vmatpush1.bf16.msra.mxu0 %v12697_v20 }
 0x11b   :  { %9315 = vmatpush1.bf16.msra.mxu1 %v12701_v24  ;;  %9285 = vmatprep.subr.bf16.mxu0 %v12703_v25 }
 0x11c   :  { %9317 = vmatprep.subr.bf16.mxu1 %v12715_v30 }
 0x11e   :  { %9287 = vmatpush1.bf16.msra.mxu0 %v12733_v39 }
 0x11f   :  { %9319 = vmatpush1.bf16.msra.mxu1 %v12737_v40  ;;  %9289 = vmatprep.subr.bf16.mxu0 %v12739_v41 }
 0x120   :  { %9321 = vmatprep.subr.bf16.mxu1 %v12751_v48 }
 0x122   :  { %9291 = vmatpush1.bf16.msra.mxu0 %v12757_v56 }
 0x123   :  { %9323 = vmatpush1.bf16.msra.mxu1 %v12761_v60  ;;  %9325 = vmatprep.subr.bf16.mxu0 %v12763_v61 }
 0x124   :  { %9357 = vmatprep.subr.bf16.mxu1 %v12766_v3  ;;  %v299_v3 = vrot.slane %v282_v10, %v14625_v49  ;;  %v14633_v49 = vsub.s32 7, %v12904_v36 }
 0x178   :  { %v390_v61 = vpop.f32.mrb[0].mxu0 }
 0x179   :  { %v391_v60 = vadd.f32 %v390_v61, %v287_v32  ;;  %v461_v56 = vpop.f32.mrb[0].mxu1  ;;  %v392_v48 = vpop.f32.mrb[1].mxu0  ;;  %v303_v61 = vrot.slane %v282_v10, %v14626_v29  ;;  %v12252_v29 = vmov 1966171168  }
 0x17a   :  { %v462_v41 = vadd.f32 %v461_v56, %v295_v54  ;;  %v393_v40 = vadd.f32 %v392_v48, %v291_v50  ;;  %v463_v39 = vpop.f32.mrb[1].mxu1  ;;  %v311_v48 = vrot.slane %v282_v10, %v14627_v2  ;;  %v894_v2 = vunpack.c.l.s4 %v12252_v29 }
 0x17b   :  { %608 = vst [vmem:[#allocation2] sm:$0xff] %v391_v60  ;;  %v464_v30 = vadd.f32 %v463_v39, %v299_v3  ;;  %v307_v39 = vrot.slane %v282_v10, %v14630_v31 }
 0x17c   :  { %610 = vst [vmem:[#allocation2 + $0x10] sm:$0xff] %v462_v41  ;;  %609 = vst [vmem:[#allocation2 + $0x8] sm:$0xff] %v393_v40  ;;  %v895_v25 = vunpack.c.0.s8 %v894_v2 }
 0x17d   :  { %611 = vst [vmem:[#allocation2 + $0x18] sm:$0xff] %v464_v30  ;;  %v315_v30 = vrot.slane %v282_v10, %v14633_v49 }
 0x17e   :  { %v12935_v31 = vsub.s32 %v895_v25, %v12904_v36 }
 0x198   :  { %v532_v40 = vpop.f32.mrb[2].mxu0 }
 0x199   :  { %v533_v41 = vadd.f32 %v532_v40, %v303_v61  ;;  %v603_v56 = vpop.f32.mrb[2].mxu1  ;;  %v534_v60 = vpop.f32.mrb[3].mxu0 }
 0x19a   :  { %v604_v3 = vadd.f32 %v603_v56, %v311_v48  ;;  %v535_v32 = vadd.f32 %v534_v60, %v307_v39  ;;  %v605_v54 = vpop.f32.mrb[3].mxu1  ;;  %v744_v56 = vld [vmem:[#allocation2] ss:$8 sm:$0xf] }
 0x19b   :  { %612 = vst [vmem:[#allocation2 + $0x20] sm:$0xff] %v533_v41  ;;  %v606_v50 = vadd.f32 %v605_v54, %v315_v30 }
 0x19c   :  { %614 = vst [vmem:[#allocation2 + $0x30] sm:$0xff] %v604_v3  ;;  %613 = vst [vmem:[#allocation2 + $0x28] sm:$0xff] %v535_v32 }
 0x19d   :  { %615 = vst [vmem:[#allocation2 + $0x38] sm:$0xff] %v606_v50 }
 0x1b8   :  { %v811_v24 = vpop.f32.mrb[4].mxu0 }
 0x1b9   :  { %v882_v10 = vpop.f32.mrb[4].mxu1  ;;  %v813_v49 = vpop.f32.mrb[5].mxu0 }
 0x1ba   :  { %v891_v61 = vcombine.low %v811_v24, %v813_v49  ;;  %v884_v40 = vpop.f32.mrb[5].mxu1 }
 0x1bb   :  { %v892_v20 = vcombine.low %v882_v10, %v884_v40 }
 0x1bc   :  { %v899_v48 = vrot.slane %v891_v61, %v12935_v31 }
 0x1bd   :  { %v906_v39 = vrot.slane %v892_v20, %v12935_v31 }
 0x1bf   :  { %v907_v30 = vcombine.low %v899_v48, %v906_v39 }
 0x1c1   :  { %v914_v41 = vrot.slane %v907_v30, %v12935_v31 }
 0x1c3   :  { %v916_v60 = vadd.f32 %v914_v41, %v744_v56 }
 0x1c5   :  { %v8811_v29 = vmul.f32 -1.442695, %v916_v60  ;;  %v1098_v2 = vrot.slane %v916_v60, 1  ;;  %v1109_v3 = vrot.slane %v916_v60, 3  ;;  %v1106_v24 = vrot.slane %v916_v60, 2 }
 0x1c7   :  { %11525 = vpow2.f32 %v8811_v29  ;;  %v8812_v25 = vmul.f32 -1.442695, %v1098_v2  ;;  %v8813_v32 = vmul.f32 -1.442695, %v1109_v3 }
 0x1c9   :  { %11527 = vpow2.f32 %v8812_v25 }
 0x1ca   :  { %11529 = vpow2.f32 %v8813_v32 }
 0x1d1   :  { %v11526_v54 = vpop.eup %11525 }
 0x1d2   :  { %v1094_v49 = vadd.f32 1.0, %v11526_v54 }
 0x1d3   :  { %v11528_v50 = vpop.eup %11527 }
 0x1d4   :  { %11531 = vrcp.f32 %v1094_v49  ;;  %v1103_v10 = vadd.f32 1.0, %v11528_v50  ;;  %v11530_v56 = vpop.eup %11529  ;;  %v918_v50 = vld [vmem:[#allocation2 + $0x27] ss:$8 sm:$0xf] }
 0x1d5   :  { %11533 = vtanh.f32 %v1106_v24  ;;  %v1114_v54 = vadd.f32 1.0, %v11530_v56 }
 0x1d6   :  { %11535 = vrcp.f32 %v1103_v10 }
 0x1d7   :  { %11537 = vrcp.f32 %v1114_v54 }
 0x1d8   :  { %v985_v20 = vpop.f32.mrb[6].mxu0 }
 0x1d9   :  { %v1056_v61 = vpop.f32.mrb[6].mxu1  ;;  %v987_v40 = vpop.f32.mrb[7].mxu0 }
 0x1da   :  { %v1065_v48 = vcombine.low %v985_v20, %v987_v40  ;;  %v1058_v39 = vpop.f32.mrb[7].mxu1 }
 0x1db   :  { %v1066_v30 = vcombine.low %v1056_v61, %v1058_v39 }
 0x1dc   :  { %v1073_v41 = vrot.slane %v1065_v48, %v12935_v31 }
 0x1dd   :  { %v1080_v29 = vrot.slane %v1066_v30, %v12935_v31 }
 0x1de   :  { %v11532_v2 = vpop.eup %11531 }
 0x1df   :  { %v11534_v60 = vpop.eup %11533  ;;  %v1081_v25 = vcombine.low %v1073_v41, %v1080_v29 }
 0x1e0   :  { %v11536_v3 = vpop.eup %11535  ;;  %v1118_v49 = vmul.f32 %v11534_v60, %v11532_v2 }
 0x1e1   :  { %v1088_v32 = vrot.slane %v1081_v25, %v12935_v31  ;;  %v1117_v24 = vmul.f32 0.0, %v11536_v3  ;;  %v11538_v39 = vpop.eup %11537 }
 0x1e3   :  { %v1090_v10 = vadd.f32 %v1088_v32, %v918_v50  ;;  %v12943_v36 = vadd.f32 %v1118_v49, %v1117_v24  ;;  %v14783_v32 = vld [vmem:[#allocation52_spill] sm:$0xff]  ;;  %v14784_v24 = vld [vmem:[#allocation53_spill] sm:$0xff]  ;;  %v14785_v49 = vld [vmem:[#allocation54_spill] sm:$0xff] }
 0x1e5   :  { %v8814_v20 = vmul.f32 -1.442695, %v1090_v10  ;;  %v1129_v61 = vrot.slane %v1090_v10, 1  ;;  %11539 = vtanh.f32 %v12943_v36  ;;  %v1140_v48 = vrot.slane %v1090_v10, 3 }
 0x1e6   :  { %v1137_v56 = vrot.slane %v1090_v10, 2 }
 0x1e7   :  { %11541 = vpow2.f32 %v8814_v20  ;;  %v8815_v40 = vmul.f32 -1.442695, %v1129_v61  ;;  %v8816_v30 = vmul.f32 -1.442695, %v1140_v48  ;;  %v14786_v61 = vld [vmem:[#allocation55_spill] sm:$0xff] }
 0x1e9   :  { %11543 = vpow2.f32 %v8815_v40  ;;  %v14787_v40 = vld [vmem:[#allocation56_spill] sm:$0xff] }
 0x1ea   :  { %11545 = vpow2.f32 %v8816_v30  ;;  %v14789_v30 = vld [vmem:[#allocation58_spill] sm:$0xff] }
 0x1ef   :  { %v11540_v41 = vpop.eup %11539 }
 0x1f0   :  { %v1121_v25 = vmul.f32 %v11540_v41, %v11538_v39  ;;  %v14788_v39 = vld [vmem:[#allocation57_spill] sm:$0xff] }
 0x1f1   :  { %v11542_v29 = vpop.eup %11541 }
 0x1f2   :  { %v1125_v2 = vadd.f32 1.0, %v11542_v29  ;;  %1153 = vst [vmem:[#allocation3] sm:$0x1] %v1121_v25  ;;  %1222 = vmatmul.mubr.f32.vlgmr.msra.gmra.mrb[8].mxu0 %v1121_v25  ;;  %1293 = vmatmul.mubr.f32.vlgmr.msra.gmra.mrb[8].mxu1 %v1121_v25  ;;  %v14790_v25 = vld [vmem:[#allocation59_spill] sm:$0xff] }
 0x1f3   :  { %v11544_v60 = vpop.eup %11543  ;;  %9327 = vmatpush1.bf16.msra.mxu0 %v12769_v14  ;;  %9359 = vmatpush1.bf16.msra.mxu1 %v12773_v16 }
 0x1f4   :  { %11547 = vrcp.f32 %v1125_v2  ;;  %v1134_v3 = vadd.f32 1.0, %v11544_v60  ;;  %9329 = vmatprep.subr.bf16.mxu0 %v12775_v17  ;;  %9361 = vmatprep.subr.bf16.mxu1 %v12778_v28  ;;  %v11546_v54 = vpop.eup %11545  ;;  %v14791_v2 = vld [vmem:[#allocation60_spill] sm:$0xff]  ;;  %v14792_v60 = vld [vmem:[#allocation61_spill] sm:$0xff] }
 0x1f5   :  { %11549 = vtanh.f32 %v1137_v56  ;;  %1395 = vmatprep.mubr.f32.mxu0 %v14780_v5  ;;  %1466 = vmatprep.mubr.f32.mxu1 %v14780_v5  ;;  %v1145_v48 = vadd.f32 1.0, %v11546_v54 }
 0x1f6   :  { %11551 = vrcp.f32 %v1134_v3 }
 0x1f7   :  { %9331 = vmatpush1.bf16.msra.mxu0 %v12783_v37  ;;  %9363 = vmatpush1.bf16.msra.mxu1 %v12787_v42  ;;  %11553 = vrcp.f32 %v1145_v48  ;;  %v14795_v48 = vld [vmem:[#allocation42_spill] sm:$0xff] }
 0x1f8   :  { %9333 = vmatprep.subr.bf16.mxu0 %v12789_v43  ;;  %9365 = vmatprep.subr.bf16.mxu1 %v12792_v53 }
 0x1fb   :  { %9335 = vmatpush1.bf16.msra.mxu0 %v12797_v4  ;;  %9367 = vmatpush1.bf16.msra.mxu1 %v14783_v32 }
 0x1fc   :  { %9337 = vmatprep.subr.bf16.mxu0 %v14784_v24  ;;  %9369 = vmatprep.subr.bf16.mxu1 %v14785_v49 }
 0x1fe   :  { %v11548_v50 = vpop.eup %11547 }
 0x1ff   :  { %v11550_v10 = vpop.eup %11549  ;;  %9339 = vmatpush1.bf16.msra.mxu0 %v14786_v61  ;;  %9371 = vmatpush1.bf16.msra.mxu1 %v14787_v40 }
 0x200   :  { %v11552_v20 = vpop.eup %11551  ;;  %9341 = vmatprep.subr.bf16.mxu0 %v14788_v39  ;;  %9373 = vmatprep.subr.bf16.mxu1 %v14789_v30  ;;  %v1149_v29 = vmul.f32 %v11550_v10, %v11548_v50  ;;  %v14793_v10 = vld [vmem:[#allocation40_spill] sm:$0xff] }
 0x201   :  { %v1148_v41 = vmul.f32 0.0, %v11552_v20  ;;  %v11554_v3 = vpop.eup %11553  ;;  %v14794_v20 = vld [vmem:[#allocation41_spill] sm:$0xff] }
 0x203   :  { %v12964_v56 = vadd.f32 %v1149_v29, %v1148_v41  ;;  %9343 = vmatpush1.bf16.msra.mxu0 %v14790_v25  ;;  %9375 = vmatpush1.bf16.msra.mxu1 %v14791_v2  ;;  %v14796_v41 = vld [vmem:[#allocation43_spill] sm:$0xff]  ;;  %v14797_v29 = vld [vmem:[#allocation44_spill] sm:$0xff] }
 0x204   :  { %9345 = vmatprep.subr.bf16.mxu0 %v12827_v26  ;;  %9377 = vmatprep.subr.bf16.mxu1 %v14792_v60 }
 0x205   :  { %11555 = vtanh.f32 %v12964_v56 }
 0x207   :  { %9347 = vmatpush1.bf16.msra.mxu0 %v12833_v47  ;;  %9379 = vmatpush1.bf16.msra.mxu1 %v12837_v1 }
 0x208   :  { %9349 = vmatprep.subr.bf16.mxu0 %v12839_v55  ;;  %9381 = vmatprep.subr.bf16.mxu1 %v12842_v12 }
 0x20b   :  { %9351 = vmatpush1.bf16.msra.mxu0 %v12845_v18  ;;  %9383 = vmatpush1.bf16.msra.mxu1 %v12849_v9 }
 0x20c   :  { %9353 = vmatprep.subr.bf16.mxu0 %v12851_v19  ;;  %9385 = vmatprep.subr.bf16.mxu1 %v12854_v52 }
 0x20f   :  { %v11556_v54 = vpop.eup %11555  ;;  %9355 = vmatpush1.bf16.msra.mxu0 %v12857_v0  ;;  %9387 = vmatpush1.bf16.msra.mxu1 %v12861_v62 }
 0x210   :  { %v1152_v50 = vmul.f32 %v11556_v54, %v11554_v3  ;;  %9389 = vmatprep.subr.bf16.mxu0 %v12486_v11  ;;  %9421 = vmatprep.subr.bf16.mxu1 %v12497_v15  ;;  %v14798_v3 = vld [vmem:[#allocation45_spill] sm:$0xff]  ;;  %v14799_v54 = vld [vmem:[#allocation46_spill] sm:$0xff] }
 0x212   :  { %1154 = vst [vmem:[#allocation4 + $0x7] sm:$0x1] %v1152_v50  ;;  %1396 = vmatmul.mubr.f32.vlgmr.msra.gmra.mrb[10].mxu0 %v1152_v50  ;;  %1467 = vmatmul.mubr.f32.vlgmr.msra.gmra.mrb[10].mxu1 %v1152_v50  ;;  %v14800_v50 = vld [vmem:[#allocation47_spill] sm:$0xff] }
 0x213   :  { %9391 = vmatpush1.bf16.msra.mxu0 %v12514_v21  ;;  %9423 = vmatpush1.bf16.msra.mxu1 %v12517_v22 }
 0x214   :  { %9393 = vmatprep.subr.bf16.mxu0 %v12519_v23  ;;  %9425 = vmatprep.subr.bf16.mxu1 %v12531_v27 }
 0x215   :  { %1633 = vmatprep.mubr.f32.mxu0 %v14780_v5  ;;  %1704 = vmatprep.mubr.f32.mxu1 %v14780_v5 }
 0x217   :  { %9395 = vmatpush1.bf16.msra.mxu0 %v12551_v33  ;;  %9427 = vmatpush1.bf16.msra.mxu1 %v12555_v34 }
 0x218   :  { %9397 = vmatprep.subr.bf16.mxu0 %v12557_v35  ;;  %9429 = vmatprep.subr.bf16.mxu1 %v12569_v38 }
 0x21b   :  { %9399 = vmatpush1.bf16.msra.mxu0 %v12589_v44  ;;  %9431 = vmatpush1.bf16.msra.mxu1 %v12593_v45 }
 0x21c   :  { %9401 = vmatprep.subr.bf16.mxu0 %v12595_v46  ;;  %9433 = vmatprep.subr.bf16.mxu1 %v12607_v51 }
 0x21f   :  { %9403 = vmatpush1.bf16.msra.mxu0 %v12625_v57  ;;  %9435 = vmatpush1.bf16.msra.mxu1 %v12629_v58 }
 0x220   :  { %9405 = vmatprep.subr.bf16.mxu0 %v12631_v59  ;;  %9437 = vmatprep.subr.bf16.mxu1 %v12643_v63 }
 0x223   :  { %9407 = vmatpush1.bf16.msra.mxu0 %v12661_v6  ;;  %9439 = vmatpush1.bf16.msra.mxu1 %v12665_v7  ;;  %v14801_v7 = vld [vmem:[#allocation48_spill] sm:$0xff] }
 0x224   :  { %9409 = vmatprep.subr.bf16.mxu0 %v12667_v8  ;;  %9441 = vmatprep.subr.bf16.mxu1 %v12679_v13  ;;  %v14802_v8 = vld [vmem:[#allocation49_spill] sm:$0xff]  ;;  %v14803_v13 = vld [vmem:[#allocation50_spill] sm:$0xff] }
 0x227   :  { %9411 = vmatpush1.bf16.msra.mxu0 %v14793_v10  ;;  %9443 = vmatpush1.bf16.msra.mxu1 %v14794_v20  ;;  %v14804_v10 = vld [vmem:[#allocation51_spill] sm:$0xff] }
 0x228   :  { %9413 = vmatprep.subr.bf16.mxu0 %v14795_v48  ;;  %9445 = vmatprep.subr.bf16.mxu1 %v14796_v41 }
 0x22b   :  { %9415 = vmatpush1.bf16.msra.mxu0 %v14797_v29  ;;  %9447 = vmatpush1.bf16.msra.mxu1 %v14798_v3 }
 0x22c   :  { %9417 = vmatprep.subr.bf16.mxu0 %v14799_v54  ;;  %9449 = vmatprep.subr.bf16.mxu1 %v14800_v50 }
 0x22f   :  { %9419 = vmatpush1.bf16.msra.mxu0 %v14801_v7  ;;  %9451 = vmatpush1.bf16.msra.mxu1 %v14802_v8  ;;  %v1156_v7 = vld [vmem:[#allocation2 + $0x1] ss:$8 sm:$0xf] }
 0x230   :  { %9453 = vmatprep.subr.bf16.mxu0 %v14803_v13  ;;  %9485 = vmatprep.subr.bf16.mxu1 %v14804_v10 }
 0x2c5   :  { %v1223_v20 = vpop.f32.mrb[8].mxu0  ;;  %v1294_v48 = vpop.f32.mrb[8].mxu1 }
 0x2c6   :  { %v1225_v6 = vpop.f32.mrb[9].mxu0  ;;  %v1296_v41 = vpop.f32.mrb[9].mxu1 }
 0x2c7   :  { %v1303_v63 = vcombine.low %v1223_v20, %v1225_v6  ;;  %v1304_v29 = vcombine.low %v1294_v48, %v1296_v41 }
 0x2c9   :  { %v1311_v3 = vrot.slane %v1303_v63, %v12935_v31  ;;  %v1318_v54 = vrot.slane %v1304_v29, %v12935_v31 }
 0x2cb   :  { %v1319_v59 = vcombine.low %v1311_v3, %v1318_v54 }
 0x2cd   :  { %v1326_v50 = vrot.slane %v1319_v59, %v12935_v31 }
 0x2cf   :  { %v1328_v58 = vadd.f32 %v1326_v50, %v1156_v7 }
 0x2d1   :  { %v8817_v8 = vmul.f32 -1.442695, %v1328_v58  ;;  %v1510_v57 = vrot.slane %v1328_v58, 1  ;;  %v1521_v10 = vrot.slane %v1328_v58, 3  ;;  %v1518_v45 = vrot.slane %v1328_v58, 2 }
 0x2d3   :  { %11557 = vpow2.f32 %v8817_v8  ;;  %v8818_v13 = vmul.f32 -1.442695, %v1510_v57  ;;  %v8819_v51 = vmul.f32 -1.442695, %v1521_v10 }
 0x2d5   :  { %11559 = vpow2.f32 %v8818_v13 }
 0x2d6   :  { %11561 = vpow2.f32 %v8819_v51 }
 0x2dd   :  { %v11558_v46 = vpop.eup %11557 }
 0x2de   :  { %v1506_v6 = vadd.f32 1.0, %v11558_v46 }
 0x2df   :  { %v11560_v20 = vpop.eup %11559 }
 0x2e0   :  { %11563 = vrcp.f32 %v1506_v6  ;;  %v1515_v63 = vadd.f32 1.0, %v11560_v20  ;;  %v11562_v8 = vpop.eup %11561  ;;  %v1330_v20 = vld [vmem:[#allocation2 + $0x26] ss:$8 sm:$0xf] }
 0x2e1   :  { %11565 = vtanh.f32 %v1518_v45  ;;  %v1526_v50 = vadd.f32 1.0, %v11562_v8 }
 0x2e2   :  { %11567 = vrcp.f32 %v1515_v63 }
 0x2e3   :  { %11569 = vrcp.f32 %v1526_v50 }
 0x2e5   :  { %v1397_v48 = vpop.f32.mrb[10].mxu0  ;;  %v1468_v59 = vpop.f32.mrb[10].mxu1 }
 0x2e6   :  { %v1399_v41 = vpop.f32.mrb[11].mxu0  ;;  %v1470_v7 = vpop.f32.mrb[11].mxu1 }
 0x2e7   :  { %v1477_v29 = vcombine.low %v1397_v48, %v1399_v41  ;;  %v1478_v3 = vcombine.low %v1468_v59, %v1470_v7 }
 0x2e9   :  { %v1485_v57 = vrot.slane %v1477_v29, %v12935_v31  ;;  %v1492_v13 = vrot.slane %v1478_v3, %v12935_v31 }
 0x2ea   :  { %v11564_v10 = vpop.eup %11563 }
 0x2eb   :  { %v11566_v58 = vpop.eup %11565  ;;  %v1493_v46 = vcombine.low %v1485_v57, %v1492_v13 }
 0x2ec   :  { %v11568_v54 = vpop.eup %11567  ;;  %v1530_v6 = vmul.f32 %v11566_v58, %v11564_v10 }
 0x2ed   :  { %v1500_v51 = vrot.slane %v1493_v46, %v12935_v31  ;;  %v1529_v45 = vmul.f32 %v11568_v54, %v12943_v36  ;;  %v11570_v29 = vpop.eup %11569 }
 0x2ef   :  { %v1502_v63 = vadd.f32 %v1500_v51, %v1330_v20  ;;  %v13024_v44 = vadd.f32 %v1530_v6, %v1529_v45 }
 0x2f1   :  { %v8820_v48 = vmul.f32 -1.442695, %v1502_v63  ;;  %v1541_v59 = vrot.slane %v1502_v63, 1  ;;  %11571 = vtanh.f32 %v13024_v44  ;;  %v1552_v7 = vrot.slane %v1502_v63, 3 }
 0x2f2   :  { %v1549_v13 = vrot.slane %v1502_v63, 2 }
 0x2f3   :  { %11573 = vpow2.f32 %v8820_v48  ;;  %v8821_v41 = vmul.f32 -1.442695, %v1541_v59  ;;  %v8822_v3 = vmul.f32 -1.442695, %v1552_v7  ;;  %v14805_v7 = vld [vmem:[#allocation28_spill] sm:$0xff] }
 0x2f5   :  { %11575 = vpow2.f32 %v8821_v41 }
 0x2f6   :  { %11577 = vpow2.f32 %v8822_v3  ;;  %v14807_v3 = vld [vmem:[#allocation30_spill] sm:$0xff] }
 0x2fb   :  { %v11572_v57 = vpop.eup %11571 }
 0x2fc   :  { %v1533_v36 = vmul.f32 %v11572_v57, %v11570_v29  ;;  %v14806_v29 = vld [vmem:[#allocation29_spill] sm:$0xff]  ;;  %v14808_v57 = vld [vmem:[#allocation31_spill] sm:$0xff] }
 0x2fd   :  { %v11574_v8 = vpop.eup %11573 }
 0x2fe   :  { %v1537_v10 = vadd.f32 1.0, %v11574_v8  ;;  %1565 = vst [vmem:[#allocation3 + $0x1] sm:$0x1] %v1533_v36  ;;  %1634 = vmatmul.mubr.f32.vlgmr.msra.gmra.mrb[12].mxu0 %v1533_v36  ;;  %1705 = vmatmul.mubr.f32.vlgmr.msra.gmra.mrb[12].mxu1 %v1533_v36  ;;  %v14809_v8 = vld [vmem:[#allocation32_spill] sm:$0xff]  ;;  %v14811_v36 = vld [vmem:[#allocation34_spill] sm:$0xff] }
 0x2ff   :  { %v11576_v58 = vpop.eup %11575  ;;  %9455 = vmatpush1.bf16.msra.mxu0 %v12769_v14  ;;  %9487 = vmatpush1.bf16.msra.mxu1 %v12773_v16 }
 0x300   :  { %11579 = vrcp.f32 %v1537_v10  ;;  %v1546_v46 = vadd.f32 1.0, %v11576_v58  ;;  %9457 = vmatprep.subr.bf16.mxu0 %v12775_v17  ;;  %9489 = vmatprep.subr.bf16.mxu1 %v12778_v28  ;;  %v11578_v54 = vpop.eup %11577  ;;  %v14812_v10 = vld [vmem:[#allocation35_spill] sm:$0xff]  ;;  %v14813_v58 = vld [vmem:[#allocation36_spill] sm:$0xff] }
 0x301   :  { %11581 = vtanh.f32 %v1549_v13  ;;  %1807 = vmatprep.mubr.f32.mxu0 %v14780_v5  ;;  %1878 = vmatprep.mubr.f32.mxu1 %v14780_v5  ;;  %v1557_v6 = vadd.f32 1.0, %v11578_v54  ;;  %v14810_v13 = vld [vmem:[#allocation33_spill] sm:$0xff]  ;;  %v14815_v54 = vld [vmem:[#allocation38_spill] sm:$0xff] }
 0x302   :  { %11583 = vrcp.f32 %v1546_v46  ;;  %v14814_v46 = vld [vmem:[#allocation37_spill] sm:$0xff] }
 0x303   :  { %9459 = vmatpush1.bf16.msra.mxu0 %v12783_v37  ;;  %9491 = vmatpush1.bf16.msra.mxu1 %v12787_v42  ;;  %11585 = vrcp.f32 %v1557_v6  ;;  %v14819_v6 = vld [vmem:[#allocation42_spill] sm:$0xff] }
 0x304   :  { %9461 = vmatprep.subr.bf16.mxu0 %v12789_v43  ;;  %9493 = vmatprep.subr.bf16.mxu1 %v12792_v53 }
 0x307   :  { %9463 = vmatpush1.bf16.msra.mxu0 %v12797_v4  ;;  %9495 = vmatpush1.bf16.msra.mxu1 %v14783_v32 }
 0x308   :  { %9465 = vmatprep.subr.bf16.mxu0 %v14784_v24  ;;  %9497 = vmatprep.subr.bf16.mxu1 %v14785_v49 }
 0x30a   :  { %v11580_v51 = vpop.eup %11579 }
 0x30b   :  { %v11582_v50 = vpop.eup %11581  ;;  %9467 = vmatpush1.bf16.msra.mxu0 %v14786_v61  ;;  %9499 = vmatpush1.bf16.msra.mxu1 %v14787_v40 }
 0x30c   :  { %v11584_v45 = vpop.eup %11583  ;;  %9469 = vmatprep.subr.bf16.mxu0 %v14788_v39  ;;  %9501 = vmatprep.subr.bf16.mxu1 %v14789_v30  ;;  %v1561_v63 = vmul.f32 %v11582_v50, %v11580_v51  ;;  %v14816_v51 = vld [vmem:[#allocation39_spill] sm:$0xff]  ;;  %v14817_v50 = vld [vmem:[#allocation40_spill] sm:$0xff] }
 0x30d   :  { %v1560_v20 = vmul.f32 %v11584_v45, %v12964_v56  ;;  %v11586_v56 = vpop.eup %11585  ;;  %v14818_v45 = vld [vmem:[#allocation41_spill] sm:$0xff] }
 0x30f   :  { %v13046_v48 = vadd.f32 %v1561_v63, %v1560_v20  ;;  %9471 = vmatpush1.bf16.msra.mxu0 %v14790_v25  ;;  %9503 = vmatpush1.bf16.msra.mxu1 %v14791_v2  ;;  %v14820_v20 = vld [vmem:[#allocation43_spill] sm:$0xff]  ;;  %v14821_v63 = vld [vmem:[#allocation44_spill] sm:$0xff] }
 0x310   :  { %9473 = vmatprep.subr.bf16.mxu0 %v12827_v26  ;;  %9505 = vmatprep.subr.bf16.mxu1 %v14792_v60 }
 0x311   :  { %11587 = vtanh.f32 %v13046_v48 }
 0x313   :  { %9475 = vmatpush1.bf16.msra.mxu0 %v12833_v47  ;;  %9507 = vmatpush1.bf16.msra.mxu1 %v12837_v1 }
 0x314   :  { %9477 = vmatprep.subr.bf16.mxu0 %v12839_v55  ;;  %9509 = vmatprep.subr.bf16.mxu1 %v12842_v12 }
 0x317   :  { %9479 = vmatpush1.bf16.msra.mxu0 %v12845_v18  ;;  %9511 = vmatpush1.bf16.msra.mxu1 %v12849_v9 }
 0x318   :  { %9481 = vmatprep.subr.bf16.mxu0 %v12851_v19  ;;  %9513 = vmatprep.subr.bf16.mxu1 %v12854_v52 }
 0x31b   :  { %v11588_v59 = vpop.eup %11587  ;;  %9483 = vmatpush1.bf16.msra.mxu0 %v12857_v0  ;;  %9515 = vmatpush1.bf16.msra.mxu1 %v12861_v62 }
 0x31c   :  { %v1564_v41 = vmul.f32 %v11588_v59, %v11586_v56  ;;  %9517 = vmatprep.subr.bf16.mxu0 %v12486_v11  ;;  %9549 = vmatprep.subr.bf16.mxu1 %v12497_v15  ;;  %v14822_v56 = vld [vmem:[#allocation45_spill] sm:$0xff]  ;;  %v14823_v59 = vld [vmem:[#allocation46_spill] sm:$0xff] }
 0x31e   :  { %1566 = vst [vmem:[#allocation4 + $0x6] sm:$0x1] %v1564_v41  ;;  %1808 = vmatmul.mubr.f32.vlgmr.msra.gmra.mrb[14].mxu0 %v1564_v41  ;;  %1879 = vmatmul.mubr.f32.vlgmr.msra.gmra.mrb[14].mxu1 %v1564_v41  ;;  %v14824_v41 = vld [vmem:[#allocation47_spill] sm:$0xff] }
 0x31f   :  { %9519 = vmatpush1.bf16.msra.mxu0 %v12514_v21  ;;  %9551 = vmatpush1.bf16.msra.mxu1 %v12517_v22 }
 0x320   :  { %9521 = vmatprep.subr.bf16.mxu0 %v12519_v23  ;;  %9553 = vmatprep.subr.bf16.mxu1 %v12531_v27 }
 0x321   :  { %2045 = vmatprep.mubr.f32.mxu0 %v14780_v5  ;;  %2116 = vmatprep.mubr.f32.mxu1 %v14780_v5 }
 0x323   :  { %9523 = vmatpush1.bf16.msra.mxu0 %v12551_v33  ;;  %9555 = vmatpush1.bf16.msra.mxu1 %v12555_v34 }
 0x324   :  { %9525 = vmatprep.subr.bf16.mxu0 %v12557_v35  ;;  %9557 = vmatprep.subr.bf16.mxu1 %v12569_v38 }
 0x327   :  { %9527 = vmatpush1.bf16.msra.mxu0 %v14805_v7  ;;  %9559 = vmatpush1.bf16.msra.mxu1 %v14806_v29 }
 0x328   :  { %9529 = vmatprep.subr.bf16.mxu0 %v14807_v3  ;;  %9561 = vmatprep.subr.bf16.mxu1 %v14808_v57 }
 0x32b   :  { %9531 = vmatpush1.bf16.msra.mxu0 %v14809_v8  ;;  %9563 = vmatpush1.bf16.msra.mxu1 %v14810_v13 }
 0x32c   :  { %9533 = vmatprep.subr.bf16.mxu0 %v14811_v36  ;;  %9565 = vmatprep.subr.bf16.mxu1 %v14812_v10 }
 0x32f   :  { %9535 = vmatpush1.bf16.msra.mxu0 %v14813_v58  ;;  %9567 = vmatpush1.bf16.msra.mxu1 %v14814_v46  ;;  %v14825_v46 = vld [vmem:[#allocation48_spill] sm:$0xff] }
 0x330   :  { %9537 = vmatprep.subr.bf16.mxu0 %v14815_v54  ;;  %9569 = vmatprep.subr.bf16.mxu1 %v14816_v51  ;;  %v14826_v54 = vld [vmem:[#allocation49_spill] sm:$0xff]  ;;  %v14827_v51 = vld [vmem:[#allocation50_spill] sm:$0xff] }
 0x333   :  { %9539 = vmatpush1.bf16.msra.mxu0 %v14817_v50  ;;  %9571 = vmatpush1.bf16.msra.mxu1 %v14818_v45  ;;  %v14828_v50 = vld [vmem:[#allocation51_spill] sm:$0xff] }
 0x334   :  { %9541 = vmatprep.subr.bf16.mxu0 %v14819_v6  ;;  %9573 = vmatprep.subr.bf16.mxu1 %v14820_v20 }
 0x337   :  { %9543 = vmatpush1.bf16.msra.mxu0 %v14821_v63  ;;  %9575 = vmatpush1.bf16.msra.mxu1 %v14822_v56 }
 0x338   :  { %9545 = vmatprep.subr.bf16.mxu0 %v14823_v59  ;;  %9577 = vmatprep.subr.bf16.mxu1 %v14824_v41 }
 0x33b   :  { %9547 = vmatpush1.bf16.msra.mxu0 %v14825_v46  ;;  %9579 = vmatpush1.bf16.msra.mxu1 %v14826_v54  ;;  %v1568_v46 = vld [vmem:[#allocation2 + $0x2] ss:$8 sm:$0xf] }
 0x33c   :  { %9581 = vmatprep.subr.bf16.mxu0 %v14827_v51  ;;  %9613 = vmatprep.subr.bf16.mxu1 %v14828_v50 }
 0x3d1   :  { %v1635_v45 = vpop.f32.mrb[12].mxu0  ;;  %v1706_v6 = vpop.f32.mrb[12].mxu1 }
 0x3d2   :  { %v1637_v58 = vpop.f32.mrb[13].mxu0  ;;  %v1708_v20 = vpop.f32.mrb[13].mxu1 }
 0x3d3   :  { %v1715_v10 = vcombine.low %v1635_v45, %v1637_v58  ;;  %v1716_v63 = vcombine.low %v1706_v6, %v1708_v20 }
 0x3d5   :  { %v1723_v56 = vrot.slane %v1715_v10, %v12935_v31  ;;  %v1730_v59 = vrot.slane %v1716_v63, %v12935_v31 }
 0x3d7   :  { %v1731_v36 = vcombine.low %v1723_v56, %v1730_v59 }
 0x3d9   :  { %v1738_v41 = vrot.slane %v1731_v36, %v12935_v31 }
 0x3db   :  { %v1740_v13 = vadd.f32 %v1738_v41, %v1568_v46 }
 0x3dd   :  { %v8823_v54 = vmul.f32 -1.442695, %v1740_v13  ;;  %v1922_v8 = vrot.slane %v1740_v13, 1  ;;  %v1933_v50 = vrot.slane %v1740_v13, 3  ;;  %v1930_v29 = vrot.slane %v1740_v13, 2 }
 0x3df   :  { %11589 = vpow2.f32 %v8823_v54  ;;  %v8824_v51 = vmul.f32 -1.442695, %v1922_v8  ;;  %v8825_v57 = vmul.f32 -1.442695, %v1933_v50 }
 0x3e1   :  { %11591 = vpow2.f32 %v8824_v51 }
 0x3e2   :  { %11593 = vpow2.f32 %v8825_v57 }
 0x3e9   :  { %v11590_v3 = vpop.eup %11589 }
 0x3ea   :  { %v1918_v58 = vadd.f32 1.0, %v11590_v3 }
 0x3eb   :  { %v11592_v45 = vpop.eup %11591 }
 0x3ec   :  { %11595 = vrcp.f32 %v1918_v58  ;;  %v1927_v10 = vadd.f32 1.0, %v11592_v45  ;;  %v11594_v54 = vpop.eup %11593  ;;  %v1742_v45 = vld [vmem:[#allocation2 + $0x25] ss:$8 sm:$0xf] }
 0x3ed   :  { %11597 = vtanh.f32 %v1930_v29  ;;  %v1938_v41 = vadd.f32 1.0, %v11594_v54 }
 0x3ee   :  { %11599 = vrcp.f32 %v1927_v10 }
 0x3ef   :  { %11601 = vrcp.f32 %v1938_v41 }
 0x3f1   :  { %v1809_v6 = vpop.f32.mrb[14].mxu0  ;;  %v1880_v36 = vpop.f32.mrb[14].mxu1 }
 0x3f2   :  { %v1811_v20 = vpop.f32.mrb[15].mxu0  ;;  %v1882_v46 = vpop.f32.mrb[15].mxu1 }
 0x3f3   :  { %v1889_v63 = vcombine.low %v1809_v6, %v1811_v20  ;;  %v1890_v56 = vcombine.low %v1880_v36, %v1882_v46 }
 0x3f5   :  { %v1897_v8 = vrot.slane %v1889_v63, %v12935_v31  ;;  %v1904_v51 = vrot.slane %v1890_v56, %v12935_v31 }
 0x3f6   :  { %v11596_v50 = vpop.eup %11595 }
 0x3f7   :  { %v11598_v13 = vpop.eup %11597  ;;  %v1905_v3 = vcombine.low %v1897_v8, %v1904_v51 }
 0x3f8   :  { %v11600_v59 = vpop.eup %11599  ;;  %v1942_v58 = vmul.f32 %v11598_v13, %v11596_v50 }
 0x3f9   :  { %v1912_v57 = vrot.slane %v1905_v3, %v12935_v31  ;;  %v1941_v29 = vmul.f32 %v11600_v59, %v13024_v44  ;;  %v11602_v63 = vpop.eup %11601 }
 0x3fb   :  { %v1914_v10 = vadd.f32 %v1912_v57, %v1742_v45  ;;  %v13106_v7 = vadd.f32 %v1942_v58, %v1941_v29 }
 0x3fd   :  { %v8826_v6 = vmul.f32 -1.442695, %v1914_v10  ;;  %v1953_v36 = vrot.slane %v1914_v10, 1  ;;  %11603 = vtanh.f32 %v13106_v7  ;;  %v1964_v46 = vrot.slane %v1914_v10, 3 }
 0x3fe   :  { %v1961_v51 = vrot.slane %v1914_v10, 2 }
 0x3ff   :  { %11605 = vpow2.f32 %v8826_v6  ;;  %v8827_v20 = vmul.f32 -1.442695, %v1953_v36  ;;  %v8828_v56 = vmul.f32 -1.442695, %v1964_v46  ;;  %v14829_v46 = vld [vmem:[#allocation28_spill] sm:$0xff] }
 0x401   :  { %11607 = vpow2.f32 %v8827_v20 }
 0x402   :  { %11609 = vpow2.f32 %v8828_v56  ;;  %v14831_v56 = vld [vmem:[#allocation30_spill] sm:$0xff] }
 0x407   :  { %v11604_v8 = vpop.eup %11603 }
 0x408   :  { %v1945_v44 = vmul.f32 %v11604_v8, %v11602_v63  ;;  %v14830_v63 = vld [vmem:[#allocation29_spill] sm:$0xff]  ;;  %v14832_v8 = vld [vmem:[#allocation31_spill] sm:$0xff] }
 0x409   :  { %v11606_v54 = vpop.eup %11605 }
 0x40a   :  { %v1949_v50 = vadd.f32 1.0, %v11606_v54  ;;  %1977 = vst [vmem:[#allocation3 + $0x2] sm:$0x1] %v1945_v44  ;;  %2046 = vmatmul.mubr.f32.vlgmr.msra.gmra.mrb[16].mxu0 %v1945_v44  ;;  %2117 = vmatmul.mubr.f32.vlgmr.msra.gmra.mrb[16].mxu1 %v1945_v44  ;;  %v14833_v54 = vld [vmem:[#allocation32_spill] sm:$0xff]  ;;  %v14835_v44 = vld [vmem:[#allocation34_spill] sm:$0xff] }
 0x40b   :  { %v11608_v13 = vpop.eup %11607  ;;  %9583 = vmatpush1.bf16.msra.mxu0 %v12769_v14  ;;  %9615 = vmatpush1.bf16.msra.mxu1 %v12773_v16 }
 0x40c   :  { %11611 = vrcp.f32 %v1949_v50  ;;  %v1958_v3 = vadd.f32 1.0, %v11608_v13  ;;  %9585 = vmatprep.subr.bf16.mxu0 %v12775_v17  ;;  %9617 = vmatprep.subr.bf16.mxu1 %v12778_v28  ;;  %v11610_v59 = vpop.eup %11609  ;;  %v14836_v50 = vld [vmem:[#allocation35_spill] sm:$0xff]  ;;  %v14837_v13 = vld [vmem:[#allocation36_spill] sm:$0xff] }
 0x40d   :  { %11613 = vtanh.f32 %v1961_v51  ;;  %2219 = vmatprep.mubr.f32.mxu0 %v14780_v5  ;;  %2290 = vmatprep.mubr.f32.mxu1 %v14780_v5  ;;  %v1969_v58 = vadd.f32 1.0, %v11610_v59  ;;  %v14834_v51 = vld [vmem:[#allocation33_spill] sm:$0xff]  ;;  %v14839_v59 = vld [vmem:[#allocation38_spill] sm:$0xff] }
 0x40e   :  { %11615 = vrcp.f32 %v1958_v3  ;;  %v14838_v3 = vld [vmem:[#allocation37_spill] sm:$0xff] }
 0x40f   :  { %9587 = vmatpush1.bf16.msra.mxu0 %v12783_v37  ;;  %9619 = vmatpush1.bf16.msra.mxu1 %v12787_v42  ;;  %11617 = vrcp.f32 %v1969_v58  ;;  %v14843_v58 = vld [vmem:[#allocation42_spill] sm:$0xff] }
 0x410   :  { %9589 = vmatprep.subr.bf16.mxu0 %v12789_v43  ;;  %9621 = vmatprep.subr.bf16.mxu1 %v12792_v53 }
 0x413   :  { %9591 = vmatpush1.bf16.msra.mxu0 %v12797_v4  ;;  %9623 = vmatpush1.bf16.msra.mxu1 %v14783_v32 }
 0x414   :  { %9593 = vmatprep.subr.bf16.mxu0 %v14784_v24  ;;  %9625 = vmatprep.subr.bf16.mxu1 %v14785_v49 }
 0x416   :  { %v11612_v57 = vpop.eup %11611 }
 0x417   :  { %v11614_v41 = vpop.eup %11613  ;;  %9595 = vmatpush1.bf16.msra.mxu0 %v14786_v61  ;;  %9627 = vmatpush1.bf16.msra.mxu1 %v14787_v40 }
 0x418   :  { %v11616_v29 = vpop.eup %11615  ;;  %9597 = vmatprep.subr.bf16.mxu0 %v14788_v39  ;;  %9629 = vmatprep.subr.bf16.mxu1 %v14789_v30  ;;  %v1973_v10 = vmul.f32 %v11614_v41, %v11612_v57  ;;  %v14840_v57 = vld [vmem:[#allocation39_spill] sm:$0xff]  ;;  %v14841_v41 = vld [vmem:[#allocation40_spill] sm:$0xff] }
 0x419   :  { %v1972_v45 = vmul.f32 %v11616_v29, %v13046_v48  ;;  %v11618_v48 = vpop.eup %11617  ;;  %v14842_v29 = vld [vmem:[#allocation41_spill] sm:$0xff] }
 0x41b   :  { %v13128_v6 = vadd.f32 %v1973_v10, %v1972_v45  ;;  %9599 = vmatpush1.bf16.msra.mxu0 %v14790_v25  ;;  %9631 = vmatpush1.bf16.msra.mxu1 %v14791_v2  ;;  %v14844_v45 = vld [vmem:[#allocation43_spill] sm:$0xff]  ;;  %v14845_v10 = vld [vmem:[#allocation44_spill] sm:$0xff] }
 0x41c   :  { %9601 = vmatprep.subr.bf16.mxu0 %v12827_v26  ;;  %9633 = vmatprep.subr.bf16.mxu1 %v14792_v60 }
 0x41d   :  { %11619 = vtanh.f32 %v13128_v6 }
 0x41f   :  { %9603 = vmatpush1.bf16.msra.mxu0 %v12833_v47  ;;  %9635 = vmatpush1.bf16.msra.mxu1 %v12837_v1 }
 0x420   :  { %9605 = vmatprep.subr.bf16.mxu0 %v12839_v55  ;;  %9637 = vmatprep.subr.bf16.mxu1 %v12842_v12 }
 0x423   :  { %9607 = vmatpush1.bf16.msra.mxu0 %v12845_v18  ;;  %9639 = vmatpush1.bf16.msra.mxu1 %v12849_v9 }
 0x424   :  { %9609 = vmatprep.subr.bf16.mxu0 %v12851_v19  ;;  %9641 = vmatprep.subr.bf16.mxu1 %v12854_v52 }
 0x427   :  { %v11620_v36 = vpop.eup %11619  ;;  %9611 = vmatpush1.bf16.msra.mxu0 %v12857_v0  ;;  %9643 = vmatpush1.bf16.msra.mxu1 %v12861_v62 }
 0x428   :  { %v1976_v20 = vmul.f32 %v11620_v36, %v11618_v48  ;;  %9645 = vmatprep.subr.bf16.mxu0 %v12486_v11  ;;  %9677 = vmatprep.subr.bf16.mxu1 %v12497_v15  ;;  %v14846_v48 = vld [vmem:[#allocation45_spill] sm:$0xff]  ;;  %v14847_v36 = vld [vmem:[#allocation46_spill] sm:$0xff] }
 0x42a   :  { %1978 = vst [vmem:[#allocation4 + $0x5] sm:$0x1] %v1976_v20  ;;  %2220 = vmatmul.mubr.f32.vlgmr.msra.gmra.mrb[18].mxu0 %v1976_v20  ;;  %2291 = vmatmul.mubr.f32.vlgmr.msra.gmra.mrb[18].mxu1 %v1976_v20  ;;  %v14848_v20 = vld [vmem:[#allocation47_spill] sm:$0xff] }
 0x42b   :  { %9647 = vmatpush1.bf16.msra.mxu0 %v12514_v21  ;;  %9679 = vmatpush1.bf16.msra.mxu1 %v12517_v22 }
 0x42c   :  { %9649 = vmatprep.subr.bf16.mxu0 %v12519_v23  ;;  %9681 = vmatprep.subr.bf16.mxu1 %v12531_v27 }
 0x42d   :  { %2457 = vmatprep.mubr.f32.mxu0 %v14780_v5  ;;  %2528 = vmatprep.mubr.f32.mxu1 %v14780_v5 }
 0x42f   :  { %9651 = vmatpush1.bf16.msra.mxu0 %v12551_v33  ;;  %9683 = vmatpush1.bf16.msra.mxu1 %v12555_v34 }
 0x430   :  { %9653 = vmatprep.subr.bf16.mxu0 %v12557_v35  ;;  %9685 = vmatprep.subr.bf16.mxu1 %v12569_v38 }
 0x433   :  { %9655 = vmatpush1.bf16.msra.mxu0 %v14829_v46  ;;  %9687 = vmatpush1.bf16.msra.mxu1 %v14830_v63 }
 0x434   :  { %9657 = vmatprep.subr.bf16.mxu0 %v14831_v56  ;;  %9689 = vmatprep.subr.bf16.mxu1 %v14832_v8 }
 0x437   :  { %9659 = vmatpush1.bf16.msra.mxu0 %v14833_v54  ;;  %9691 = vmatpush1.bf16.msra.mxu1 %v14834_v51 }
 0x438   :  { %9661 = vmatprep.subr.bf16.mxu0 %v14835_v44  ;;  %9693 = vmatprep.subr.bf16.mxu1 %v14836_v50 }
 0x43b   :  { %9663 = vmatpush1.bf16.msra.mxu0 %v14837_v13  ;;  %9695 = vmatpush1.bf16.msra.mxu1 %v14838_v3  ;;  %v14849_v3 = vld [vmem:[#allocation48_spill] sm:$0xff] }
 0x43c   :  { %9665 = vmatprep.subr.bf16.mxu0 %v14839_v59  ;;  %9697 = vmatprep.subr.bf16.mxu1 %v14840_v57  ;;  %v14850_v59 = vld [vmem:[#allocation49_spill] sm:$0xff]  ;;  %v14851_v57 = vld [vmem:[#allocation50_spill] sm:$0xff] }
 0x43f   :  { %9667 = vmatpush1.bf16.msra.mxu0 %v14841_v41  ;;  %9699 = vmatpush1.bf16.msra.mxu1 %v14842_v29  ;;  %v14852_v41 = vld [vmem:[#allocation51_spill] sm:$0xff] }
 0x440   :  { %9669 = vmatprep.subr.bf16.mxu0 %v14843_v58  ;;  %9701 = vmatprep.subr.bf16.mxu1 %v14844_v45 }
 0x443   :  { %9671 = vmatpush1.bf16.msra.mxu0 %v14845_v10  ;;  %9703 = vmatpush1.bf16.msra.mxu1 %v14846_v48 }
 0x444   :  { %9673 = vmatprep.subr.bf16.mxu0 %v14847_v36  ;;  %9705 = vmatprep.subr.bf16.mxu1 %v14848_v20 }
 0x447   :  { %9675 = vmatpush1.bf16.msra.mxu0 %v14849_v3  ;;  %9707 = vmatpush1.bf16.msra.mxu1 %v14850_v59  ;;  %v1980_v3 = vld [vmem:[#allocation2 + $0x3] ss:$8 sm:$0xf] }
 0x448   :  { %9709 = vmatprep.subr.bf16.mxu0 %v14851_v57  ;;  %9741 = vmatprep.subr.bf16.mxu1 %v14852_v41 }
 0x4dd   :  { %v2047_v29 = vpop.f32.mrb[16].mxu0  ;;  %v2118_v58 = vpop.f32.mrb[16].mxu1 }
 0x4de   :  { %v2049_v13 = vpop.f32.mrb[17].mxu0  ;;  %v2120_v45 = vpop.f32.mrb[17].mxu1 }
 0x4df   :  { %v2127_v50 = vcombine.low %v2047_v29, %v2049_v13  ;;  %v2128_v10 = vcombine.low %v2118_v58, %v2120_v45 }
 0x4e1   :  { %v2135_v48 = vrot.slane %v2127_v50, %v12935_v31  ;;  %v2142_v36 = vrot.slane %v2128_v10, %v12935_v31 }
 0x4e3   :  { %v2143_v44 = vcombine.low %v2135_v48, %v2142_v36 }
 0x4e5   :  { %v2150_v20 = vrot.slane %v2143_v44, %v12935_v31 }
 0x4e7   :  { %v2152_v51 = vadd.f32 %v2150_v20, %v1980_v3 }
 0x4e9   :  { %v8829_v59 = vmul.f32 -1.442695, %v2152_v51  ;;  %v2334_v54 = vrot.slane %v2152_v51, 1  ;;  %v2345_v41 = vrot.slane %v2152_v51, 3  ;;  %v2342_v63 = vrot.slane %v2152_v51, 2 }
 0x4eb   :  { %11621 = vpow2.f32 %v8829_v59  ;;  %v8830_v57 = vmul.f32 -1.442695, %v2334_v54  ;;  %v8831_v8 = vmul.f32 -1.442695, %v2345_v41 }
 0x4ed   :  { %11623 = vpow2.f32 %v8830_v57 }
 0x4ee   :  { %11625 = vpow2.f32 %v8831_v8 }
 0x4f5   :  { %v11622_v56 = vpop.eup %11621 }
 0x4f6   :  { %v2330_v13 = vadd.f32 1.0, %v11622_v56 }
 0x4f7   :  { %v11624_v29 = vpop.eup %11623 }
 0x4f8   :  { %11627 = vrcp.f32 %v2330_v13  ;;  %v2339_v50 = vadd.f32 1.0, %v11624_v29  ;;  %v11626_v59 = vpop.eup %11625  ;;  %v2154_v29 = vld [vmem:[#allocation2 + $0x24] ss:$8 sm:$0xf] }
 0x4f9   :  { %11629 = vtanh.f32 %v2342_v63  ;;  %v2350_v20 = vadd.f32 1.0, %v11626_v59 }
 0x4fa   :  { %11631 = vrcp.f32 %v2339_v50 }
 0x4fb   :  { %11633 = vrcp.f32 %v2350_v20 }
 0x4fd   :  { %v2221_v58 = vpop.f32.mrb[18].mxu0  ;;  %v2292_v44 = vpop.f32.mrb[18].mxu1 }
 0x4fe   :  { %v2223_v45 = vpop.f32.mrb[19].mxu0  ;;  %v2294_v3 = vpop.f32.mrb[19].mxu1 }
 0x4ff   :  { %v2301_v10 = vcombine.low %v2221_v58, %v2223_v45  ;;  %v2302_v48 = vcombine.low %v2292_v44, %v2294_v3 }
 0x501   :  { %v2309_v54 = vrot.slane %v2301_v10, %v12935_v31  ;;  %v2316_v57 = vrot.slane %v2302_v48, %v12935_v31 }
 0x502   :  { %v11628_v41 = vpop.eup %11627 }
 0x503   :  { %v11630_v51 = vpop.eup %11629  ;;  %v2317_v56 = vcombine.low %v2309_v54, %v2316_v57 }
 0x504   :  { %v11632_v36 = vpop.eup %11631  ;;  %v2354_v13 = vmul.f32 %v11630_v51, %v11628_v41 }
 0x505   :  { %v2324_v8 = vrot.slane %v2317_v56, %v12935_v31  ;;  %v2353_v63 = vmul.f32 %v11632_v36, %v13106_v7  ;;  %v11634_v10 = vpop.eup %11633 }
 0x507   :  { %v2326_v50 = vadd.f32 %v2324_v8, %v2154_v29  ;;  %v13188_v46 = vadd.f32 %v2354_v13, %v2353_v63 }
 0x509   :  { %v8832_v58 = vmul.f32 -1.442695, %v2326_v50  ;;  %v2365_v44 = vrot.slane %v2326_v50, 1  ;;  %11635 = vtanh.f32 %v13188_v46  ;;  %v2376_v3 = vrot.slane %v2326_v50, 3 }
 0x50a   :  { %v2373_v57 = vrot.slane %v2326_v50, 2 }
 0x50b   :  { %11637 = vpow2.f32 %v8832_v58  ;;  %v8833_v45 = vmul.f32 -1.442695, %v2365_v44  ;;  %v8834_v48 = vmul.f32 -1.442695, %v2376_v3  ;;  %v14853_v3 = vld [vmem:[#allocation28_spill] sm:$0xff] }
 0x50d   :  { %11639 = vpow2.f32 %v8833_v45 }
 0x50e   :  { %11641 = vpow2.f32 %v8834_v48  ;;  %v14855_v48 = vld [vmem:[#allocation30_spill] sm:$0xff] }
 0x513   :  { %v11636_v54 = vpop.eup %11635 }
 0x514   :  { %v2357_v7 = vmul.f32 %v11636_v54, %v11634_v10  ;;  %v14854_v10 = vld [vmem:[#allocation29_spill] sm:$0xff]  ;;  %v14856_v54 = vld [vmem:[#allocation31_spill] sm:$0xff] }
 0x515   :  { %v11638_v59 = vpop.eup %11637 }
 0x516   :  { %v2361_v41 = vadd.f32 1.0, %v11638_v59  ;;  %2389 = vst [vmem:[#allocation3 + $0x3] sm:$0x1] %v2357_v7  ;;  %2458 = vmatmul.mubr.f32.vlgmr.msra.gmra.mrb[20].mxu0 %v2357_v7  ;;  %2529 = vmatmul.mubr.f32.vlgmr.msra.gmra.mrb[20].mxu1 %v2357_v7  ;;  %v14857_v59 = vld [vmem:[#allocation32_spill] sm:$0xff]  ;;  %v14859_v7 = vld [vmem:[#allocation34_spill] sm:$0xff] }
 0x517   :  { %v11640_v51 = vpop.eup %11639  ;;  %9711 = vmatpush1.bf16.msra.mxu0 %v12769_v14  ;;  %9743 = vmatpush1.bf16.msra.mxu1 %v12773_v16 }
 0x518   :  { %11643 = vrcp.f32 %v2361_v41  ;;  %v2370_v56 = vadd.f32 1.0, %v11640_v51  ;;  %9713 = vmatprep.subr.bf16.mxu0 %v12775_v17  ;;  %9745 = vmatprep.subr.bf16.mxu1 %v12778_v28  ;;  %v11642_v36 = vpop.eup %11641  ;;  %v14860_v41 = vld [vmem:[#allocation35_spill] sm:$0xff]  ;;  %v14861_v51 = vld [vmem:[#allocation36_spill] sm:$0xff] }
 0x519   :  { %11645 = vtanh.f32 %v2373_v57  ;;  %2631 = vmatprep.mubr.f32.mxu0 %v14780_v5  ;;  %2702 = vmatprep.mubr.f32.mxu1 %v14780_v5  ;;  %v2381_v13 = vadd.f32 1.0, %v11642_v36  ;;  %v14858_v57 = vld [vmem:[#allocation33_spill] sm:$0xff]  ;;  %v14863_v36 = vld [vmem:[#allocation38_spill] sm:$0xff] }
 0x51a   :  { %11647 = vrcp.f32 %v2370_v56  ;;  %v14862_v56 = vld [vmem:[#allocation37_spill] sm:$0xff] }
 0x51b   :  { %9715 = vmatpush1.bf16.msra.mxu0 %v12783_v37  ;;  %9747 = vmatpush1.bf16.msra.mxu1 %v12787_v42  ;;  %11649 = vrcp.f32 %v2381_v13  ;;  %v14867_v13 = vld [vmem:[#allocation42_spill] sm:$0xff] }
 0x51c   :  { %9717 = vmatprep.subr.bf16.mxu0 %v12789_v43  ;;  %9749 = vmatprep.subr.bf16.mxu1 %v12792_v53 }
 0x51f   :  { %9719 = vmatpush1.bf16.msra.mxu0 %v12797_v4  ;;  %9751 = vmatpush1.bf16.msra.mxu1 %v14783_v32 }
 0x520   :  { %9721 = vmatprep.subr.bf16.mxu0 %v14784_v24  ;;  %9753 = vmatprep.subr.bf16.mxu1 %v14785_v49 }
 0x522   :  { %v11644_v8 = vpop.eup %11643 }
 0x523   :  { %v11646_v20 = vpop.eup %11645  ;;  %9723 = vmatpush1.bf16.msra.mxu0 %v14786_v61  ;;  %9755 = vmatpush1.bf16.msra.mxu1 %v14787_v40 }
 0x524   :  { %v11648_v63 = vpop.eup %11647  ;;  %9725 = vmatprep.subr.bf16.mxu0 %v14788_v39  ;;  %9757 = vmatprep.subr.bf16.mxu1 %v14789_v30  ;;  %v2385_v50 = vmul.f32 %v11646_v20, %v11644_v8  ;;  %v14864_v8 = vld [vmem:[#allocation39_spill] sm:$0xff]  ;;  %v14865_v20 = vld [vmem:[#allocation40_spill] sm:$0xff] }
 0x525   :  { %v2384_v29 = vmul.f32 %v11648_v63, %v13128_v6  ;;  %v11650_v6 = vpop.eup %11649  ;;  %v14866_v63 = vld [vmem:[#allocation41_spill] sm:$0xff] }
 0x527   :  { %v13210_v58 = vadd.f32 %v2385_v50, %v2384_v29  ;;  %9727 = vmatpush1.bf16.msra.mxu0 %v14790_v25  ;;  %9759 = vmatpush1.bf16.msra.mxu1 %v14791_v2  ;;  %v14868_v29 = vld [vmem:[#allocation43_spill] sm:$0xff]  ;;  %v14869_v50 = vld [vmem:[#allocation44_spill] sm:$0xff] }
 0x528   :  { %9729 = vmatprep.subr.bf16.mxu0 %v12827_v26  ;;  %9761 = vmatprep.subr.bf16.mxu1 %v14792_v60 }
 0x529   :  { %11651 = vtanh.f32 %v13210_v58 }
 0x52b   :  { %9731 = vmatpush1.bf16.msra.mxu0 %v12833_v47  ;;  %9763 = vmatpush1.bf16.msra.mxu1 %v12837_v1 }
 0x52c   :  { %9733 = vmatprep.subr.bf16.mxu0 %v12839_v55  ;;  %9765 = vmatprep.subr.bf16.mxu1 %v12842_v12 }
 0x52f   :  { %9735 = vmatpush1.bf16.msra.mxu0 %v12845_v18  ;;  %9767 = vmatpush1.bf16.msra.mxu1 %v12849_v9 }
 0x530   :  { %9737 = vmatprep.subr.bf16.mxu0 %v12851_v19  ;;  %9769 = vmatprep.subr.bf16.mxu1 %v12854_v52 }
 0x533   :  { %v11652_v44 = vpop.eup %11651  ;;  %9739 = vmatpush1.bf16.msra.mxu0 %v12857_v0  ;;  %9771 = vmatpush1.bf16.msra.mxu1 %v12861_v62 }
 0x534   :  { %v2388_v45 = vmul.f32 %v11652_v44, %v11650_v6  ;;  %9773 = vmatprep.subr.bf16.mxu0 %v12486_v11  ;;  %9805 = vmatprep.subr.bf16.mxu1 %v12497_v15  ;;  %v14870_v6 = vld [vmem:[#allocation45_spill] sm:$0xff]  ;;  %v14871_v44 = vld [vmem:[#allocation46_spill] sm:$0xff] }
 0x536   :  { %2390 = vst [vmem:[#allocation4 + $0x4] sm:$0x1] %v2388_v45  ;;  %2632 = vmatmul.mubr.f32.vlgmr.msra.gmra.mrb[22].mxu0 %v2388_v45  ;;  %2703 = vmatmul.mubr.f32.vlgmr.msra.gmra.mrb[22].mxu1 %v2388_v45  ;;  %v14872_v45 = vld [vmem:[#allocation47_spill] sm:$0xff] }
 0x537   :  { %9775 = vmatpush1.bf16.msra.mxu0 %v12514_v21  ;;  %9807 = vmatpush1.bf16.msra.mxu1 %v12517_v22 }
 0x538   :  { %9777 = vmatprep.subr.bf16.mxu0 %v12519_v23  ;;  %9809 = vmatprep.subr.bf16.mxu1 %v12531_v27 }
 0x539   :  { %2869 = vmatprep.mubr.f32.mxu0 %v14780_v5  ;;  %2940 = vmatprep.mubr.f32.mxu1 %v14780_v5 }
 0x53b   :  { %9779 = vmatpush1.bf16.msra.mxu0 %v12551_v33  ;;  %9811 = vmatpush1.bf16.msra.mxu1 %v12555_v34 }
 0x53c   :  { %9781 = vmatprep.subr.bf16.mxu0 %v12557_v35  ;;  %9813 = vmatprep.subr.bf16.mxu1 %v12569_v38 }
 0x53f   :  { %9783 = vmatpush1.bf16.msra.mxu0 %v14853_v3  ;;  %9815 = vmatpush1.bf16.msra.mxu1 %v14854_v10 }
 0x540   :  { %9785 = vmatprep.subr.bf16.mxu0 %v14855_v48  ;;  %9817 = vmatprep.subr.bf16.mxu1 %v14856_v54 }
 0x543   :  { %9787 = vmatpush1.bf16.msra.mxu0 %v14857_v59  ;;  %9819 = vmatpush1.bf16.msra.mxu1 %v14858_v57 }
 0x544   :  { %9789 = vmatprep.subr.bf16.mxu0 %v14859_v7  ;;  %9821 = vmatprep.subr.bf16.mxu1 %v14860_v41 }
 0x547   :  { %9791 = vmatpush1.bf16.msra.mxu0 %v14861_v51  ;;  %9823 = vmatpush1.bf16.msra.mxu1 %v14862_v56  ;;  %v14873_v56 = vld [vmem:[#allocation48_spill] sm:$0xff] }
 0x548   :  { %9793 = vmatprep.subr.bf16.mxu0 %v14863_v36  ;;  %9825 = vmatprep.subr.bf16.mxu1 %v14864_v8  ;;  %v14874_v36 = vld [vmem:[#allocation49_spill] sm:$0xff]  ;;  %v14875_v8 = vld [vmem:[#allocation50_spill] sm:$0xff] }
 0x54b   :  { %9795 = vmatpush1.bf16.msra.mxu0 %v14865_v20  ;;  %9827 = vmatpush1.bf16.msra.mxu1 %v14866_v63  ;;  %v14876_v20 = vld [vmem:[#allocation51_spill] sm:$0xff] }
 0x54c   :  { %9797 = vmatprep.subr.bf16.mxu0 %v14867_v13  ;;  %9829 = vmatprep.subr.bf16.mxu1 %v14868_v29 }
 0x54f   :  { %9799 = vmatpush1.bf16.msra.mxu0 %v14869_v50  ;;  %9831 = vmatpush1.bf16.msra.mxu1 %v14870_v6 }
 0x550   :  { %9801 = vmatprep.subr.bf16.mxu0 %v14871_v44  ;;  %9833 = vmatprep.subr.bf16.mxu1 %v14872_v45 }
 0x553   :  { %9803 = vmatpush1.bf16.msra.mxu0 %v14873_v56  ;;  %9835 = vmatpush1.bf16.msra.mxu1 %v14874_v36  ;;  %v2392_v56 = vld [vmem:[#allocation2 + $0x4] ss:$8 sm:$0xf] }
 0x554   :  { %9837 = vmatprep.subr.bf16.mxu0 %v14875_v8  ;;  %9869 = vmatprep.subr.bf16.mxu1 %v14876_v20 }
 0x5e9   :  { %v2459_v63 = vpop.f32.mrb[20].mxu0  ;;  %v2530_v13 = vpop.f32.mrb[20].mxu1 }
 0x5ea   :  { %v2461_v51 = vpop.f32.mrb[21].mxu0  ;;  %v2532_v29 = vpop.f32.mrb[21].mxu1 }
 0x5eb   :  { %v2539_v41 = vcombine.low %v2459_v63, %v2461_v51  ;;  %v2540_v50 = vcombine.low %v2530_v13, %v2532_v29 }
 0x5ed   :  { %v2547_v6 = vrot.slane %v2539_v41, %v12935_v31  ;;  %v2554_v44 = vrot.slane %v2540_v50, %v12935_v31 }
 0x5ef   :  { %v2555_v7 = vcombine.low %v2547_v6, %v2554_v44 }
 0x5f1   :  { %v2562_v45 = vrot.slane %v2555_v7, %v12935_v31 }
 0x5f3   :  { %v2564_v57 = vadd.f32 %v2562_v45, %v2392_v56 }
 0x5f5   :  { %v8835_v36 = vmul.f32 -1.442695, %v2564_v57  ;;  %v2746_v59 = vrot.slane %v2564_v57, 1  ;;  %v2757_v20 = vrot.slane %v2564_v57, 3  ;;  %v2754_v10 = vrot.slane %v2564_v57, 2 }
 0x5f7   :  { %11653 = vpow2.f32 %v8835_v36  ;;  %v8836_v8 = vmul.f32 -1.442695, %v2746_v59  ;;  %v8837_v54 = vmul.f32 -1.442695, %v2757_v20 }
 0x5f9   :  { %11655 = vpow2.f32 %v8836_v8 }
 0x5fa   :  { %11657 = vpow2.f32 %v8837_v54 }
 0x601   :  { %v11654_v48 = vpop.eup %11653 }
 0x602   :  { %v2742_v51 = vadd.f32 1.0, %v11654_v48 }
 0x603   :  { %v11656_v63 = vpop.eup %11655 }
 0x604   :  { %11659 = vrcp.f32 %v2742_v51  ;;  %v2751_v41 = vadd.f32 1.0, %v11656_v63  ;;  %v11658_v36 = vpop.eup %11657  ;;  %v2566_v63 = vld [vmem:[#allocation2 + $0x23] ss:$8 sm:$0xf] }
 0x605   :  { %11661 = vtanh.f32 %v2754_v10  ;;  %v2762_v45 = vadd.f32 1.0, %v11658_v36 }
 0x606   :  { %11663 = vrcp.f32 %v2751_v41 }
 0x607   :  { %11665 = vrcp.f32 %v2762_v45 }
 0x609   :  { %v2633_v13 = vpop.f32.mrb[22].mxu0  ;;  %v2704_v7 = vpop.f32.mrb[22].mxu1 }
 0x60a   :  { %v2635_v29 = vpop.f32.mrb[23].mxu0  ;;  %v2706_v56 = vpop.f32.mrb[23].mxu1 }
 0x60b   :  { %v2713_v50 = vcombine.low %v2633_v13, %v2635_v29  ;;  %v2714_v6 = vcombine.low %v2704_v7, %v2706_v56 }
 0x60d   :  { %v2721_v59 = vrot.slane %v2713_v50, %v12935_v31  ;;  %v2728_v8 = vrot.slane %v2714_v6, %v12935_v31 }
 0x60e   :  { %v11660_v20 = vpop.eup %11659 }
 0x60f   :  { %v11662_v57 = vpop.eup %11661  ;;  %v2729_v48 = vcombine.low %v2721_v59, %v2728_v8 }
 0x610   :  { %v11664_v44 = vpop.eup %11663  ;;  %v2766_v51 = vmul.f32 %v11662_v57, %v11660_v20 }
 0x611   :  { %v2736_v54 = vrot.slane %v2729_v48, %v12935_v31  ;;  %v2765_v10 = vmul.f32 %v11664_v44, %v13188_v46  ;;  %v11666_v50 = vpop.eup %11665 }
 0x613   :  { %v2738_v41 = vadd.f32 %v2736_v54, %v2566_v63  ;;  %v13270_v3 = vadd.f32 %v2766_v51, %v2765_v10 }
 0x615   :  { %v8838_v13 = vmul.f32 -1.442695, %v2738_v41  ;;  %v2777_v7 = vrot.slane %v2738_v41, 1  ;;  %11667 = vtanh.f32 %v13270_v3  ;;  %v2788_v56 = vrot.slane %v2738_v41, 3 }
 0x616   :  { %v2785_v8 = vrot.slane %v2738_v41, 2 }
 0x617   :  { %11669 = vpow2.f32 %v8838_v13  ;;  %v8839_v29 = vmul.f32 -1.442695, %v2777_v7  ;;  %v8840_v6 = vmul.f32 -1.442695, %v2788_v56  ;;  %v14877_v56 = vld [vmem:[#allocation28_spill] sm:$0xff] }
 0x619   :  { %11671 = vpow2.f32 %v8839_v29 }
 0x61a   :  { %11673 = vpow2.f32 %v8840_v6  ;;  %v14879_v6 = vld [vmem:[#allocation30_spill] sm:$0xff] }
 0x61f   :  { %v11668_v59 = vpop.eup %11667 }
 0x620   :  { %v2769_v46 = vmul.f32 %v11668_v59, %v11666_v50  ;;  %v14878_v50 = vld [vmem:[#allocation29_spill] sm:$0xff]  ;;  %v14880_v59 = vld [vmem:[#allocation31_spill] sm:$0xff] }
 0x621   :  { %v11670_v36 = vpop.eup %11669 }
 0x622   :  { %v2773_v20 = vadd.f32 1.0, %v11670_v36  ;;  %2801 = vst [vmem:[#allocation3 + $0x4] sm:$0x1] %v2769_v46  ;;  %2870 = vmatmul.mubr.f32.vlgmr.msra.gmra.mrb[24].mxu0 %v2769_v46  ;;  %2941 = vmatmul.mubr.f32.vlgmr.msra.gmra.mrb[24].mxu1 %v2769_v46  ;;  %v14881_v36 = vld [vmem:[#allocation32_spill] sm:$0xff]  ;;  %v14883_v46 = vld [vmem:[#allocation34_spill] sm:$0xff] }
 0x623   :  { %v11672_v57 = vpop.eup %11671  ;;  %9839 = vmatpush1.bf16.msra.mxu0 %v12769_v14  ;;  %9871 = vmatpush1.bf16.msra.mxu1 %v12773_v16 }
 0x624   :  { %11675 = vrcp.f32 %v2773_v20  ;;  %v2782_v48 = vadd.f32 1.0, %v11672_v57  ;;  %9841 = vmatprep.subr.bf16.mxu0 %v12775_v17  ;;  %9873 = vmatprep.subr.bf16.mxu1 %v12778_v28  ;;  %v11674_v44 = vpop.eup %11673  ;;  %v14884_v20 = vld [vmem:[#allocation35_spill] sm:$0xff]  ;;  %v14885_v57 = vld [vmem:[#allocation36_spill] sm:$0xff] }
 0x625   :  { %11677 = vtanh.f32 %v2785_v8  ;;  %3043 = vmatprep.mubr.f32.mxu0 %v14780_v5  ;;  %3114 = vmatprep.mubr.f32.mxu1 %v14780_v5  ;;  %v2793_v51 = vadd.f32 1.0, %v11674_v44  ;;  %v14882_v8 = vld [vmem:[#allocation33_spill] sm:$0xff]  ;;  %v14887_v44 = vld [vmem:[#allocation38_spill] sm:$0xff] }
 0x626   :  { %11679 = vrcp.f32 %v2782_v48  ;;  %v14886_v48 = vld [vmem:[#allocation37_spill] sm:$0xff] }
 0x627   :  { %9843 = vmatpush1.bf16.msra.mxu0 %v12783_v37  ;;  %9875 = vmatpush1.bf16.msra.mxu1 %v12787_v42  ;;  %11681 = vrcp.f32 %v2793_v51  ;;  %v14891_v51 = vld [vmem:[#allocation42_spill] sm:$0xff] }
 0x628   :  { %9845 = vmatprep.subr.bf16.mxu0 %v12789_v43  ;;  %9877 = vmatprep.subr.bf16.mxu1 %v12792_v53 }
 0x62b   :  { %9847 = vmatpush1.bf16.msra.mxu0 %v12797_v4  ;;  %9879 = vmatpush1.bf16.msra.mxu1 %v14783_v32 }
 0x62c   :  { %9849 = vmatprep.subr.bf16.mxu0 %v14784_v24  ;;  %9881 = vmatprep.subr.bf16.mxu1 %v14785_v49 }
 0x62e   :  { %v11676_v54 = vpop.eup %11675 }
 0x62f   :  { %v11678_v45 = vpop.eup %11677  ;;  %9851 = vmatpush1.bf16.msra.mxu0 %v14786_v61  ;;  %9883 = vmatpush1.bf16.msra.mxu1 %v14787_v40 }
 0x630   :  { %v11680_v10 = vpop.eup %11679  ;;  %9853 = vmatprep.subr.bf16.mxu0 %v14788_v39  ;;  %9885 = vmatprep.subr.bf16.mxu1 %v14789_v30  ;;  %v2797_v41 = vmul.f32 %v11678_v45, %v11676_v54  ;;  %v14888_v54 = vld [vmem:[#allocation39_spill] sm:$0xff]  ;;  %v14889_v45 = vld [vmem:[#allocation40_spill] sm:$0xff] }
 0x631   :  { %v2796_v63 = vmul.f32 %v11680_v10, %v13210_v58  ;;  %v11682_v58 = vpop.eup %11681  ;;  %v14890_v10 = vld [vmem:[#allocation41_spill] sm:$0xff] }
 0x633   :  { %v13292_v13 = vadd.f32 %v2797_v41, %v2796_v63  ;;  %9855 = vmatpush1.bf16.msra.mxu0 %v14790_v25  ;;  %9887 = vmatpush1.bf16.msra.mxu1 %v14791_v2  ;;  %v14892_v63 = vld [vmem:[#allocation43_spill] sm:$0xff]  ;;  %v14893_v41 = vld [vmem:[#allocation44_spill] sm:$0xff] }
 0x634   :  { %9857 = vmatprep.subr.bf16.mxu0 %v12827_v26  ;;  %9889 = vmatprep.subr.bf16.mxu1 %v14792_v60 }
 0x635   :  { %11683 = vtanh.f32 %v13292_v13 }
 0x637   :  { %9859 = vmatpush1.bf16.msra.mxu0 %v12833_v47  ;;  %9891 = vmatpush1.bf16.msra.mxu1 %v12837_v1 }
 0x638   :  { %9861 = vmatprep.subr.bf16.mxu0 %v12839_v55  ;;  %9893 = vmatprep.subr.bf16.mxu1 %v12842_v12 }
 0x63b   :  { %9863 = vmatpush1.bf16.msra.mxu0 %v12845_v18  ;;  %9895 = vmatpush1.bf16.msra.mxu1 %v12849_v9 }
 0x63c   :  { %9865 = vmatprep.subr.bf16.mxu0 %v12851_v19  ;;  %9897 = vmatprep.subr.bf16.mxu1 %v12854_v52 }
 0x63f   :  { %v11684_v7 = vpop.eup %11683  ;;  %9867 = vmatpush1.bf16.msra.mxu0 %v12857_v0  ;;  %9899 = vmatpush1.bf16.msra.mxu1 %v12861_v62 }
 0x640   :  { %v2800_v29 = vmul.f32 %v11684_v7, %v11682_v58  ;;  %9901 = vmatprep.subr.bf16.mxu0 %v12486_v11  ;;  %9933 = vmatprep.subr.bf16.mxu1 %v12497_v15  ;;  %v14894_v58 = vld [vmem:[#allocation45_spill] sm:$0xff]  ;;  %v14895_v7 = vld [vmem:[#allocation46_spill] sm:$0xff] }
 0x642   :  { %2802 = vst [vmem:[#allocation4 + $0x3] sm:$0x1] %v2800_v29  ;;  %3044 = vmatmul.mubr.f32.vlgmr.msra.gmra.mrb[26].mxu0 %v2800_v29  ;;  %3115 = vmatmul.mubr.f32.vlgmr.msra.gmra.mrb[26].mxu1 %v2800_v29  ;;  %v14896_v29 = vld [vmem:[#allocation47_spill] sm:$0xff] }
 0x643   :  { %9903 = vmatpush1.bf16.msra.mxu0 %v12514_v21  ;;  %9935 = vmatpush1.bf16.msra.mxu1 %v12517_v22 }
 0x644   :  { %9905 = vmatprep.subr.bf16.mxu0 %v12519_v23  ;;  %9937 = vmatprep.subr.bf16.mxu1 %v12531_v27 }
 0x645   :  { %3281 = vmatprep.mubr.f32.mxu0 %v14780_v5  ;;  %3352 = vmatprep.mubr.f32.mxu1 %v14780_v5 }
 0x647   :  { %9907 = vmatpush1.bf16.msra.mxu0 %v12551_v33  ;;  %9939 = vmatpush1.bf16.msra.mxu1 %v12555_v34 }
 0x648   :  { %9909 = vmatprep.subr.bf16.mxu0 %v12557_v35  ;;  %9941 = vmatprep.subr.bf16.mxu1 %v12569_v38 }
 0x64b   :  { %9911 = vmatpush1.bf16.msra.mxu0 %v14877_v56  ;;  %9943 = vmatpush1.bf16.msra.mxu1 %v14878_v50 }
 0x64c   :  { %9913 = vmatprep.subr.bf16.mxu0 %v14879_v6  ;;  %9945 = vmatprep.subr.bf16.mxu1 %v14880_v59 }
 0x64f   :  { %9915 = vmatpush1.bf16.msra.mxu0 %v14881_v36  ;;  %9947 = vmatpush1.bf16.msra.mxu1 %v14882_v8 }
 0x650   :  { %9917 = vmatprep.subr.bf16.mxu0 %v14883_v46  ;;  %9949 = vmatprep.subr.bf16.mxu1 %v14884_v20 }
 0x653   :  { %9919 = vmatpush1.bf16.msra.mxu0 %v14885_v57  ;;  %9951 = vmatpush1.bf16.msra.mxu1 %v14886_v48  ;;  %v14897_v48 = vld [vmem:[#allocation48_spill] sm:$0xff] }
 0x654   :  { %9921 = vmatprep.subr.bf16.mxu0 %v14887_v44  ;;  %9953 = vmatprep.subr.bf16.mxu1 %v14888_v54  ;;  %v14898_v44 = vld [vmem:[#allocation49_spill] sm:$0xff]  ;;  %v14899_v54 = vld [vmem:[#allocation50_spill] sm:$0xff] }
 0x657   :  { %9923 = vmatpush1.bf16.msra.mxu0 %v14889_v45  ;;  %9955 = vmatpush1.bf16.msra.mxu1 %v14890_v10  ;;  %v14900_v45 = vld [vmem:[#allocation51_spill] sm:$0xff] }
 0x658   :  { %9925 = vmatprep.subr.bf16.mxu0 %v14891_v51  ;;  %9957 = vmatprep.subr.bf16.mxu1 %v14892_v63 }
 0x65b   :  { %9927 = vmatpush1.bf16.msra.mxu0 %v14893_v41  ;;  %9959 = vmatpush1.bf16.msra.mxu1 %v14894_v58 }
 0x65c   :  { %9929 = vmatprep.subr.bf16.mxu0 %v14895_v7  ;;  %9961 = vmatprep.subr.bf16.mxu1 %v14896_v29 }
 0x65f   :  { %9931 = vmatpush1.bf16.msra.mxu0 %v14897_v48  ;;  %9963 = vmatpush1.bf16.msra.mxu1 %v14898_v44  ;;  %v2804_v48 = vld [vmem:[#allocation2 + $0x5] ss:$8 sm:$0xf] }
 0x660   :  { %9965 = vmatprep.subr.bf16.mxu0 %v14899_v54  ;;  %9997 = vmatprep.subr.bf16.mxu1 %v14900_v45 }
 0x6f5   :  { %v2871_v10 = vpop.f32.mrb[24].mxu0  ;;  %v2942_v51 = vpop.f32.mrb[24].mxu1 }
 0x6f6   :  { %v2873_v57 = vpop.f32.mrb[25].mxu0  ;;  %v2944_v63 = vpop.f32.mrb[25].mxu1 }
 0x6f7   :  { %v2951_v20 = vcombine.low %v2871_v10, %v2873_v57  ;;  %v2952_v41 = vcombine.low %v2942_v51, %v2944_v63 }
 0x6f9   :  { %v2959_v58 = vrot.slane %v2951_v20, %v12935_v31  ;;  %v2966_v7 = vrot.slane %v2952_v41, %v12935_v31 }
 0x6fb   :  { %v2967_v46 = vcombine.low %v2959_v58, %v2966_v7 }
 0x6fd   :  { %v2974_v29 = vrot.slane %v2967_v46, %v12935_v31 }
 0x6ff   :  { %v2976_v8 = vadd.f32 %v2974_v29, %v2804_v48 }
 0x701   :  { %v8841_v44 = vmul.f32 -1.442695, %v2976_v8  ;;  %v3158_v36 = vrot.slane %v2976_v8, 1  ;;  %v3169_v45 = vrot.slane %v2976_v8, 3  ;;  %v3166_v50 = vrot.slane %v2976_v8, 2 }
 0x703   :  { %11685 = vpow2.f32 %v8841_v44  ;;  %v8842_v54 = vmul.f32 -1.442695, %v3158_v36  ;;  %v8843_v59 = vmul.f32 -1.442695, %v3169_v45 }
 0x705   :  { %11687 = vpow2.f32 %v8842_v54 }
 0x706   :  { %11689 = vpow2.f32 %v8843_v59 }
 0x70d   :  { %v11686_v6 = vpop.eup %11685 }
 0x70e   :  { %v3154_v57 = vadd.f32 1.0, %v11686_v6 }
 0x70f   :  { %v11688_v10 = vpop.eup %11687 }
 0x710   :  { %11691 = vrcp.f32 %v3154_v57  ;;  %v3163_v20 = vadd.f32 1.0, %v11688_v10  ;;  %v11690_v44 = vpop.eup %11689  ;;  %v2978_v10 = vld [vmem:[#allocation2 + $0x22] ss:$8 sm:$0xf] }
 0x711   :  { %11693 = vtanh.f32 %v3166_v50  ;;  %v3174_v29 = vadd.f32 1.0, %v11690_v44 }
 0x712   :  { %11695 = vrcp.f32 %v3163_v20 }
 0x713   :  { %11697 = vrcp.f32 %v3174_v29 }
 0x715   :  { %v3045_v51 = vpop.f32.mrb[26].mxu0  ;;  %v3116_v46 = vpop.f32.mrb[26].mxu1 }
 0x716   :  { %v3047_v63 = vpop.f32.mrb[27].mxu0  ;;  %v3118_v48 = vpop.f32.mrb[27].mxu1 }
 0x717   :  { %v3125_v41 = vcombine.low %v3045_v51, %v3047_v63  ;;  %v3126_v58 = vcombine.low %v3116_v46, %v3118_v48 }
 0x719   :  { %v3133_v36 = vrot.slane %v3125_v41, %v12935_v31  ;;  %v3140_v54 = vrot.slane %v3126_v58, %v12935_v31 }
 0x71a   :  { %v11692_v45 = vpop.eup %11691 }
 0x71b   :  { %v11694_v8 = vpop.eup %11693  ;;  %v3141_v6 = vcombine.low %v3133_v36, %v3140_v54 }
 0x71c   :  { %v11696_v7 = vpop.eup %11695  ;;  %v3178_v57 = vmul.f32 %v11694_v8, %v11692_v45 }
 0x71d   :  { %v3148_v59 = vrot.slane %v3141_v6, %v12935_v31  ;;  %v3177_v50 = vmul.f32 %v11696_v7, %v13270_v3  ;;  %v11698_v41 = vpop.eup %11697 }
 0x71f   :  { %v3150_v20 = vadd.f32 %v3148_v59, %v2978_v10  ;;  %v13352_v56 = vadd.f32 %v3178_v57, %v3177_v50 }
 0x721   :  { %v8844_v51 = vmul.f32 -1.442695, %v3150_v20  ;;  %v3189_v46 = vrot.slane %v3150_v20, 1  ;;  %11699 = vtanh.f32 %v13352_v56  ;;  %v3200_v48 = vrot.slane %v3150_v20, 3 }
 0x722   :  { %v3197_v54 = vrot.slane %v3150_v20, 2 }
 0x723   :  { %11701 = vpow2.f32 %v8844_v51  ;;  %v8845_v63 = vmul.f32 -1.442695, %v3189_v46  ;;  %v8846_v58 = vmul.f32 -1.442695, %v3200_v48  ;;  %v14907_v48 = vld [vmem:[#allocation34_spill] sm:$0xff] }
 0x725   :  { %11703 = vpow2.f32 %v8845_v63 }
 0x726   :  { %11705 = vpow2.f32 %v8846_v58  ;;  %v14913_v58 = vld [vmem:[#allocation40_spill] sm:$0xff] }
 0x72b   :  { %v11700_v36 = vpop.eup %11699 }
 0x72c   :  { %v3181_v3 = vmul.f32 %v11700_v36, %v11698_v41  ;;  %v14912_v41 = vld [vmem:[#allocation39_spill] sm:$0xff]  ;;  %v14914_v36 = vld [vmem:[#allocation41_spill] sm:$0xff] }
 0x72d   :  { %v11702_v44 = vpop.eup %11701 }
 0x72e   :  { %v3185_v45 = vadd.f32 1.0, %v11702_v44  ;;  %3213 = vst [vmem:[#allocation3 + $0x5] sm:$0x1] %v3181_v3  ;;  %3282 = vmatmul.mubr.f32.vlgmr.msra.gmra.mrb[28].mxu0 %v3181_v3  ;;  %3353 = vmatmul.mubr.f32.vlgmr.msra.gmra.mrb[28].mxu1 %v3181_v3  ;;  %v14915_v44 = vld [vmem:[#allocation42_spill] sm:$0xff]  ;;  %v14917_v3 = vld [vmem:[#allocation44_spill] sm:$0xff] }
 0x72f   :  { %v11704_v8 = vpop.eup %11703  ;;  %9967 = vmatpush1.bf16.msra.mxu0 %v12769_v14  ;;  %9999 = vmatpush1.bf16.msra.mxu1 %v12773_v16 }
 0x730   :  { %11707 = vrcp.f32 %v3185_v45  ;;  %v3194_v6 = vadd.f32 1.0, %v11704_v8  ;;  %9969 = vmatprep.subr.bf16.mxu0 %v12775_v17  ;;  %10001 = vmatprep.subr.bf16.mxu1 %v12778_v28  ;;  %v11706_v7 = vpop.eup %11705  ;;  %v14918_v45 = vld [vmem:[#allocation45_spill] sm:$0xff]  ;;  %v14919_v8 = vld [vmem:[#allocation46_spill] sm:$0xff] }
 0x731   :  { %11709 = vtanh.f32 %v3197_v54  ;;  %3455 = vmatprep.mubr.f32.mxu0 %v14780_v5  ;;  %3526 = vmatprep.mubr.f32.mxu1 %v14780_v5  ;;  %v3205_v57 = vadd.f32 1.0, %v11706_v7  ;;  %v14916_v54 = vld [vmem:[#allocation43_spill] sm:$0xff]  ;;  %v14921_v7 = vld [vmem:[#allocation48_spill] sm:$0xff] }
 0x732   :  { %11711 = vrcp.f32 %v3194_v6  ;;  %v14920_v6 = vld [vmem:[#allocation47_spill] sm:$0xff] }
 0x733   :  { %9971 = vmatpush1.bf16.msra.mxu0 %v12783_v37  ;;  %10003 = vmatpush1.bf16.msra.mxu1 %v12787_v42  ;;  %11713 = vrcp.f32 %v3205_v57 }
 0x734   :  { %9973 = vmatprep.subr.bf16.mxu0 %v12789_v43  ;;  %10005 = vmatprep.subr.bf16.mxu1 %v12792_v53 }
 0x737   :  { %9975 = vmatpush1.bf16.msra.mxu0 %v12797_v4  ;;  %10007 = vmatpush1.bf16.msra.mxu1 %v14783_v32 }
 0x738   :  { %9977 = vmatprep.subr.bf16.mxu0 %v14784_v24  ;;  %10009 = vmatprep.subr.bf16.mxu1 %v14785_v49 }
 0x73a   :  { %v11708_v59 = vpop.eup %11707 }
 0x73b   :  { %v11710_v29 = vpop.eup %11709  ;;  %9979 = vmatpush1.bf16.msra.mxu0 %v14786_v61  ;;  %10011 = vmatpush1.bf16.msra.mxu1 %v14787_v40 }
 0x73c   :  { %v11712_v50 = vpop.eup %11711  ;;  %9981 = vmatprep.subr.bf16.mxu0 %v14788_v39  ;;  %10013 = vmatprep.subr.bf16.mxu1 %v14789_v30  ;;  %v3209_v20 = vmul.f32 %v11710_v29, %v11708_v59  ;;  %v14922_v59 = vld [vmem:[#allocation49_spill] sm:$0xff]  ;;  %v14923_v29 = vld [vmem:[#allocation50_spill] sm:$0xff] }
 0x73d   :  { %v3208_v10 = vmul.f32 %v11712_v50, %v13292_v13  ;;  %v11714_v13 = vpop.eup %11713  ;;  %v14924_v50 = vld [vmem:[#allocation51_spill] sm:$0xff] }
 0x73f   :  { %v13374_v51 = vadd.f32 %v3209_v20, %v3208_v10  ;;  %9983 = vmatpush1.bf16.msra.mxu0 %v14790_v25  ;;  %10015 = vmatpush1.bf16.msra.mxu1 %v14791_v2 }
 0x740   :  { %9985 = vmatprep.subr.bf16.mxu0 %v12827_v26  ;;  %10017 = vmatprep.subr.bf16.mxu1 %v14792_v60 }
 0x741   :  { %11715 = vtanh.f32 %v13374_v51 }
 0x743   :  { %9987 = vmatpush1.bf16.msra.mxu0 %v12833_v47  ;;  %10019 = vmatpush1.bf16.msra.mxu1 %v12837_v1 }
 0x744   :  { %9989 = vmatprep.subr.bf16.mxu0 %v12839_v55  ;;  %10021 = vmatprep.subr.bf16.mxu1 %v12842_v12 }
 0x747   :  { %9991 = vmatpush1.bf16.msra.mxu0 %v12845_v18  ;;  %10023 = vmatpush1.bf16.msra.mxu1 %v12849_v9 }
 0x748   :  { %9993 = vmatprep.subr.bf16.mxu0 %v12851_v19  ;;  %10025 = vmatprep.subr.bf16.mxu1 %v12854_v52 }
 0x74b   :  { %v11716_v46 = vpop.eup %11715  ;;  %9995 = vmatpush1.bf16.msra.mxu0 %v12857_v0  ;;  %10027 = vmatpush1.bf16.msra.mxu1 %v12861_v62 }
 0x74c   :  { %v3212_v63 = vmul.f32 %v11716_v46, %v11714_v13  ;;  %10029 = vmatprep.subr.bf16.mxu0 %v12486_v11  ;;  %10061 = vmatprep.subr.bf16.mxu1 %v12497_v15  ;;  %v14901_v11 = vld [vmem:[#allocation28_spill] sm:$0xff]  ;;  %v14902_v15 = vld [vmem:[#allocation29_spill] sm:$0xff] }
 0x74e   :  { %3214 = vst [vmem:[#allocation4 + $0x2] sm:$0x1] %v3212_v63  ;;  %3456 = vmatmul.mubr.f32.vlgmr.msra.gmra.mrb[30].mxu0 %v3212_v63  ;;  %3527 = vmatmul.mubr.f32.vlgmr.msra.gmra.mrb[30].mxu1 %v3212_v63 }
 0x74f   :  { %10031 = vmatpush1.bf16.msra.mxu0 %v12514_v21  ;;  %10063 = vmatpush1.bf16.msra.mxu1 %v12517_v22  ;;  %v14903_v21 = vld [vmem:[#allocation30_spill] sm:$0xff]  ;;  %v14904_v22 = vld [vmem:[#allocation31_spill] sm:$0xff] }
 0x750   :  { %10033 = vmatprep.subr.bf16.mxu0 %v12519_v23  ;;  %10065 = vmatprep.subr.bf16.mxu1 %v12531_v27  ;;  %v14905_v23 = vld [vmem:[#allocation32_spill] sm:$0xff]  ;;  %v14906_v27 = vld [vmem:[#allocation33_spill] sm:$0xff] }
 0x751   :  { %3693 = vmatprep.mubr.f32.mxu0 %v14780_v5  ;;  %3764 = vmatprep.mubr.f32.mxu1 %v14780_v5 }
 0x753   :  { %10035 = vmatpush1.bf16.msra.mxu0 %v12551_v33  ;;  %10067 = vmatpush1.bf16.msra.mxu1 %v12555_v34  ;;  %v14908_v33 = vld [vmem:[#allocation35_spill] sm:$0xff]  ;;  %v14909_v34 = vld [vmem:[#allocation36_spill] sm:$0xff] }
 0x754   :  { %10037 = vmatprep.subr.bf16.mxu0 %v12557_v35  ;;  %10069 = vmatprep.subr.bf16.mxu1 %v12569_v38  ;;  %v14910_v35 = vld [vmem:[#allocation37_spill] sm:$0xff]  ;;  %v14911_v38 = vld [vmem:[#allocation38_spill] sm:$0xff] }
 0x757   :  { %10039 = vmatpush1.bf16.msra.mxu0 %v14901_v11  ;;  %10071 = vmatpush1.bf16.msra.mxu1 %v14902_v15 }
 0x758   :  { %10041 = vmatprep.subr.bf16.mxu0 %v14903_v21  ;;  %10073 = vmatprep.subr.bf16.mxu1 %v14904_v22 }
 0x75b   :  { %10043 = vmatpush1.bf16.msra.mxu0 %v14905_v23  ;;  %10075 = vmatpush1.bf16.msra.mxu1 %v14906_v27  ;;  %v3216_v23 = vld [vmem:[#allocation2 + $0x6] ss:$8 sm:$0xf] }
 0x75c   :  { %10045 = vmatprep.subr.bf16.mxu0 %v14907_v48  ;;  %10077 = vmatprep.subr.bf16.mxu1 %v14908_v33 }
 0x75f   :  { %10047 = vmatpush1.bf16.msra.mxu0 %v14909_v34  ;;  %10079 = vmatpush1.bf16.msra.mxu1 %v14910_v35 }
 0x760   :  { %10049 = vmatprep.subr.bf16.mxu0 %v14911_v38  ;;  %10081 = vmatprep.subr.bf16.mxu1 %v14912_v41 }
 0x763   :  { %10051 = vmatpush1.bf16.msra.mxu0 %v14913_v58  ;;  %10083 = vmatpush1.bf16.msra.mxu1 %v14914_v36 }
 0x764   :  { %10053 = vmatprep.subr.bf16.mxu0 %v14915_v44  ;;  %10085 = vmatprep.subr.bf16.mxu1 %v14916_v54 }
 0x767   :  { %10055 = vmatpush1.bf16.msra.mxu0 %v14917_v3  ;;  %10087 = vmatpush1.bf16.msra.mxu1 %v14918_v45 }
 0x768   :  { %10057 = vmatprep.subr.bf16.mxu0 %v14919_v8  ;;  %10089 = vmatprep.subr.bf16.mxu1 %v14920_v6 }
 0x76b   :  { %10059 = vmatpush1.bf16.msra.mxu0 %v14921_v7  ;;  %10091 = vmatpush1.bf16.msra.mxu1 %v14922_v59 }
 0x76c   :  { %10093 = vmatprep.subr.bf16.mxu0 %v14923_v29  ;;  %10125 = vmatprep.subr.bf16.mxu1 %v14924_v50 }
 0x801   :  { %v3283_v57 = vpop.f32.mrb[28].mxu0  ;;  %v3354_v10 = vpop.f32.mrb[28].mxu1 }
 0x802   :  { %v3285_v20 = vpop.f32.mrb[29].mxu0  ;;  %v3356_v13 = vpop.f32.mrb[29].mxu1 }
 0x803   :  { %v3363_v46 = vcombine.low %v3283_v57, %v3285_v20  ;;  %v3364_v63 = vcombine.low %v3354_v10, %v3356_v13 }
 0x805   :  { %v3371_v11 = vrot.slane %v3363_v46, %v12935_v31  ;;  %v3378_v15 = vrot.slane %v3364_v63, %v12935_v31 }
 0x807   :  { %v3379_v21 = vcombine.low %v3371_v11, %v3378_v15 }
 0x809   :  { %v3386_v22 = vrot.slane %v3379_v21, %v12935_v31 }
 0x80b   :  { %v3388_v27 = vadd.f32 %v3386_v22, %v3216_v23  ;;  %v3390_v22 = vld [vmem:[#allocation2 + $0x21] ss:$8 sm:$0xf] }
 0x80d   :  { %v8847_v48 = vmul.f32 -1.442695, %v3388_v27  ;;  %v3570_v33 = vrot.slane %v3388_v27, 1  ;;  %v3581_v35 = vrot.slane %v3388_v27, 3  ;;  %v3578_v58 = vrot.slane %v3388_v27, 2 }
 0x80f   :  { %11717 = vpow2.f32 %v8847_v48  ;;  %v8848_v34 = vmul.f32 -1.442695, %v3570_v33  ;;  %v8849_v38 = vmul.f32 -1.442695, %v3581_v35 }
 0x811   :  { %11719 = vpow2.f32 %v8848_v34 }
 0x812   :  { %11721 = vpow2.f32 %v8849_v38 }
 0x819   :  { %v11718_v41 = vpop.eup %11717 }
 0x81a   :  { %v3566_v36 = vadd.f32 1.0, %v11718_v41 }
 0x81b   :  { %v11720_v44 = vpop.eup %11719 }
 0x81c   :  { %11723 = vrcp.f32 %v3566_v36  ;;  %v3575_v54 = vadd.f32 1.0, %v11720_v44  ;;  %v11722_v29 = vpop.eup %11721 }
 0x81d   :  { %11725 = vtanh.f32 %v3578_v58  ;;  %v3586_v11 = vadd.f32 1.0, %v11722_v29  ;;  %v4202_v29 = vld [vmem:[#allocation14 + $0x108] sm:$0xff] }
 0x81e   :  { %11727 = vrcp.f32 %v3575_v54 }
 0x81f   :  { %11729 = vrcp.f32 %v3586_v11 }
 0x821   :  { %v3457_v3 = vpop.f32.mrb[30].mxu0  ;;  %v3528_v45 = vpop.f32.mrb[30].mxu1 }
 0x822   :  { %v3459_v8 = vpop.f32.mrb[31].mxu0  ;;  %v3530_v6 = vpop.f32.mrb[31].mxu1 }
 0x823   :  { %v3537_v7 = vcombine.low %v3457_v3, %v3459_v8  ;;  %v3538_v59 = vcombine.low %v3528_v45, %v3530_v6  ;;  %v4187_v6 = vld [vmem:[#allocation14 + $0x90] sm:$0xff] }
 0x825   :  { %v3545_v50 = vrot.slane %v3537_v7, %v12935_v31  ;;  %v3552_v57 = vrot.slane %v3538_v59, %v12935_v31  ;;  %v4195_v7 = vld [vmem:[#allocation14 + $0xd0] sm:$0xff] }
 0x826   :  { %v11724_v10 = vpop.eup %11723  ;;  %v10194_v59 = vpack.c.bf16 %v4195_v7, %v4187_v6  ;;  %v4267_v6 = vld [vmem:[#allocation14 + $0x310] sm:$0xff] }
 0x827   :  { %v11726_v20 = vpop.eup %11725  ;;  %v3553_v13 = vcombine.low %v3545_v50, %v3552_v57  ;;  %v4210_v50 = vld [vmem:[#allocation14 + $0x148] sm:$0xff]  ;;  %v4204_v57 = vld [vmem:[#allocation14 + $0x118] sm:$0xff]  ;;  %v4275_v7 = vld [vmem:[#allocation14 + $0x350] sm:$0xff] }
 0x828   :  { %v11728_v46 = vpop.eup %11727  ;;  %v3590_v21 = vmul.f32 %v11726_v20, %v11724_v10  ;;  %v10164_v10 = vpack.c.bf16 %v4210_v50, %v4202_v29  ;;  %v4212_v20 = vld [vmem:[#allocation14 + $0x158] sm:$0xff]  ;;  %v4282_v29 = vld [vmem:[#allocation14 + $0x388] sm:$0xff] }
 0x829   :  { %v3560_v63 = vrot.slane %v3553_v13, %v12935_v31  ;;  %v3589_v15 = vmul.f32 %v11728_v46, %v13352_v56  ;;  %v11730_v38 = vpop.eup %11729  ;;  %v4201_v13 = vld [vmem:[#allocation14 + $0x100] sm:$0xff]  ;;  %v4290_v50 = vld [vmem:[#allocation14 + $0x3c8] sm:$0xff] }
 0x82a   :  { %v4209_v46 = vld [vmem:[#allocation14 + $0x140] sm:$0xff] }
 0x82b   :  { %v3562_v23 = vadd.f32 %v3560_v63, %v3390_v22  ;;  %v13434_v27 = vadd.f32 %v3590_v21, %v3589_v15  ;;  %v10196_v63 = vpack.c.bf16 %v4212_v20, %v4204_v57  ;;  %v10166_v11 = vpack.c.bf16 %v4209_v46, %v4201_v13  ;;  %v4203_v15 = vld [vmem:[#allocation14 + $0x110] sm:$0xff]  ;;  %v4284_v57 = vld [vmem:[#allocation14 + $0x398] sm:$0xff]  ;;  %v4281_v13 = vld [vmem:[#allocation14 + $0x380] sm:$0xff] }
 0x82c   :  { %v4211_v21 = vld [vmem:[#allocation14 + $0x150] sm:$0xff]  ;;  %v4292_v20 = vld [vmem:[#allocation14 + $0x3d8] sm:$0xff]  ;;  %v4289_v46 = vld [vmem:[#allocation14 + $0x3c0] sm:$0xff] }
 0x82d   :  { %v8850_v48 = vmul.f32 -1.442695, %v3562_v23  ;;  %v3601_v33 = vrot.slane %v3562_v23, 1  ;;  %11731 = vtanh.f32 %v13434_v27  ;;  %v3612_v35 = vrot.slane %v3562_v23, 3 }
 0x82e   :  { %v3609_v44 = vrot.slane %v3562_v23, 2  ;;  %v10198_v22 = vpack.c.bf16 %v4211_v21, %v4203_v15  ;;  %v4218_v23 = vld [vmem:[#allocation14 + $0x188] sm:$0xff]  ;;  %v4283_v15 = vld [vmem:[#allocation14 + $0x390] sm:$0xff] }
 0x82f   :  { %11733 = vpow2.f32 %v8850_v48  ;;  %v8851_v34 = vmul.f32 -1.442695, %v3601_v33  ;;  %v8852_v41 = vmul.f32 -1.442695, %v3612_v35  ;;  %v4226_v48 = vld [vmem:[#allocation14 + $0x1c8] sm:$0xff]  ;;  %v4220_v33 = vld [vmem:[#allocation14 + $0x198] sm:$0xff] }
 0x830   :  { %v4228_v35 = vld [vmem:[#allocation14 + $0x1d8] sm:$0xff]  ;;  %v4291_v21 = vld [vmem:[#allocation14 + $0x3d0] sm:$0xff] }
 0x831   :  { %11735 = vpow2.f32 %v8851_v34  ;;  %v10168_v34 = vpack.c.bf16 %v4226_v48, %v4218_v23  ;;  %v10218_v23 = vpack.c.bf16 %v4291_v21, %v4283_v15  ;;  %v4182_v48 = vld [vmem:[#allocation14 + $0x68] sm:$0xff] }
 0x832   :  { %11737 = vpow2.f32 %v8852_v41  ;;  %v4225_v41 = vld [vmem:[#allocation14 + $0x1c0] sm:$0xff] }
 0x837   :  { %v11732_v58 = vpop.eup %11731 }
 0x838   :  { %v3593_v56 = vmul.f32 %v11732_v58, %v11730_v38  ;;  %v4217_v38 = vld [vmem:[#allocation14 + $0x180] sm:$0xff]  ;;  %v10200_v58 = vpack.c.bf16 %v4228_v35, %v4220_v33  ;;  %v4176_v33 = vld [vmem:[#allocation14 + $0x38] sm:$0xff] }
 0x839   :  { %v11734_v36 = vpop.eup %11733 }
 0x83a   :  { %v3597_v54 = vadd.f32 1.0, %v11734_v36  ;;  %3625 = vst [vmem:[#allocation3 + $0x6] sm:$0x1] %v3593_v56  ;;  %3694 = vmatmul.mubr.f32.vlgmr.msra.gmra.mrb[32].mxu0 %v3593_v56  ;;  %3765 = vmatmul.mubr.f32.vlgmr.msra.gmra.mrb[32].mxu1 %v3593_v56  ;;  %v10170_v36 = vpack.c.bf16 %v4225_v41, %v4217_v38  ;;  %v4227_v56 = vld [vmem:[#allocation14 + $0x1d0] sm:$0xff] }
 0x83b   :  { %v11736_v3 = vpop.eup %11735  ;;  %10095 = vmatpush1.bf16.msra.mxu0 %v12769_v14  ;;  %10127 = vmatpush1.bf16.msra.mxu1 %v12773_v16 }
 0x83c   :  { %11739 = vrcp.f32 %v3597_v54  ;;  %v3606_v45 = vadd.f32 1.0, %v11736_v3  ;;  %10097 = vmatprep.subr.bf16.mxu0 %v12775_v17  ;;  %10129 = vmatprep.subr.bf16.mxu1 %v12778_v28  ;;  %v11738_v14 = vpop.eup %11737  ;;  %v4234_v3 = vld [vmem:[#allocation14 + $0x208] sm:$0xff] }
 0x83d   :  { %11741 = vtanh.f32 %v3609_v44  ;;  %3867 = vmatprep.mubr.f32.mxu0 %v14780_v5  ;;  %3938 = vmatprep.mubr.f32.mxu1 %v14780_v5  ;;  %v4219_v44 = vld [vmem:[#allocation14 + $0x190] sm:$0xff] }
 0x83e   :  { %11743 = vrcp.f32 %v3606_v45  ;;  %v10202_v54 = vpack.c.bf16 %v4227_v56, %v4219_v44  ;;  %v4242_v45 = vld [vmem:[#allocation14 + $0x248] sm:$0xff] }
 0x83f   :  { %10099 = vmatpush1.bf16.msra.mxu0 %v12783_v37  ;;  %10131 = vmatpush1.bf16.msra.mxu1 %v12787_v42  ;;  %v3617_v37 = vadd.f32 1.0, %v11738_v14  ;;  %v4236_v14 = vld [vmem:[#allocation14 + $0x218] sm:$0xff] }
 0x840   :  { %10101 = vmatprep.subr.bf16.mxu0 %v12789_v43  ;;  %10133 = vmatprep.subr.bf16.mxu1 %v12792_v53 }
 0x841   :  { %11745 = vrcp.f32 %v3617_v37  ;;  %v4241_v37 = vld [vmem:[#allocation14 + $0x240] sm:$0xff] }
 0x843   :  { %10103 = vmatpush1.bf16.msra.mxu0 %v12797_v4  ;;  %10135 = vmatpush1.bf16.msra.mxu1 %v14783_v32 }
 0x844   :  { %10105 = vmatprep.subr.bf16.mxu0 %v14784_v24  ;;  %10137 = vmatprep.subr.bf16.mxu1 %v14785_v49  ;;  %v4179_v49 = vld [vmem:[#allocation14 + $0x50] sm:$0xff] }
 0x846   :  { %v11740_v16 = vpop.eup %11739 }
 0x847   :  { %v11742_v17 = vpop.eup %11741  ;;  %10107 = vmatpush1.bf16.msra.mxu0 %v14786_v61  ;;  %10139 = vmatpush1.bf16.msra.mxu1 %v14787_v40  ;;  %v4186_v61 = vld [vmem:[#allocation14 + $0x88] sm:$0xff] }
 0x848   :  { %v11744_v28 = vpop.eup %11743  ;;  %10109 = vmatprep.subr.bf16.mxu0 %v14788_v39  ;;  %10141 = vmatprep.subr.bf16.mxu1 %v14789_v30  ;;  %v3621_v43 = vmul.f32 %v11742_v17, %v11740_v16  ;;  %v4194_v40 = vld [vmem:[#allocation14 + $0xc8] sm:$0xff]  ;;  %v4188_v39 = vld [vmem:[#allocation14 + $0x98] sm:$0xff]  ;;  %v10172_v16 = vpack.c.bf16 %v4242_v45, %v4234_v3 }
 0x849   :  { %v3620_v42 = vmul.f32 %v11744_v28, %v13374_v51  ;;  %v10160_v30 = vpack.c.bf16 %v4194_v40, %v4186_v61  ;;  %v4244_v17 = vld [vmem:[#allocation14 + $0x258] sm:$0xff]  ;;  %v4233_v28 = vld [vmem:[#allocation14 + $0x200] sm:$0xff]  ;;  %v4266_v61 = vld [vmem:[#allocation14 + $0x308] sm:$0xff] }
 0x84a   :  { %v4274_v40 = vld [vmem:[#allocation14 + $0x348] sm:$0xff] }
 0x84b   :  { %v13456_v53 = vadd.f32 %v3621_v43, %v3620_v42  ;;  %10111 = vmatpush1.bf16.msra.mxu0 %v14790_v25  ;;  %10143 = vmatpush1.bf16.msra.mxu1 %v14791_v2  ;;  %v11746_v4 = vpop.eup %11745  ;;  %v4196_v25 = vld [vmem:[#allocation14 + $0xd8] sm:$0xff]  ;;  %v4185_v2 = vld [vmem:[#allocation14 + $0x80] sm:$0xff]  ;;  %v10204_v42 = vpack.c.bf16 %v4244_v17, %v4236_v14  ;;  %v10174_v43 = vpack.c.bf16 %v4241_v37, %v4233_v28 }
 0x84c   :  { %10113 = vmatprep.subr.bf16.mxu0 %v12827_v26  ;;  %10145 = vmatprep.subr.bf16.mxu1 %v14792_v60  ;;  %v4193_v60 = vld [vmem:[#allocation14 + $0xc0] sm:$0xff]  ;;  %v10192_v51 = vpack.c.bf16 %v4196_v25, %v4188_v39  ;;  %v4268_v39 = vld [vmem:[#allocation14 + $0x318] sm:$0xff] }
 0x84d   :  { %11747 = vtanh.f32 %v13456_v53  ;;  %v10162_v8 = vpack.c.bf16 %v4193_v60, %v4185_v2  ;;  %v4276_v25 = vld [vmem:[#allocation14 + $0x358] sm:$0xff]  ;;  %v4265_v2 = vld [vmem:[#allocation14 + $0x300] sm:$0xff] }
 0x84e   :  { %v4273_v60 = vld [vmem:[#allocation14 + $0x340] sm:$0xff] }
 0x84f   :  { %10115 = vmatpush1.bf16.msra.mxu0 %v12833_v47  ;;  %10147 = vmatpush1.bf16.msra.mxu1 %v12837_v1  ;;  %v4178_v1 = vld [vmem:[#allocation14 + $0x48] sm:$0xff] }
 0x850   :  { %10117 = vmatprep.subr.bf16.mxu0 %v12839_v55  ;;  %10149 = vmatprep.subr.bf16.mxu1 %v12842_v12  ;;  %v4172_v55 = vld [vmem:[#allocation14 + $0x18] sm:$0xff] }
 0x851   :  { %v3628_v17 = vld [vmem:[#allocation2 + $0x7] ss:$8 sm:$0xf] }
 0x853   :  { %10119 = vmatpush1.bf16.msra.mxu0 %v12845_v18  ;;  %10151 = vmatpush1.bf16.msra.mxu1 %v12849_v9  ;;  %v4170_v18 = vld [vmem:[#allocation14 + $0x8] sm:$0xff]  ;;  %v4180_v9 = vld [vmem:[#allocation14 + $0x58] sm:$0xff] }
 0x854   :  { %10121 = vmatprep.subr.bf16.mxu0 %v12851_v19  ;;  %10153 = vmatprep.subr.bf16.mxu1 %v12854_v52  ;;  %v10156_v12 = vpack.c.bf16 %v4178_v1, %v4170_v18  ;;  %v4169_v19 = vld [vmem:[#allocation14] sm:$0xff]  ;;  %v10188_v32 = vpack.c.bf16 %v4180_v9, %v4172_v55  ;;  %v4250_v18 = vld [vmem:[#allocation14 + $0x288] sm:$0xff]  ;;  %v4252_v55 = vld [vmem:[#allocation14 + $0x298] sm:$0xff] }
 0x855   :  { %v4177_v52 = vld [vmem:[#allocation14 + $0x40] sm:$0xff]  ;;  %v4258_v1 = vld [vmem:[#allocation14 + $0x2c8] sm:$0xff]  ;;  %v4260_v9 = vld [vmem:[#allocation14 + $0x2d8] sm:$0xff] }
 0x856   :  { %v10158_v24 = vpack.c.bf16 %v4177_v52, %v4169_v19  ;;  %v4249_v19 = vld [vmem:[#allocation14 + $0x280] sm:$0xff] }
 0x857   :  { %v11748_v26 = vpop.eup %11747  ;;  %10123 = vmatpush1.bf16.msra.mxu0 %v12857_v0  ;;  %10155 = vmatpush1.bf16.msra.mxu1 %v12861_v62  ;;  %v4171_v0 = vld [vmem:[#allocation14 + $0x10] sm:$0xff]  ;;  %v4257_v52 = vld [vmem:[#allocation14 + $0x2c0] sm:$0xff] }
 0x858   :  { %v3624_v47 = vmul.f32 %v11748_v26, %v11746_v4  ;;  %10157 = vmatprep.subr.bf16.mxu0 %v10156_v12  ;;  %v10190_v62 = vpack.c.bf16 %v4179_v49, %v4171_v0  ;;  %10189 = vmatprep.subr.bf16.mxu1 %v10188_v32  ;;  %v4235_v4 = vld [vmem:[#allocation14 + $0x210] sm:$0xff]  ;;  %v10176_v12 = vpack.c.bf16 %v4258_v1, %v4250_v18 }
 0x859   :  { %v4243_v26 = vld [vmem:[#allocation14 + $0x250] sm:$0xff]  ;;  %v10208_v32 = vpack.c.bf16 %v4260_v9, %v4252_v55 }
 0x85a   :  { %3626 = vst [vmem:[#allocation4 + $0x1] sm:$0x1] %v3624_v47  ;;  %3868 = vmatmul.mubr.f32.vlgmr.msra.gmra.mrb[34].mxu0 %v3624_v47  ;;  %3939 = vmatmul.mubr.f32.vlgmr.msra.gmra.mrb[34].mxu1 %v3624_v47  ;;  %v10206_v47 = vpack.c.bf16 %v4243_v26, %v4235_v4  ;;  %v4251_v0 = vld [vmem:[#allocation14 + $0x290] sm:$0xff] }
 0x85b   :  { %4361 = vmatprep.mubr.f32.mxu0 %v14780_v5  ;;  %4432 = vmatprep.mubr.f32.mxu1 %v14780_v5  ;;  %v4259_v49 = vld [vmem:[#allocation14 + $0x2d0] sm:$0xff] }
 0x85c   :  { %10159 = vmatpush1.bf16.msra.mxu0 %v10158_v24  ;;  %10191 = vmatpush1.bf16.msra.mxu1 %v10190_v62  ;;  %v10178_v24 = vpack.c.bf16 %v4257_v52, %v4249_v19  ;;  %v10210_v62 = vpack.c.bf16 %v4259_v49, %v4251_v0 }
 0x85d   :  { %10161 = vmatprep.subr.bf16.mxu0 %v10160_v30  ;;  %10193 = vmatprep.subr.bf16.mxu1 %v10192_v51  ;;  %v10180_v30 = vpack.c.bf16 %v4274_v40, %v4266_v61  ;;  %v10212_v51 = vpack.c.bf16 %v4276_v25, %v4268_v39 }
 0x860   :  { %10163 = vmatpush1.bf16.msra.mxu0 %v10162_v8  ;;  %10195 = vmatpush1.bf16.msra.mxu1 %v10194_v59  ;;  %v10182_v8 = vpack.c.bf16 %v4273_v60, %v4265_v2  ;;  %v10214_v59 = vpack.c.bf16 %v4275_v7, %v4267_v6  ;;  %v3802_v6 = vld [vmem:[#allocation2 + $0x20] ss:$8 sm:$0xf] }
 0x861   :  { %10165 = vmatprep.subr.bf16.mxu0 %v10164_v10  ;;  %10197 = vmatprep.subr.bf16.mxu1 %v10196_v63  ;;  %v10184_v10 = vpack.c.bf16 %v4290_v50, %v4282_v29  ;;  %v10216_v63 = vpack.c.bf16 %v4292_v20, %v4284_v57 }
 0x864   :  { %10167 = vmatpush1.bf16.msra.mxu0 %v10166_v11  ;;  %10199 = vmatpush1.bf16.msra.mxu1 %v10198_v22  ;;  %v10186_v11 = vpack.c.bf16 %v4289_v46, %v4281_v13  ;;  %v4174_v22 = vld [vmem:[#allocation14 + $0x28] sm:$0xff] }
 0x865   :  { %10169 = vmatprep.subr.bf16.mxu0 %v10168_v34  ;;  %10201 = vmatprep.subr.bf16.mxu1 %v10200_v58  ;;  %v4184_v34 = vld [vmem:[#allocation14 + $0x78] sm:$0xff]  ;;  %v10220_v35 = vpack.c.bf16 %v4182_v48, %v4174_v22 }
 0x866   :  { %v10252_v38 = vpack.c.bf16 %v4184_v34, %v4176_v33 }
 0x868   :  { %10171 = vmatpush1.bf16.msra.mxu0 %v10170_v36  ;;  %10203 = vmatpush1.bf16.msra.mxu1 %v10202_v54 }
 0x869   :  { %10173 = vmatprep.subr.bf16.mxu0 %v10172_v16  ;;  %10205 = vmatprep.subr.bf16.mxu1 %v10204_v42 }
 0x86c   :  { %10175 = vmatpush1.bf16.msra.mxu0 %v10174_v43  ;;  %10207 = vmatpush1.bf16.msra.mxu1 %v10206_v47 }
 0x86d   :  { %10177 = vmatprep.subr.bf16.mxu0 %v10176_v12  ;;  %10209 = vmatprep.subr.bf16.mxu1 %v10208_v32 }
 0x870   :  { %10179 = vmatpush1.bf16.msra.mxu0 %v10178_v24  ;;  %10211 = vmatpush1.bf16.msra.mxu1 %v10210_v62 }
 0x871   :  { %10181 = vmatprep.subr.bf16.mxu0 %v10180_v30  ;;  %10213 = vmatprep.subr.bf16.mxu1 %v10212_v51 }
 0x874   :  { %10183 = vmatpush1.bf16.msra.mxu0 %v10182_v8  ;;  %10215 = vmatpush1.bf16.msra.mxu1 %v10214_v59 }
 0x875   :  { %10185 = vmatprep.subr.bf16.mxu0 %v10184_v10  ;;  %10217 = vmatprep.subr.bf16.mxu1 %v10216_v63 }
 0x878   :  { %10187 = vmatpush1.bf16.msra.mxu0 %v10186_v11  ;;  %10219 = vmatpush1.bf16.msra.mxu1 %v10218_v23 }
 0x879   :  { %10221 = vmatprep.subr.bf16.mxu0 %v10220_v35  ;;  %10253 = vmatprep.subr.bf16.mxu1 %v10252_v38 }
 0x90d   :  { %v3695_v41 = vpop.f32.mrb[32].mxu0  ;;  %v3766_v58 = vpop.f32.mrb[32].mxu1 }
 0x90e   :  { %v3697_v36 = vpop.f32.mrb[33].mxu0  ;;  %v3768_v44 = vpop.f32.mrb[33].mxu1 }
 0x90f   :  { %v3775_v56 = vcombine.low %v3695_v41, %v3697_v36  ;;  %v3776_v54 = vcombine.low %v3766_v58, %v3768_v44 }
 0x911   :  { %v3783_v3 = vrot.slane %v3775_v56, %v12935_v31  ;;  %v3790_v45 = vrot.slane %v3776_v54, %v12935_v31  ;;  %v4173_v54 = vld [vmem:[#allocation14 + $0x20] sm:$0xff] }
 0x913   :  { %v3791_v14 = vcombine.low %v3783_v3, %v3790_v45  ;;  %v4181_v3 = vld [vmem:[#allocation14 + $0x60] sm:$0xff]  ;;  %v4175_v45 = vld [vmem:[#allocation14 + $0x30] sm:$0xff] }
 0x915   :  { %v3798_v16 = vrot.slane %v3791_v14, %v12935_v31  ;;  %v4183_v14 = vld [vmem:[#allocation14 + $0x70] sm:$0xff] }
 0x917   :  { %v3800_v28 = vadd.f32 %v3798_v16, %v3628_v17  ;;  %v4190_v16 = vld [vmem:[#allocation14 + $0xa8] sm:$0xff] }
 0x918   :  { %v4198_v17 = vld [vmem:[#allocation14 + $0xe8] sm:$0xff] }
 0x919   :  { %v8853_v37 = vmul.f32 -1.442695, %v3800_v28  ;;  %v3982_v42 = vrot.slane %v3800_v28, 1  ;;  %v3993_v4 = vrot.slane %v3800_v28, 3  ;;  %v3990_v18 = vrot.slane %v3800_v28, 2  ;;  %v4192_v28 = vld [vmem:[#allocation14 + $0xb8] sm:$0xff] }
 0x91b   :  { %11749 = vpow2.f32 %v8853_v37  ;;  %v8854_v43 = vmul.f32 -1.442695, %v3982_v42  ;;  %v8855_v26 = vmul.f32 -1.442695, %v3993_v4  ;;  %v4200_v37 = vld [vmem:[#allocation14 + $0xf8] sm:$0xff]  ;;  %v10222_v42 = vpack.c.bf16 %v4181_v3, %v4173_v54  ;;  %v4189_v4 = vld [vmem:[#allocation14 + $0xa0] sm:$0xff] }
 0x91c   :  { %v4255_v3 = vld [vmem:[#allocation14 + $0x2b0] sm:$0xff] }
 0x91d   :  { %11751 = vpow2.f32 %v8854_v43  ;;  %v10254_v43 = vpack.c.bf16 %v4183_v14, %v4175_v45  ;;  %v4263_v45 = vld [vmem:[#allocation14 + $0x2f0] sm:$0xff]  ;;  %v4270_v14 = vld [vmem:[#allocation14 + $0x328] sm:$0xff] }
 0x91e   :  { %11753 = vpow2.f32 %v8855_v26  ;;  %v4191_v26 = vld [vmem:[#allocation14 + $0xb0] sm:$0xff] }
 0x925   :  { %v11750_v47 = vpop.eup %11749 }
 0x926   :  { %v3978_v1 = vadd.f32 1.0, %v11750_v47  ;;  %v10224_v47 = vpack.c.bf16 %v4198_v17, %v4190_v16  ;;  %v4278_v16 = vld [vmem:[#allocation14 + $0x368] sm:$0xff]  ;;  %v4272_v17 = vld [vmem:[#allocation14 + $0x338] sm:$0xff] }
 0x927   :  { %v11752_v55 = vpop.eup %11751 }
 0x928   :  { %11755 = vrcp.f32 %v3978_v1  ;;  %v3987_v12 = vadd.f32 1.0, %v11752_v55  ;;  %v11754_v49 = vpop.eup %11753  ;;  %v4199_v1 = vld [vmem:[#allocation14 + $0xf0] sm:$0xff]  ;;  %v4206_v55 = vld [vmem:[#allocation14 + $0x128] sm:$0xff] }
 0x929   :  { %11757 = vtanh.f32 %v3990_v18  ;;  %v3998_v2 = vadd.f32 1.0, %v11754_v49  ;;  %v10256_v18 = vpack.c.bf16 %v4200_v37, %v4192_v28  ;;  %v4213_v49 = vld [vmem:[#allocation14 + $0x160] sm:$0xff]  ;;  %v4280_v28 = vld [vmem:[#allocation14 + $0x378] sm:$0xff] }
 0x92a   :  { %11759 = vrcp.f32 %v3987_v12  ;;  %v4214_v12 = vld [vmem:[#allocation14 + $0x168] sm:$0xff] }
 0x92b   :  { %11761 = vrcp.f32 %v3998_v2  ;;  %v4224_v2 = vld [vmem:[#allocation14 + $0x1b8] sm:$0xff] }
 0x92d   :  { %v3869_v9 = vpop.f32.mrb[34].mxu0  ;;  %v3940_v19 = vpop.f32.mrb[34].mxu1 }
 0x92e   :  { %v3871_v52 = vpop.f32.mrb[35].mxu0  ;;  %v3942_v32 = vpop.f32.mrb[35].mxu1 }
 0x92f   :  { %v3949_v24 = vcombine.low %v3869_v9, %v3871_v52  ;;  %v3950_v0 = vcombine.low %v3940_v19, %v3942_v32  ;;  %v4208_v19 = vld [vmem:[#allocation14 + $0x138] sm:$0xff] }
 0x930   :  { %v4216_v52 = vld [vmem:[#allocation14 + $0x178] sm:$0xff] }
 0x931   :  { %v3957_v62 = vrot.slane %v3949_v24, %v12935_v31  ;;  %v3964_v61 = vrot.slane %v3950_v0, %v12935_v31  ;;  %v10258_v24 = vpack.c.bf16 %v4199_v1, %v4191_v26  ;;  %v4205_v0 = vld [vmem:[#allocation14 + $0x120] sm:$0xff]  ;;  %v10276_v26 = vpack.c.bf16 %v4280_v28, %v4272_v17  ;;  %v4286_v1 = vld [vmem:[#allocation14 + $0x3a8] sm:$0xff]  ;;  %v4100_v17 = vld [vmem:[#allocation13 + $0x1d8] sm:$0xff] }
 0x932   :  { %v11756_v40 = vpop.eup %11755 }
 0x933   :  { %v11758_v39 = vpop.eup %11757  ;;  %v3965_v30 = vcombine.low %v3957_v62, %v3964_v61  ;;  %v10228_v62 = vpack.c.bf16 %v4214_v12, %v4206_v55  ;;  %v10260_v61 = vpack.c.bf16 %v4216_v52, %v4208_v19  ;;  %v4294_v55 = vld [vmem:[#allocation14 + $0x3e8] sm:$0xff]  ;;  %v4288_v12 = vld [vmem:[#allocation14 + $0x3b8] sm:$0xff] }
 0x934   :  { %v11760_v25 = vpop.eup %11759  ;;  %v4002_v51 = vmul.f32 %v11758_v39, %v11756_v40  ;;  %v4207_v40 = vld [vmem:[#allocation14 + $0x130] sm:$0xff]  ;;  %v4296_v19 = vld [vmem:[#allocation14 + $0x3f8] sm:$0xff] }
 0x935   :  { %v4001_v60 = vmul.f32 %v11760_v25, %v13434_v27  ;;  %v3972_v8 = vrot.slane %v3965_v30, %v12935_v31  ;;  %v11762_v20 = vpop.eup %11761  ;;  %v4215_v39 = vld [vmem:[#allocation14 + $0x170] sm:$0xff]  ;;  %v4222_v30 = vld [vmem:[#allocation14 + $0x1a8] sm:$0xff] }
 0x936   :  { %v4230_v25 = vld [vmem:[#allocation14 + $0x1e8] sm:$0xff] }
 0x937   :  { %v4003_v7 = vadd.f32 %v4002_v51, %v4001_v60  ;;  %v3974_v59 = vadd.f32 %v3972_v8, %v3802_v6  ;;  %v4232_v60 = vld [vmem:[#allocation14 + $0x1f8] sm:$0xff]  ;;  %v10230_v51 = vpack.c.bf16 %v4213_v49, %v4205_v0  ;;  %v10262_v8 = vpack.c.bf16 %v4215_v39, %v4207_v40  ;;  %v4221_v6 = vld [vmem:[#allocation14 + $0x1a0] sm:$0xff]  ;;  %v4295_v40 = vld [vmem:[#allocation14 + $0x3f0] sm:$0xff] }
 0x938   :  { %v4293_v0 = vld [vmem:[#allocation14 + $0x3e0] sm:$0xff]  ;;  %v10248_v49 = vpack.c.bf16 %v4294_v55, %v4286_v1  ;;  %v4042_v39 = vld [vmem:[#allocation13 + $0x8] sm:$0xff]  ;;  %v4108_v1 = vld [vmem:[#allocation13 + $0x218] sm:$0xff] }
 0x939   :  { %11763 = vtanh.f32 %v4003_v7  ;;  %v8856_v29 = vmul.f32 -1.442695, %v3974_v59  ;;  %v4013_v50 = vrot.slane %v3974_v59, 1  ;;  %v4024_v10 = vrot.slane %v3974_v59, 3  ;;  %v4229_v7 = vld [vmem:[#allocation14 + $0x1e0] sm:$0xff]  ;;  %v4116_v55 = vld [vmem:[#allocation13 + $0x258] sm:$0xff] }
 0x93a   :  { %v4021_v27 = vrot.slane %v3974_v59, 2  ;;  %v10232_v59 = vpack.c.bf16 %v4230_v25, %v4222_v30  ;;  %v4050_v30 = vld [vmem:[#allocation13 + $0x48] sm:$0xff]  ;;  %v4044_v25 = vld [vmem:[#allocation13 + $0x18] sm:$0xff] }
 0x93b   :  { %11765 = vpow2.f32 %v8856_v29  ;;  %v8857_v57 = vmul.f32 -1.442695, %v4013_v50  ;;  %v8858_v46 = vmul.f32 -1.442695, %v4024_v10  ;;  %v10264_v29 = vpack.c.bf16 %v4232_v60, %v4224_v2  ;;  %v4223_v50 = vld [vmem:[#allocation14 + $0x1b0] sm:$0xff]  ;;  %v4238_v10 = vld [vmem:[#allocation14 + $0x228] sm:$0xff] }
 0x93c   :  { %v4052_v2 = vld [vmem:[#allocation13 + $0x58] sm:$0xff] }
 0x93d   :  { %11767 = vpow2.f32 %v8857_v57  ;;  %v4231_v57 = vld [vmem:[#allocation14 + $0x1f0] sm:$0xff] }
 0x93e   :  { %11769 = vpow2.f32 %v8858_v46  ;;  %v4248_v46 = vld [vmem:[#allocation14 + $0x278] sm:$0xff] }
 0x943   :  { %v11764_v13 = vpop.eup %11763 }
 0x944   :  { %v4005_v63 = vmul.f32 %v11764_v13, %v11762_v20  ;;  %v4246_v20 = vld [vmem:[#allocation14 + $0x268] sm:$0xff]  ;;  %v4240_v13 = vld [vmem:[#allocation14 + $0x238] sm:$0xff] }
 0x945   :  { %v11766_v11 = vpop.eup %11765 }
 0x946   :  { %4037 = vst [vmem:[#allocation3 + $0x7] sm:$0x1] %v4005_v63  ;;  %v4009_v15 = vadd.f32 1.0, %v11766_v11  ;;  %v10234_v63 = vpack.c.bf16 %v4229_v7, %v4221_v6  ;;  %v10266_v11 = vpack.c.bf16 %v4231_v57, %v4223_v50  ;;  %v4049_v6 = vld [vmem:[#allocation13 + $0x40] sm:$0xff]  ;;  %v10284_v7 = vpack.c.bf16 %v4050_v30, %v4042_v39  ;;  %v4051_v50 = vld [vmem:[#allocation13 + $0x50] sm:$0xff]  ;;  %v4058_v57 = vld [vmem:[#allocation13 + $0x88] sm:$0xff] }
 0x947   :  { %v11768_v21 = vpop.eup %11767  ;;  %v4124_v39 = vld [vmem:[#allocation13 + $0x298] sm:$0xff] }
 0x948   :  { %11771 = vrcp.f32 %v4009_v15  ;;  %v4018_v22 = vadd.f32 1.0, %v11768_v21  ;;  %v11770_v23 = vpop.eup %11769  ;;  %v4245_v15 = vld [vmem:[#allocation14 + $0x260] sm:$0xff]  ;;  %v10236_v21 = vpack.c.bf16 %v4246_v20, %v4238_v10  ;;  %v4066_v10 = vld [vmem:[#allocation13 + $0xc8] sm:$0xff]  ;;  %v4060_v20 = vld [vmem:[#allocation13 + $0x98] sm:$0xff] }
 0x949   :  { %11773 = vtanh.f32 %v4021_v27  ;;  %v4029_v35 = vadd.f32 1.0, %v11770_v23  ;;  %v4237_v27 = vld [vmem:[#allocation14 + $0x220] sm:$0xff]  ;;  %v4239_v23 = vld [vmem:[#allocation14 + $0x230] sm:$0xff]  ;;  %v4132_v30 = vld [vmem:[#allocation13 + $0x2d8] sm:$0xff] }
 0x94a   :  { %11775 = vrcp.f32 %v4018_v22  ;;  %v10268_v22 = vpack.c.bf16 %v4248_v46, %v4240_v13  ;;  %v4068_v13 = vld [vmem:[#allocation13 + $0xd8] sm:$0xff] }
 0x94b   :  { %11777 = vrcp.f32 %v4029_v35  ;;  %v4256_v35 = vld [vmem:[#allocation14 + $0x2b8] sm:$0xff] }
 0x952   :  { %v11772_v48 = vpop.eup %11771 }
 0x953   :  { %v11774_v33 = vpop.eup %11773 }
 0x954   :  { %v11776_v34 = vpop.eup %11775  ;;  %v4033_v41 = vmul.f32 %v11774_v33, %v11772_v48  ;;  %v4247_v48 = vld [vmem:[#allocation14 + $0x270] sm:$0xff]  ;;  %v4254_v33 = vld [vmem:[#allocation14 + $0x2a8] sm:$0xff] }
 0x955   :  { %v4032_v38 = vmul.f32 %v11776_v34, %v13456_v53  ;;  %v11778_v36 = vpop.eup %11777  ;;  %v4197_v53 = vld [vmem:[#allocation14 + $0xe0] sm:$0xff]  ;;  %v4262_v34 = vld [vmem:[#allocation14 + $0x2e8] sm:$0xff] }
 0x956   :  { %v10226_v32 = vpack.c.bf16 %v4197_v53, %v4189_v4  ;;  %v4277_v4 = vld [vmem:[#allocation14 + $0x360] sm:$0xff]  ;;  %v10244_v53 = vpack.c.bf16 %v4278_v16, %v4270_v14  ;;  %v4098_v14 = vld [vmem:[#allocation13 + $0x1c8] sm:$0xff]  ;;  %v4092_v16 = vld [vmem:[#allocation13 + $0x198] sm:$0xff] }
 0x957   :  { %v4034_v58 = vadd.f32 %v4033_v41, %v4032_v38  ;;  %v4264_v38 = vld [vmem:[#allocation14 + $0x2f8] sm:$0xff]  ;;  %v10238_v41 = vpack.c.bf16 %v4245_v15, %v4237_v27  ;;  %v4065_v27 = vld [vmem:[#allocation13 + $0xc0] sm:$0xff]  ;;  %v10288_v15 = vpack.c.bf16 %v4066_v10, %v4058_v57 }
 0x958   :  { %v10272_v54 = vpack.c.bf16 %v4264_v38, %v4256_v35  ;;  %v4084_v35 = vld [vmem:[#allocation13 + $0x158] sm:$0xff] }
 0x959   :  { %11779 = vtanh.f32 %v4034_v58  ;;  %v10270_v58 = vpack.c.bf16 %v4247_v48, %v4239_v23  ;;  %v4067_v23 = vld [vmem:[#allocation13 + $0xd0] sm:$0xff]  ;;  %v4074_v48 = vld [vmem:[#allocation13 + $0x108] sm:$0xff]  ;;  %v4140_v57 = vld [vmem:[#allocation13 + $0x318] sm:$0xff] }
 0x95a   :  { %v4148_v10 = vld [vmem:[#allocation13 + $0x358] sm:$0xff] }
 0x963   :  { %v11780_v44 = vpop.eup %11779 }
 0x964   :  { %v4036_v56 = vmul.f32 %v11780_v44, %v11778_v36  ;;  %v4253_v36 = vld [vmem:[#allocation14 + $0x2a0] sm:$0xff] }
 0x965   :  { %v4261_v44 = vld [vmem:[#allocation14 + $0x2e0] sm:$0xff] }
 0x966   :  { %4038 = vst [vmem:[#allocation4] sm:$0x1] %v4036_v56  ;;  %v10240_v56 = vpack.c.bf16 %v4262_v34, %v4254_v33  ;;  %v10242_v37 = vpack.c.bf16 %v4261_v44, %v4253_v36  ;;  %v4082_v33 = vld [vmem:[#allocation13 + $0x148] sm:$0xff]  ;;  %v4076_v34 = vld [vmem:[#allocation13 + $0x118] sm:$0xff]  ;;  %v4081_v36 = vld [vmem:[#allocation13 + $0x140] sm:$0xff] }
 0x967   :  { %v10292_v44 = vpack.c.bf16 %v4082_v33, %v4074_v48  ;;  %v4156_v48 = vld [vmem:[#allocation13 + $0x398] sm:$0xff] }
 0x968   :  { %v4164_v33 = vld [vmem:[#allocation13 + $0x3d8] sm:$0xff] }
 0x96d   :  { %v13483_v9 = vld [vmem:[#allocation4] sm:$0xff] }
 0x96e   :  { %4362 = vmatmul.mubr.f32.vlgmr.msra.gmra.mrb[36].mxu0 %v13483_v9  ;;  %4433 = vmatmul.mubr.f32.vlgmr.msra.gmra.mrb[36].mxu1 %v13483_v9 }
 0x96f   :  { %10223 = vmatpush1.bf16.msra.mxu0 %v10222_v42  ;;  %10255 = vmatpush1.bf16.msra.mxu1 %v10254_v43  ;;  %v10274_v42 = vpack.c.bf16 %v4263_v45, %v4255_v3  ;;  %v4269_v43 = vld [vmem:[#allocation14 + $0x320] sm:$0xff]  ;;  %v4083_v3 = vld [vmem:[#allocation13 + $0x150] sm:$0xff]  ;;  %v4090_v45 = vld [vmem:[#allocation13 + $0x188] sm:$0xff] }
 0x970   :  { %10225 = vmatprep.subr.bf16.mxu0 %v10224_v47  ;;  %10257 = vmatprep.subr.bf16.mxu1 %v10256_v18  ;;  %v4271_v47 = vld [vmem:[#allocation14 + $0x330] sm:$0xff]  ;;  %v10246_v52 = vpack.c.bf16 %v4277_v4, %v4269_v43  ;;  %v10296_v43 = vpack.c.bf16 %v4098_v14, %v4090_v45  ;;  %v10328_v4 = vpack.c.bf16 %v4100_v17, %v4092_v16  ;;  %v4048_v45 = vld [vmem:[#allocation13 + $0x38] sm:$0xff] }
 0x971   :  { %4503 = vmatprep.mubr.f32.mxu0 %v14780_v5  ;;  %4574 = vmatprep.mubr.f32.mxu1 %v14780_v5  ;;  %v4279_v18 = vld [vmem:[#allocation14 + $0x370] sm:$0xff]  ;;  %v4056_v14 = vld [vmem:[#allocation13 + $0x78] sm:$0xff] }
 0x973   :  { %10227 = vmatpush1.bf16.msra.mxu0 %v10226_v32  ;;  %10259 = vmatpush1.bf16.msra.mxu1 %v10258_v24  ;;  %v10278_v32 = vpack.c.bf16 %v4279_v18, %v4271_v47  ;;  %v4285_v24 = vld [vmem:[#allocation14 + $0x3a0] sm:$0xff]  ;;  %v4106_v47 = vld [vmem:[#allocation13 + $0x208] sm:$0xff] }
 0x974   :  { %10229 = vmatprep.subr.bf16.mxu0 %v10228_v62  ;;  %10261 = vmatprep.subr.bf16.mxu1 %v10260_v61  ;;  %v10280_v62 = vpack.c.bf16 %v4296_v19, %v4288_v12  ;;  %v4287_v61 = vld [vmem:[#allocation14 + $0x3b0] sm:$0xff]  ;;  %v10250_v60 = vpack.c.bf16 %v4293_v0, %v4285_v24  ;;  %v4114_v18 = vld [vmem:[#allocation13 + $0x248] sm:$0xff]  ;;  %v10332_v0 = vpack.c.bf16 %v4116_v55, %v4108_v1 }
 0x975   :  { %v10300_v24 = vpack.c.bf16 %v4114_v18, %v4106_v47  ;;  %v4064_v47 = vld [vmem:[#allocation13 + $0xb8] sm:$0xff] }
 0x976   :  { %v4072_v18 = vld [vmem:[#allocation13 + $0xf8] sm:$0xff] }
 0x977   :  { %10231 = vmatpush1.bf16.msra.mxu0 %v10230_v51  ;;  %10263 = vmatpush1.bf16.msra.mxu1 %v10262_v8  ;;  %v10282_v51 = vpack.c.bf16 %v4295_v40, %v4287_v61  ;;  %v4041_v8 = vld [vmem:[#allocation13] sm:$0xff]  ;;  %v4122_v61 = vld [vmem:[#allocation13 + $0x288] sm:$0xff] }
 0x978   :  { %10233 = vmatprep.subr.bf16.mxu0 %v10232_v59  ;;  %10265 = vmatprep.subr.bf16.mxu1 %v10264_v29  ;;  %v10316_v59 = vpack.c.bf16 %v4052_v2, %v4044_v25  ;;  %v4043_v29 = vld [vmem:[#allocation13 + $0x10] sm:$0xff]  ;;  %v10286_v46 = vpack.c.bf16 %v4049_v6, %v4041_v8  ;;  %v4130_v40 = vld [vmem:[#allocation13 + $0x2c8] sm:$0xff]  ;;  %v10336_v6 = vpack.c.bf16 %v4132_v30, %v4124_v39  ;;  %v4088_v39 = vld [vmem:[#allocation13 + $0x178] sm:$0xff] }
 0x979   :  { %v10304_v8 = vpack.c.bf16 %v4130_v40, %v4122_v61  ;;  %v13493_v61 = vld [vmem:[#allocation3] sm:$0xff] }
 0x97a   :  { %v4080_v40 = vld [vmem:[#allocation13 + $0x138] sm:$0xff] }
 0x97b   :  { %10235 = vmatpush1.bf16.msra.mxu0 %v10234_v63  ;;  %10267 = vmatpush1.bf16.msra.mxu1 %v10266_v11  ;;  %v10318_v63 = vpack.c.bf16 %v4051_v50, %v4043_v29  ;;  %v4057_v11 = vld [vmem:[#allocation13 + $0x80] sm:$0xff]  ;;  %v4138_v29 = vld [vmem:[#allocation13 + $0x308] sm:$0xff] }
 0x97c   :  { %10237 = vmatprep.subr.bf16.mxu0 %v10236_v21  ;;  %10269 = vmatprep.subr.bf16.mxu1 %v10268_v22  ;;  %v10320_v21 = vpack.c.bf16 %v4068_v13, %v4060_v20  ;;  %v4059_v22 = vld [vmem:[#allocation13 + $0x90] sm:$0xff]  ;;  %v10290_v38 = vpack.c.bf16 %v4065_v27, %v4057_v11  ;;  %v4146_v50 = vld [vmem:[#allocation13 + $0x348] sm:$0xff]  ;;  %v10340_v27 = vpack.c.bf16 %v4148_v10, %v4140_v57  ;;  %v4104_v57 = vld [vmem:[#allocation13 + $0x1f8] sm:$0xff] }
 0x97d   :  { %v10308_v11 = vpack.c.bf16 %v4146_v50, %v4138_v29  ;;  %v4102_v29 = vld [vmem:[#allocation13 + $0x1e8] sm:$0xff]  ;;  %v4096_v50 = vld [vmem:[#allocation13 + $0x1b8] sm:$0xff] }
 0x97f   :  { %10239 = vmatpush1.bf16.msra.mxu0 %v10238_v41  ;;  %10271 = vmatpush1.bf16.msra.mxu1 %v10270_v58  ;;  %v10322_v41 = vpack.c.bf16 %v4067_v23, %v4059_v22  ;;  %v4073_v58 = vld [vmem:[#allocation13 + $0x100] sm:$0xff]  ;;  %v4154_v22 = vld [vmem:[#allocation13 + $0x388] sm:$0xff] }
 0x980   :  { %10241 = vmatprep.subr.bf16.mxu0 %v10240_v56  ;;  %10273 = vmatprep.subr.bf16.mxu1 %v10272_v54  ;;  %v10324_v56 = vpack.c.bf16 %v4084_v35, %v4076_v34  ;;  %v4075_v54 = vld [vmem:[#allocation13 + $0x110] sm:$0xff]  ;;  %v4162_v23 = vld [vmem:[#allocation13 + $0x3c8] sm:$0xff] }
 0x981   :  { %v10326_v28 = vpack.c.bf16 %v4083_v3, %v4075_v54  ;;  %v4046_v54 = vld [vmem:[#allocation13 + $0x28] sm:$0xff] }
 0x982   :  { %v4054_v3 = vld [vmem:[#allocation13 + $0x68] sm:$0xff] }
 0x983   :  { %10243 = vmatpush1.bf16.msra.mxu0 %v10242_v37  ;;  %10275 = vmatpush1.bf16.msra.mxu1 %v10274_v42  ;;  %v4089_v37 = vld [vmem:[#allocation13 + $0x180] sm:$0xff] }
 0x984   :  { %10245 = vmatprep.subr.bf16.mxu0 %v10244_v53  ;;  %10277 = vmatprep.subr.bf16.mxu1 %v10276_v26  ;;  %v4097_v42 = vld [vmem:[#allocation13 + $0x1c0] sm:$0xff]  ;;  %v4091_v53 = vld [vmem:[#allocation13 + $0x190] sm:$0xff] }
 0x985   :  { %v4099_v26 = vld [vmem:[#allocation13 + $0x1d0] sm:$0xff]  ;;  %v10298_v12 = vpack.c.bf16 %v4097_v42, %v4089_v37  ;;  %v10348_v37 = vpack.c.bf16 %v4054_v3, %v4046_v54  ;;  %v10380_v42 = vpack.c.bf16 %v4056_v14, %v4048_v45  ;;  %v4134_v54 = vld [vmem:[#allocation13 + $0x2e8] sm:$0xff]  ;;  %v4128_v3 = vld [vmem:[#allocation13 + $0x2b8] sm:$0xff] }
 0x986   :  { %v10330_v19 = vpack.c.bf16 %v4099_v26, %v4091_v53  ;;  %v4062_v53 = vld [vmem:[#allocation13 + $0xa8] sm:$0xff]  ;;  %v4136_v45 = vld [vmem:[#allocation13 + $0x2f8] sm:$0xff] }
 0x987   :  { %10247 = vmatpush1.bf16.msra.mxu0 %v10246_v52  ;;  %10279 = vmatpush1.bf16.msra.mxu1 %v10278_v32  ;;  %v4105_v52 = vld [vmem:[#allocation13 + $0x200] sm:$0xff]  ;;  %v4070_v26 = vld [vmem:[#allocation13 + $0xe8] sm:$0xff] }
 0x988   :  { %10249 = vmatprep.subr.bf16.mxu0 %v10248_v49  ;;  %10281 = vmatprep.subr.bf16.mxu1 %v10280_v62  ;;  %v4113_v32 = vld [vmem:[#allocation13 + $0x240] sm:$0xff]  ;;  %v4107_v49 = vld [vmem:[#allocation13 + $0x210] sm:$0xff] }
 0x989   :  { %v4115_v62 = vld [vmem:[#allocation13 + $0x250] sm:$0xff]  ;;  %v10302_v25 = vpack.c.bf16 %v4113_v32, %v4105_v52  ;;  %v10352_v32 = vpack.c.bf16 %v4070_v26, %v4062_v53  ;;  %v4150_v53 = vld [vmem:[#allocation13 + $0x368] sm:$0xff]  ;;  %v4144_v26 = vld [vmem:[#allocation13 + $0x338] sm:$0xff] }
 0x98a   :  { %v10334_v2 = vpack.c.bf16 %v4115_v62, %v4107_v49  ;;  %v4063_v52 = vld [vmem:[#allocation13 + $0xb0] sm:$0xff]  ;;  %v4078_v49 = vld [vmem:[#allocation13 + $0x128] sm:$0xff] }
 0x98b   :  { %10251 = vmatpush1.bf16.msra.mxu0 %v10250_v60  ;;  %10283 = vmatpush1.bf16.msra.mxu1 %v10282_v51  ;;  %v4121_v60 = vld [vmem:[#allocation13 + $0x280] sm:$0xff]  ;;  %v4086_v62 = vld [vmem:[#allocation13 + $0x168] sm:$0xff] }
 0x98c   :  { %10285 = vmatprep.subr.bf16.mxu0 %v10284_v7  ;;  %10317 = vmatprep.subr.bf16.mxu1 %v10316_v59  ;;  %v4129_v51 = vld [vmem:[#allocation13 + $0x2c0] sm:$0xff]  ;;  %v4123_v7 = vld [vmem:[#allocation13 + $0x290] sm:$0xff] }
 0x98d   :  { %v4131_v59 = vld [vmem:[#allocation13 + $0x2d0] sm:$0xff]  ;;  %v10306_v20 = vpack.c.bf16 %v4129_v51, %v4121_v60  ;;  %v4085_v60 = vld [vmem:[#allocation13 + $0x160] sm:$0xff]  ;;  %v10356_v51 = vpack.c.bf16 %v4086_v62, %v4078_v49  ;;  %v4166_v49 = vld [vmem:[#allocation13 + $0x3e8] sm:$0xff] }
 0x98e   :  { %4504 = vmatmul.mubr.f32.vlgmr.msra.gmra.mrb[38].mxu0 %v13483_v9  ;;  %4575 = vmatmul.mubr.f32.vlgmr.msra.gmra.mrb[38].mxu1 %v13483_v9  ;;  %v10294_v9 = vpack.c.bf16 %v4081_v36, %v4073_v58  ;;  %v10338_v13 = vpack.c.bf16 %v4131_v59, %v4123_v7  ;;  %v10312_v58 = vpack.c.bf16 %v4162_v23, %v4154_v22  ;;  %v4087_v7 = vld [vmem:[#allocation13 + $0x170] sm:$0xff]  ;;  %v4094_v59 = vld [vmem:[#allocation13 + $0x1a8] sm:$0xff]  ;;  %v4112_v23 = vld [vmem:[#allocation13 + $0x238] sm:$0xff] }
 0x98f   :  { %10287 = vmatpush1.bf16.msra.mxu0 %v10286_v46  ;;  %10319 = vmatpush1.bf16.msra.mxu1 %v10318_v63  ;;  %v4137_v46 = vld [vmem:[#allocation13 + $0x300] sm:$0xff]  ;;  %v10344_v36 = vpack.c.bf16 %v4164_v33, %v4156_v48  ;;  %v4118_v22 = vld [vmem:[#allocation13 + $0x268] sm:$0xff]  ;;  %v4120_v48 = vld [vmem:[#allocation13 + $0x278] sm:$0xff] }
 0x990   :  { %10289 = vmatprep.subr.bf16.mxu0 %v10288_v15  ;;  %10321 = vmatprep.subr.bf16.mxu1 %v10320_v21  ;;  %v4145_v63 = vld [vmem:[#allocation13 + $0x340] sm:$0xff]  ;;  %v4139_v15 = vld [vmem:[#allocation13 + $0x310] sm:$0xff]  ;;  %v4160_v62 = vld [vmem:[#allocation13 + $0x3b8] sm:$0xff] }
 0x991   :  { %4645 = vmatprep.mubr.f32.mxu0 %v14780_v5  ;;  %4716 = vmatprep.mubr.f32.mxu1 %v14780_v5  ;;  %v4147_v21 = vld [vmem:[#allocation13 + $0x350] sm:$0xff]  ;;  %v10310_v34 = vpack.c.bf16 %v4145_v63, %v4137_v46  ;;  %v4101_v46 = vld [vmem:[#allocation13 + $0x1e0] sm:$0xff]  ;;  %v10360_v63 = vpack.c.bf16 %v4102_v29, %v4094_v59  ;;  %v4928_v59 = vld [vmem:[#allocation16 + $0x28] sm:$0xff] }
 0x992   :  { %v10342_v35 = vpack.c.bf16 %v4147_v21, %v4139_v15  ;;  %v4103_v15 = vld [vmem:[#allocation13 + $0x1f0] sm:$0xff]  ;;  %v4110_v21 = vld [vmem:[#allocation13 + $0x228] sm:$0xff]  ;;  %v4926_v29 = vld [vmem:[#allocation16 + $0x18] sm:$0xff] }
 0x993   :  { %10291 = vmatpush1.bf16.msra.mxu0 %v10290_v38  ;;  %10323 = vmatpush1.bf16.msra.mxu1 %v10322_v41  ;;  %v4153_v38 = vld [vmem:[#allocation13 + $0x380] sm:$0xff] }
 0x994   :  { %10293 = vmatprep.subr.bf16.mxu0 %v10292_v44  ;;  %10325 = vmatprep.subr.bf16.mxu1 %v10324_v56  ;;  %v4161_v41 = vld [vmem:[#allocation13 + $0x3c0] sm:$0xff]  ;;  %v4155_v44 = vld [vmem:[#allocation13 + $0x390] sm:$0xff] }
 0x995   :  { %v4163_v56 = vld [vmem:[#allocation13 + $0x3d0] sm:$0xff]  ;;  %v10314_v16 = vpack.c.bf16 %v4161_v41, %v4153_v38  ;;  %v4117_v38 = vld [vmem:[#allocation13 + $0x260] sm:$0xff]  ;;  %v10364_v41 = vpack.c.bf16 %v4118_v22, %v4110_v21  ;;  %v4936_v21 = vld [vmem:[#allocation16 + $0x68] sm:$0xff] }
 0x996   :  { %v10346_v17 = vpack.c.bf16 %v4163_v56, %v4155_v44  ;;  %v4119_v44 = vld [vmem:[#allocation13 + $0x270] sm:$0xff]  ;;  %v4126_v56 = vld [vmem:[#allocation13 + $0x2a8] sm:$0xff]  ;;  %v4934_v22 = vld [vmem:[#allocation16 + $0x58] sm:$0xff] }
 0x997   :  { %10295 = vmatpush1.bf16.msra.mxu0 %v10294_v9  ;;  %10327 = vmatpush1.bf16.msra.mxu1 %v10326_v28  ;;  %v4045_v9 = vld [vmem:[#allocation13 + $0x20] sm:$0xff] }
 0x998   :  { %10297 = vmatprep.subr.bf16.mxu0 %v10296_v43  ;;  %10329 = vmatprep.subr.bf16.mxu1 %v10328_v4  ;;  %v4053_v28 = vld [vmem:[#allocation13 + $0x60] sm:$0xff]  ;;  %v4047_v43 = vld [vmem:[#allocation13 + $0x30] sm:$0xff] }
 0x999   :  { %v4055_v4 = vld [vmem:[#allocation13 + $0x70] sm:$0xff]  ;;  %v10350_v1 = vpack.c.bf16 %v4053_v28, %v4045_v9  ;;  %v4133_v9 = vld [vmem:[#allocation13 + $0x2e0] sm:$0xff]  ;;  %v10368_v28 = vpack.c.bf16 %v4134_v54, %v4126_v56  ;;  %v4944_v56 = vld [vmem:[#allocation16 + $0xa8] sm:$0xff] }
 0x99a   :  { %v10382_v55 = vpack.c.bf16 %v4055_v4, %v4047_v43  ;;  %v4135_v43 = vld [vmem:[#allocation13 + $0x2f0] sm:$0xff]  ;;  %v4142_v4 = vld [vmem:[#allocation13 + $0x328] sm:$0xff]  ;;  %v4942_v54 = vld [vmem:[#allocation16 + $0x98] sm:$0xff] }
 0x99b   :  { %10299 = vmatpush1.bf16.msra.mxu0 %v10298_v12  ;;  %10331 = vmatpush1.bf16.msra.mxu1 %v10330_v19  ;;  %v4061_v12 = vld [vmem:[#allocation13 + $0xa0] sm:$0xff] }
 0x99c   :  { %10301 = vmatprep.subr.bf16.mxu0 %v10300_v24  ;;  %10333 = vmatprep.subr.bf16.mxu1 %v10332_v0  ;;  %v4069_v19 = vld [vmem:[#allocation13 + $0xe0] sm:$0xff]  ;;  %v10384_v24 = vpack.c.bf16 %v4072_v18, %v4064_v47  ;;  %v4071_v0 = vld [vmem:[#allocation13 + $0xf0] sm:$0xff]  ;;  %v4152_v47 = vld [vmem:[#allocation13 + $0x378] sm:$0xff] }
 0x99d   :  { %v10354_v30 = vpack.c.bf16 %v4069_v19, %v4061_v12  ;;  %v4149_v12 = vld [vmem:[#allocation13 + $0x360] sm:$0xff]  ;;  %v10372_v19 = vpack.c.bf16 %v4150_v53, %v4142_v4  ;;  %v4950_v4 = vld [vmem:[#allocation16 + $0xd8] sm:$0xff] }
 0x99e   :  { %v4954_v53 = vld [vmem:[#allocation16 + $0xf8] sm:$0xff] }
 0x99f   :  { %10303 = vmatpush1.bf16.msra.mxu0 %v10302_v25  ;;  %10335 = vmatpush1.bf16.msra.mxu1 %v10334_v2  ;;  %v10386_v25 = vpack.c.bf16 %v4071_v0, %v4063_v52  ;;  %v4077_v2 = vld [vmem:[#allocation13 + $0x120] sm:$0xff]  ;;  %v10404_v52 = vpack.c.bf16 %v4152_v47, %v4144_v26  ;;  %v4158_v0 = vld [vmem:[#allocation13 + $0x3a8] sm:$0xff] }
 0x9a0   :  { %10305 = vmatprep.subr.bf16.mxu0 %v10304_v8  ;;  %10337 = vmatprep.subr.bf16.mxu1 %v10336_v6  ;;  %v10388_v8 = vpack.c.bf16 %v4088_v39, %v4080_v40  ;;  %v4079_v6 = vld [vmem:[#allocation13 + $0x130] sm:$0xff]  ;;  %v10358_v10 = vpack.c.bf16 %v4085_v60, %v4077_v2  ;;  %v4168_v40 = vld [vmem:[#allocation13 + $0x3f8] sm:$0xff]  ;;  %v4165_v2 = vld [vmem:[#allocation13 + $0x3e0] sm:$0xff]  ;;  %v10376_v60 = vpack.c.bf16 %v4166_v49, %v4158_v0 }
 0x9a1   :  { %v4958_v0 = vld [vmem:[#allocation16 + $0x118] sm:$0xff] }
 0x9a2   :  { %v4962_v49 = vld [vmem:[#allocation16 + $0x138] sm:$0xff] }
 0x9a3   :  { %10307 = vmatpush1.bf16.msra.mxu0 %v10306_v20  ;;  %10339 = vmatpush1.bf16.msra.mxu1 %v10338_v13  ;;  %v10390_v20 = vpack.c.bf16 %v4087_v7, %v4079_v6  ;;  %v4093_v13 = vld [vmem:[#allocation13 + $0x1a0] sm:$0xff]  ;;  %v4167_v6 = vld [vmem:[#allocation13 + $0x3f0] sm:$0xff]  ;;  %v4924_v7 = vld [vmem:[#allocation16 + $0x8] sm:$0xff] }
 0x9a4   :  { %10309 = vmatprep.subr.bf16.mxu0 %v10308_v11  ;;  %10341 = vmatprep.subr.bf16.mxu1 %v10340_v27  ;;  %v10392_v11 = vpack.c.bf16 %v4104_v57, %v4096_v50  ;;  %v4095_v27 = vld [vmem:[#allocation13 + $0x1b0] sm:$0xff]  ;;  %v10362_v33 = vpack.c.bf16 %v4101_v46, %v4093_v13  ;;  %v4930_v50 = vld [vmem:[#allocation16 + $0x38] sm:$0xff]  ;;  %v4927_v13 = vld [vmem:[#allocation16 + $0x20] sm:$0xff]  ;;  %v13499_v46 = vpack.c.bf16 %v4928_v59, %v4924_v7 }
 0x9a5   :  { %v4966_v7 = vld [vmem:[#allocation16 + $0x158] sm:$0xff] }
 0x9a6   :  { %v4970_v59 = vld [vmem:[#allocation16 + $0x178] sm:$0xff] }
 0x9a7   :  { %10311 = vmatpush1.bf16.msra.mxu0 %v10310_v34  ;;  %10343 = vmatpush1.bf16.msra.mxu1 %v10342_v35  ;;  %v10394_v34 = vpack.c.bf16 %v4103_v15, %v4095_v27  ;;  %v4109_v35 = vld [vmem:[#allocation13 + $0x220] sm:$0xff]  ;;  %v4929_v27 = vld [vmem:[#allocation16 + $0x30] sm:$0xff]  ;;  %v4932_v15 = vld [vmem:[#allocation16 + $0x48] sm:$0xff] }
 0x9a8   :  { %10313 = vmatprep.subr.bf16.mxu0 %v10312_v58  ;;  %10345 = vmatprep.subr.bf16.mxu1 %v10344_v36  ;;  %v10396_v58 = vpack.c.bf16 %v4120_v48, %v4112_v23  ;;  %v4111_v36 = vld [vmem:[#allocation13 + $0x230] sm:$0xff]  ;;  %v10366_v14 = vpack.c.bf16 %v4117_v38, %v4109_v35  ;;  %v4938_v23 = vld [vmem:[#allocation16 + $0x78] sm:$0xff]  ;;  %v4935_v35 = vld [vmem:[#allocation16 + $0x60] sm:$0xff]  ;;  %v13509_v38 = vpack.c.bf16 %v4936_v21, %v4932_v15 }
 0x9a9   :  { %v4972_v15 = vld [vmem:[#allocation16 + $0x188] sm:$0xff] }
 0x9aa   :  { %v4976_v21 = vld [vmem:[#allocation16 + $0x1a8] sm:$0xff] }
 0x9ab   :  { %10315 = vmatpush1.bf16.msra.mxu0 %v10314_v16  ;;  %10347 = vmatpush1.bf16.msra.mxu1 %v10346_v17  ;;  %v10398_v16 = vpack.c.bf16 %v4119_v44, %v4111_v36  ;;  %v4125_v17 = vld [vmem:[#allocation13 + $0x2a0] sm:$0xff]  ;;  %v4937_v36 = vld [vmem:[#allocation16 + $0x70] sm:$0xff]  ;;  %v4940_v44 = vld [vmem:[#allocation16 + $0x88] sm:$0xff] }
 0x9ac   :  { %10349 = vmatprep.subr.bf16.mxu0 %v10348_v37  ;;  %10381 = vmatprep.subr.bf16.mxu1 %v10380_v42  ;;  %v10400_v37 = vpack.c.bf16 %v4136_v45, %v4128_v3  ;;  %v4127_v42 = vld [vmem:[#allocation13 + $0x2b0] sm:$0xff]  ;;  %v10370_v18 = vpack.c.bf16 %v4133_v9, %v4125_v17  ;;  %v4946_v3 = vld [vmem:[#allocation16 + $0xb8] sm:$0xff]  ;;  %v4943_v17 = vld [vmem:[#allocation16 + $0xa0] sm:$0xff]  ;;  %v13523_v9 = vpack.c.bf16 %v4944_v56, %v4940_v44 }
 0x9ad   :  { %v13573_v44 = vpack.c.bf16 %v4976_v21, %v4972_v15 }
 0x9ae   :  { %4646 = vmatmul.mubr.f32.vlgmr.msra.gmra.mrb[36].mxu0 %v13493_v61  ;;  %4717 = vmatmul.mubr.f32.vlgmr.msra.gmra.mrb[36].mxu1 %v13493_v61 }
 0x9af   :  { %10351 = vmatpush1.bf16.msra.mxu0 %v10350_v1  ;;  %10383 = vmatpush1.bf16.msra.mxu1 %v10382_v55  ;;  %v10402_v1 = vpack.c.bf16 %v4135_v43, %v4127_v42  ;;  %v4141_v55 = vld [vmem:[#allocation13 + $0x320] sm:$0xff]  ;;  %v4948_v42 = vld [vmem:[#allocation16 + $0xc8] sm:$0xff]  ;;  %14939 = vst [vmem:[#allocation32_spill] sm:$0xff] %v13573_v44 }
 0x9b0   :  { %10353 = vmatprep.subr.bf16.mxu0 %v10352_v32  ;;  %10385 = vmatprep.subr.bf16.mxu1 %v10384_v24  ;;  %v4143_v32 = vld [vmem:[#allocation13 + $0x330] sm:$0xff]  ;;  %v10374_v39 = vpack.c.bf16 %v4149_v12, %v4141_v55  ;;  %v4952_v43 = vld [vmem:[#allocation16 + $0xe8] sm:$0xff]  ;;  %v13539_v12 = vpack.c.bf16 %v4954_v53, %v4950_v4  ;;  %v4979_v4 = vld [vmem:[#allocation16 + $0x1c0] sm:$0xff] }
 0x9b1   :  { %4787 = vmatprep.mubr.f32.mxu0 %v14780_v5  ;;  %4858 = vmatprep.mubr.f32.mxu1 %v14780_v5  ;;  %v4151_v24 = vld [vmem:[#allocation13 + $0x370] sm:$0xff]  ;;  %v13537_v55 = vpack.c.bf16 %v4952_v43, %v4948_v42  ;;  %v4983_v53 = vld [vmem:[#allocation16 + $0x1e0] sm:$0xff] }
 0x9b2   :  { %14928 = vst [vmem:[#allocation55_spill] sm:$0xff] %v13539_v12 }
 0x9b3   :  { %10355 = vmatpush1.bf16.msra.mxu0 %v10354_v30  ;;  %10387 = vmatpush1.bf16.msra.mxu1 %v10386_v25  ;;  %v10406_v30 = vpack.c.bf16 %v4151_v24, %v4143_v32  ;;  %v4157_v25 = vld [vmem:[#allocation13 + $0x3a0] sm:$0xff]  ;;  %14927 = vst [vmem:[#allocation54_spill] sm:$0xff] %v13537_v55  ;;  %v4956_v32 = vld [vmem:[#allocation16 + $0x108] sm:$0xff] }
 0x9b4   :  { %10357 = vmatprep.subr.bf16.mxu0 %v10356_v51  ;;  %10389 = vmatprep.subr.bf16.mxu1 %v10388_v8  ;;  %v10408_v51 = vpack.c.bf16 %v4168_v40, %v4160_v62  ;;  %v4159_v8 = vld [vmem:[#allocation13 + $0x3b0] sm:$0xff]  ;;  %v10378_v57 = vpack.c.bf16 %v4165_v2, %v4157_v25  ;;  %v4960_v24 = vld [vmem:[#allocation16 + $0x128] sm:$0xff]  ;;  %v13551_v2 = vpack.c.bf16 %v4962_v49, %v4958_v0  ;;  %v4990_v0 = vld [vmem:[#allocation17 + $0x18] sm:$0xff] }
 0x9b5   :  { %v13549_v25 = vpack.c.bf16 %v4960_v24, %v4956_v32  ;;  %v4988_v32 = vld [vmem:[#allocation17 + $0x8] sm:$0xff]  ;;  %v4994_v49 = vld [vmem:[#allocation17 + $0x38] sm:$0xff] }
 0x9b6   :  { %14932 = vst [vmem:[#allocation59_spill] sm:$0xff] %v13551_v2  ;;  %v4992_v24 = vld [vmem:[#allocation17 + $0x28] sm:$0xff] }
 0x9b7   :  { %10359 = vmatpush1.bf16.msra.mxu0 %v10358_v10  ;;  %10391 = vmatpush1.bf16.msra.mxu1 %v10390_v20  ;;  %v10410_v10 = vpack.c.bf16 %v4167_v6, %v4159_v8  ;;  %v4923_v20 = vld [vmem:[#allocation16] sm:$0xff]  ;;  %14931 = vst [vmem:[#allocation58_spill] sm:$0xff] %v13549_v25  ;;  %v4964_v8 = vld [vmem:[#allocation16 + $0x148] sm:$0xff] }
 0x9b8   :  { %10361 = vmatprep.subr.bf16.mxu0 %v10360_v63  ;;  %10393 = vmatprep.subr.bf16.mxu1 %v10392_v11  ;;  %v13501_v63 = vpack.c.bf16 %v4930_v50, %v4926_v29  ;;  %v4925_v11 = vld [vmem:[#allocation16 + $0x10] sm:$0xff]  ;;  %v13503_v48 = vpack.c.bf16 %v4927_v13, %v4923_v20  ;;  %v4968_v6 = vld [vmem:[#allocation16 + $0x168] sm:$0xff]  ;;  %v13563_v13 = vpack.c.bf16 %v4970_v59, %v4966_v7 }
 0x9b9   :  { %v13561_v20 = vpack.c.bf16 %v4968_v6, %v4964_v8  ;;  %v13597_v8 = vpack.c.bf16 %v4992_v24, %v4988_v32  ;;  %v13599_v6 = vpack.c.bf16 %v4994_v49, %v4990_v0  ;;  %v4989_v7 = vld [vmem:[#allocation17 + $0x10] sm:$0xff] }
 0x9ba   :  { %14936 = vst [vmem:[#allocation29_spill] sm:$0xff] %v13563_v13  ;;  %v4993_v59 = vld [vmem:[#allocation17 + $0x30] sm:$0xff] }
 0x9bb   :  { %10363 = vmatpush1.bf16.msra.mxu0 %v10362_v33  ;;  %10395 = vmatpush1.bf16.msra.mxu1 %v10394_v34  ;;  %v13505_v33 = vpack.c.bf16 %v4929_v27, %v4925_v11  ;;  %v4931_v34 = vld [vmem:[#allocation16 + $0x40] sm:$0xff]  ;;  %14935 = vst [vmem:[#allocation28_spill] sm:$0xff] %v13561_v20  ;;  %v4965_v11 = vld [vmem:[#allocation16 + $0x150] sm:$0xff]  ;;  %14947 = vst [vmem:[#allocation40_spill] sm:$0xff] %v13597_v8  ;;  %v13605_v21 = vpack.c.bf16 %v4993_v59, %v4989_v7 }
 0x9bc   :  { %10365 = vmatprep.subr.bf16.mxu0 %v10364_v41  ;;  %10397 = vmatprep.subr.bf16.mxu1 %v10396_v58  ;;  %v13511_v41 = vpack.c.bf16 %v4938_v23, %v4934_v22  ;;  %v4933_v58 = vld [vmem:[#allocation16 + $0x50] sm:$0xff]  ;;  %v13517_v45 = vpack.c.bf16 %v4935_v35, %v4931_v34  ;;  %v4974_v22 = vld [vmem:[#allocation16 + $0x198] sm:$0xff]  ;;  %14948 = vst [vmem:[#allocation41_spill] sm:$0xff] %v13599_v6 }
 0x9bd   :  { %v4969_v27 = vld [vmem:[#allocation16 + $0x170] sm:$0xff]  ;;  %v4978_v23 = vld [vmem:[#allocation16 + $0x1b8] sm:$0xff] }
 0x9be   :  { %v13569_v35 = vpack.c.bf16 %v4969_v27, %v4965_v11  ;;  %v13575_v56 = vpack.c.bf16 %v4978_v23, %v4974_v22  ;;  %v4998_v11 = vld [vmem:[#allocation17 + $0x58] sm:$0xff]  ;;  %v4995_v22 = vld [vmem:[#allocation17 + $0x40] sm:$0xff]  ;;  %v5005_v0 = vld [vmem:[#allocation17 + $0x90] sm:$0xff] }
 0x9bf   :  { %10367 = vmatpush1.bf16.msra.mxu0 %v10366_v14  ;;  %10399 = vmatpush1.bf16.msra.mxu1 %v10398_v16  ;;  %v13519_v14 = vpack.c.bf16 %v4937_v36, %v4933_v58  ;;  %v4939_v16 = vld [vmem:[#allocation16 + $0x80] sm:$0xff]  ;;  %v5002_v27 = vld [vmem:[#allocation17 + $0x78] sm:$0xff]  ;;  %v5009_v49 = vld [vmem:[#allocation17 + $0xb0] sm:$0xff] }
 0x9c0   :  { %10369 = vmatprep.subr.bf16.mxu0 %v10368_v28  ;;  %10401 = vmatprep.subr.bf16.mxu1 %v10400_v37  ;;  %v13525_v28 = vpack.c.bf16 %v4946_v3, %v4942_v54  ;;  %v4941_v37 = vld [vmem:[#allocation16 + $0x90] sm:$0xff]  ;;  %v13531_v26 = vpack.c.bf16 %v4943_v17, %v4939_v16  ;;  %14938 = vst [vmem:[#allocation31_spill] sm:$0xff] %v13569_v35  ;;  %v4971_v58 = vld [vmem:[#allocation16 + $0x180] sm:$0xff]  ;;  %14940 = vst [vmem:[#allocation33_spill] sm:$0xff] %v13575_v56 }
 0x9c1   :  { %v4975_v36 = vld [vmem:[#allocation16 + $0x1a0] sm:$0xff]  ;;  %v4973_v54 = vld [vmem:[#allocation16 + $0x190] sm:$0xff]  ;;  %v4980_v16 = vld [vmem:[#allocation16 + $0x1c8] sm:$0xff] }
 0x9c2   :  { %14925 = vst [vmem:[#allocation52_spill] sm:$0xff] %v13531_v26  ;;  %v4977_v3 = vld [vmem:[#allocation16 + $0x1b0] sm:$0xff]  ;;  %v4984_v17 = vld [vmem:[#allocation16 + $0x1e8] sm:$0xff]  ;;  %v13579_v42 = vpack.c.bf16 %v4975_v36, %v4971_v58  ;;  %v4999_v23 = vld [vmem:[#allocation17 + $0x60] sm:$0xff]  ;;  %v13611_v36 = vpack.c.bf16 %v5002_v27, %v4998_v11 }
 0x9c3   :  { %10371 = vmatpush1.bf16.msra.mxu0 %v10370_v18  ;;  %10403 = vmatpush1.bf16.msra.mxu1 %v10402_v1  ;;  %v4947_v18 = vld [vmem:[#allocation16 + $0xc0] sm:$0xff]  ;;  %v13581_v43 = vpack.c.bf16 %v4977_v3, %v4973_v54  ;;  %v4997_v54 = vld [vmem:[#allocation17 + $0x50] sm:$0xff]  ;;  %v5014_v7 = vld [vmem:[#allocation17 + $0xd8] sm:$0xff] }
 0x9c4   :  { %10373 = vmatprep.subr.bf16.mxu0 %v10372_v19  ;;  %10405 = vmatprep.subr.bf16.mxu1 %v10404_v52  ;;  %v4951_v1 = vld [vmem:[#allocation16 + $0xe0] sm:$0xff]  ;;  %v4949_v19 = vld [vmem:[#allocation16 + $0xd0] sm:$0xff]  ;;  %14941 = vst [vmem:[#allocation34_spill] sm:$0xff] %v13579_v42  ;;  %v5018_v59 = vld [vmem:[#allocation17 + $0xf8] sm:$0xff] }
 0x9c5   :  { %v4953_v52 = vld [vmem:[#allocation16 + $0xf0] sm:$0xff]  ;;  %v13543_v62 = vpack.c.bf16 %v4951_v1, %v4947_v18  ;;  %14942 = vst [vmem:[#allocation35_spill] sm:$0xff] %v13581_v43  ;;  %v13585_v18 = vpack.c.bf16 %v4984_v17, %v4980_v16  ;;  %v5004_v16 = vld [vmem:[#allocation17 + $0x88] sm:$0xff]  ;;  %v5011_v11 = vld [vmem:[#allocation17 + $0xc0] sm:$0xff] }
 0x9c6   :  { %v13545_v40 = vpack.c.bf16 %v4953_v52, %v4949_v19  ;;  %v4981_v19 = vld [vmem:[#allocation16 + $0x1d0] sm:$0xff]  ;;  %v5008_v17 = vld [vmem:[#allocation17 + $0xa8] sm:$0xff]  ;;  %v5015_v27 = vld [vmem:[#allocation17 + $0xe0] sm:$0xff] }
 0x9c7   :  { %10375 = vmatpush1.bf16.msra.mxu0 %v10374_v39  ;;  %10407 = vmatpush1.bf16.msra.mxu1 %v10406_v30  ;;  %14929 = vst [vmem:[#allocation56_spill] sm:$0xff] %v13543_v62  ;;  %v4955_v39 = vld [vmem:[#allocation16 + $0x100] sm:$0xff]  ;;  %14943 = vst [vmem:[#allocation36_spill] sm:$0xff] %v13585_v18  ;;  %v4985_v52 = vld [vmem:[#allocation16 + $0x1f0] sm:$0xff]  ;;  %v13623_v32 = vpack.c.bf16 %v5008_v17, %v5004_v16 }
 0x9c8   :  { %10377 = vmatprep.subr.bf16.mxu0 %v10376_v60  ;;  %10409 = vmatprep.subr.bf16.mxu1 %v10408_v51  ;;  %14930 = vst [vmem:[#allocation57_spill] sm:$0xff] %v13545_v40  ;;  %v4959_v30 = vld [vmem:[#allocation16 + $0x120] sm:$0xff]  ;;  %v4957_v60 = vld [vmem:[#allocation16 + $0x110] sm:$0xff]  ;;  %v5020_v16 = vld [vmem:[#allocation17 + $0x108] sm:$0xff] }
 0x9c9   :  { %v4961_v51 = vld [vmem:[#allocation16 + $0x130] sm:$0xff]  ;;  %v13555_v29 = vpack.c.bf16 %v4959_v30, %v4955_v39  ;;  %v13591_v39 = vpack.c.bf16 %v4983_v53, %v4979_v4  ;;  %v13593_v30 = vpack.c.bf16 %v4985_v52, %v4981_v19  ;;  %v13617_v4 = vpack.c.bf16 %v4999_v23, %v4995_v22  ;;  %v5003_v19 = vld [vmem:[#allocation17 + $0x80] sm:$0xff]  ;;  %14949 = vst [vmem:[#allocation42_spill] sm:$0xff] %v13623_v32  ;;  %v5024_v17 = vld [vmem:[#allocation17 + $0x128] sm:$0xff] }
 0x9ca   :  { %v13557_v50 = vpack.c.bf16 %v4961_v51, %v4957_v60  ;;  %v4987_v60 = vld [vmem:[#allocation17] sm:$0xff]  ;;  %v5001_v3 = vld [vmem:[#allocation17 + $0x70] sm:$0xff]  ;;  %v13639_v23 = vpack.c.bf16 %v5018_v59, %v5014_v7 }
 0x9cb   :  { %10379 = vmatpush1.bf16.msra.mxu0 %v10378_v57  ;;  %10411 = vmatpush1.bf16.msra.mxu1 %v10410_v10  ;;  %14933 = vst [vmem:[#allocation60_spill] sm:$0xff] %v13555_v29  ;;  %v4963_v57 = vld [vmem:[#allocation16 + $0x140] sm:$0xff]  ;;  %14945 = vst [vmem:[#allocation38_spill] sm:$0xff] %v13591_v39  ;;  %v13619_v53 = vpack.c.bf16 %v5001_v3, %v4997_v54  ;;  %v5013_v54 = vld [vmem:[#allocation17 + $0xd0] sm:$0xff] }
 0x9cc   :  { %10413 = vmatprep.subr.bf16.mxu0 %v13499_v46  ;;  %10445 = vmatprep.subr.bf16.mxu1 %v13501_v63  ;;  %14934 = vst [vmem:[#allocation61_spill] sm:$0xff] %v13557_v50  ;;  %v4967_v10 = vld [vmem:[#allocation16 + $0x160] sm:$0xff]  ;;  %14946 = vst [vmem:[#allocation39_spill] sm:$0xff] %v13593_v30  ;;  %v5017_v3 = vld [vmem:[#allocation17 + $0xf0] sm:$0xff] }
 0x9cd   :  { %v13567_v34 = vpack.c.bf16 %v4967_v10, %v4963_v57  ;;  %v4991_v51 = vld [vmem:[#allocation17 + $0x20] sm:$0xff]  ;;  %v4996_v57 = vld [vmem:[#allocation17 + $0x48] sm:$0xff]  ;;  %14954 = vst [vmem:[#allocation47_spill] sm:$0xff] %v13639_v23  ;;  %v5021_v7 = vld [vmem:[#allocation17 + $0x110] sm:$0xff] }
 0x9ce   :  { %4788 = vmatmul.mubr.f32.vlgmr.msra.gmra.mrb[38].mxu0 %v13493_v61  ;;  %4859 = vmatmul.mubr.f32.vlgmr.msra.gmra.mrb[38].mxu1 %v13493_v61  ;;  %v4945_v61 = vld [vmem:[#allocation16 + $0xb0] sm:$0xff]  ;;  %v5000_v10 = vld [vmem:[#allocation17 + $0x68] sm:$0xff]  ;;  %v13603_v15 = vpack.c.bf16 %v4991_v51, %v4987_v60  ;;  %v5007_v52 = vld [vmem:[#allocation17 + $0xa0] sm:$0xff] }
 0x9cf   :  { %10415 = vmatpush1.bf16.msra.mxu0 %v13503_v48  ;;  %10447 = vmatpush1.bf16.msra.mxu1 %v13505_v33  ;;  %v13533_v47 = vpack.c.bf16 %v4945_v61, %v4941_v37  ;;  %14937 = vst [vmem:[#allocation30_spill] sm:$0xff] %v13567_v34  ;;  %v4982_v37 = vld [vmem:[#allocation16 + $0x1d8] sm:$0xff]  ;;  %v13609_v58 = vpack.c.bf16 %v5000_v10, %v4996_v57  ;;  %v5012_v60 = vld [vmem:[#allocation17 + $0xc8] sm:$0xff]  ;;  %v5025_v59 = vld [vmem:[#allocation17 + $0x130] sm:$0xff] }
 0x9d0   :  { %10417 = vmatprep.subr.bf16.mxu0 %v13509_v38  ;;  %10449 = vmatprep.subr.bf16.mxu1 %v13511_v41  ;;  %v4986_v61 = vld [vmem:[#allocation16 + $0x1f8] sm:$0xff]  ;;  %v5016_v51 = vld [vmem:[#allocation17 + $0xe8] sm:$0xff]  ;;  %v13631_v57 = vpack.c.bf16 %v5007_v52, %v5003_v19  ;;  %v13633_v10 = vpack.c.bf16 %v5009_v49, %v5005_v0  ;;  %v13643_v19 = vpack.c.bf16 %v5015_v27, %v5011_v11  ;;  %v5019_v0 = vld [vmem:[#allocation17 + $0x100] sm:$0xff] }
 0x9d1   :  { %5116 = vmatprep.mubr.f32.mxu0 %v14780_v5  ;;  %5187 = vmatprep.mubr.f32.mxu1 %v14780_v5  ;;  %14926 = vst [vmem:[#allocation53_spill] sm:$0xff] %v13533_v47  ;;  %v13587_v1 = vpack.c.bf16 %v4986_v61, %v4982_v37  ;;  %v5006_v37 = vld [vmem:[#allocation17 + $0x98] sm:$0xff]  ;;  %v13637_v22 = vpack.c.bf16 %v5016_v51, %v5012_v60  ;;  %v5023_v49 = vld [vmem:[#allocation17 + $0x120] sm:$0xff] }
 0x9d2   :  { %v5010_v61 = vld [vmem:[#allocation17 + $0xb8] sm:$0xff]  ;;  %14951 = vst [vmem:[#allocation44_spill] sm:$0xff] %v13631_v57  ;;  %14952 = vst [vmem:[#allocation45_spill] sm:$0xff] %v13633_v10  ;;  %v13645_v52 = vpack.c.bf16 %v5017_v3, %v5013_v54  ;;  %v13649_v60 = vpack.c.bf16 %v5024_v17, %v5020_v16  ;;  %v13655_v11 = vpack.c.bf16 %v5023_v49, %v5019_v0  ;;  %v5027_v54 = vld [vmem:[#allocation17 + $0x140] sm:$0xff] }
 0x9d3   :  { %10419 = vmatpush1.bf16.msra.mxu0 %v13517_v45  ;;  %10451 = vmatpush1.bf16.msra.mxu1 %v13519_v14  ;;  %14944 = vst [vmem:[#allocation37_spill] sm:$0xff] %v13587_v1  ;;  %v13625_v24 = vpack.c.bf16 %v5010_v61, %v5006_v37  ;;  %14953 = vst [vmem:[#allocation46_spill] sm:$0xff] %v13637_v22  ;;  %v5022_v37 = vld [vmem:[#allocation17 + $0x118] sm:$0xff]  ;;  %v13657_v27 = vpack.c.bf16 %v5025_v59, %v5021_v7  ;;  %v5031_v3 = vld [vmem:[#allocation17 + $0x160] sm:$0xff] }
 0x9d4   :  { %10421 = vmatprep.subr.bf16.mxu0 %v13523_v9  ;;  %10453 = vmatprep.subr.bf16.mxu1 %v13525_v28  ;;  %v5026_v61 = vld [vmem:[#allocation17 + $0x138] sm:$0xff]  ;;  %14955 = vst [vmem:[#allocation48_spill] sm:$0xff] %v13643_v19  ;;  %14956 = vst [vmem:[#allocation49_spill] sm:$0xff] %v13645_v52  ;;  %v13667_v0 = vpack.c.bf16 %v5031_v3, %v5027_v54  ;;  %v5035_v7 = vld [vmem:[#allocation17 + $0x180] sm:$0xff] }
 0x9d5   :  { %14950 = vst [vmem:[#allocation43_spill] sm:$0xff] %v13625_v24  ;;  %14957 = vst [vmem:[#allocation50_spill] sm:$0xff] %v13649_v60  ;;  %v13651_v51 = vpack.c.bf16 %v5026_v61, %v5022_v37  ;;  %v5029_v37 = vld [vmem:[#allocation17 + $0x150] sm:$0xff]  ;;  %v5039_v59 = vld [vmem:[#allocation17 + $0x1a0] sm:$0xff] }
 0x9d6   :  { %14959 = vst [vmem:[#allocation64_spill] sm:$0xff] %v13655_v11  ;;  %14960 = vst [vmem:[#allocation65_spill] sm:$0xff] %v13657_v27  ;;  %v5033_v61 = vld [vmem:[#allocation17 + $0x170] sm:$0xff]  ;;  %v13679_v54 = vpack.c.bf16 %v5039_v59, %v5035_v7 }
 0x9d7   :  { %10423 = vmatpush1.bf16.msra.mxu0 %v13531_v26  ;;  %10455 = vmatpush1.bf16.msra.mxu1 %v13533_v47  ;;  %14958 = vst [vmem:[#allocation51_spill] sm:$0xff] %v13651_v51  ;;  %v13669_v49 = vpack.c.bf16 %v5033_v61, %v5029_v37  ;;  %v5043_v37 = vld [vmem:[#allocation17 + $0x1c0] sm:$0xff]  ;;  %v5049_v61 = vld [vmem:[#allocation17 + $0x1f0] sm:$0xff] }
 0x9d8   :  { %10425 = vmatprep.subr.bf16.mxu0 %v13537_v55  ;;  %10457 = vmatprep.subr.bf16.mxu1 %v13539_v12 }
 0x9db   :  { %10427 = vmatpush1.bf16.msra.mxu0 %v13543_v62  ;;  %10459 = vmatpush1.bf16.msra.mxu1 %v13545_v40 }
 0x9dc   :  { %10429 = vmatprep.subr.bf16.mxu0 %v13549_v25  ;;  %10461 = vmatprep.subr.bf16.mxu1 %v13551_v2 }
 0x9df   :  { %10431 = vmatpush1.bf16.msra.mxu0 %v13555_v29  ;;  %10463 = vmatpush1.bf16.msra.mxu1 %v13557_v50 }
 0x9e0   :  { %10433 = vmatprep.subr.bf16.mxu0 %v13561_v20  ;;  %10465 = vmatprep.subr.bf16.mxu1 %v13563_v13 }
 0x9e3   :  { %10435 = vmatpush1.bf16.msra.mxu0 %v13567_v34  ;;  %10467 = vmatpush1.bf16.msra.mxu1 %v13569_v35 }
 0x9e4   :  { %10437 = vmatprep.subr.bf16.mxu0 %v13573_v44  ;;  %10469 = vmatprep.subr.bf16.mxu1 %v13575_v56 }
 0x9e7   :  { %10439 = vmatpush1.bf16.msra.mxu0 %v13579_v42  ;;  %10471 = vmatpush1.bf16.msra.mxu1 %v13581_v43 }
 0x9e8   :  { %10441 = vmatprep.subr.bf16.mxu0 %v13585_v18  ;;  %10473 = vmatprep.subr.bf16.mxu1 %v13587_v1 }
 0x9eb   :  { %10443 = vmatpush1.bf16.msra.mxu0 %v13591_v39  ;;  %10475 = vmatpush1.bf16.msra.mxu1 %v13593_v30 }
 0x9ec   :  { %10477 = vmatprep.subr.bf16.mxu0 %v13597_v8  ;;  %10509 = vmatprep.subr.bf16.mxu1 %v13599_v6 }
 0x9ee   :  { %5117 = vmatmul.mubr.f32.vlgmr.msra.gmra.mrb[40].mxu0 %v14780_v5  ;;  %5188 = vmatmul.mubr.f32.vlgmr.msra.gmra.mrb[40].mxu1 %v14780_v5 }
 0x9ef   :  { %10479 = vmatpush1.bf16.msra.mxu0 %v13603_v15  ;;  %10511 = vmatpush1.bf16.msra.mxu1 %v13605_v21 }
 0x9f0   :  { %10481 = vmatprep.subr.bf16.mxu0 %v13609_v58  ;;  %10513 = vmatprep.subr.bf16.mxu1 %v13611_v36 }
 0x9f1   :  { %5289 = vmatprep.mubr.f32.mxu0 %v14780_v5  ;;  %5360 = vmatprep.mubr.f32.mxu1 %v14780_v5 }
 0x9f3   :  { %10483 = vmatpush1.bf16.msra.mxu0 %v13617_v4  ;;  %10515 = vmatpush1.bf16.msra.mxu1 %v13619_v53 }
 0x9f4   :  { %10485 = vmatprep.subr.bf16.mxu0 %v13623_v32  ;;  %10517 = vmatprep.subr.bf16.mxu1 %v13625_v24  ;;  %v5028_v24 = vld [vmem:[#allocation17 + $0x148] sm:$0xff]  ;;  %v5030_v32 = vld [vmem:[#allocation17 + $0x158] sm:$0xff] }
 0x9f7   :  { %10487 = vmatpush1.bf16.msra.mxu0 %v13631_v57  ;;  %10519 = vmatpush1.bf16.msra.mxu1 %v13633_v10  ;;  %v5032_v57 = vld [vmem:[#allocation17 + $0x168] sm:$0xff]  ;;  %v5034_v10 = vld [vmem:[#allocation17 + $0x178] sm:$0xff] }
 0x9f8   :  { %10489 = vmatprep.subr.bf16.mxu0 %v13637_v22  ;;  %10521 = vmatprep.subr.bf16.mxu1 %v13639_v23  ;;  %v13661_v16 = vpack.c.bf16 %v5032_v57, %v5028_v24  ;;  %v13663_v17 = vpack.c.bf16 %v5034_v10, %v5030_v32  ;;  %v5036_v23 = vld [vmem:[#allocation17 + $0x188] sm:$0xff]  ;;  %v5038_v22 = vld [vmem:[#allocation17 + $0x198] sm:$0xff]  ;;  %v5037_v57 = vld [vmem:[#allocation17 + $0x190] sm:$0xff] }
 0x9f9   :  { %v5041_v10 = vld [vmem:[#allocation17 + $0x1b0] sm:$0xff] }
 0x9fa   :  { %v13681_v3 = vpack.c.bf16 %v5041_v10, %v5037_v57 }
 0x9fb   :  { %10491 = vmatpush1.bf16.msra.mxu0 %v13643_v19  ;;  %10523 = vmatpush1.bf16.msra.mxu1 %v13645_v52  ;;  %v5040_v19 = vld [vmem:[#allocation17 + $0x1a8] sm:$0xff]  ;;  %v5042_v52 = vld [vmem:[#allocation17 + $0x1b8] sm:$0xff] }
 0x9fc   :  { %10493 = vmatprep.subr.bf16.mxu0 %v13649_v60  ;;  %10525 = vmatprep.subr.bf16.mxu1 %v13651_v51  ;;  %v13673_v32 = vpack.c.bf16 %v5040_v19, %v5036_v23  ;;  %v13675_v24 = vpack.c.bf16 %v5042_v52, %v5038_v22  ;;  %v5044_v51 = vld [vmem:[#allocation17 + $0x1c8] sm:$0xff]  ;;  %v5046_v60 = vld [vmem:[#allocation17 + $0x1d8] sm:$0xff]  ;;  %v5047_v19 = vld [vmem:[#allocation17 + $0x1e0] sm:$0xff] }
 0x9fd   :  { %v5045_v52 = vld [vmem:[#allocation17 + $0x1d0] sm:$0xff]  ;;  %v13691_v7 = vpack.c.bf16 %v5047_v19, %v5043_v37 }
 0x9fe   :  { %v13693_v59 = vpack.c.bf16 %v5049_v61, %v5045_v52 }
 0x9ff   :  { %10495 = vmatpush1.bf16.msra.mxu0 %v13655_v11  ;;  %10527 = vmatpush1.bf16.msra.mxu1 %v13657_v27  ;;  %v5048_v11 = vld [vmem:[#allocation17 + $0x1e8] sm:$0xff]  ;;  %v5050_v27 = vld [vmem:[#allocation17 + $0x1f8] sm:$0xff] }
 0xa00   :  { %10497 = vmatprep.subr.bf16.mxu0 %v13661_v16  ;;  %10529 = vmatprep.subr.bf16.mxu1 %v13663_v17  ;;  %v13685_v22 = vpack.c.bf16 %v5048_v11, %v5044_v51  ;;  %v13687_v23 = vpack.c.bf16 %v5050_v27, %v5046_v60  ;;  %v4865_v60 = vld [vmem:[%s14564_s11] sm:$0xff] }
 0xa01   :  { %v14961_v51 = vld [vmem:[#allocation63_spill] sm:$0xff]  ;;  %v14962_v27 = vld [vmem:[#allocation62_spill] sm:$0xff] }
 0xa02   :  { %v4870_v11 = vrot.slane %v4865_v60, %v14961_v51  ;;  %v14963_v57 = vsub.s32 2, %v14962_v27  ;;  %v14964_v37 = vsub.s32 1, %v14962_v27  ;;  %v14965_v52 = vsub.s32 3, %v14962_v27 }
 0xa03   :  { %10499 = vmatpush1.bf16.msra.mxu0 %v13667_v0  ;;  %10531 = vmatpush1.bf16.msra.mxu1 %v13669_v49 }
 0xa04   :  { %10501 = vmatprep.subr.bf16.mxu0 %v13673_v32  ;;  %10533 = vmatprep.subr.bf16.mxu1 %v13675_v24  ;;  %v4878_v10 = vrot.slane %v4865_v60, %v14963_v57  ;;  %v4874_v19 = vrot.slane %v4865_v60, %v14964_v37  ;;  %v4882_v61 = vrot.slane %v4865_v60, %v14965_v52  ;;  %v14966_v57 = vsub.s32 4, %v14962_v27 }
 0xa05   :  { %v14967_v37 = vsub.s32 6, %v14962_v27  ;;  %v14968_v52 = vsub.s32 5, %v14962_v27 }
 0xa06   :  { %v4886_v51 = vrot.slane %v4865_v60, %v14966_v57 }
 0xa07   :  { %10503 = vmatpush1.bf16.msra.mxu0 %v13679_v54  ;;  %10535 = vmatpush1.bf16.msra.mxu1 %v13681_v3 }
 0xa08   :  { %10505 = vmatprep.subr.bf16.mxu0 %v13685_v22  ;;  %10537 = vmatprep.subr.bf16.mxu1 %v13687_v23 }
 0xa0b   :  { %10507 = vmatpush1.bf16.msra.mxu0 %v13691_v7  ;;  %10539 = vmatpush1.bf16.msra.mxu1 %v13693_v59 }
 0xa0c   :  { %10541 = vmatprep.subr.bf16.mxu0 %v13499_v46  ;;  %10573 = vmatprep.subr.bf16.mxu1 %v13501_v63 }
 0xa0e   :  { %5290 = vmatmul.mubr.f32.vlgmr.msra.gmra.mrb[42].mxu0 %v14780_v5  ;;  %5361 = vmatmul.mubr.f32.vlgmr.msra.gmra.mrb[42].mxu1 %v14780_v5 }
 0xa0f   :  { %10543 = vmatpush1.bf16.msra.mxu0 %v13503_v48  ;;  %10575 = vmatpush1.bf16.msra.mxu1 %v13505_v33 }
 0xa10   :  { %10545 = vmatprep.subr.bf16.mxu0 %v13509_v38  ;;  %10577 = vmatprep.subr.bf16.mxu1 %v13511_v41 }
 0xa11   :  { %5526 = vmatprep.mubr.f32.mxu0 %v14780_v5  ;;  %5597 = vmatprep.mubr.f32.mxu1 %v14780_v5 }
 0xa13   :  { %10547 = vmatpush1.bf16.msra.mxu0 %v13517_v45  ;;  %10579 = vmatpush1.bf16.msra.mxu1 %v13519_v14 }
 0xa14   :  { %10549 = vmatprep.subr.bf16.mxu0 %v13523_v9  ;;  %10581 = vmatprep.subr.bf16.mxu1 %v13525_v28 }
 0xa17   :  { %10551 = vmatpush1.bf16.msra.mxu0 %v13531_v26  ;;  %10583 = vmatpush1.bf16.msra.mxu1 %v13533_v47 }
 0xa18   :  { %10553 = vmatprep.subr.bf16.mxu0 %v13537_v55  ;;  %10585 = vmatprep.subr.bf16.mxu1 %v13539_v12 }
 0xa1b   :  { %10555 = vmatpush1.bf16.msra.mxu0 %v13543_v62  ;;  %10587 = vmatpush1.bf16.msra.mxu1 %v13545_v40 }
 0xa1c   :  { %10557 = vmatprep.subr.bf16.mxu0 %v13549_v25  ;;  %10589 = vmatprep.subr.bf16.mxu1 %v13551_v2 }
 0xa1f   :  { %10559 = vmatpush1.bf16.msra.mxu0 %v13555_v29  ;;  %10591 = vmatpush1.bf16.msra.mxu1 %v13557_v50 }
 0xa20   :  { %10561 = vmatprep.subr.bf16.mxu0 %v13561_v20  ;;  %10593 = vmatprep.subr.bf16.mxu1 %v13563_v13 }
 0xa23   :  { %10563 = vmatpush1.bf16.msra.mxu0 %v13567_v34  ;;  %10595 = vmatpush1.bf16.msra.mxu1 %v13569_v35 }
 0xa24   :  { %10565 = vmatprep.subr.bf16.mxu0 %v13573_v44  ;;  %10597 = vmatprep.subr.bf16.mxu1 %v13575_v56  ;;  %v4894_v56 = vrot.slane %v4865_v60, %v14967_v37  ;;  %v4890_v44 = vrot.slane %v4865_v60, %v14968_v52 }
 0xa27   :  { %10567 = vmatpush1.bf16.msra.mxu0 %v13579_v42  ;;  %10599 = vmatpush1.bf16.msra.mxu1 %v13581_v43 }
 0xa28   :  { %10569 = vmatprep.subr.bf16.mxu0 %v13585_v18  ;;  %10601 = vmatprep.subr.bf16.mxu1 %v13587_v1 }
 0xa2b   :  { %10571 = vmatpush1.bf16.msra.mxu0 %v13591_v39  ;;  %10603 = vmatpush1.bf16.msra.mxu1 %v13593_v30 }
 0xa2c   :  { %10605 = vmatprep.subr.bf16.mxu0 %v13597_v8  ;;  %10637 = vmatprep.subr.bf16.mxu1 %v13599_v6 }
 0xa81   :  { %v4647_v30 = vpop.f32.mrb[36].mxu0  ;;  %v4718_v39 = vpop.f32.mrb[36].mxu1 }
 0xa82   :  { %v4907_v8 = vadd.f32 %v4870_v11, %v4647_v30  ;;  %v4909_v1 = vadd.f32 %v4878_v10, %v4718_v39  ;;  %v4649_v6 = vpop.f32.mrb[37].mxu0  ;;  %v4720_v18 = vpop.f32.mrb[37].mxu1  ;;  %v14969_v30 = vsub.s32 7, %v14962_v27 }
 0xa83   :  { %v4908_v43 = vadd.f32 %v4874_v19, %v4649_v6  ;;  %v4910_v42 = vadd.f32 %v4882_v61, %v4720_v18 }
 0xa84   :  { %4915 = vst [vmem:[#allocation2] sm:$0xff] %v4907_v8  ;;  %4917 = vst [vmem:[#allocation2 + $0x10] sm:$0xff] %v4909_v1  ;;  %v4898_v39 = vrot.slane %v4865_v60, %v14969_v30 }
 0xa85   :  { %4916 = vst [vmem:[#allocation2 + $0x8] sm:$0xff] %v4908_v43  ;;  %4918 = vst [vmem:[#allocation2 + $0x18] sm:$0xff] %v4910_v42 }
 0xa8c   :  { %v5051_v30 = vld [vmem:[#allocation2] ss:$8 sm:$0xf] }
 0xaa1   :  { %v4789_v11 = vpop.f32.mrb[38].mxu0  ;;  %v4860_v10 = vpop.f32.mrb[38].mxu1 }
 0xaa2   :  { %v4911_v6 = vadd.f32 %v4886_v51, %v4789_v11  ;;  %v4913_v18 = vadd.f32 %v4894_v56, %v4860_v10  ;;  %v4791_v8 = vpop.f32.mrb[39].mxu0  ;;  %v4862_v1 = vpop.f32.mrb[39].mxu1 }
 0xaa3   :  { %v4912_v43 = vadd.f32 %v4890_v44, %v4791_v8  ;;  %v4914_v42 = vadd.f32 %v4898_v39, %v4862_v1 }
 0xaa4   :  { %4919 = vst [vmem:[#allocation2 + $0x20] sm:$0xff] %v4911_v6  ;;  %4921 = vst [vmem:[#allocation2 + $0x30] sm:$0xff] %v4913_v18 }
 0xaa5   :  { %4920 = vst [vmem:[#allocation2 + $0x28] sm:$0xff] %v4912_v43  ;;  %4922 = vst [vmem:[#allocation2 + $0x38] sm:$0xff] %v4914_v42 }
 0xac1   :  { %v5118_v19 = vpop.f32.mrb[40].mxu0  ;;  %v5189_v61 = vpop.f32.mrb[40].mxu1 }
 0xac2   :  { %v5120_v57 = vpop.f32.mrb[41].mxu0  ;;  %v5191_v37 = vpop.f32.mrb[41].mxu1 }
 0xac3   :  { %v5198_v52 = vcombine.low %v5118_v19, %v5120_v57  ;;  %v5199_v35 = vcombine.low %v5189_v61, %v5191_v37 }
 0xac5   :  { %v5206_v60 = vrot.slane %v5198_v52, %v12935_v31  ;;  %v5213_v27 = vrot.slane %v5199_v35, %v12935_v31 }
 0xac7   :  { %v5214_v51 = vcombine.low %v5206_v60, %v5213_v27 }
 0xac9   :  { %v5221_v56 = vrot.slane %v5214_v51, %v12935_v31 }
 0xacb   :  { %v5223_v44 = vadd.f32 %v5221_v56, %v5051_v30 }
 0xacd   :  { %v8859_v39 = vmul.f32 -1.442695, %v5223_v44  ;;  %v5404_v11 = vrot.slane %v5223_v44, 1  ;;  %v5415_v6 = vrot.slane %v5223_v44, 3  ;;  %v5412_v1 = vrot.slane %v5223_v44, 2 }
 0xacf   :  { %11781 = vpow2.f32 %v8859_v39  ;;  %v8860_v10 = vmul.f32 -1.442695, %v5404_v11  ;;  %v8861_v18 = vmul.f32 -1.442695, %v5415_v6 }
 0xad1   :  { %11783 = vpow2.f32 %v8860_v10 }
 0xad2   :  { %11785 = vpow2.f32 %v8861_v18 }
 0xad9   :  { %v11782_v8 = vpop.eup %11781 }
 0xada   :  { %v5400_v43 = vadd.f32 1.0, %v11782_v8 }
 0xadb   :  { %v11784_v42 = vpop.eup %11783 }
 0xadc   :  { %11787 = vrcp.f32 %v5400_v43  ;;  %v5409_v19 = vadd.f32 1.0, %v11784_v42  ;;  %v11786_v27 = vpop.eup %11785 }
 0xadd   :  { %11789 = vtanh.f32 %v5412_v1  ;;  %v5420_v6 = vadd.f32 1.0, %v11786_v27  ;;  %v5224_v1 = vld [vmem:[#allocation2 + $0x27] ss:$8 sm:$0xf] }
 0xade   :  { %11791 = vrcp.f32 %v5409_v19 }
 0xadf   :  { %11793 = vrcp.f32 %v5420_v6  ;;  %v14972_v6 = vld [vmem:[#allocation44_spill] sm:$0xff] }
 0xae1   :  { %v5291_v35 = vpop.f32.mrb[42].mxu0  ;;  %v5362_v61 = vpop.f32.mrb[42].mxu1 }
 0xae2   :  { %v5293_v57 = vpop.f32.mrb[43].mxu0  ;;  %v5364_v37 = vpop.f32.mrb[43].mxu1 }
 0xae3   :  { %v5371_v52 = vcombine.low %v5291_v35, %v5293_v57  ;;  %v5372_v60 = vcombine.low %v5362_v61, %v5364_v37 }
 0xae5   :  { %v5379_v51 = vrot.slane %v5371_v52, %v12935_v31  ;;  %v5386_v56 = vrot.slane %v5372_v60, %v12935_v31 }
 0xae6   :  { %v11788_v30 = vpop.eup %11787 }
 0xae7   :  { %v11790_v44 = vpop.eup %11789  ;;  %v5387_v39 = vcombine.low %v5379_v51, %v5386_v56 }
 0xae8   :  { %v11792_v11 = vpop.eup %11791  ;;  %v5424_v8 = vmul.f32 %v11790_v44, %v11788_v30 }
 0xae9   :  { %v5394_v10 = vrot.slane %v5387_v39, %v12935_v31  ;;  %v5423_v18 = vmul.f32 0.0, %v11792_v11  ;;  %v11794_v37 = vpop.eup %11793  ;;  %v14970_v11 = vld [vmem:[#allocation42_spill] sm:$0xff] }
 0xaeb   :  { %v5396_v43 = vadd.f32 %v5394_v10, %v5224_v1  ;;  %v13761_v42 = vadd.f32 %v5424_v8, %v5423_v18  ;;  %v14971_v10 = vld [vmem:[#allocation43_spill] sm:$0xff]  ;;  %v14973_v18 = vld [vmem:[#allocation45_spill] sm:$0xff]  ;;  %v14974_v1 = vld [vmem:[#allocation46_spill] sm:$0xff] }
 0xaed   :  { %v8862_v19 = vmul.f32 -1.442695, %v5396_v43  ;;  %v5435_v35 = vrot.slane %v5396_v43, 1  ;;  %11795 = vtanh.f32 %v13761_v42  ;;  %v5446_v57 = vrot.slane %v5396_v43, 3 }
 0xaee   :  { %v5443_v27 = vrot.slane %v5396_v43, 2  ;;  %v14975_v43 = vld [vmem:[#allocation47_spill] sm:$0xff] }
 0xaef   :  { %11797 = vpow2.f32 %v8862_v19  ;;  %v8863_v61 = vmul.f32 -1.442695, %v5435_v35  ;;  %v8864_v52 = vmul.f32 -1.442695, %v5446_v57  ;;  %v14976_v57 = vld [vmem:[#allocation48_spill] sm:$0xff] }
 0xaf1   :  { %11799 = vpow2.f32 %v8863_v61 }
 0xaf2   :  { %11801 = vpow2.f32 %v8864_v52 }
 0xaf7   :  { %v11796_v60 = vpop.eup %11795 }
 0xaf8   :  { %v5427_v56 = vmul.f32 %v11796_v60, %v11794_v37  ;;  %v14977_v37 = vld [vmem:[#allocation49_spill] sm:$0xff]  ;;  %v14978_v60 = vld [vmem:[#allocation50_spill] sm:$0xff] }
 0xaf9   :  { %v11798_v51 = vpop.eup %11797 }
 0xafa   :  { %v5431_v30 = vadd.f32 1.0, %v11798_v51  ;;  %5459 = vst [vmem:[#allocation5] sm:$0x1] %v5427_v56  ;;  %5527 = vmatmul.mubr.f32.vlgmr.msra.gmra.mrb[44].mxu0 %v5427_v56  ;;  %5598 = vmatmul.mubr.f32.vlgmr.msra.gmra.mrb[44].mxu1 %v5427_v56  ;;  %v14979_v51 = vld [vmem:[#allocation51_spill] sm:$0xff] }
 0xafb   :  { %v11800_v44 = vpop.eup %11799  ;;  %10607 = vmatpush1.bf16.msra.mxu0 %v13603_v15  ;;  %10639 = vmatpush1.bf16.msra.mxu1 %v13605_v21 }
 0xafc   :  { %11803 = vrcp.f32 %v5431_v30  ;;  %v5440_v39 = vadd.f32 1.0, %v11800_v44  ;;  %10609 = vmatprep.subr.bf16.mxu0 %v13609_v58  ;;  %10641 = vmatprep.subr.bf16.mxu1 %v13611_v36  ;;  %v11802_v8 = vpop.eup %11801  ;;  %v14980_v44 = vld [vmem:[#allocation64_spill] sm:$0xff] }
 0xafd   :  { %11805 = vtanh.f32 %v5443_v27  ;;  %5699 = vmatprep.mubr.f32.mxu0 %v14780_v5  ;;  %5770 = vmatprep.mubr.f32.mxu1 %v14780_v5  ;;  %v5451_v52 = vadd.f32 1.0, %v11802_v8 }
 0xafe   :  { %11807 = vrcp.f32 %v5440_v39  ;;  %v14981_v39 = vld [vmem:[#allocation65_spill] sm:$0xff] }
 0xaff   :  { %10611 = vmatpush1.bf16.msra.mxu0 %v13617_v4  ;;  %10643 = vmatpush1.bf16.msra.mxu1 %v13619_v53  ;;  %11809 = vrcp.f32 %v5451_v52  ;;  %v14983_v52 = vld [vmem:[#allocation32_spill] sm:$0xff] }
 0xb00   :  { %10613 = vmatprep.subr.bf16.mxu0 %v14970_v11  ;;  %10645 = vmatprep.subr.bf16.mxu1 %v14971_v10 }
 0xb03   :  { %10615 = vmatpush1.bf16.msra.mxu0 %v14972_v6  ;;  %10647 = vmatpush1.bf16.msra.mxu1 %v14973_v18 }
 0xb04   :  { %10617 = vmatprep.subr.bf16.mxu0 %v14974_v1  ;;  %10649 = vmatprep.subr.bf16.mxu1 %v14975_v43 }
 0xb06   :  { %v11804_v19 = vpop.eup %11803 }
 0xb07   :  { %v11806_v35 = vpop.eup %11805  ;;  %10619 = vmatpush1.bf16.msra.mxu0 %v14976_v57  ;;  %10651 = vmatpush1.bf16.msra.mxu1 %v14977_v37 }
 0xb08   :  { %v11808_v61 = vpop.eup %11807  ;;  %10621 = vmatprep.subr.bf16.mxu0 %v14978_v60  ;;  %10653 = vmatprep.subr.bf16.mxu1 %v14979_v51  ;;  %v5455_v56 = vmul.f32 %v11806_v35, %v11804_v19 }
 0xb09   :  { %v5454_v27 = vmul.f32 0.0, %v11808_v61  ;;  %v11810_v8 = vpop.eup %11809  ;;  %v14982_v61 = vld [vmem:[#allocation31_spill] sm:$0xff] }
 0xb0b   :  { %v13782_v30 = vadd.f32 %v5455_v56, %v5454_v27  ;;  %10623 = vmatpush1.bf16.msra.mxu0 %v14980_v44  ;;  %10655 = vmatpush1.bf16.msra.mxu1 %v14981_v39  ;;  %v14984_v27 = vld [vmem:[#allocation33_spill] sm:$0xff]  ;;  %v14985_v56 = vld [vmem:[#allocation34_spill] sm:$0xff] }
 0xb0c   :  { %10625 = vmatprep.subr.bf16.mxu0 %v13661_v16  ;;  %10657 = vmatprep.subr.bf16.mxu1 %v13663_v17 }
 0xb0d   :  { %11811 = vtanh.f32 %v13782_v30 }
 0xb0f   :  { %10627 = vmatpush1.bf16.msra.mxu0 %v13667_v0  ;;  %10659 = vmatpush1.bf16.msra.mxu1 %v13669_v49 }
 0xb10   :  { %10629 = vmatprep.subr.bf16.mxu0 %v13673_v32  ;;  %10661 = vmatprep.subr.bf16.mxu1 %v13675_v24 }
 0xb13   :  { %10631 = vmatpush1.bf16.msra.mxu0 %v13679_v54  ;;  %10663 = vmatpush1.bf16.msra.mxu1 %v13681_v3 }
 0xb14   :  { %10633 = vmatprep.subr.bf16.mxu0 %v13685_v22  ;;  %10665 = vmatprep.subr.bf16.mxu1 %v13687_v23 }
 0xb17   :  { %v11812_v19 = vpop.eup %11811  ;;  %10635 = vmatpush1.bf16.msra.mxu0 %v13691_v7  ;;  %10667 = vmatpush1.bf16.msra.mxu1 %v13693_v59 }
 0xb18   :  { %v5458_v35 = vmul.f32 %v11812_v19, %v11810_v8  ;;  %10669 = vmatprep.subr.bf16.mxu0 %v13499_v46  ;;  %10701 = vmatprep.subr.bf16.mxu1 %v13501_v63  ;;  %v14986_v8 = vld [vmem:[#allocation35_spill] sm:$0xff]  ;;  %v14987_v19 = vld [vmem:[#allocation36_spill] sm:$0xff] }
 0xb1a   :  { %5460 = vst [vmem:[#allocation6 + $0x7] sm:$0x1] %v5458_v35  ;;  %5700 = vmatmul.mubr.f32.vlgmr.msra.gmra.mrb[46].mxu0 %v5458_v35  ;;  %5771 = vmatmul.mubr.f32.vlgmr.msra.gmra.mrb[46].mxu1 %v5458_v35  ;;  %v14988_v35 = vld [vmem:[#allocation37_spill] sm:$0xff] }
 0xb1b   :  { %10671 = vmatpush1.bf16.msra.mxu0 %v13503_v48  ;;  %10703 = vmatpush1.bf16.msra.mxu1 %v13505_v33 }
 0xb1c   :  { %10673 = vmatprep.subr.bf16.mxu0 %v13509_v38  ;;  %10705 = vmatprep.subr.bf16.mxu1 %v13511_v41 }
 0xb1d   :  { %5936 = vmatprep.mubr.f32.mxu0 %v14780_v5  ;;  %6007 = vmatprep.mubr.f32.mxu1 %v14780_v5 }
 0xb1f   :  { %10675 = vmatpush1.bf16.msra.mxu0 %v13517_v45  ;;  %10707 = vmatpush1.bf16.msra.mxu1 %v13519_v14 }
 0xb20   :  { %10677 = vmatprep.subr.bf16.mxu0 %v13523_v9  ;;  %10709 = vmatprep.subr.bf16.mxu1 %v13525_v28 }
 0xb23   :  { %10679 = vmatpush1.bf16.msra.mxu0 %v13531_v26  ;;  %10711 = vmatpush1.bf16.msra.mxu1 %v13533_v47 }
 0xb24   :  { %10681 = vmatprep.subr.bf16.mxu0 %v13537_v55  ;;  %10713 = vmatprep.subr.bf16.mxu1 %v13539_v12 }
 0xb27   :  { %10683 = vmatpush1.bf16.msra.mxu0 %v13543_v62  ;;  %10715 = vmatpush1.bf16.msra.mxu1 %v13545_v40 }
 0xb28   :  { %10685 = vmatprep.subr.bf16.mxu0 %v13549_v25  ;;  %10717 = vmatprep.subr.bf16.mxu1 %v13551_v2 }
 0xb2b   :  { %10687 = vmatpush1.bf16.msra.mxu0 %v13555_v29  ;;  %10719 = vmatpush1.bf16.msra.mxu1 %v13557_v50  ;;  %v14989_v50 = vld [vmem:[#allocation38_spill] sm:$0xff] }
 0xb2c   :  { %10689 = vmatprep.subr.bf16.mxu0 %v13561_v20  ;;  %10721 = vmatprep.subr.bf16.mxu1 %v13563_v13  ;;  %v14990_v20 = vld [vmem:[#allocation39_spill] sm:$0xff]  ;;  %v14991_v13 = vld [vmem:[#allocation40_spill] sm:$0xff] }
 0xb2f   :  { %10691 = vmatpush1.bf16.msra.mxu0 %v13567_v34  ;;  %10723 = vmatpush1.bf16.msra.mxu1 %v14982_v61  ;;  %v14992_v34 = vld [vmem:[#allocation41_spill] sm:$0xff] }
 0xb30   :  { %10693 = vmatprep.subr.bf16.mxu0 %v14983_v52  ;;  %10725 = vmatprep.subr.bf16.mxu1 %v14984_v27 }
 0xb33   :  { %10695 = vmatpush1.bf16.msra.mxu0 %v14985_v56  ;;  %10727 = vmatpush1.bf16.msra.mxu1 %v14986_v8 }
 0xb34   :  { %10697 = vmatprep.subr.bf16.mxu0 %v14987_v19  ;;  %10729 = vmatprep.subr.bf16.mxu1 %v14988_v35 }
 0xb37   :  { %10699 = vmatpush1.bf16.msra.mxu0 %v14989_v50  ;;  %10731 = vmatpush1.bf16.msra.mxu1 %v14990_v20  ;;  %v5461_v50 = vld [vmem:[#allocation2 + $0x1] ss:$8 sm:$0xf] }
 0xb38   :  { %10733 = vmatprep.subr.bf16.mxu0 %v14991_v13  ;;  %10765 = vmatprep.subr.bf16.mxu1 %v14992_v34 }
 0xbcd   :  { %v5528_v61 = vpop.f32.mrb[44].mxu0  ;;  %v5599_v52 = vpop.f32.mrb[44].mxu1 }
 0xbce   :  { %v5530_v29 = vpop.f32.mrb[45].mxu0  ;;  %v5601_v27 = vpop.f32.mrb[45].mxu1 }
 0xbcf   :  { %v5608_v2 = vcombine.low %v5528_v61, %v5530_v29  ;;  %v5609_v56 = vcombine.low %v5599_v52, %v5601_v27 }
 0xbd1   :  { %v5616_v8 = vrot.slane %v5608_v2, %v12935_v31  ;;  %v5623_v19 = vrot.slane %v5609_v56, %v12935_v31 }
 0xbd3   :  { %v5624_v25 = vcombine.low %v5616_v8, %v5623_v19 }
 0xbd5   :  { %v5631_v35 = vrot.slane %v5624_v25, %v12935_v31 }
 0xbd7   :  { %v5633_v40 = vadd.f32 %v5631_v35, %v5461_v50 }
 0xbd9   :  { %v8865_v20 = vmul.f32 -1.442695, %v5633_v40  ;;  %v5814_v62 = vrot.slane %v5633_v40, 1  ;;  %v5825_v34 = vrot.slane %v5633_v40, 3  ;;  %v5822_v47 = vrot.slane %v5633_v40, 2 }
 0xbdb   :  { %11813 = vpow2.f32 %v8865_v20  ;;  %v8866_v13 = vmul.f32 -1.442695, %v5814_v62  ;;  %v8867_v12 = vmul.f32 -1.442695, %v5825_v34 }
 0xbdd   :  { %11815 = vpow2.f32 %v8866_v13 }
 0xbde   :  { %11817 = vpow2.f32 %v8867_v12 }
 0xbe5   :  { %v11814_v55 = vpop.eup %11813 }
 0xbe6   :  { %v5810_v29 = vadd.f32 1.0, %v11814_v55 }
 0xbe7   :  { %v11816_v61 = vpop.eup %11815 }
 0xbe8   :  { %11819 = vrcp.f32 %v5810_v29  ;;  %v5819_v2 = vadd.f32 1.0, %v11816_v61  ;;  %v11818_v20 = vpop.eup %11817  ;;  %v5634_v61 = vld [vmem:[#allocation2 + $0x26] ss:$8 sm:$0xf] }
 0xbe9   :  { %11821 = vtanh.f32 %v5822_v47  ;;  %v5830_v35 = vadd.f32 1.0, %v11818_v20 }
 0xbea   :  { %11823 = vrcp.f32 %v5819_v2 }
 0xbeb   :  { %11825 = vrcp.f32 %v5830_v35 }
 0xbed   :  { %v5701_v52 = vpop.f32.mrb[46].mxu0  ;;  %v5772_v25 = vpop.f32.mrb[46].mxu1 }
 0xbee   :  { %v5703_v27 = vpop.f32.mrb[47].mxu0  ;;  %v5774_v50 = vpop.f32.mrb[47].mxu1 }
 0xbef   :  { %v5781_v56 = vcombine.low %v5701_v52, %v5703_v27  ;;  %v5782_v8 = vcombine.low %v5772_v25, %v5774_v50 }
 0xbf1   :  { %v5789_v62 = vrot.slane %v5781_v56, %v12935_v31  ;;  %v5796_v13 = vrot.slane %v5782_v8, %v12935_v31 }
 0xbf2   :  { %v11820_v34 = vpop.eup %11819 }
 0xbf3   :  { %v11822_v40 = vpop.eup %11821  ;;  %v5797_v55 = vcombine.low %v5789_v62, %v5796_v13 }
 0xbf4   :  { %v11824_v19 = vpop.eup %11823  ;;  %v5834_v29 = vmul.f32 %v11822_v40, %v11820_v34 }
 0xbf5   :  { %v5804_v12 = vrot.slane %v5797_v55, %v12935_v31  ;;  %v5833_v47 = vmul.f32 %v11824_v19, %v13761_v42  ;;  %v11826_v56 = vpop.eup %11825 }
 0xbf7   :  { %v5806_v2 = vadd.f32 %v5804_v12, %v5634_v61  ;;  %v13842_v26 = vadd.f32 %v5834_v29, %v5833_v47 }
 0xbf9   :  { %v8868_v52 = vmul.f32 -1.442695, %v5806_v2  ;;  %v5845_v25 = vrot.slane %v5806_v2, 1  ;;  %11827 = vtanh.f32 %v13842_v26  ;;  %v5856_v50 = vrot.slane %v5806_v2, 3 }
 0xbfa   :  { %v5853_v13 = vrot.slane %v5806_v2, 2 }
 0xbfb   :  { %11829 = vpow2.f32 %v8868_v52  ;;  %v8869_v27 = vmul.f32 -1.442695, %v5845_v25  ;;  %v8870_v8 = vmul.f32 -1.442695, %v5856_v50  ;;  %v14993_v50 = vld [vmem:[#allocation52_spill] sm:$0xff] }
 0xbfd   :  { %11831 = vpow2.f32 %v8869_v27 }
 0xbfe   :  { %11833 = vpow2.f32 %v8870_v8  ;;  %v14995_v8 = vld [vmem:[#allocation54_spill] sm:$0xff] }
 0xc03   :  { %v11828_v62 = vpop.eup %11827 }
 0xc04   :  { %v5837_v42 = vmul.f32 %v11828_v62, %v11826_v56  ;;  %v14994_v56 = vld [vmem:[#allocation53_spill] sm:$0xff]  ;;  %v14996_v62 = vld [vmem:[#allocation55_spill] sm:$0xff] }
 0xc05   :  { %v11830_v20 = vpop.eup %11829 }
 0xc06   :  { %v5841_v34 = vadd.f32 1.0, %v11830_v20  ;;  %5869 = vst [vmem:[#allocation5 + $0x1] sm:$0x1] %v5837_v42  ;;  %5937 = vmatmul.mubr.f32.vlgmr.msra.gmra.mrb[48].mxu0 %v5837_v42  ;;  %6008 = vmatmul.mubr.f32.vlgmr.msra.gmra.mrb[48].mxu1 %v5837_v42  ;;  %v14997_v20 = vld [vmem:[#allocation56_spill] sm:$0xff]  ;;  %v14999_v42 = vld [vmem:[#allocation58_spill] sm:$0xff] }
 0xc07   :  { %v11832_v40 = vpop.eup %11831  ;;  %10735 = vmatpush1.bf16.msra.mxu0 %v13603_v15  ;;  %10767 = vmatpush1.bf16.msra.mxu1 %v13605_v21 }
 0xc08   :  { %11835 = vrcp.f32 %v5841_v34  ;;  %v5850_v55 = vadd.f32 1.0, %v11832_v40  ;;  %10737 = vmatprep.subr.bf16.mxu0 %v13609_v58  ;;  %10769 = vmatprep.subr.bf16.mxu1 %v13611_v36  ;;  %v11834_v19 = vpop.eup %11833  ;;  %v15000_v34 = vld [vmem:[#allocation59_spill] sm:$0xff]  ;;  %v15001_v40 = vld [vmem:[#allocation60_spill] sm:$0xff] }
 0xc09   :  { %11837 = vtanh.f32 %v5853_v13  ;;  %6109 = vmatprep.mubr.f32.mxu0 %v14780_v5  ;;  %6180 = vmatprep.mubr.f32.mxu1 %v14780_v5  ;;  %v5861_v29 = vadd.f32 1.0, %v11834_v19  ;;  %v14998_v13 = vld [vmem:[#allocation57_spill] sm:$0xff]  ;;  %v15003_v19 = vld [vmem:[#allocation28_spill] sm:$0xff] }
 0xc0a   :  { %11839 = vrcp.f32 %v5850_v55  ;;  %v15002_v55 = vld [vmem:[#allocation61_spill] sm:$0xff] }
 0xc0b   :  { %10739 = vmatpush1.bf16.msra.mxu0 %v13617_v4  ;;  %10771 = vmatpush1.bf16.msra.mxu1 %v13619_v53  ;;  %11841 = vrcp.f32 %v5861_v29  ;;  %v15007_v29 = vld [vmem:[#allocation32_spill] sm:$0xff] }
 0xc0c   :  { %10741 = vmatprep.subr.bf16.mxu0 %v14970_v11  ;;  %10773 = vmatprep.subr.bf16.mxu1 %v14971_v10 }
 0xc0f   :  { %10743 = vmatpush1.bf16.msra.mxu0 %v14972_v6  ;;  %10775 = vmatpush1.bf16.msra.mxu1 %v14973_v18 }
 0xc10   :  { %10745 = vmatprep.subr.bf16.mxu0 %v14974_v1  ;;  %10777 = vmatprep.subr.bf16.mxu1 %v14975_v43 }
 0xc12   :  { %v11836_v12 = vpop.eup %11835 }
 0xc13   :  { %v11838_v35 = vpop.eup %11837  ;;  %10747 = vmatpush1.bf16.msra.mxu0 %v14976_v57  ;;  %10779 = vmatpush1.bf16.msra.mxu1 %v14977_v37 }
 0xc14   :  { %v11840_v47 = vpop.eup %11839  ;;  %10749 = vmatprep.subr.bf16.mxu0 %v14978_v60  ;;  %10781 = vmatprep.subr.bf16.mxu1 %v14979_v51  ;;  %v5865_v2 = vmul.f32 %v11838_v35, %v11836_v12  ;;  %v15004_v12 = vld [vmem:[#allocation29_spill] sm:$0xff]  ;;  %v15005_v35 = vld [vmem:[#allocation30_spill] sm:$0xff] }
 0xc15   :  { %v5864_v61 = vmul.f32 %v11840_v47, %v13782_v30  ;;  %v11842_v30 = vpop.eup %11841  ;;  %v15006_v47 = vld [vmem:[#allocation31_spill] sm:$0xff] }
 0xc17   :  { %v13864_v52 = vadd.f32 %v5865_v2, %v5864_v61  ;;  %10751 = vmatpush1.bf16.msra.mxu0 %v14980_v44  ;;  %10783 = vmatpush1.bf16.msra.mxu1 %v14981_v39  ;;  %v15008_v61 = vld [vmem:[#allocation33_spill] sm:$0xff]  ;;  %v15009_v2 = vld [vmem:[#allocation34_spill] sm:$0xff] }
 0xc18   :  { %10753 = vmatprep.subr.bf16.mxu0 %v13661_v16  ;;  %10785 = vmatprep.subr.bf16.mxu1 %v13663_v17 }
 0xc19   :  { %11843 = vtanh.f32 %v13864_v52 }
 0xc1b   :  { %10755 = vmatpush1.bf16.msra.mxu0 %v13667_v0  ;;  %10787 = vmatpush1.bf16.msra.mxu1 %v13669_v49 }
 0xc1c   :  { %10757 = vmatprep.subr.bf16.mxu0 %v13673_v32  ;;  %10789 = vmatprep.subr.bf16.mxu1 %v13675_v24 }
 0xc1f   :  { %10759 = vmatpush1.bf16.msra.mxu0 %v13679_v54  ;;  %10791 = vmatpush1.bf16.msra.mxu1 %v13681_v3 }
 0xc20   :  { %10761 = vmatprep.subr.bf16.mxu0 %v13685_v22  ;;  %10793 = vmatprep.subr.bf16.mxu1 %v13687_v23 }
 0xc23   :  { %v11844_v25 = vpop.eup %11843  ;;  %10763 = vmatpush1.bf16.msra.mxu0 %v13691_v7  ;;  %10795 = vmatpush1.bf16.msra.mxu1 %v13693_v59 }
 0xc24   :  { %v5868_v27 = vmul.f32 %v11844_v25, %v11842_v30  ;;  %10797 = vmatprep.subr.bf16.mxu0 %v13499_v46  ;;  %10829 = vmatprep.subr.bf16.mxu1 %v13501_v63  ;;  %v15010_v30 = vld [vmem:[#allocation35_spill] sm:$0xff]  ;;  %v15011_v25 = vld [vmem:[#allocation36_spill] sm:$0xff] }
 0xc26   :  { %5870 = vst [vmem:[#allocation6 + $0x6] sm:$0x1] %v5868_v27  ;;  %6110 = vmatmul.mubr.f32.vlgmr.msra.gmra.mrb[50].mxu0 %v5868_v27  ;;  %6181 = vmatmul.mubr.f32.vlgmr.msra.gmra.mrb[50].mxu1 %v5868_v27  ;;  %v15012_v27 = vld [vmem:[#allocation37_spill] sm:$0xff] }
 0xc27   :  { %10799 = vmatpush1.bf16.msra.mxu0 %v13503_v48  ;;  %10831 = vmatpush1.bf16.msra.mxu1 %v13505_v33 }
 0xc28   :  { %10801 = vmatprep.subr.bf16.mxu0 %v13509_v38  ;;  %10833 = vmatprep.subr.bf16.mxu1 %v13511_v41 }
 0xc29   :  { %6346 = vmatprep.mubr.f32.mxu0 %v14780_v5  ;;  %6417 = vmatprep.mubr.f32.mxu1 %v14780_v5 }
 0xc2b   :  { %10803 = vmatpush1.bf16.msra.mxu0 %v13517_v45  ;;  %10835 = vmatpush1.bf16.msra.mxu1 %v13519_v14 }
 0xc2c   :  { %10805 = vmatprep.subr.bf16.mxu0 %v13523_v9  ;;  %10837 = vmatprep.subr.bf16.mxu1 %v13525_v28 }
 0xc2f   :  { %10807 = vmatpush1.bf16.msra.mxu0 %v14993_v50  ;;  %10839 = vmatpush1.bf16.msra.mxu1 %v14994_v56 }
 0xc30   :  { %10809 = vmatprep.subr.bf16.mxu0 %v14995_v8  ;;  %10841 = vmatprep.subr.bf16.mxu1 %v14996_v62 }
 0xc33   :  { %10811 = vmatpush1.bf16.msra.mxu0 %v14997_v20  ;;  %10843 = vmatpush1.bf16.msra.mxu1 %v14998_v13 }
 0xc34   :  { %10813 = vmatprep.subr.bf16.mxu0 %v14999_v42  ;;  %10845 = vmatprep.subr.bf16.mxu1 %v15000_v34 }
 0xc37   :  { %10815 = vmatpush1.bf16.msra.mxu0 %v15001_v40  ;;  %10847 = vmatpush1.bf16.msra.mxu1 %v15002_v55  ;;  %v15013_v55 = vld [vmem:[#allocation38_spill] sm:$0xff] }
 0xc38   :  { %10817 = vmatprep.subr.bf16.mxu0 %v15003_v19  ;;  %10849 = vmatprep.subr.bf16.mxu1 %v15004_v12  ;;  %v15014_v19 = vld [vmem:[#allocation39_spill] sm:$0xff]  ;;  %v15015_v12 = vld [vmem:[#allocation40_spill] sm:$0xff] }
 0xc3b   :  { %10819 = vmatpush1.bf16.msra.mxu0 %v15005_v35  ;;  %10851 = vmatpush1.bf16.msra.mxu1 %v15006_v47  ;;  %v15016_v35 = vld [vmem:[#allocation41_spill] sm:$0xff] }
 0xc3c   :  { %10821 = vmatprep.subr.bf16.mxu0 %v15007_v29  ;;  %10853 = vmatprep.subr.bf16.mxu1 %v15008_v61 }
 0xc3f   :  { %10823 = vmatpush1.bf16.msra.mxu0 %v15009_v2  ;;  %10855 = vmatpush1.bf16.msra.mxu1 %v15010_v30 }
 0xc40   :  { %10825 = vmatprep.subr.bf16.mxu0 %v15011_v25  ;;  %10857 = vmatprep.subr.bf16.mxu1 %v15012_v27 }
 0xc43   :  { %10827 = vmatpush1.bf16.msra.mxu0 %v15013_v55  ;;  %10859 = vmatpush1.bf16.msra.mxu1 %v15014_v19  ;;  %v5871_v55 = vld [vmem:[#allocation2 + $0x2] ss:$8 sm:$0xf] }
 0xc44   :  { %10861 = vmatprep.subr.bf16.mxu0 %v15015_v12  ;;  %10893 = vmatprep.subr.bf16.mxu1 %v15016_v35 }
 0xcd9   :  { %v5938_v47 = vpop.f32.mrb[48].mxu0  ;;  %v6009_v29 = vpop.f32.mrb[48].mxu1 }
 0xcda   :  { %v5940_v40 = vpop.f32.mrb[49].mxu0  ;;  %v6011_v61 = vpop.f32.mrb[49].mxu1 }
 0xcdb   :  { %v6018_v34 = vcombine.low %v5938_v47, %v5940_v40  ;;  %v6019_v2 = vcombine.low %v6009_v29, %v6011_v61 }
 0xcdd   :  { %v6026_v30 = vrot.slane %v6018_v34, %v12935_v31  ;;  %v6033_v25 = vrot.slane %v6019_v2, %v12935_v31 }
 0xcdf   :  { %v6034_v42 = vcombine.low %v6026_v30, %v6033_v25 }
 0xce1   :  { %v6041_v27 = vrot.slane %v6034_v42, %v12935_v31 }
 0xce3   :  { %v6043_v13 = vadd.f32 %v6041_v27, %v5871_v55 }
 0xce5   :  { %v8871_v19 = vmul.f32 -1.442695, %v6043_v13  ;;  %v6224_v20 = vrot.slane %v6043_v13, 1  ;;  %v6235_v35 = vrot.slane %v6043_v13, 3  ;;  %v6232_v56 = vrot.slane %v6043_v13, 2 }
 0xce7   :  { %11845 = vpow2.f32 %v8871_v19  ;;  %v8872_v12 = vmul.f32 -1.442695, %v6224_v20  ;;  %v8873_v62 = vmul.f32 -1.442695, %v6235_v35 }
 0xce9   :  { %11847 = vpow2.f32 %v8872_v12 }
 0xcea   :  { %11849 = vpow2.f32 %v8873_v62 }
 0xcf1   :  { %v11846_v8 = vpop.eup %11845 }
 0xcf2   :  { %v6220_v40 = vadd.f32 1.0, %v11846_v8 }
 0xcf3   :  { %v11848_v47 = vpop.eup %11847 }
 0xcf4   :  { %11851 = vrcp.f32 %v6220_v40  ;;  %v6229_v34 = vadd.f32 1.0, %v11848_v47  ;;  %v11850_v19 = vpop.eup %11849  ;;  %v6044_v47 = vld [vmem:[#allocation2 + $0x25] ss:$8 sm:$0xf] }
 0xcf5   :  { %11853 = vtanh.f32 %v6232_v56  ;;  %v6240_v27 = vadd.f32 1.0, %v11850_v19 }
 0xcf6   :  { %11855 = vrcp.f32 %v6229_v34 }
 0xcf7   :  { %11857 = vrcp.f32 %v6240_v27 }
 0xcf9   :  { %v6111_v29 = vpop.f32.mrb[50].mxu0  ;;  %v6182_v42 = vpop.f32.mrb[50].mxu1 }
 0xcfa   :  { %v6113_v61 = vpop.f32.mrb[51].mxu0  ;;  %v6184_v55 = vpop.f32.mrb[51].mxu1 }
 0xcfb   :  { %v6191_v2 = vcombine.low %v6111_v29, %v6113_v61  ;;  %v6192_v30 = vcombine.low %v6182_v42, %v6184_v55 }
 0xcfd   :  { %v6199_v20 = vrot.slane %v6191_v2, %v12935_v31  ;;  %v6206_v12 = vrot.slane %v6192_v30, %v12935_v31 }
 0xcfe   :  { %v11852_v35 = vpop.eup %11851 }
 0xcff   :  { %v11854_v13 = vpop.eup %11853  ;;  %v6207_v8 = vcombine.low %v6199_v20, %v6206_v12 }
 0xd00   :  { %v11856_v25 = vpop.eup %11855  ;;  %v6244_v40 = vmul.f32 %v11854_v13, %v11852_v35 }
 0xd01   :  { %v6214_v62 = vrot.slane %v6207_v8, %v12935_v31  ;;  %v6243_v56 = vmul.f32 %v11856_v25, %v13842_v26  ;;  %v11858_v2 = vpop.eup %11857 }
 0xd03   :  { %v6216_v34 = vadd.f32 %v6214_v62, %v6044_v47  ;;  %v13924_v50 = vadd.f32 %v6244_v40, %v6243_v56 }
 0xd05   :  { %v8874_v29 = vmul.f32 -1.442695, %v6216_v34  ;;  %v6255_v42 = vrot.slane %v6216_v34, 1  ;;  %11859 = vtanh.f32 %v13924_v50  ;;  %v6266_v55 = vrot.slane %v6216_v34, 3 }
 0xd06   :  { %v6263_v12 = vrot.slane %v6216_v34, 2 }
 0xd07   :  { %11861 = vpow2.f32 %v8874_v29  ;;  %v8875_v61 = vmul.f32 -1.442695, %v6255_v42  ;;  %v8876_v30 = vmul.f32 -1.442695, %v6266_v55  ;;  %v15017_v55 = vld [vmem:[#allocation52_spill] sm:$0xff] }
 0xd09   :  { %11863 = vpow2.f32 %v8875_v61 }
 0xd0a   :  { %11865 = vpow2.f32 %v8876_v30  ;;  %v15019_v30 = vld [vmem:[#allocation54_spill] sm:$0xff] }
 0xd0f   :  { %v11860_v20 = vpop.eup %11859 }
 0xd10   :  { %v6247_v26 = vmul.f32 %v11860_v20, %v11858_v2  ;;  %v15018_v2 = vld [vmem:[#allocation53_spill] sm:$0xff]  ;;  %v15020_v20 = vld [vmem:[#allocation55_spill] sm:$0xff] }
 0xd11   :  { %v11862_v19 = vpop.eup %11861 }
 0xd12   :  { %v6251_v35 = vadd.f32 1.0, %v11862_v19  ;;  %6279 = vst [vmem:[#allocation5 + $0x2] sm:$0x1] %v6247_v26  ;;  %6347 = vmatmul.mubr.f32.vlgmr.msra.gmra.mrb[52].mxu0 %v6247_v26  ;;  %6418 = vmatmul.mubr.f32.vlgmr.msra.gmra.mrb[52].mxu1 %v6247_v26  ;;  %v15021_v19 = vld [vmem:[#allocation56_spill] sm:$0xff]  ;;  %v15023_v26 = vld [vmem:[#allocation58_spill] sm:$0xff] }
 0xd13   :  { %v11864_v13 = vpop.eup %11863  ;;  %10863 = vmatpush1.bf16.msra.mxu0 %v13603_v15  ;;  %10895 = vmatpush1.bf16.msra.mxu1 %v13605_v21 }
 0xd14   :  { %11867 = vrcp.f32 %v6251_v35  ;;  %v6260_v8 = vadd.f32 1.0, %v11864_v13  ;;  %10865 = vmatprep.subr.bf16.mxu0 %v13609_v58  ;;  %10897 = vmatprep.subr.bf16.mxu1 %v13611_v36  ;;  %v11866_v25 = vpop.eup %11865  ;;  %v15024_v35 = vld [vmem:[#allocation59_spill] sm:$0xff]  ;;  %v15025_v13 = vld [vmem:[#allocation60_spill] sm:$0xff] }
 0xd15   :  { %11869 = vtanh.f32 %v6263_v12  ;;  %6519 = vmatprep.mubr.f32.mxu0 %v14780_v5  ;;  %6590 = vmatprep.mubr.f32.mxu1 %v14780_v5  ;;  %v6271_v40 = vadd.f32 1.0, %v11866_v25  ;;  %v15022_v12 = vld [vmem:[#allocation57_spill] sm:$0xff]  ;;  %v15027_v25 = vld [vmem:[#allocation28_spill] sm:$0xff] }
 0xd16   :  { %11871 = vrcp.f32 %v6260_v8  ;;  %v15026_v8 = vld [vmem:[#allocation61_spill] sm:$0xff] }
 0xd17   :  { %10867 = vmatpush1.bf16.msra.mxu0 %v13617_v4  ;;  %10899 = vmatpush1.bf16.msra.mxu1 %v13619_v53  ;;  %11873 = vrcp.f32 %v6271_v40  ;;  %v15031_v40 = vld [vmem:[#allocation32_spill] sm:$0xff] }
 0xd18   :  { %10869 = vmatprep.subr.bf16.mxu0 %v14970_v11  ;;  %10901 = vmatprep.subr.bf16.mxu1 %v14971_v10 }
 0xd1b   :  { %10871 = vmatpush1.bf16.msra.mxu0 %v14972_v6  ;;  %10903 = vmatpush1.bf16.msra.mxu1 %v14973_v18 }
 0xd1c   :  { %10873 = vmatprep.subr.bf16.mxu0 %v14974_v1  ;;  %10905 = vmatprep.subr.bf16.mxu1 %v14975_v43 }
 0xd1e   :  { %v11868_v62 = vpop.eup %11867 }
 0xd1f   :  { %v11870_v27 = vpop.eup %11869  ;;  %10875 = vmatpush1.bf16.msra.mxu0 %v14976_v57  ;;  %10907 = vmatpush1.bf16.msra.mxu1 %v14977_v37 }
 0xd20   :  { %v11872_v56 = vpop.eup %11871  ;;  %10877 = vmatprep.subr.bf16.mxu0 %v14978_v60  ;;  %10909 = vmatprep.subr.bf16.mxu1 %v14979_v51  ;;  %v6275_v34 = vmul.f32 %v11870_v27, %v11868_v62  ;;  %v15028_v62 = vld [vmem:[#allocation29_spill] sm:$0xff]  ;;  %v15029_v27 = vld [vmem:[#allocation30_spill] sm:$0xff] }
 0xd21   :  { %v6274_v47 = vmul.f32 %v11872_v56, %v13864_v52  ;;  %v11874_v52 = vpop.eup %11873  ;;  %v15030_v56 = vld [vmem:[#allocation31_spill] sm:$0xff] }
 0xd23   :  { %v13946_v29 = vadd.f32 %v6275_v34, %v6274_v47  ;;  %10879 = vmatpush1.bf16.msra.mxu0 %v14980_v44  ;;  %10911 = vmatpush1.bf16.msra.mxu1 %v14981_v39  ;;  %v15032_v47 = vld [vmem:[#allocation33_spill] sm:$0xff]  ;;  %v15033_v34 = vld [vmem:[#allocation34_spill] sm:$0xff] }
 0xd24   :  { %10881 = vmatprep.subr.bf16.mxu0 %v13661_v16  ;;  %10913 = vmatprep.subr.bf16.mxu1 %v13663_v17 }
 0xd25   :  { %11875 = vtanh.f32 %v13946_v29 }
 0xd27   :  { %10883 = vmatpush1.bf16.msra.mxu0 %v13667_v0  ;;  %10915 = vmatpush1.bf16.msra.mxu1 %v13669_v49 }
 0xd28   :  { %10885 = vmatprep.subr.bf16.mxu0 %v13673_v32  ;;  %10917 = vmatprep.subr.bf16.mxu1 %v13675_v24 }
 0xd2b   :  { %10887 = vmatpush1.bf16.msra.mxu0 %v13679_v54  ;;  %10919 = vmatpush1.bf16.msra.mxu1 %v13681_v3 }
 0xd2c   :  { %10889 = vmatprep.subr.bf16.mxu0 %v13685_v22  ;;  %10921 = vmatprep.subr.bf16.mxu1 %v13687_v23 }
 0xd2f   :  { %v11876_v42 = vpop.eup %11875  ;;  %10891 = vmatpush1.bf16.msra.mxu0 %v13691_v7  ;;  %10923 = vmatpush1.bf16.msra.mxu1 %v13693_v59 }
 0xd30   :  { %v6278_v61 = vmul.f32 %v11876_v42, %v11874_v52  ;;  %10925 = vmatprep.subr.bf16.mxu0 %v13499_v46  ;;  %10957 = vmatprep.subr.bf16.mxu1 %v13501_v63  ;;  %v15034_v52 = vld [vmem:[#allocation35_spill] sm:$0xff]  ;;  %v15035_v42 = vld [vmem:[#allocation36_spill] sm:$0xff] }
 0xd32   :  { %6280 = vst [vmem:[#allocation6 + $0x5] sm:$0x1] %v6278_v61  ;;  %6520 = vmatmul.mubr.f32.vlgmr.msra.gmra.mrb[54].mxu0 %v6278_v61  ;;  %6591 = vmatmul.mubr.f32.vlgmr.msra.gmra.mrb[54].mxu1 %v6278_v61  ;;  %v15036_v61 = vld [vmem:[#allocation37_spill] sm:$0xff] }
 0xd33   :  { %10927 = vmatpush1.bf16.msra.mxu0 %v13503_v48  ;;  %10959 = vmatpush1.bf16.msra.mxu1 %v13505_v33 }
 0xd34   :  { %10929 = vmatprep.subr.bf16.mxu0 %v13509_v38  ;;  %10961 = vmatprep.subr.bf16.mxu1 %v13511_v41 }
 0xd35   :  { %6756 = vmatprep.mubr.f32.mxu0 %v14780_v5  ;;  %6827 = vmatprep.mubr.f32.mxu1 %v14780_v5 }
 0xd37   :  { %10931 = vmatpush1.bf16.msra.mxu0 %v13517_v45  ;;  %10963 = vmatpush1.bf16.msra.mxu1 %v13519_v14 }
 0xd38   :  { %10933 = vmatprep.subr.bf16.mxu0 %v13523_v9  ;;  %10965 = vmatprep.subr.bf16.mxu1 %v13525_v28 }
 0xd3b   :  { %10935 = vmatpush1.bf16.msra.mxu0 %v15017_v55  ;;  %10967 = vmatpush1.bf16.msra.mxu1 %v15018_v2 }
 0xd3c   :  { %10937 = vmatprep.subr.bf16.mxu0 %v15019_v30  ;;  %10969 = vmatprep.subr.bf16.mxu1 %v15020_v20 }
 0xd3f   :  { %10939 = vmatpush1.bf16.msra.mxu0 %v15021_v19  ;;  %10971 = vmatpush1.bf16.msra.mxu1 %v15022_v12 }
 0xd40   :  { %10941 = vmatprep.subr.bf16.mxu0 %v15023_v26  ;;  %10973 = vmatprep.subr.bf16.mxu1 %v15024_v35 }
 0xd43   :  { %10943 = vmatpush1.bf16.msra.mxu0 %v15025_v13  ;;  %10975 = vmatpush1.bf16.msra.mxu1 %v15026_v8  ;;  %v15037_v8 = vld [vmem:[#allocation38_spill] sm:$0xff] }
 0xd44   :  { %10945 = vmatprep.subr.bf16.mxu0 %v15027_v25  ;;  %10977 = vmatprep.subr.bf16.mxu1 %v15028_v62  ;;  %v15038_v25 = vld [vmem:[#allocation39_spill] sm:$0xff]  ;;  %v15039_v62 = vld [vmem:[#allocation40_spill] sm:$0xff] }
 0xd47   :  { %10947 = vmatpush1.bf16.msra.mxu0 %v15029_v27  ;;  %10979 = vmatpush1.bf16.msra.mxu1 %v15030_v56  ;;  %v15040_v27 = vld [vmem:[#allocation41_spill] sm:$0xff] }
 0xd48   :  { %10949 = vmatprep.subr.bf16.mxu0 %v15031_v40  ;;  %10981 = vmatprep.subr.bf16.mxu1 %v15032_v47 }
 0xd4b   :  { %10951 = vmatpush1.bf16.msra.mxu0 %v15033_v34  ;;  %10983 = vmatpush1.bf16.msra.mxu1 %v15034_v52 }
 0xd4c   :  { %10953 = vmatprep.subr.bf16.mxu0 %v15035_v42  ;;  %10985 = vmatprep.subr.bf16.mxu1 %v15036_v61 }
 0xd4f   :  { %10955 = vmatpush1.bf16.msra.mxu0 %v15037_v8  ;;  %10987 = vmatpush1.bf16.msra.mxu1 %v15038_v25  ;;  %v6281_v8 = vld [vmem:[#allocation2 + $0x3] ss:$8 sm:$0xf] }
 0xd50   :  { %10989 = vmatprep.subr.bf16.mxu0 %v15039_v62  ;;  %11021 = vmatprep.subr.bf16.mxu1 %v15040_v27 }
 0xde5   :  { %v6348_v56 = vpop.f32.mrb[52].mxu0  ;;  %v6419_v40 = vpop.f32.mrb[52].mxu1 }
 0xde6   :  { %v6350_v13 = vpop.f32.mrb[53].mxu0  ;;  %v6421_v47 = vpop.f32.mrb[53].mxu1 }
 0xde7   :  { %v6428_v35 = vcombine.low %v6348_v56, %v6350_v13  ;;  %v6429_v34 = vcombine.low %v6419_v40, %v6421_v47 }
 0xde9   :  { %v6436_v52 = vrot.slane %v6428_v35, %v12935_v31  ;;  %v6443_v42 = vrot.slane %v6429_v34, %v12935_v31 }
 0xdeb   :  { %v6444_v26 = vcombine.low %v6436_v52, %v6443_v42 }
 0xded   :  { %v6451_v61 = vrot.slane %v6444_v26, %v12935_v31 }
 0xdef   :  { %v6453_v12 = vadd.f32 %v6451_v61, %v6281_v8 }
 0xdf1   :  { %v8877_v25 = vmul.f32 -1.442695, %v6453_v12  ;;  %v6634_v19 = vrot.slane %v6453_v12, 1  ;;  %v6645_v27 = vrot.slane %v6453_v12, 3  ;;  %v6642_v2 = vrot.slane %v6453_v12, 2 }
 0xdf3   :  { %11877 = vpow2.f32 %v8877_v25  ;;  %v8878_v62 = vmul.f32 -1.442695, %v6634_v19  ;;  %v8879_v20 = vmul.f32 -1.442695, %v6645_v27 }
 0xdf5   :  { %11879 = vpow2.f32 %v8878_v62 }
 0xdf6   :  { %11881 = vpow2.f32 %v8879_v20 }
 0xdfd   :  { %v11878_v30 = vpop.eup %11877 }
 0xdfe   :  { %v6630_v13 = vadd.f32 1.0, %v11878_v30 }
 0xdff   :  { %v11880_v56 = vpop.eup %11879 }
 0xe00   :  { %11883 = vrcp.f32 %v6630_v13  ;;  %v6639_v35 = vadd.f32 1.0, %v11880_v56  ;;  %v11882_v25 = vpop.eup %11881  ;;  %v6454_v56 = vld [vmem:[#allocation2 + $0x24] ss:$8 sm:$0xf] }
 0xe01   :  { %11885 = vtanh.f32 %v6642_v2  ;;  %v6650_v61 = vadd.f32 1.0, %v11882_v25 }
 0xe02   :  { %11887 = vrcp.f32 %v6639_v35 }
 0xe03   :  { %11889 = vrcp.f32 %v6650_v61 }
 0xe05   :  { %v6521_v40 = vpop.f32.mrb[54].mxu0  ;;  %v6592_v26 = vpop.f32.mrb[54].mxu1 }
 0xe06   :  { %v6523_v47 = vpop.f32.mrb[55].mxu0  ;;  %v6594_v8 = vpop.f32.mrb[55].mxu1 }
 0xe07   :  { %v6601_v34 = vcombine.low %v6521_v40, %v6523_v47  ;;  %v6602_v52 = vcombine.low %v6592_v26, %v6594_v8 }
 0xe09   :  { %v6609_v19 = vrot.slane %v6601_v34, %v12935_v31  ;;  %v6616_v62 = vrot.slane %v6602_v52, %v12935_v31 }
 0xe0a   :  { %v11884_v27 = vpop.eup %11883 }
 0xe0b   :  { %v11886_v12 = vpop.eup %11885  ;;  %v6617_v30 = vcombine.low %v6609_v19, %v6616_v62 }
 0xe0c   :  { %v11888_v42 = vpop.eup %11887  ;;  %v6654_v13 = vmul.f32 %v11886_v12, %v11884_v27 }
 0xe0d   :  { %v6624_v20 = vrot.slane %v6617_v30, %v12935_v31  ;;  %v6653_v2 = vmul.f32 %v11888_v42, %v13924_v50  ;;  %v11890_v34 = vpop.eup %11889 }
 0xe0f   :  { %v6626_v35 = vadd.f32 %v6624_v20, %v6454_v56  ;;  %v14006_v55 = vadd.f32 %v6654_v13, %v6653_v2 }
 0xe11   :  { %v8880_v40 = vmul.f32 -1.442695, %v6626_v35  ;;  %v6665_v26 = vrot.slane %v6626_v35, 1  ;;  %11891 = vtanh.f32 %v14006_v55  ;;  %v6676_v8 = vrot.slane %v6626_v35, 3 }
 0xe12   :  { %v6673_v62 = vrot.slane %v6626_v35, 2 }
 0xe13   :  { %11893 = vpow2.f32 %v8880_v40  ;;  %v8881_v47 = vmul.f32 -1.442695, %v6665_v26  ;;  %v8882_v52 = vmul.f32 -1.442695, %v6676_v8  ;;  %v15041_v8 = vld [vmem:[#allocation52_spill] sm:$0xff] }
 0xe15   :  { %11895 = vpow2.f32 %v8881_v47 }
 0xe16   :  { %11897 = vpow2.f32 %v8882_v52  ;;  %v15043_v52 = vld [vmem:[#allocation54_spill] sm:$0xff] }
 0xe1b   :  { %v11892_v19 = vpop.eup %11891 }
 0xe1c   :  { %v6657_v50 = vmul.f32 %v11892_v19, %v11890_v34  ;;  %v15042_v34 = vld [vmem:[#allocation53_spill] sm:$0xff]  ;;  %v15044_v19 = vld [vmem:[#allocation55_spill] sm:$0xff] }
 0xe1d   :  { %v11894_v25 = vpop.eup %11893 }
 0xe1e   :  { %v6661_v27 = vadd.f32 1.0, %v11894_v25  ;;  %6689 = vst [vmem:[#allocation5 + $0x3] sm:$0x1] %v6657_v50  ;;  %6757 = vmatmul.mubr.f32.vlgmr.msra.gmra.mrb[56].mxu0 %v6657_v50  ;;  %6828 = vmatmul.mubr.f32.vlgmr.msra.gmra.mrb[56].mxu1 %v6657_v50  ;;  %v15045_v25 = vld [vmem:[#allocation56_spill] sm:$0xff]  ;;  %v15047_v50 = vld [vmem:[#allocation58_spill] sm:$0xff] }
 0xe1f   :  { %v11896_v12 = vpop.eup %11895  ;;  %10991 = vmatpush1.bf16.msra.mxu0 %v13603_v15  ;;  %11023 = vmatpush1.bf16.msra.mxu1 %v13605_v21 }
 0xe20   :  { %11899 = vrcp.f32 %v6661_v27  ;;  %v6670_v30 = vadd.f32 1.0, %v11896_v12  ;;  %10993 = vmatprep.subr.bf16.mxu0 %v13609_v58  ;;  %11025 = vmatprep.subr.bf16.mxu1 %v13611_v36  ;;  %v11898_v42 = vpop.eup %11897  ;;  %v15048_v27 = vld [vmem:[#allocation59_spill] sm:$0xff]  ;;  %v15049_v12 = vld [vmem:[#allocation60_spill] sm:$0xff] }
 0xe21   :  { %11901 = vtanh.f32 %v6673_v62  ;;  %6929 = vmatprep.mubr.f32.mxu0 %v14780_v5  ;;  %7000 = vmatprep.mubr.f32.mxu1 %v14780_v5  ;;  %v6681_v13 = vadd.f32 1.0, %v11898_v42  ;;  %v15046_v62 = vld [vmem:[#allocation57_spill] sm:$0xff]  ;;  %v15051_v42 = vld [vmem:[#allocation28_spill] sm:$0xff] }
 0xe22   :  { %11903 = vrcp.f32 %v6670_v30  ;;  %v15050_v30 = vld [vmem:[#allocation61_spill] sm:$0xff] }
 0xe23   :  { %10995 = vmatpush1.bf16.msra.mxu0 %v13617_v4  ;;  %11027 = vmatpush1.bf16.msra.mxu1 %v13619_v53  ;;  %11905 = vrcp.f32 %v6681_v13  ;;  %v15055_v13 = vld [vmem:[#allocation32_spill] sm:$0xff] }
 0xe24   :  { %10997 = vmatprep.subr.bf16.mxu0 %v14970_v11  ;;  %11029 = vmatprep.subr.bf16.mxu1 %v14971_v10 }
 0xe27   :  { %10999 = vmatpush1.bf16.msra.mxu0 %v14972_v6  ;;  %11031 = vmatpush1.bf16.msra.mxu1 %v14973_v18 }
 0xe28   :  { %11001 = vmatprep.subr.bf16.mxu0 %v14974_v1  ;;  %11033 = vmatprep.subr.bf16.mxu1 %v14975_v43 }
 0xe2a   :  { %v11900_v20 = vpop.eup %11899 }
 0xe2b   :  { %v11902_v61 = vpop.eup %11901  ;;  %11003 = vmatpush1.bf16.msra.mxu0 %v14976_v57  ;;  %11035 = vmatpush1.bf16.msra.mxu1 %v14977_v37 }
 0xe2c   :  { %v11904_v2 = vpop.eup %11903  ;;  %11005 = vmatprep.subr.bf16.mxu0 %v14978_v60  ;;  %11037 = vmatprep.subr.bf16.mxu1 %v14979_v51  ;;  %v6685_v35 = vmul.f32 %v11902_v61, %v11900_v20  ;;  %v15052_v20 = vld [vmem:[#allocation29_spill] sm:$0xff]  ;;  %v15053_v61 = vld [vmem:[#allocation30_spill] sm:$0xff] }
 0xe2d   :  { %v6684_v56 = vmul.f32 %v11904_v2, %v13946_v29  ;;  %v11906_v29 = vpop.eup %11905  ;;  %v15054_v2 = vld [vmem:[#allocation31_spill] sm:$0xff] }
 0xe2f   :  { %v14028_v40 = vadd.f32 %v6685_v35, %v6684_v56  ;;  %11007 = vmatpush1.bf16.msra.mxu0 %v14980_v44  ;;  %11039 = vmatpush1.bf16.msra.mxu1 %v14981_v39  ;;  %v15056_v56 = vld [vmem:[#allocation33_spill] sm:$0xff]  ;;  %v15057_v35 = vld [vmem:[#allocation34_spill] sm:$0xff] }
 0xe30   :  { %11009 = vmatprep.subr.bf16.mxu0 %v13661_v16  ;;  %11041 = vmatprep.subr.bf16.mxu1 %v13663_v17 }
 0xe31   :  { %11907 = vtanh.f32 %v14028_v40 }
 0xe33   :  { %11011 = vmatpush1.bf16.msra.mxu0 %v13667_v0  ;;  %11043 = vmatpush1.bf16.msra.mxu1 %v13669_v49 }
 0xe34   :  { %11013 = vmatprep.subr.bf16.mxu0 %v13673_v32  ;;  %11045 = vmatprep.subr.bf16.mxu1 %v13675_v24 }
 0xe37   :  { %11015 = vmatpush1.bf16.msra.mxu0 %v13679_v54  ;;  %11047 = vmatpush1.bf16.msra.mxu1 %v13681_v3 }
 0xe38   :  { %11017 = vmatprep.subr.bf16.mxu0 %v13685_v22  ;;  %11049 = vmatprep.subr.bf16.mxu1 %v13687_v23 }
 0xe3b   :  { %v11908_v26 = vpop.eup %11907  ;;  %11019 = vmatpush1.bf16.msra.mxu0 %v13691_v7  ;;  %11051 = vmatpush1.bf16.msra.mxu1 %v13693_v59 }
 0xe3c   :  { %v6688_v47 = vmul.f32 %v11908_v26, %v11906_v29  ;;  %11053 = vmatprep.subr.bf16.mxu0 %v13499_v46  ;;  %11085 = vmatprep.subr.bf16.mxu1 %v13501_v63  ;;  %v15058_v29 = vld [vmem:[#allocation35_spill] sm:$0xff]  ;;  %v15059_v26 = vld [vmem:[#allocation36_spill] sm:$0xff] }
 0xe3e   :  { %6690 = vst [vmem:[#allocation6 + $0x4] sm:$0x1] %v6688_v47  ;;  %6930 = vmatmul.mubr.f32.vlgmr.msra.gmra.mrb[58].mxu0 %v6688_v47  ;;  %7001 = vmatmul.mubr.f32.vlgmr.msra.gmra.mrb[58].mxu1 %v6688_v47  ;;  %v15060_v47 = vld [vmem:[#allocation37_spill] sm:$0xff] }
 0xe3f   :  { %11055 = vmatpush1.bf16.msra.mxu0 %v13503_v48  ;;  %11087 = vmatpush1.bf16.msra.mxu1 %v13505_v33 }
 0xe40   :  { %11057 = vmatprep.subr.bf16.mxu0 %v13509_v38  ;;  %11089 = vmatprep.subr.bf16.mxu1 %v13511_v41 }
 0xe41   :  { %7166 = vmatprep.mubr.f32.mxu0 %v14780_v5  ;;  %7237 = vmatprep.mubr.f32.mxu1 %v14780_v5 }
 0xe43   :  { %11059 = vmatpush1.bf16.msra.mxu0 %v13517_v45  ;;  %11091 = vmatpush1.bf16.msra.mxu1 %v13519_v14 }
 0xe44   :  { %11061 = vmatprep.subr.bf16.mxu0 %v13523_v9  ;;  %11093 = vmatprep.subr.bf16.mxu1 %v13525_v28 }
 0xe47   :  { %11063 = vmatpush1.bf16.msra.mxu0 %v15041_v8  ;;  %11095 = vmatpush1.bf16.msra.mxu1 %v15042_v34 }
 0xe48   :  { %11065 = vmatprep.subr.bf16.mxu0 %v15043_v52  ;;  %11097 = vmatprep.subr.bf16.mxu1 %v15044_v19 }
 0xe4b   :  { %11067 = vmatpush1.bf16.msra.mxu0 %v15045_v25  ;;  %11099 = vmatpush1.bf16.msra.mxu1 %v15046_v62 }
 0xe4c   :  { %11069 = vmatprep.subr.bf16.mxu0 %v15047_v50  ;;  %11101 = vmatprep.subr.bf16.mxu1 %v15048_v27 }
 0xe4f   :  { %11071 = vmatpush1.bf16.msra.mxu0 %v15049_v12  ;;  %11103 = vmatpush1.bf16.msra.mxu1 %v15050_v30  ;;  %v15061_v30 = vld [vmem:[#allocation38_spill] sm:$0xff] }
 0xe50   :  { %11073 = vmatprep.subr.bf16.mxu0 %v15051_v42  ;;  %11105 = vmatprep.subr.bf16.mxu1 %v15052_v20  ;;  %v15062_v42 = vld [vmem:[#allocation39_spill] sm:$0xff]  ;;  %v15063_v20 = vld [vmem:[#allocation40_spill] sm:$0xff] }
 0xe53   :  { %11075 = vmatpush1.bf16.msra.mxu0 %v15053_v61  ;;  %11107 = vmatpush1.bf16.msra.mxu1 %v15054_v2  ;;  %v15064_v61 = vld [vmem:[#allocation41_spill] sm:$0xff] }
 0xe54   :  { %11077 = vmatprep.subr.bf16.mxu0 %v15055_v13  ;;  %11109 = vmatprep.subr.bf16.mxu1 %v15056_v56 }
 0xe57   :  { %11079 = vmatpush1.bf16.msra.mxu0 %v15057_v35  ;;  %11111 = vmatpush1.bf16.msra.mxu1 %v15058_v29 }
 0xe58   :  { %11081 = vmatprep.subr.bf16.mxu0 %v15059_v26  ;;  %11113 = vmatprep.subr.bf16.mxu1 %v15060_v47 }
 0xe5b   :  { %11083 = vmatpush1.bf16.msra.mxu0 %v15061_v30  ;;  %11115 = vmatpush1.bf16.msra.mxu1 %v15062_v42  ;;  %v6691_v30 = vld [vmem:[#allocation2 + $0x4] ss:$8 sm:$0xf] }
 0xe5c   :  { %11117 = vmatprep.subr.bf16.mxu0 %v15063_v20  ;;  %11149 = vmatprep.subr.bf16.mxu1 %v15064_v61 }
 0xef1   :  { %v6758_v2 = vpop.f32.mrb[56].mxu0  ;;  %v6829_v13 = vpop.f32.mrb[56].mxu1 }
 0xef2   :  { %v6760_v12 = vpop.f32.mrb[57].mxu0  ;;  %v6831_v56 = vpop.f32.mrb[57].mxu1 }
 0xef3   :  { %v6838_v27 = vcombine.low %v6758_v2, %v6760_v12  ;;  %v6839_v35 = vcombine.low %v6829_v13, %v6831_v56 }
 0xef5   :  { %v6846_v29 = vrot.slane %v6838_v27, %v12935_v31  ;;  %v6853_v26 = vrot.slane %v6839_v35, %v12935_v31 }
 0xef7   :  { %v6854_v50 = vcombine.low %v6846_v29, %v6853_v26 }
 0xef9   :  { %v6861_v47 = vrot.slane %v6854_v50, %v12935_v31 }
 0xefb   :  { %v6863_v62 = vadd.f32 %v6861_v47, %v6691_v30 }
 0xefd   :  { %v8883_v42 = vmul.f32 -1.442695, %v6863_v62  ;;  %v7044_v25 = vrot.slane %v6863_v62, 1  ;;  %v7055_v61 = vrot.slane %v6863_v62, 3  ;;  %v7052_v34 = vrot.slane %v6863_v62, 2 }
 0xeff   :  { %11909 = vpow2.f32 %v8883_v42  ;;  %v8884_v20 = vmul.f32 -1.442695, %v7044_v25  ;;  %v8885_v19 = vmul.f32 -1.442695, %v7055_v61 }
 0xf01   :  { %11911 = vpow2.f32 %v8884_v20 }
 0xf02   :  { %11913 = vpow2.f32 %v8885_v19 }
 0xf09   :  { %v11910_v52 = vpop.eup %11909 }
 0xf0a   :  { %v7040_v12 = vadd.f32 1.0, %v11910_v52 }
 0xf0b   :  { %v11912_v2 = vpop.eup %11911 }
 0xf0c   :  { %11915 = vrcp.f32 %v7040_v12  ;;  %v7049_v27 = vadd.f32 1.0, %v11912_v2  ;;  %v11914_v42 = vpop.eup %11913  ;;  %v6864_v2 = vld [vmem:[#allocation2 + $0x23] ss:$8 sm:$0xf] }
 0xf0d   :  { %11917 = vtanh.f32 %v7052_v34  ;;  %v7060_v47 = vadd.f32 1.0, %v11914_v42 }
 0xf0e   :  { %11919 = vrcp.f32 %v7049_v27 }
 0xf0f   :  { %11921 = vrcp.f32 %v7060_v47 }
 0xf11   :  { %v6931_v13 = vpop.f32.mrb[58].mxu0  ;;  %v7002_v50 = vpop.f32.mrb[58].mxu1 }
 0xf12   :  { %v6933_v56 = vpop.f32.mrb[59].mxu0  ;;  %v7004_v30 = vpop.f32.mrb[59].mxu1 }
 0xf13   :  { %v7011_v35 = vcombine.low %v6931_v13, %v6933_v56  ;;  %v7012_v29 = vcombine.low %v7002_v50, %v7004_v30 }
 0xf15   :  { %v7019_v25 = vrot.slane %v7011_v35, %v12935_v31  ;;  %v7026_v20 = vrot.slane %v7012_v29, %v12935_v31 }
 0xf16   :  { %v11916_v61 = vpop.eup %11915 }
 0xf17   :  { %v11918_v62 = vpop.eup %11917  ;;  %v7027_v52 = vcombine.low %v7019_v25, %v7026_v20 }
 0xf18   :  { %v11920_v26 = vpop.eup %11919  ;;  %v7064_v12 = vmul.f32 %v11918_v62, %v11916_v61 }
 0xf19   :  { %v7034_v19 = vrot.slane %v7027_v52, %v12935_v31  ;;  %v7063_v34 = vmul.f32 %v11920_v26, %v14006_v55  ;;  %v11922_v35 = vpop.eup %11921 }
 0xf1b   :  { %v7036_v27 = vadd.f32 %v7034_v19, %v6864_v2  ;;  %v14088_v8 = vadd.f32 %v7064_v12, %v7063_v34 }
 0xf1d   :  { %v8886_v13 = vmul.f32 -1.442695, %v7036_v27  ;;  %v7075_v50 = vrot.slane %v7036_v27, 1  ;;  %11923 = vtanh.f32 %v14088_v8  ;;  %v7086_v30 = vrot.slane %v7036_v27, 3 }
 0xf1e   :  { %v7083_v20 = vrot.slane %v7036_v27, 2 }
 0xf1f   :  { %11925 = vpow2.f32 %v8886_v13  ;;  %v8887_v56 = vmul.f32 -1.442695, %v7075_v50  ;;  %v8888_v29 = vmul.f32 -1.442695, %v7086_v30  ;;  %v15065_v30 = vld [vmem:[#allocation52_spill] sm:$0xff] }
 0xf21   :  { %11927 = vpow2.f32 %v8887_v56 }
 0xf22   :  { %11929 = vpow2.f32 %v8888_v29  ;;  %v15067_v29 = vld [vmem:[#allocation54_spill] sm:$0xff] }
 0xf27   :  { %v11924_v25 = vpop.eup %11923 }
 0xf28   :  { %v7067_v55 = vmul.f32 %v11924_v25, %v11922_v35  ;;  %v15066_v35 = vld [vmem:[#allocation53_spill] sm:$0xff]  ;;  %v15068_v25 = vld [vmem:[#allocation55_spill] sm:$0xff] }
 0xf29   :  { %v11926_v42 = vpop.eup %11925 }
 0xf2a   :  { %v7071_v61 = vadd.f32 1.0, %v11926_v42  ;;  %7099 = vst [vmem:[#allocation5 + $0x4] sm:$0x1] %v7067_v55  ;;  %7167 = vmatmul.mubr.f32.vlgmr.msra.gmra.mrb[60].mxu0 %v7067_v55  ;;  %7238 = vmatmul.mubr.f32.vlgmr.msra.gmra.mrb[60].mxu1 %v7067_v55  ;;  %v15069_v42 = vld [vmem:[#allocation56_spill] sm:$0xff]  ;;  %v15071_v55 = vld [vmem:[#allocation58_spill] sm:$0xff] }
 0xf2b   :  { %v11928_v62 = vpop.eup %11927  ;;  %11119 = vmatpush1.bf16.msra.mxu0 %v13603_v15  ;;  %11151 = vmatpush1.bf16.msra.mxu1 %v13605_v21 }
 0xf2c   :  { %11931 = vrcp.f32 %v7071_v61  ;;  %v7080_v52 = vadd.f32 1.0, %v11928_v62  ;;  %11121 = vmatprep.subr.bf16.mxu0 %v13609_v58  ;;  %11153 = vmatprep.subr.bf16.mxu1 %v13611_v36  ;;  %v11930_v26 = vpop.eup %11929  ;;  %v15072_v61 = vld [vmem:[#allocation59_spill] sm:$0xff]  ;;  %v15073_v62 = vld [vmem:[#allocation60_spill] sm:$0xff] }
 0xf2d   :  { %11933 = vtanh.f32 %v7083_v20  ;;  %7339 = vmatprep.mubr.f32.mxu0 %v14780_v5  ;;  %7410 = vmatprep.mubr.f32.mxu1 %v14780_v5  ;;  %v7091_v12 = vadd.f32 1.0, %v11930_v26  ;;  %v15070_v20 = vld [vmem:[#allocation57_spill] sm:$0xff]  ;;  %v15075_v26 = vld [vmem:[#allocation28_spill] sm:$0xff] }
 0xf2e   :  { %11935 = vrcp.f32 %v7080_v52  ;;  %v15074_v52 = vld [vmem:[#allocation61_spill] sm:$0xff] }
 0xf2f   :  { %11123 = vmatpush1.bf16.msra.mxu0 %v13617_v4  ;;  %11155 = vmatpush1.bf16.msra.mxu1 %v13619_v53  ;;  %11937 = vrcp.f32 %v7091_v12  ;;  %v15079_v12 = vld [vmem:[#allocation32_spill] sm:$0xff] }
 0xf30   :  { %11125 = vmatprep.subr.bf16.mxu0 %v14970_v11  ;;  %11157 = vmatprep.subr.bf16.mxu1 %v14971_v10 }
 0xf33   :  { %11127 = vmatpush1.bf16.msra.mxu0 %v14972_v6  ;;  %11159 = vmatpush1.bf16.msra.mxu1 %v14973_v18 }
 0xf34   :  { %11129 = vmatprep.subr.bf16.mxu0 %v14974_v1  ;;  %11161 = vmatprep.subr.bf16.mxu1 %v14975_v43 }
 0xf36   :  { %v11932_v19 = vpop.eup %11931 }
 0xf37   :  { %v11934_v47 = vpop.eup %11933  ;;  %11131 = vmatpush1.bf16.msra.mxu0 %v14976_v57  ;;  %11163 = vmatpush1.bf16.msra.mxu1 %v14977_v37 }
 0xf38   :  { %v11936_v34 = vpop.eup %11935  ;;  %11133 = vmatprep.subr.bf16.mxu0 %v14978_v60  ;;  %11165 = vmatprep.subr.bf16.mxu1 %v14979_v51  ;;  %v7095_v27 = vmul.f32 %v11934_v47, %v11932_v19  ;;  %v15076_v19 = vld [vmem:[#allocation29_spill] sm:$0xff]  ;;  %v15077_v47 = vld [vmem:[#allocation30_spill] sm:$0xff] }
 0xf39   :  { %v7094_v2 = vmul.f32 %v11936_v34, %v14028_v40  ;;  %v11938_v40 = vpop.eup %11937  ;;  %v15078_v34 = vld [vmem:[#allocation31_spill] sm:$0xff] }
 0xf3b   :  { %v14110_v13 = vadd.f32 %v7095_v27, %v7094_v2  ;;  %11135 = vmatpush1.bf16.msra.mxu0 %v14980_v44  ;;  %11167 = vmatpush1.bf16.msra.mxu1 %v14981_v39  ;;  %v15080_v2 = vld [vmem:[#allocation33_spill] sm:$0xff]  ;;  %v15081_v27 = vld [vmem:[#allocation34_spill] sm:$0xff] }
 0xf3c   :  { %11137 = vmatprep.subr.bf16.mxu0 %v13661_v16  ;;  %11169 = vmatprep.subr.bf16.mxu1 %v13663_v17 }
 0xf3d   :  { %11939 = vtanh.f32 %v14110_v13 }
 0xf3f   :  { %11139 = vmatpush1.bf16.msra.mxu0 %v13667_v0  ;;  %11171 = vmatpush1.bf16.msra.mxu1 %v13669_v49 }
 0xf40   :  { %11141 = vmatprep.subr.bf16.mxu0 %v13673_v32  ;;  %11173 = vmatprep.subr.bf16.mxu1 %v13675_v24 }
 0xf43   :  { %11143 = vmatpush1.bf16.msra.mxu0 %v13679_v54  ;;  %11175 = vmatpush1.bf16.msra.mxu1 %v13681_v3 }
 0xf44   :  { %11145 = vmatprep.subr.bf16.mxu0 %v13685_v22  ;;  %11177 = vmatprep.subr.bf16.mxu1 %v13687_v23 }
 0xf47   :  { %v11940_v50 = vpop.eup %11939  ;;  %11147 = vmatpush1.bf16.msra.mxu0 %v13691_v7  ;;  %11179 = vmatpush1.bf16.msra.mxu1 %v13693_v59 }
 0xf48   :  { %v7098_v56 = vmul.f32 %v11940_v50, %v11938_v40  ;;  %11181 = vmatprep.subr.bf16.mxu0 %v13499_v46  ;;  %11213 = vmatprep.subr.bf16.mxu1 %v13501_v63  ;;  %v15082_v40 = vld [vmem:[#allocation35_spill] sm:$0xff]  ;;  %v15083_v50 = vld [vmem:[#allocation36_spill] sm:$0xff] }
 0xf4a   :  { %7100 = vst [vmem:[#allocation6 + $0x3] sm:$0x1] %v7098_v56  ;;  %7340 = vmatmul.mubr.f32.vlgmr.msra.gmra.mrb[62].mxu0 %v7098_v56  ;;  %7411 = vmatmul.mubr.f32.vlgmr.msra.gmra.mrb[62].mxu1 %v7098_v56  ;;  %v15084_v56 = vld [vmem:[#allocation37_spill] sm:$0xff] }
 0xf4b   :  { %11183 = vmatpush1.bf16.msra.mxu0 %v13503_v48  ;;  %11215 = vmatpush1.bf16.msra.mxu1 %v13505_v33 }
 0xf4c   :  { %11185 = vmatprep.subr.bf16.mxu0 %v13509_v38  ;;  %11217 = vmatprep.subr.bf16.mxu1 %v13511_v41 }
 0xf4d   :  { %7576 = vmatprep.mubr.f32.mxu0 %v14780_v5  ;;  %7647 = vmatprep.mubr.f32.mxu1 %v14780_v5 }
 0xf4f   :  { %11187 = vmatpush1.bf16.msra.mxu0 %v13517_v45  ;;  %11219 = vmatpush1.bf16.msra.mxu1 %v13519_v14 }
 0xf50   :  { %11189 = vmatprep.subr.bf16.mxu0 %v13523_v9  ;;  %11221 = vmatprep.subr.bf16.mxu1 %v13525_v28 }
 0xf53   :  { %11191 = vmatpush1.bf16.msra.mxu0 %v15065_v30  ;;  %11223 = vmatpush1.bf16.msra.mxu1 %v15066_v35 }
 0xf54   :  { %11193 = vmatprep.subr.bf16.mxu0 %v15067_v29  ;;  %11225 = vmatprep.subr.bf16.mxu1 %v15068_v25 }
 0xf57   :  { %11195 = vmatpush1.bf16.msra.mxu0 %v15069_v42  ;;  %11227 = vmatpush1.bf16.msra.mxu1 %v15070_v20 }
 0xf58   :  { %11197 = vmatprep.subr.bf16.mxu0 %v15071_v55  ;;  %11229 = vmatprep.subr.bf16.mxu1 %v15072_v61 }
 0xf5b   :  { %11199 = vmatpush1.bf16.msra.mxu0 %v15073_v62  ;;  %11231 = vmatpush1.bf16.msra.mxu1 %v15074_v52  ;;  %v15085_v52 = vld [vmem:[#allocation38_spill] sm:$0xff] }
 0xf5c   :  { %11201 = vmatprep.subr.bf16.mxu0 %v15075_v26  ;;  %11233 = vmatprep.subr.bf16.mxu1 %v15076_v19  ;;  %v15086_v26 = vld [vmem:[#allocation39_spill] sm:$0xff]  ;;  %v15087_v19 = vld [vmem:[#allocation40_spill] sm:$0xff] }
 0xf5f   :  { %11203 = vmatpush1.bf16.msra.mxu0 %v15077_v47  ;;  %11235 = vmatpush1.bf16.msra.mxu1 %v15078_v34  ;;  %v15088_v47 = vld [vmem:[#allocation41_spill] sm:$0xff] }
 0xf60   :  { %11205 = vmatprep.subr.bf16.mxu0 %v15079_v12  ;;  %11237 = vmatprep.subr.bf16.mxu1 %v15080_v2 }
 0xf63   :  { %11207 = vmatpush1.bf16.msra.mxu0 %v15081_v27  ;;  %11239 = vmatpush1.bf16.msra.mxu1 %v15082_v40 }
 0xf64   :  { %11209 = vmatprep.subr.bf16.mxu0 %v15083_v50  ;;  %11241 = vmatprep.subr.bf16.mxu1 %v15084_v56 }
 0xf67   :  { %11211 = vmatpush1.bf16.msra.mxu0 %v15085_v52  ;;  %11243 = vmatpush1.bf16.msra.mxu1 %v15086_v26  ;;  %v7101_v52 = vld [vmem:[#allocation2 + $0x5] ss:$8 sm:$0xf] }
 0xf68   :  { %11245 = vmatprep.subr.bf16.mxu0 %v15087_v19  ;;  %11277 = vmatprep.subr.bf16.mxu1 %v15088_v47 }
 0xffd   :  { %v7168_v34 = vpop.f32.mrb[60].mxu0  ;;  %v7239_v12 = vpop.f32.mrb[60].mxu1 }
 0xffe   :  { %v7170_v62 = vpop.f32.mrb[61].mxu0  ;;  %v7241_v2 = vpop.f32.mrb[61].mxu1 }
 0xfff   :  { %v7248_v61 = vcombine.low %v7168_v34, %v7170_v62  ;;  %v7249_v27 = vcombine.low %v7239_v12, %v7241_v2 }
0x1001   :  { %v7256_v40 = vrot.slane %v7248_v61, %v12935_v31  ;;  %v7263_v50 = vrot.slane %v7249_v27, %v12935_v31 }
0x1003   :  { %v7264_v55 = vcombine.low %v7256_v40, %v7263_v50 }
0x1005   :  { %v7271_v56 = vrot.slane %v7264_v55, %v12935_v31 }
0x1007   :  { %v7273_v20 = vadd.f32 %v7271_v56, %v7101_v52 }
0x1009   :  { %v8889_v26 = vmul.f32 -1.442695, %v7273_v20  ;;  %v7454_v42 = vrot.slane %v7273_v20, 1  ;;  %v7465_v47 = vrot.slane %v7273_v20, 3  ;;  %v7462_v35 = vrot.slane %v7273_v20, 2 }
0x100b   :  { %11941 = vpow2.f32 %v8889_v26  ;;  %v8890_v19 = vmul.f32 -1.442695, %v7454_v42  ;;  %v8891_v25 = vmul.f32 -1.442695, %v7465_v47 }
0x100d   :  { %11943 = vpow2.f32 %v8890_v19 }
0x100e   :  { %11945 = vpow2.f32 %v8891_v25 }
0x1015   :  { %v11942_v29 = vpop.eup %11941 }
0x1016   :  { %v7450_v62 = vadd.f32 1.0, %v11942_v29 }
0x1017   :  { %v11944_v34 = vpop.eup %11943 }
0x1018   :  { %11947 = vrcp.f32 %v7450_v62  ;;  %v7459_v61 = vadd.f32 1.0, %v11944_v34  ;;  %v11946_v26 = vpop.eup %11945  ;;  %v7274_v34 = vld [vmem:[#allocation2 + $0x22] ss:$8 sm:$0xf] }
0x1019   :  { %11949 = vtanh.f32 %v7462_v35  ;;  %v7470_v56 = vadd.f32 1.0, %v11946_v26 }
0x101a   :  { %11951 = vrcp.f32 %v7459_v61 }
0x101b   :  { %11953 = vrcp.f32 %v7470_v56 }
0x101d   :  { %v7341_v12 = vpop.f32.mrb[62].mxu0  ;;  %v7412_v55 = vpop.f32.mrb[62].mxu1 }
0x101e   :  { %v7343_v2 = vpop.f32.mrb[63].mxu0  ;;  %v7414_v52 = vpop.f32.mrb[63].mxu1 }
0x101f   :  { %v7421_v27 = vcombine.low %v7341_v12, %v7343_v2  ;;  %v7422_v40 = vcombine.low %v7412_v55, %v7414_v52 }
0x1021   :  { %v7429_v42 = vrot.slane %v7421_v27, %v12935_v31  ;;  %v7436_v19 = vrot.slane %v7422_v40, %v12935_v31 }
0x1022   :  { %v11948_v47 = vpop.eup %11947 }
0x1023   :  { %v11950_v20 = vpop.eup %11949  ;;  %v7437_v29 = vcombine.low %v7429_v42, %v7436_v19 }
0x1024   :  { %v11952_v50 = vpop.eup %11951  ;;  %v7474_v62 = vmul.f32 %v11950_v20, %v11948_v47 }
0x1025   :  { %v7444_v25 = vrot.slane %v7437_v29, %v12935_v31  ;;  %v7473_v35 = vmul.f32 %v11952_v50, %v14088_v8  ;;  %v11954_v27 = vpop.eup %11953 }
0x1027   :  { %v7446_v61 = vadd.f32 %v7444_v25, %v7274_v34  ;;  %v14170_v30 = vadd.f32 %v7474_v62, %v7473_v35 }
0x1029   :  { %v8892_v12 = vmul.f32 -1.442695, %v7446_v61  ;;  %v7485_v55 = vrot.slane %v7446_v61, 1  ;;  %11955 = vtanh.f32 %v14170_v30  ;;  %v7496_v52 = vrot.slane %v7446_v61, 3 }
0x102a   :  { %v7493_v19 = vrot.slane %v7446_v61, 2 }
0x102b   :  { %11957 = vpow2.f32 %v8892_v12  ;;  %v8893_v2 = vmul.f32 -1.442695, %v7485_v55  ;;  %v8894_v40 = vmul.f32 -1.442695, %v7496_v52  ;;  %v15095_v52 = vld [vmem:[#allocation58_spill] sm:$0xff] }
0x102d   :  { %11959 = vpow2.f32 %v8893_v2 }
0x102e   :  { %11961 = vpow2.f32 %v8894_v40  ;;  %v15101_v40 = vld [vmem:[#allocation30_spill] sm:$0xff] }
0x1033   :  { %v11956_v42 = vpop.eup %11955 }
0x1034   :  { %v7477_v8 = vmul.f32 %v11956_v42, %v11954_v27  ;;  %v15100_v27 = vld [vmem:[#allocation29_spill] sm:$0xff]  ;;  %v15102_v42 = vld [vmem:[#allocation31_spill] sm:$0xff] }
0x1035   :  { %v11958_v26 = vpop.eup %11957 }
0x1036   :  { %v7481_v47 = vadd.f32 1.0, %v11958_v26  ;;  %7509 = vst [vmem:[#allocation5 + $0x5] sm:$0x1] %v7477_v8  ;;  %7577 = vmatmul.mubr.f32.vlgmr.msra.gmra.mrb[64].mxu0 %v7477_v8  ;;  %7648 = vmatmul.mubr.f32.vlgmr.msra.gmra.mrb[64].mxu1 %v7477_v8  ;;  %v15103_v26 = vld [vmem:[#allocation32_spill] sm:$0xff]  ;;  %v15105_v8 = vld [vmem:[#allocation34_spill] sm:$0xff] }
0x1037   :  { %v11960_v20 = vpop.eup %11959  ;;  %11247 = vmatpush1.bf16.msra.mxu0 %v13603_v15  ;;  %11279 = vmatpush1.bf16.msra.mxu1 %v13605_v21 }
0x1038   :  { %11963 = vrcp.f32 %v7481_v47  ;;  %v7490_v29 = vadd.f32 1.0, %v11960_v20  ;;  %11249 = vmatprep.subr.bf16.mxu0 %v13609_v58  ;;  %11281 = vmatprep.subr.bf16.mxu1 %v13611_v36  ;;  %v11962_v50 = vpop.eup %11961  ;;  %v15106_v47 = vld [vmem:[#allocation35_spill] sm:$0xff]  ;;  %v15107_v20 = vld [vmem:[#allocation36_spill] sm:$0xff] }
0x1039   :  { %11965 = vtanh.f32 %v7493_v19  ;;  %7749 = vmatprep.mubr.f32.mxu0 %v14780_v5  ;;  %7820 = vmatprep.mubr.f32.mxu1 %v14780_v5  ;;  %v7501_v62 = vadd.f32 1.0, %v11962_v50  ;;  %v15104_v19 = vld [vmem:[#allocation33_spill] sm:$0xff]  ;;  %v15109_v50 = vld [vmem:[#allocation38_spill] sm:$0xff] }
0x103a   :  { %11967 = vrcp.f32 %v7490_v29  ;;  %v15108_v29 = vld [vmem:[#allocation37_spill] sm:$0xff] }
0x103b   :  { %11251 = vmatpush1.bf16.msra.mxu0 %v13617_v4  ;;  %11283 = vmatpush1.bf16.msra.mxu1 %v13619_v53  ;;  %11969 = vrcp.f32 %v7501_v62 }
0x103c   :  { %11253 = vmatprep.subr.bf16.mxu0 %v14970_v11  ;;  %11285 = vmatprep.subr.bf16.mxu1 %v14971_v10 }
0x103f   :  { %11255 = vmatpush1.bf16.msra.mxu0 %v14972_v6  ;;  %11287 = vmatpush1.bf16.msra.mxu1 %v14973_v18 }
0x1040   :  { %11257 = vmatprep.subr.bf16.mxu0 %v14974_v1  ;;  %11289 = vmatprep.subr.bf16.mxu1 %v14975_v43 }
0x1042   :  { %v11964_v25 = vpop.eup %11963 }
0x1043   :  { %v11966_v56 = vpop.eup %11965  ;;  %11259 = vmatpush1.bf16.msra.mxu0 %v14976_v57  ;;  %11291 = vmatpush1.bf16.msra.mxu1 %v14977_v37 }
0x1044   :  { %v11968_v35 = vpop.eup %11967  ;;  %11261 = vmatprep.subr.bf16.mxu0 %v14978_v60  ;;  %11293 = vmatprep.subr.bf16.mxu1 %v14979_v51  ;;  %v7505_v61 = vmul.f32 %v11966_v56, %v11964_v25  ;;  %v15110_v25 = vld [vmem:[#allocation39_spill] sm:$0xff]  ;;  %v15111_v56 = vld [vmem:[#allocation40_spill] sm:$0xff] }
0x1045   :  { %v7504_v34 = vmul.f32 %v11968_v35, %v14110_v13  ;;  %v11970_v13 = vpop.eup %11969  ;;  %v15112_v35 = vld [vmem:[#allocation41_spill] sm:$0xff] }
0x1047   :  { %v14192_v12 = vadd.f32 %v7505_v61, %v7504_v34  ;;  %11263 = vmatpush1.bf16.msra.mxu0 %v14980_v44  ;;  %11295 = vmatpush1.bf16.msra.mxu1 %v14981_v39 }
0x1048   :  { %11265 = vmatprep.subr.bf16.mxu0 %v13661_v16  ;;  %11297 = vmatprep.subr.bf16.mxu1 %v13663_v17 }
0x1049   :  { %11971 = vtanh.f32 %v14192_v12 }
0x104b   :  { %11267 = vmatpush1.bf16.msra.mxu0 %v13667_v0  ;;  %11299 = vmatpush1.bf16.msra.mxu1 %v13669_v49 }
0x104c   :  { %11269 = vmatprep.subr.bf16.mxu0 %v13673_v32  ;;  %11301 = vmatprep.subr.bf16.mxu1 %v13675_v24 }
0x104f   :  { %11271 = vmatpush1.bf16.msra.mxu0 %v13679_v54  ;;  %11303 = vmatpush1.bf16.msra.mxu1 %v13681_v3 }
0x1050   :  { %11273 = vmatprep.subr.bf16.mxu0 %v13685_v22  ;;  %11305 = vmatprep.subr.bf16.mxu1 %v13687_v23 }
0x1053   :  { %v11972_v55 = vpop.eup %11971  ;;  %11275 = vmatpush1.bf16.msra.mxu0 %v13691_v7  ;;  %11307 = vmatpush1.bf16.msra.mxu1 %v13693_v59 }
0x1054   :  { %v7508_v2 = vmul.f32 %v11972_v55, %v11970_v13  ;;  %11309 = vmatprep.subr.bf16.mxu0 %v13499_v46  ;;  %11341 = vmatprep.subr.bf16.mxu1 %v13501_v63  ;;  %v15089_v46 = vld [vmem:[#allocation52_spill] sm:$0xff]  ;;  %v15090_v63 = vld [vmem:[#allocation53_spill] sm:$0xff] }
0x1056   :  { %7510 = vst [vmem:[#allocation6 + $0x2] sm:$0x1] %v7508_v2  ;;  %7750 = vmatmul.mubr.f32.vlgmr.msra.gmra.mrb[66].mxu0 %v7508_v2  ;;  %7821 = vmatmul.mubr.f32.vlgmr.msra.gmra.mrb[66].mxu1 %v7508_v2 }
0x1057   :  { %11311 = vmatpush1.bf16.msra.mxu0 %v13503_v48  ;;  %11343 = vmatpush1.bf16.msra.mxu1 %v13505_v33  ;;  %v15091_v48 = vld [vmem:[#allocation54_spill] sm:$0xff]  ;;  %v15092_v33 = vld [vmem:[#allocation55_spill] sm:$0xff] }
0x1058   :  { %11313 = vmatprep.subr.bf16.mxu0 %v13509_v38  ;;  %11345 = vmatprep.subr.bf16.mxu1 %v13511_v41  ;;  %v15093_v38 = vld [vmem:[#allocation56_spill] sm:$0xff]  ;;  %v15094_v41 = vld [vmem:[#allocation57_spill] sm:$0xff] }
0x1059   :  { %7986 = vmatprep.mubr.f32.mxu0 %v14780_v5  ;;  %8057 = vmatprep.mubr.f32.mxu1 %v14780_v5 }
0x105b   :  { %11315 = vmatpush1.bf16.msra.mxu0 %v13517_v45  ;;  %11347 = vmatpush1.bf16.msra.mxu1 %v13519_v14  ;;  %v15096_v45 = vld [vmem:[#allocation59_spill] sm:$0xff]  ;;  %v15097_v14 = vld [vmem:[#allocation60_spill] sm:$0xff] }
0x105c   :  { %11317 = vmatprep.subr.bf16.mxu0 %v13523_v9  ;;  %11349 = vmatprep.subr.bf16.mxu1 %v13525_v28  ;;  %v15098_v9 = vld [vmem:[#allocation61_spill] sm:$0xff]  ;;  %v15099_v28 = vld [vmem:[#allocation28_spill] sm:$0xff] }
0x105f   :  { %11319 = vmatpush1.bf16.msra.mxu0 %v15089_v46  ;;  %11351 = vmatpush1.bf16.msra.mxu1 %v15090_v63 }
0x1060   :  { %11321 = vmatprep.subr.bf16.mxu0 %v15091_v48  ;;  %11353 = vmatprep.subr.bf16.mxu1 %v15092_v33 }
0x1063   :  { %11323 = vmatpush1.bf16.msra.mxu0 %v15093_v38  ;;  %11355 = vmatpush1.bf16.msra.mxu1 %v15094_v41  ;;  %v7511_v38 = vld [vmem:[#allocation2 + $0x6] ss:$8 sm:$0xf] }
0x1064   :  { %11325 = vmatprep.subr.bf16.mxu0 %v15095_v52  ;;  %11357 = vmatprep.subr.bf16.mxu1 %v15096_v45 }
0x1067   :  { %11327 = vmatpush1.bf16.msra.mxu0 %v15097_v14  ;;  %11359 = vmatpush1.bf16.msra.mxu1 %v15098_v9 }
0x1068   :  { %11329 = vmatprep.subr.bf16.mxu0 %v15099_v28  ;;  %11361 = vmatprep.subr.bf16.mxu1 %v15100_v27 }
0x106b   :  { %11331 = vmatpush1.bf16.msra.mxu0 %v15101_v40  ;;  %11363 = vmatpush1.bf16.msra.mxu1 %v15102_v42 }
0x106c   :  { %11333 = vmatprep.subr.bf16.mxu0 %v15103_v26  ;;  %11365 = vmatprep.subr.bf16.mxu1 %v15104_v19 }
0x106f   :  { %11335 = vmatpush1.bf16.msra.mxu0 %v15105_v8  ;;  %11367 = vmatpush1.bf16.msra.mxu1 %v15106_v47 }
0x1070   :  { %11337 = vmatprep.subr.bf16.mxu0 %v15107_v20  ;;  %11369 = vmatprep.subr.bf16.mxu1 %v15108_v29 }
0x1073   :  { %11339 = vmatpush1.bf16.msra.mxu0 %v15109_v50  ;;  %11371 = vmatpush1.bf16.msra.mxu1 %v15110_v25 }
0x1074   :  { %11373 = vmatprep.subr.bf16.mxu0 %v15111_v56  ;;  %11405 = vmatprep.subr.bf16.mxu1 %v15112_v35 }
0x1109   :  { %v7578_v62 = vpop.f32.mrb[64].mxu0  ;;  %v7649_v34 = vpop.f32.mrb[64].mxu1 }
0x110a   :  { %v7580_v61 = vpop.f32.mrb[65].mxu0  ;;  %v7651_v13 = vpop.f32.mrb[65].mxu1 }
0x110b   :  { %v7658_v55 = vcombine.low %v7578_v62, %v7580_v61  ;;  %v7659_v2 = vcombine.low %v7649_v34, %v7651_v13 }
0x110d   :  { %v7666_v46 = vrot.slane %v7658_v55, %v12935_v31  ;;  %v7673_v63 = vrot.slane %v7659_v2, %v12935_v31 }
0x110f   :  { %v7674_v48 = vcombine.low %v7666_v46, %v7673_v63 }
0x1111   :  { %v7681_v33 = vrot.slane %v7674_v48, %v12935_v31 }
0x1113   :  { %v7683_v41 = vadd.f32 %v7681_v33, %v7511_v38  ;;  %v7684_v33 = vld [vmem:[#allocation2 + $0x21] ss:$8 sm:$0xf] }
0x1115   :  { %v8895_v52 = vmul.f32 -1.442695, %v7683_v41  ;;  %v7864_v45 = vrot.slane %v7683_v41, 1  ;;  %v7875_v9 = vrot.slane %v7683_v41, 3  ;;  %v7872_v40 = vrot.slane %v7683_v41, 2 }
0x1117   :  { %11973 = vpow2.f32 %v8895_v52  ;;  %v8896_v14 = vmul.f32 -1.442695, %v7864_v45  ;;  %v8897_v28 = vmul.f32 -1.442695, %v7875_v9 }
0x1119   :  { %11975 = vpow2.f32 %v8896_v14 }
0x111a   :  { %11977 = vpow2.f32 %v8897_v28 }
0x1121   :  { %v11974_v27 = vpop.eup %11973 }
0x1122   :  { %v7860_v42 = vadd.f32 1.0, %v11974_v27 }
0x1123   :  { %v11976_v26 = vpop.eup %11975 }
0x1124   :  { %11979 = vrcp.f32 %v7860_v42  ;;  %v7869_v19 = vadd.f32 1.0, %v11976_v26  ;;  %v11978_v56 = vpop.eup %11977 }
0x1125   :  { %11981 = vtanh.f32 %v7872_v40  ;;  %v7880_v46 = vadd.f32 1.0, %v11978_v56 }
0x1126   :  { %11983 = vrcp.f32 %v7869_v19 }
0x1127   :  { %11985 = vrcp.f32 %v7880_v46  ;;  %v8395_v46 = vld [vmem:[%s14565_s12 + $0x80] sm:$0xff] }
0x1129   :  { %v7751_v8 = vpop.f32.mrb[66].mxu0  ;;  %v7822_v47 = vpop.f32.mrb[66].mxu1 }
0x112a   :  { %v7753_v20 = vpop.f32.mrb[67].mxu0  ;;  %v7824_v29 = vpop.f32.mrb[67].mxu1 }
0x112b   :  { %v7831_v50 = vcombine.low %v7751_v8, %v7753_v20  ;;  %v7832_v25 = vcombine.low %v7822_v47, %v7824_v29  ;;  %v8387_v20 = vld [vmem:[%s14565_s12 + $0x40] sm:$0xff]  ;;  %v8389_v29 = vld [vmem:[%s14565_s12 + $0x50] sm:$0xff] }
0x112c   :  { %v11446_v56 = vpack.c.bf16 %v8389_v29, %v8387_v20 }
0x112d   :  { %v7839_v35 = vrot.slane %v7831_v50, %v12935_v31  ;;  %v7846_v62 = vrot.slane %v7832_v25, %v12935_v31  ;;  %v8392_v50 = vld [vmem:[%s14565_s12 + $0x68] sm:$0xff]  ;;  %v8394_v25 = vld [vmem:[%s14565_s12 + $0x78] sm:$0xff] }
0x112e   :  { %v11980_v34 = vpop.eup %11979 }
0x112f   :  { %v11982_v61 = vpop.eup %11981  ;;  %v7847_v13 = vcombine.low %v7839_v35, %v7846_v62  ;;  %v11448_v35 = vpack.c.bf16 %v8394_v25, %v8392_v50  ;;  %v8391_v62 = vld [vmem:[%s14565_s12 + $0x60] sm:$0xff] }
0x1130   :  { %v11984_v55 = vpop.eup %11983  ;;  %v7884_v48 = vmul.f32 %v11982_v61, %v11980_v34  ;;  %v8393_v34 = vld [vmem:[%s14565_s12 + $0x70] sm:$0xff]  ;;  %v8396_v61 = vld [vmem:[%s14565_s12 + $0x88] sm:$0xff] }
0x1131   :  { %v7854_v2 = vrot.slane %v7847_v13, %v12935_v31  ;;  %v7883_v63 = vmul.f32 %v11984_v55, %v14170_v30  ;;  %v11986_v28 = vpop.eup %11985  ;;  %v8398_v13 = vld [vmem:[%s14565_s12 + $0x98] sm:$0xff]  ;;  %v11450_v55 = vpack.c.bf16 %v8393_v34, %v8391_v62 }
0x1132   :  { %v8094_v25 = vld [vmem:[#allocation2 + $0x20] ss:$8 sm:$0xf] }
0x1133   :  { %v7856_v38 = vadd.f32 %v7854_v2, %v7684_v33  ;;  %v14252_v41 = vadd.f32 %v7884_v48, %v7883_v63  ;;  %v11452_v2 = vpack.c.bf16 %v8398_v13, %v8396_v61  ;;  %v8397_v63 = vld [vmem:[%s14565_s12 + $0x90] sm:$0xff]  ;;  %v8400_v48 = vld [vmem:[%s14565_s12 + $0xa8] sm:$0xff]  ;;  %v8402_v33 = vld [vmem:[%s14565_s12 + $0xb8] sm:$0xff] }
0x1135   :  { %v8898_v52 = vmul.f32 -1.442695, %v7856_v38  ;;  %v7895_v45 = vrot.slane %v7856_v38, 1  ;;  %11987 = vtanh.f32 %v14252_v41  ;;  %v7906_v9 = vrot.slane %v7856_v38, 3 }
0x1136   :  { %v7903_v26 = vrot.slane %v7856_v38, 2  ;;  %v11454_v38 = vpack.c.bf16 %v8397_v63, %v8395_v46 }
0x1137   :  { %11989 = vpow2.f32 %v8898_v52  ;;  %v8899_v14 = vmul.f32 -1.442695, %v7895_v45  ;;  %v8900_v27 = vmul.f32 -1.442695, %v7906_v9  ;;  %v11456_v52 = vpack.c.bf16 %v8402_v33, %v8400_v48  ;;  %v8399_v45 = vld [vmem:[%s14565_s12 + $0xa0] sm:$0xff] }
0x1139   :  { %11991 = vpow2.f32 %v8899_v14  ;;  %v8401_v14 = vld [vmem:[%s14565_s12 + $0xb0] sm:$0xff] }
0x113a   :  { %11993 = vpow2.f32 %v8900_v27  ;;  %v11458_v9 = vpack.c.bf16 %v8401_v14, %v8399_v45  ;;  %v8403_v27 = vld [vmem:[%s14565_s12 + $0xc0] sm:$0xf] }
0x113f   :  { %v11988_v40 = vpop.eup %11987 }
0x1140   :  { %v7887_v30 = vmul.f32 %v11988_v40, %v11986_v28  ;;  %v8404_v28 = vld [vmem:[%s14565_s12 + $0xc8] sm:$0xf] }
0x1141   :  { %v11990_v42 = vpop.eup %11989 }
0x1142   :  { %v7891_v19 = vadd.f32 1.0, %v11990_v42  ;;  %7919 = vst [vmem:[#allocation5 + $0x6] sm:$0x1] %v7887_v30  ;;  %7987 = vmatmul.mubr.f32.vlgmr.msra.gmra.mrb[68].mxu0 %v7887_v30  ;;  %8058 = vmatmul.mubr.f32.vlgmr.msra.gmra.mrb[68].mxu1 %v7887_v30 }
0x1143   :  { %v11992_v8 = vpop.eup %11991  ;;  %11375 = vmatpush1.bf16.msra.mxu0 %v13603_v15  ;;  %11407 = vmatpush1.bf16.msra.mxu1 %v13605_v21 }
0x1144   :  { %11995 = vrcp.f32 %v7891_v19  ;;  %v7900_v47 = vadd.f32 1.0, %v11992_v8  ;;  %11377 = vmatprep.subr.bf16.mxu0 %v13609_v58  ;;  %11409 = vmatprep.subr.bf16.mxu1 %v13611_v36  ;;  %v11994_v15 = vpop.eup %11993 }
0x1145   :  { %11997 = vtanh.f32 %v7903_v26  ;;  %8159 = vmatprep.mubr.f32.mxu0 %v14780_v5  ;;  %8230 = vmatprep.mubr.f32.mxu1 %v14780_v5 }
0x1146   :  { %11999 = vrcp.f32 %v7900_v47 }
0x1147   :  { %11379 = vmatpush1.bf16.msra.mxu0 %v13617_v4  ;;  %11411 = vmatpush1.bf16.msra.mxu1 %v13619_v53  ;;  %v7911_v4 = vadd.f32 1.0, %v11994_v15 }
0x1148   :  { %11381 = vmatprep.subr.bf16.mxu0 %v14970_v11  ;;  %11413 = vmatprep.subr.bf16.mxu1 %v14971_v10 }
0x1149   :  { %12001 = vrcp.f32 %v7911_v4 }
0x114b   :  { %11383 = vmatpush1.bf16.msra.mxu0 %v14972_v6  ;;  %11415 = vmatpush1.bf16.msra.mxu1 %v14973_v18  ;;  %v8381_v6 = vld [vmem:[%s14565_s12 + $0x10] sm:$0xff]  ;;  %v8384_v18 = vld [vmem:[%s14565_s12 + $0x28] sm:$0xff] }
0x114c   :  { %11385 = vmatprep.subr.bf16.mxu0 %v14974_v1  ;;  %11417 = vmatprep.subr.bf16.mxu1 %v14975_v43  ;;  %v8386_v1 = vld [vmem:[%s14565_s12 + $0x38] sm:$0xff] }
0x114e   :  { %v11996_v21 = vpop.eup %11995 }
0x114f   :  { %v11998_v58 = vpop.eup %11997  ;;  %11387 = vmatpush1.bf16.msra.mxu0 %v14976_v57  ;;  %11419 = vmatpush1.bf16.msra.mxu1 %v14977_v37  ;;  %v11440_v57 = vpack.c.bf16 %v8386_v1, %v8384_v18  ;;  %v8383_v37 = vld [vmem:[%s14565_s12 + $0x20] sm:$0xff] }
0x1150   :  { %v12000_v36 = vpop.eup %11999  ;;  %11389 = vmatprep.subr.bf16.mxu0 %v14978_v60  ;;  %11421 = vmatprep.subr.bf16.mxu1 %v14979_v51  ;;  %v7915_v11 = vmul.f32 %v11998_v58, %v11996_v21  ;;  %v8385_v60 = vld [vmem:[%s14565_s12 + $0x30] sm:$0xff]  ;;  %v8388_v51 = vld [vmem:[%s14565_s12 + $0x48] sm:$0xff] }
0x1151   :  { %v7914_v53 = vmul.f32 %v12000_v36, %v14192_v12  ;;  %v7921_v36 = vld [vmem:[#allocation2 + $0x7] ss:$8 sm:$0xf] }
0x1153   :  { %v14274_v10 = vadd.f32 %v7915_v11, %v7914_v53  ;;  %11391 = vmatpush1.bf16.msra.mxu0 %v14980_v44  ;;  %11423 = vmatpush1.bf16.msra.mxu1 %v14981_v39  ;;  %v8390_v44 = vld [vmem:[%s14565_s12 + $0x58] sm:$0xff]  ;;  %v11442_v39 = vpack.c.bf16 %v8385_v60, %v8383_v37 }
0x1154   :  { %11393 = vmatprep.subr.bf16.mxu0 %v13661_v16  ;;  %11425 = vmatprep.subr.bf16.mxu1 %v13663_v17  ;;  %v12002_v16 = vpop.eup %12001  ;;  %v11444_v12 = vpack.c.bf16 %v8390_v44, %v8388_v51 }
0x1155   :  { %12003 = vtanh.f32 %v14274_v10 }
0x1157   :  { %11395 = vmatpush1.bf16.msra.mxu0 %v13667_v0  ;;  %11427 = vmatpush1.bf16.msra.mxu1 %v13669_v49  ;;  %v14295_v49 = vld [vmem:[%s15113_s26] sm:$0xff] }
0x1158   :  { %11397 = vmatprep.subr.bf16.mxu0 %v13673_v32  ;;  %11429 = vmatprep.subr.bf16.mxu1 %v13675_v24  ;;  %v8344_v32 = vadd.f32 1e-13, %v14295_v49 }
0x115a   :  { %12005 = vrcp.f32 %v8344_v32 }
0x115b   :  { %11399 = vmatpush1.bf16.msra.mxu0 %v13679_v54  ;;  %11431 = vmatpush1.bf16.msra.mxu1 %v13681_v3  ;;  %v12253_v3 = vmov 0  }
0x115c   :  { %11401 = vmatprep.subr.bf16.mxu0 %v13685_v22  ;;  %11433 = vmatprep.subr.bf16.mxu1 %v13687_v23  ;;  %v8380_v22 = vld [vmem:[%s14565_s12 + $0x8] sm:$0xff]  ;;  %v8382_v23 = vld [vmem:[%s14565_s12 + $0x18] sm:$0xff] }
0x115d   :  { %11524 = vset.pattern.permute.xlu1 %v12253_v3  ;;  %11523 = vset.pattern.permute.xlu0 %v12253_v3 }
0x115f   :  { %v12004_v17 = vpop.eup %12003  ;;  %11403 = vmatpush1.bf16.msra.mxu0 %v13691_v7  ;;  %11435 = vmatpush1.bf16.msra.mxu1 %v13693_v59  ;;  %v8379_v7 = vld [vmem:[%s14565_s12] sm:$0xff]  ;;  %v11436_v59 = vpack.c.bf16 %v8382_v23, %v8380_v22 }
0x1160   :  { %v7918_v0 = vmul.f32 %v12004_v17, %v12002_v16  ;;  %v11438_v43 = vpack.c.bf16 %v8381_v6, %v8379_v7 }
0x1161   :  { %11437 = vmatprep.subr.bf16.mxu0 %v11436_v59 }
0x1162   :  { %7920 = vst [vmem:[#allocation6 + $0x1] sm:$0x1] %v7918_v0  ;;  %8160 = vmatmul.mubr.f32.vlgmr.msra.gmra.mrb[70].mxu0 %v7918_v0  ;;  %8231 = vmatmul.mubr.f32.vlgmr.msra.gmra.mrb[70].mxu1 %v7918_v0 }
0x1163   :  { %8479 = vmatprep.mubr.f32.mxu0 %v14780_v5  ;;  %11439 = vmatpush1.bf16.msra.mxu0 %v11438_v43 }
0x1164   :  { %v12006_v24 = vpop.eup %12005  ;;  %11441 = vmatprep.subr.bf16.mxu0 %v11440_v57  ;;  %8972 = vmatprep.mubr.msk.f32.mxu1 %vm12256_vm1, %v14780_v5 }
0x1165   :  { %v8346_v54 = vmul.f32 %v12006_v24, %v14295_v49 }
0x1167   :  { %8363 = vperm.xlu1 %11524, %v8346_v54   ;;  %11443 = vmatpush1.bf16.msra.mxu0 %v11442_v39 }
0x1168   :  { %11445 = vmatprep.subr.bf16.mxu0 %v11444_v12 }
0x116b   :  { %11447 = vmatpush1.bf16.msra.mxu0 %v11446_v56 }
0x116c   :  { %11449 = vmatprep.subr.bf16.mxu0 %v11448_v35 }
0x116f   :  { %11451 = vmatpush1.bf16.msra.mxu0 %v11450_v55 }
0x1170   :  { %11453 = vmatprep.subr.bf16.mxu0 %v11452_v2 }
0x1173   :  { %11455 = vmatpush1.bf16.msra.mxu0 %v11454_v38 }
0x1174   :  { %11457 = vmatprep.subr.bf16.mxu0 %v11456_v52 }
0x1177   :  { %11459 = vmatpush1.bf16.msra.mxu0 %v11458_v9 }
0x1178   :  { %8907 = vmatprep.subr.msk.mxu0 %vm8408_vm0, %v8404_v28 }
0x117b   :  { %8908 = vmatpush1.msk.msra.mxu0 %vm8408_vm0, %v8403_v27 }
0x1215   :  { %v7988_v40 = vpop.f32.mrb[68].mxu0  ;;  %v8059_v42 = vpop.f32.mrb[68].mxu1 }
0x1216   :  { %v7990_v26 = vpop.f32.mrb[69].mxu0  ;;  %v8061_v30 = vpop.f32.mrb[69].mxu1 }
0x1217   :  { %v8068_v19 = vcombine.low %v7988_v40, %v7990_v26  ;;  %v8069_v8 = vcombine.low %v8059_v42, %v8061_v30  ;;  %v14390_v26 = vld [vmem:[%s15114_s4] sm:$0xff] }
0x1218   :  { %v8341_v30 = vadd.f32 1e-13, %v14390_v26 }
0x1219   :  { %v8076_v47 = vrot.slane %v8068_v19, %v12935_v31  ;;  %v8083_v15 = vrot.slane %v8069_v8, %v12935_v31  ;;  %v12254_v8 = vmov 0.0|0.0  }
0x121a   :  { %11478 = vmatprep.subr.bf16.mxu0 %v12254_v8  ;;  %11460 = vmatprep.subr.bf16.mxu1 %v12254_v8 }
0x121b   :  { %v8084_v21 = vcombine.low %v8076_v47, %v8083_v15 }
0x121d   :  { %v8091_v58 = vrot.slane %v8084_v21, %v12935_v31 }
0x121f   :  { %v8093_v4 = vadd.f32 %v8091_v58, %v7921_v36  ;;  %v8645_v36 = vld [vmem:[%s14569_s16] sm:$0xff] }
0x1221   :  { %v8901_v53 = vmul.f32 -1.442695, %v8093_v4  ;;  %v8274_v11 = vrot.slane %v8093_v4, 1  ;;  %v8285_v17 = vrot.slane %v8093_v4, 3  ;;  %v8282_v24 = vrot.slane %v8093_v4, 2  ;;  %v8646_v4 = vld [vmem:[%s14569_s16 + $0x8] sm:$0xff] }
0x1223   :  { %12007 = vpow2.f32 %v8901_v53  ;;  %v8902_v16 = vmul.f32 -1.442695, %v8274_v11  ;;  %v8903_v0 = vmul.f32 -1.442695, %v8285_v17  ;;  %v11479_v53 = vpack.c.bf16 %v8646_v4, %v8645_v36  ;;  %v8647_v17 = vld [vmem:[%s14569_s16 + $0x10] sm:$0xff]  ;;  %v8547_v36 = vld [vmem:[%s14567_s14 + $0x28] sm:$0xff] }
0x1225   :  { %12009 = vpow2.f32 %v8902_v16 }
0x1226   :  { %12011 = vpow2.f32 %v8903_v0  ;;  %v8648_v0 = vld [vmem:[%s14569_s16 + $0x18] sm:$0xff] }
0x122d   :  { %v12008_v32 = vpop.eup %12007 }
0x122e   :  { %v8270_v54 = vadd.f32 1.0, %v12008_v32 }
0x122f   :  { %v12010_v3 = vpop.eup %12009 }
0x1230   :  { %12013 = vrcp.f32 %v8270_v54  ;;  %v8279_v22 = vadd.f32 1.0, %v12010_v3  ;;  %v12012_v43 = vpop.eup %12011  ;;  %v8649_v54 = vld [vmem:[%s14569_s16 + $0x20] sm:$0xff]  ;;  %v8650_v3 = vld [vmem:[%s14569_s16 + $0x28] sm:$0xff] }
0x1231   :  { %12015 = vtanh.f32 %v8282_v24  ;;  %v8290_v12 = vadd.f32 1.0, %v12012_v43  ;;  %v11482_v24 = vpack.c.bf16 %v8648_v0, %v8647_v17  ;;  %v8655_v43 = vld [vmem:[%s14569_s16 + $0x50] sm:$0xff] }
0x1232   :  { %12017 = vrcp.f32 %v8279_v22  ;;  %v11485_v22 = vpack.c.bf16 %v8650_v3, %v8649_v54 }
0x1233   :  { %12019 = vrcp.f32 %v8290_v12 }
0x1235   :  { %v8161_v23 = vpop.f32.mrb[70].mxu0  ;;  %v8232_v7 = vpop.f32.mrb[70].mxu1 }
0x1236   :  { %v8163_v59 = vpop.f32.mrb[71].mxu0  ;;  %v8234_v6 = vpop.f32.mrb[71].mxu1 }
0x1237   :  { %v8241_v18 = vcombine.low %v8161_v23, %v8163_v59  ;;  %v8242_v1 = vcombine.low %v8232_v7, %v8234_v6  ;;  %v8651_v23 = vld [vmem:[%s14569_s16 + $0x30] sm:$0xff]  ;;  %v8652_v7 = vld [vmem:[%s14569_s16 + $0x38] sm:$0xff]  ;;  %v8653_v6 = vld [vmem:[%s14569_s16 + $0x40] sm:$0xff] }
0x1238   :  { %v11488_v59 = vpack.c.bf16 %v8652_v7, %v8651_v23 }
0x1239   :  { %v8249_v57 = vrot.slane %v8241_v18, %v12935_v31  ;;  %v8256_v37 = vrot.slane %v8242_v1, %v12935_v31  ;;  %v8654_v18 = vld [vmem:[%s14569_s16 + $0x48] sm:$0xff] }
0x123a   :  { %v12014_v60 = vpop.eup %12013  ;;  %v11491_v1 = vpack.c.bf16 %v8654_v18, %v8653_v6 }
0x123b   :  { %v12016_v51 = vpop.eup %12015  ;;  %v8257_v44 = vcombine.low %v8249_v57, %v8256_v37  ;;  %v8656_v57 = vld [vmem:[%s14569_s16 + $0x58] sm:$0xff] }
0x123c   :  { %v12018_v39 = vpop.eup %12017  ;;  %v8294_v29 = vmul.f32 %v12016_v51, %v12014_v60  ;;  %v11494_v51 = vpack.c.bf16 %v8656_v57, %v8655_v43 }
0x123d   :  { %v8293_v20 = vmul.f32 %v12018_v39, %v14252_v41  ;;  %v8264_v50 = vrot.slane %v8257_v44, %v12935_v31  ;;  %v12020_v55 = vpop.eup %12019 }
0x123f   :  { %v8295_v56 = vadd.f32 %v8294_v29, %v8293_v20  ;;  %v8266_v35 = vadd.f32 %v8264_v50, %v8094_v25  ;;  %v8657_v20 = vld [vmem:[%s14569_s16 + $0x60] sm:$0xf] }
0x1241   :  { %12021 = vtanh.f32 %v8295_v56  ;;  %v8904_v62 = vmul.f32 -1.442695, %v8266_v35  ;;  %v8305_v34 = vrot.slane %v8266_v35, 1  ;;  %v8316_v13 = vrot.slane %v8266_v35, 3 }
0x1242   :  { %v8313_v41 = vrot.slane %v8266_v35, 2  ;;  %v8364_v35 = vpop.permute.xlu1 %8363 }
0x1243   :  { %12023 = vpow2.f32 %v8904_v62  ;;  %v8905_v61 = vmul.f32 -1.442695, %v8305_v34  ;;  %v8906_v46 = vmul.f32 -1.442695, %v8316_v13 }
0x1245   :  { %12025 = vpow2.f32 %v8905_v61 }
0x1246   :  { %12027 = vpow2.f32 %v8906_v46 }
0x124b   :  { %v12022_v2 = vpop.eup %12021 }
0x124c   :  { %v8297_v63 = vmul.f32 %v12022_v2, %v12020_v55 }
0x124d   :  { %v12024_v48 = vpop.eup %12023 }
0x124e   :  { %8329 = vst [vmem:[#allocation5 + $0x7] sm:$0x1] %v8297_v63  ;;  %v8301_v33 = vadd.f32 1.0, %v12024_v48 }
0x124f   :  { %v12026_v31 = vpop.eup %12025 }
0x1250   :  { %12029 = vrcp.f32 %v8301_v33  ;;  %v8310_v38 = vadd.f32 1.0, %v12026_v31  ;;  %v12028_v52 = vpop.eup %12027  ;;  %v15115_v33 = vld [vmem:[#allocation63_spill] sm:$0xff] }
0x1251   :  { %12031 = vtanh.f32 %v8313_v41  ;;  %v8321_v28 = vadd.f32 1.0, %v12028_v52 }
0x1252   :  { %12033 = vrcp.f32 %v8310_v38 }
0x1253   :  { %12035 = vrcp.f32 %v8321_v28 }
0x1255   :  { %v8331_v11 = vld [vmem:[#allocation5] sm:$0xff] }
0x125a   :  { %v12030_v45 = vpop.eup %12029 }
0x125b   :  { %v12032_v14 = vpop.eup %12031 }
0x125c   :  { %v12034_v9 = vpop.eup %12033  ;;  %v8325_v40 = vmul.f32 %v12032_v14, %v12030_v45 }
0x125d   :  { %v8324_v27 = vmul.f32 %v12034_v9, %v14274_v10  ;;  %v12036_v19 = vpop.eup %12035 }
0x125f   :  { %v8326_v42 = vadd.f32 %v8325_v40, %v8324_v27 }
0x1261   :  { %12037 = vtanh.f32 %v8326_v42 }
0x1262   :  { %12039 = vrcp.f32 %v8341_v30  ;;  %v8542_v30 = vld [vmem:[%s14567_s14] sm:$0xff] }
0x126b   :  { %v12038_v47 = vpop.eup %12037 }
0x126c   :  { %v8328_v10 = vmul.f32 %v12038_v47, %v12036_v19  ;;  %v12040_v15 = vpop.eup %12039  ;;  %v8543_v19 = vld [vmem:[%s14567_s14 + $0x8] sm:$0xff]  ;;  %v8544_v47 = vld [vmem:[%s14567_s14 + $0x10] sm:$0xff] }
0x126d   :  { %v8343_v58 = vmul.f32 %v12040_v15, %v14390_v26  ;;  %v8545_v15 = vld [vmem:[%s14567_s14 + $0x18] sm:$0xff] }
0x126e   :  { %8330 = vst [vmem:[#allocation6] sm:$0x1] %v8328_v10  ;;  %v11461_v10 = vpack.c.bf16 %v8543_v19, %v8542_v30 }
0x1270   :  { %11462 = vmatpush3.bf16.msra.mxu1 %v11461_v10 }
0x1271   :  { %11463 = vmatprep.subr.bf16.mxu1 %v12254_v8 }
0x1275   :  { %v8332_v21 = vld [vmem:[#allocation6] sm:$0xff] }
0x1276   :  { %8334 = vrot.lane.b32.xlu0 %v8332_v21, %s12255_s30  ;;  %v11464_v21 = vpack.c.bf16 %v8545_v15, %v8544_v47 }
0x1278   :  { %11465 = vmatpush3.bf16.msra.mxu1 %v11464_v21 }
0x1279   :  { %11466 = vmatprep.subr.bf16.mxu1 %v12254_v8 }
0x127a   :  { %8349 = vperm.xlu0 %11523, %v8343_v58   ;;  %v8546_v58 = vld [vmem:[%s14567_s14 + $0x20] sm:$0xff] }
0x127b   :  { %v11467_v4 = vpack.c.bf16 %v8547_v36, %v8546_v58 }
0x127d   :  { %11468 = vmatpush3.bf16.msra.mxu1 %v11467_v4 }
0x127e   :  { %11469 = vmatprep.subr.bf16.mxu1 %v12254_v8 }
0x12e8   :  { %v8335_v16 = vpop.permute.xlu0 %8334 }
0x12e9   :  { %v14409_v32 = vsel %vm8337_vm2, %v8331_v11, %v8335_v16 }
0x12ea   :  { %8909 = vmatmul.mubr.msk.f32.vlgmr.msra.gmra.mrb[72].mxu0 %vm8353_vm3, %v14409_v32  ;;  %v8366_v62 = vmul.f32 %v8364_v35, %v14409_v32  ;;  %v8553_v35 = vld [vmem:[%s14567_s14 + $0x58] sm:$0xff] }
0x12eb   :  { %11480 = vmatpush3.bf16.msra.mxu0 %v11479_v53  ;;  %9001 = vmatprep.mubr.msk.f32.mxu0 %vm12256_vm1, %v14780_v5  ;;  %v8910_v53 = vld [vmem:[#allocation7] ss:$0 sm:$0xff] }
0x12ec   :  { %11481 = vmatprep.subr.bf16.mxu0 %v12254_v8  ;;  %v8367_v34 = vsel %vm8353_vm3, %v8366_v62, 0.0 }
0x12ed   :  { %v8368_v61 = vrot.slane %v8367_v34, 4 }
0x12ef   :  { %11483 = vmatpush3.bf16.msra.mxu0 %v11482_v24  ;;  %v8369_v13 = vadd.f32 %v8368_v61, %v8367_v34  ;;  %v8554_v34 = vld [vmem:[%s14567_s14 + $0x60] sm:$0xf] }
0x12f0   :  { %11484 = vmatprep.subr.bf16.mxu0 %v12254_v8  ;;  %v8913_v61 = vld [vmem:[%s14570_s17] ss:$0 sm:$0xff] }
0x12f1   :  { %v8370_v55 = vrot.slane %v8369_v13, 2 }
0x12f3   :  { %11486 = vmatpush3.bf16.msra.mxu0 %v11485_v22  ;;  %v8371_v2 = vadd.f32 %v8370_v55, %v8369_v13 }
0x12f4   :  { %11487 = vmatprep.subr.bf16.mxu0 %v12254_v8 }
0x12f5   :  { %v8372_v46 = vrot.slane %v8371_v2, 1 }
0x12f7   :  { %11489 = vmatpush3.bf16.msra.mxu0 %v11488_v59  ;;  %v8373_v48 = vadd.f32 %v8372_v46, %v8371_v2 }
0x12f8   :  { %11490 = vmatprep.subr.bf16.mxu0 %v12254_v8 }
0x12f9   :  { %v8350_v37 = vpop.permute.xlu0 %8349 }
0x12fa   :  { %v8352_v60 = vmul.f32 %v8350_v37, %v14409_v32 }
0x12fb   :  { %11492 = vmatpush3.bf16.msra.mxu0 %v11491_v1 }
0x12fc   :  { %v8354_v44 = vsel %vm8353_vm3, %v8352_v60, 0.0  ;;  %11493 = vmatprep.subr.bf16.mxu0 %v12254_v8 }
0x12fd   :  { %v8355_v39 = vrot.slane %v8354_v44, 4 }
0x12ff   :  { %v8356_v12 = vadd.f32 %v8355_v39, %v8354_v44  ;;  %11495 = vmatpush3.bf16.msra.mxu0 %v11494_v51 }
0x1300   :  { %8999 = vmatprep.subr.mxu0 %v14780_v5 }
0x1301   :  { %v8357_v29 = vrot.slane %v8356_v12, 2 }
0x1303   :  { %v8358_v50 = vadd.f32 %v8357_v29, %v8356_v12  ;;  %9000 = vmatpush3.msk.msra.mxu0 %vm8408_vm0, %v8657_v20  ;;  %v8548_v12 = vld [vmem:[%s14567_s14 + $0x30] sm:$0xff]  ;;  %v8549_v20 = vld [vmem:[%s14567_s14 + $0x38] sm:$0xff] }
0x1304   :  { %9002 = vmatmul.mubr.msk.f32.vlgmr.msra.gmra.mrb[74].mxu0 %vm8353_vm3, %v14409_v32  ;;  %v11470_v29 = vpack.c.bf16 %v8549_v20, %v8548_v12 }
0x1305   :  { %v8359_v25 = vrot.slane %v8358_v50, 1 }
0x1306   :  { %11471 = vmatpush3.bf16.msra.mxu1 %v11470_v29 }
0x1307   :  { %v8360_v56 = vadd.f32 %v8359_v25, %v8358_v50  ;;  %11472 = vmatprep.subr.bf16.mxu1 %v12254_v8  ;;  %v8550_v50 = vld [vmem:[%s14567_s14 + $0x40] sm:$0xff]  ;;  %v8551_v25 = vld [vmem:[%s14567_s14 + $0x48] sm:$0xff] }
0x1309   :  { %8375 = vrot.lane.b32.xlu1 %v8360_v56, %s12257_s29  ;;  %v11473_v56 = vpack.c.bf16 %v8551_v25, %v8550_v50 }
0x130b   :  { %11474 = vmatpush3.bf16.msra.mxu1 %v11473_v56 }
0x130c   :  { %11475 = vmatprep.subr.bf16.mxu1 %v12254_v8 }
0x137b   :  { %v8376_v63 = vpop.permute.xlu1 %8375 }
0x137c   :  { %v8378_v41 = vsel %vm8353_vm3, %v8373_v48, %v8376_v63  ;;  %v8493_v31 = vrot.slane %v8376_v63, %v15115_v33 }
0x137d   :  { %v8489_v52 = vrot.slane %v8378_v41, %v15115_v33 }
0x13bd   :  { %v8481_v38 = vpop.f32.mrb[72].mxu0 }
0x13be   :  { %v8483_v45 = vpop.f32.mrb[73].mxu0  ;;  %v8494_v9 = vmul.f32 %v8489_v52, %v8481_v38  ;;  %v8917_v38 = vld [vmem:[%s14572_s19] ss:$0 sm:$0xff] }
0x13bf   :  { %v8495_v14 = vmul.f32 %v8493_v31, %v8483_v45 }
0x13c1   :  { %v8497_v28 = vsel %vm8496_vm4, %v8495_v14, 0.0 }
0x13c2   :  { %v8498_v27 = vadd.f32 %v8497_v28, %v8494_v9 }
0x13c4   :  { %8499 = vadd.xlane.f32.xlu1 %v8498_v27  ;;  %v8555_v27 = vld [vmem:[%s14568_s15] sm:$0x1]  ;;  %s12258_s15 = smov [#allocation19]  }
0x13c5   :  { %s8785_s19 = sshll.u32 %s12258_s15, 4  ;;  %s8786_s19 = int_to_ptr.vmem [resolvable:$true] %s8785_s19 }
0x13c6   :  { %s12185_s0 = scalar_lea.vmem %s8786_s19, 16  ;;  %s12189_s11 = scalar_lea.vmem %s8786_s19, 32 }
0x13c7   :  { %p12186_p6 = scmp.ne.s32.totalorder %s8786_s19, %s12185_s0  ;;  %p12190_p7 = scmp.lt.s32.totalorder %s8786_s19, %s8786_s19 }
0x13c8   :  { %p12191_p8 = scmp.lt.s32.totalorder %s12189_s11, %s12185_s0 }
0x13ca   :  { %p12192_p9 = por %p12191_p8, %p12190_p7 }
0x13cc   :  { %p12193_p10 = pnand %p12192_p9, %p12186_p6 }
0x13d7   :  { %v14457_v40 = vpop.f32.mrb[74].mxu0 }
0x13d8   :  { %v9003_v42 = vpop.f32.mrb[75].mxu0 }
0x1451   :  { %v8500_v11 = vpop.xlane.xlu1 %8499 }
0x1452   :  { %v8508_v16 = vadd.f32 %v8910_v53, %v8500_v11 }
0x1454   :  { %v8510_v17 = vsel %vm8509_vm5, %v8508_v16, -inf }
0x1455   :  { %v8511_v0 = vrot.slane %v8510_v17, 4 }
0x1457   :  { %v8512_v24 = vmax.f32 %v8510_v17, %v8511_v0 }
0x1459   :  { %v8513_v54 = vrot.slane %v8512_v24, 2 }
0x145b   :  { %v8514_v3 = vmax.f32 %v8512_v24, %v8513_v54 }
0x145d   :  { %v8515_v22 = vrot.slane %v8514_v3, 1 }
0x145f   :  { %v8516_v23 = vmax.f32 %v8514_v3, %v8515_v22 }
0x1461   :  { %v8517_v7 = vsub.f32 %v8508_v16, %v8516_v23 }
0x1463   :  { %v8518_v59 = vmul.f32 1.442695, %v8517_v7 }
0x1465   :  { %12041 = vpow2.f32 %v8518_v59 }
0x146f   :  { %v12042_v6 = vpop.eup %12041 }
0x1470   :  { %v8520_v18 = vsel %vm8509_vm5, %v12042_v6, 0.0 }
0x1471   :  { %v8521_v1 = vrot.slane %v8520_v18, 4 }
0x1473   :  { %v8522_v43 = vadd.f32 %v8521_v1, %v8520_v18 }
0x1475   :  { %v8523_v57 = vrot.slane %v8522_v43, 2 }
0x1477   :  { %v8524_v37 = vadd.f32 %v8523_v57, %v8522_v43 }
0x1479   :  { %v8525_v60 = vrot.slane %v8524_v37, 1 }
0x147b   :  { %v8526_v51 = vadd.f32 %v8525_v60, %v8524_v37 }
0x147d   :  { %12043 = vrcp.f32 %v8526_v51 }
0x1487   :  { %v12044_v44 = vpop.eup %12043 }
0x1488   :  { %v8528_v39 = vmul.f32 %v12044_v44, %v12042_v6 }
0x148a   :  { %8531 = vperm.xlu0 %11523, %v8528_v39  }
0x148e   :  { %8661 = vperm.xlu0 %11523, %v14295_v49   ;;  %v8552_v49 = vld [vmem:[%s14567_s14 + $0x50] sm:$0xff] }
0x148f   :  { %v11476_v62 = vpack.c.bf16 %v8553_v35, %v8552_v49 }
0x1491   :  { %11477 = vmatpush3.bf16.msra.mxu1 %v11476_v62 }
0x1492   :  { %8747 = vperm.xlu0 %11523, %v14390_v26   ;;  %8970 = vmatprep.subr.mxu1 %v14780_v5  ;;  %v8916_v5 = vld [vmem:[%s14571_s18] ss:$0 sm:$0xff] }
0x1495   :  { %8971 = vmatpush3.msk.msra.mxu1 %vm8408_vm0, %v8554_v34 }
0x1509   :  { %v8532_v26 = vpop.permute.xlu0 %8531 }
0x150a   :  { %v8534_v8 = vmul.f32 %v8532_v26, %v14409_v32 }
0x150c   :  { %v8535_v13 = vsel %vm8353_vm3, %v8534_v8, 0.0 }
0x150d   :  { %v8536_v55 = vrot.slane %v8535_v13, 4  ;;  %v8662_v2 = vpop.permute.xlu0 %8661 }
0x150e   :  { %v8670_v46 = vmul.f32 %v8913_v61, %v8662_v2 }
0x150f   :  { %v8537_v63 = vadd.f32 %v8536_v55, %v8535_v13 }
0x1510   :  { %v8741_v33 = vadd.f32 %v14457_v40, %v8670_v46 }
0x1511   :  { %v8538_v48 = vrot.slane %v8537_v63, 2  ;;  %v8748_v41 = vpop.permute.xlu0 %8747 }
0x1512   :  { %v8756_v31 = vmul.f32 %v8916_v5, %v8748_v41 }
0x1513   :  { %v8539_v32 = vadd.f32 %v8538_v48, %v8537_v63 }
0x1514   :  { %v8757_v52 = vadd.f32 %v8756_v31, %v8741_v33 }
0x1515   :  { %v8540_v45 = vrot.slane %v8539_v32, 1 }
0x1516   :  { %v8765_v14 = vadd.f32 %v8917_v38, %v8757_v52 }
0x1517   :  { %v8541_v9 = vadd.f32 %v8540_v45, %v8539_v32 }
0x1518   :  { %v8767_v28 = vsel %vm8766_vm6, %v8765_v14, -inf }
0x1519   :  { %8973 = vmatmul.mubr.msk.f32.vlgmr.msra.gmra.mrb[72].mxu1 %vm8353_vm3, %v8541_v9  ;;  %8768 = vmax.xlane.f32.xlu1 %v8767_v28 }
0x15a6   :  { %v8769_v47 = vpop.xlane.xlu1 %8768 }
0x15a7   :  { %v8770_v10 = vsub.f32 %v8765_v14, %v8769_v47 }
0x15a9   :  { %v8771_v58 = vmul.f32 1.442695, %v8770_v10 }
0x15ec   :  { %v8628_v40 = vpop.f32.mrb[72].mxu1 }
0x15ed   :  { %v8629_v42 = vadd.f32 %v8628_v40, %v8555_v27  ;;  %v8974_v30 = vpop.f32.mrb[73].mxu1 }
0x15ef   :  { %v8633_v19 = vsel %vm8632_vm7, %v8629_v42, -inf }
0x15f0   :  { %8634 = vmax.xlane.f32.xlu0 %v8633_v19 }
0x167d   :  { %v8635_v15 = vpop.xlane.xlu0 %8634 }
0x167e   :  { %v8636_v21 = vsub.f32 %v8629_v42, %v8635_v15 }
0x1680   :  { %v8637_v36 = vmul.f32 1.442695, %v8636_v21 }
0x1682   :  { %12045 = vpow2.f32 %v8637_v36 }
0x1683   :  { %12047 = vpow2.f32 %v8771_v58 }
0x168c   :  { %v12046_v4 = vpop.eup %12045 }
0x168d   :  { %v8639_v53 = vsel %vm8632_vm7, %v12046_v4, 0.0  ;;  %v12048_v11 = vpop.eup %12047 }
0x168e   :  { %8640 = vadd.xlane.f32.xlu1 %v8639_v53  ;;  %v8773_v16 = vsel %vm8766_vm6, %v12048_v11, 0.0 }
0x1692   :  { %8774 = vadd.xlane.f32.xlu1 %v8773_v16 }
0x171b   :  { %v8641_v17 = vpop.xlane.xlu1 %8640 }
0x171c   :  { %12049 = vrcp.f32 %v8641_v17 }
0x171f   :  { %v8775_v0 = vpop.xlane.xlu1 %8774 }
0x1720   :  { %12051 = vrcp.f32 %v8775_v0 }
0x1726   :  { %v12050_v24 = vpop.eup %12049 }
0x1727   :  { %v8643_v54 = vmul.f32 %v12050_v24, %v12046_v4 }
0x1729   :  { %8644 = vst.msk [vmem:[#allocation19] sm:$0x1] %vm8632_vm7, %v8643_v54 }
0x172a   :  { %v12052_v3 = vpop.eup %12051 }
0x172b   :  { %12196 = shalt.err (!%p12193_p10)
}
0x172c   :  { %s12197_s23 = scalar_lea.hbm %s14573_s20, 16 }
0x172d   :  { %p12198_p11 = scmp.ne.s32.totalorder %s14573_s20, %s12197_s23  ;;  %p12201_p12 = scmp.lt.u32.totalorder %s12197_s23, %s14573_s20 }
0x172f   :  { %p12203_p13 = pnand %p12201_p12, %p12198_p11 }
0x1731   :  { %12206 = shalt.err (!%p12203_p13)
}
0x1732   :  { %8788 = dma.vmem_to_hbm [thread:$0]  %s8786_s19, 16, %s14573_s20, [#allocation10]   ;;  %v8777_v22 = vmul.f32 %v12052_v3, %v12048_v11 }
0x1733   :  { %s12207_s1 = scalar_lea.vmem %s8796_s6, 128  ;;  %p12212_p1 = scmp.lt.s32.totalorder %s8796_s6, %s8796_s6 }
0x1734   :  { %8778 = vst.msk [vmem:[#allocation20] sm:$0xff] %vm8766_vm6, %v8777_v22  ;;  %p12208_p0 = scmp.ne.s32.totalorder %s8796_s6, %s12207_s1  ;;  %p12213_p2 = scmp.lt.s32.totalorder %s12207_s1, %s12207_s1 }
0x1736   :  { %p12214_p3 = por %p12213_p2, %p12212_p1 }
0x1738   :  { %p12215_p4 = pnand %p12214_p3, %p12208_p0 }
0x173a   :  { %12218 = shalt.err (!%p12215_p4)
}
0x173b   :  { %s15116_s5 = sld [smem:[#allocation72_spill]] }
0x1741   :  { %s12219_s7 = scalar_lea.hbm %s15116_s5, 128 }
0x1742   :  { %p12220_p5 = scmp.ne.s32.totalorder %s15116_s5, %s12219_s7  ;;  %p12223_p6 = scmp.lt.u32.totalorder %s12219_s7, %s15116_s5 }
0x1744   :  { %p12225_p7 = pnand %p12223_p6, %p12220_p5 }
0x1746   :  { %12228 = shalt.err (!%p12225_p7)
}
0x1747   :  { %8798 = dma.vmem_to_hbm [thread:$0]  %s8796_s6, 128, %s15116_s5, [#allocation21]  }
0x1748   :  { %12237 = dma.done.wait [#allocation10], 16  }
0x1749   :  { %12238 = vsyncadd [#allocation10], 4294967280 }
0x174a   :  { %12239 = dma.done.wait [#allocation21], 128  }
0x174b   :  { %12240 = vsyncadd [#allocation21], 4294967168 }
0x174c   :  { %8805 = vsyncpa [#allocation9], 1 }
0x174d   :  { %8806 = vsyncpa [#allocation12], 1 }
0x174e   :  { %8807 = vsyncpa [#allocation15], 1 }
0x174f   :  { %8808 = vsyncpa [#allocation18], 1 }
0x1750   :  { %8809 = vsyncpa [#allocation10], 1 }
0x1751   :  { %8810 = vsyncpa [#allocation21], 1 }

</bundles_post_ra>
